<compile_context>
chip_gen: v6e
topology: v6e:2x2x1
jax: 0.10.0
libtpu: 0.0.40
codegen_flags: <defaults>
</compile_context>

<pallas_src>
import numpy as np
import jax
import jax.numpy as jnp
from jax.experimental import pallas as pl
from jax.experimental.pallas import tpu as pltpu


def _round_up(x, m):
    return ((x + m - 1) // m) * m


# ---------------------------------------------------------------------------
# Fused kernel: y2 = relu(conv3x3(relu(conv3x3(x)@w1 + b1))@w2 + b2)
# operating on a flattened, spatially zero-padded image of L = (H+2)*(W+2)
# rows; each 3x3 conv is 9 shifted (L, C) @ (C, Cout) MXU matmuls.
# ---------------------------------------------------------------------------
def _fused_double_conv_kernel_factory(H, W, Cin_p, Cout_p):
    Hp, Wp = H + 2, W + 2
    L = Hp * Wp                    # rows of the flattened zero-padded image
    E = Wp + 1                     # flat halo rows needed on each side
    F = _round_up(E, 16)           # front halo rounded so the big staging
                                   # stores land on a packed-bf16 boundary
    L_ext = F + L + E
    base = F - E                   # tap t reads staging rows [base+off_t, base+off_t+L)
    offs = tuple(dh * Wp + dw for dh in range(3) for dw in range(3))

    # Exact floor(r / Wp) via f32 multiply-add: the +0.5/Wp margin dwarfs any
    # f32 rounding error, and we verify it exhaustively at trace time, so no
    # vector integer division is needed on the VPU.
    inv_wp = float(np.float32(1.0 / Wp))
    half_inv_wp = float(np.float32(0.5 / Wp))
    r_np = np.arange(L, dtype=np.float32)
    oh_np = (r_np * np.float32(inv_wp) + np.float32(half_inv_wp)).astype(np.int32)
    assert np.array_equal(oh_np, (np.arange(L) // Wp).astype(np.int32)), \
        "in-kernel mask floor-division is not exact for this Wp/L"

    def kernel(x_ref, w1_ref, b1_ref, w2_ref, b2_ref, o_ref,
               xs_ref, y1_ref, acc_ref):
        # ---- stage x with a flat halo in VMEM (only the halo rows are zeroed;
        #      interior rows are fully overwritten every grid step) ----
        xs_ref[:F, :] = jnp.zeros((F, Cin_p), xs_ref.dtype)
        xs_ref[F + L:L_ext, :] = jnp.zeros((E, Cin_p), xs_ref.dtype)
        xs_ref[F:F + L, :] = x_ref[0, :, :]

        # ---- conv1: 9 shifted bf16 MXU matmuls, in-place f32 accumulation ----
        s0 = base + offs[0]
        acc_ref[...] = jnp.dot(xs_ref[s0:s0 + L, :], w1_ref[0],
                               preferred_element_type=jnp.float32)
        for t in range(1, 9):
            s = base + offs[t]
            acc_ref[...] += jnp.dot(xs_ref[s:s + L, :], w1_ref[t],
                                    preferred_element_type=jnp.float32)

        # interior mask built in-kernel: zero the pad ring so y1 has a correct
        # zero border for conv2 (pad-ring output rows are discarded later).
        r = jax.lax.broadcasted_iota(jnp.int32, (L, Cout_p), 0)
        oh = (r.astype(jnp.float32) * inv_wp + half_inv_wp).astype(jnp.int32)
        ow = r - oh * Wp
        interior = (oh >= 1) & (oh <= H) & (ow >= 1) & (ow <= W)
        y1 = jnp.where(interior,
                       jnp.maximum(acc_ref[...] + b1_ref[...], 0.0),
                       0.0).astype(y1_ref.dtype)

        # ---- stage y1 (+ halo) in VMEM: no HBM round trip between convs ----
        y1_ref[:F, :] = jnp.zeros((F, Cout_p), y1_ref.dtype)
        y1_ref[F + L:L_ext, :] = jnp.zeros((E, Cout_p), y1_ref.dtype)
        y1_ref[F:F + L, :] = y1

        # ---- conv2: 9 shifted bf16 MXU matmuls, in-place f32 accumulation ----
        acc_ref[...] = jnp.dot(y1_ref[s0:s0 + L, :], w2_ref[0],
                               preferred_element_type=jnp.float32)
        for t in range(1, 9):
            s = base + offs[t]
            acc_ref[...] += jnp.dot(y1_ref[s:s + L, :], w2_ref[t],
                                    preferred_element_type=jnp.float32)

        o_ref[0, :, :] = jnp.maximum(acc_ref[...] + b2_ref[...],
                                     0.0).astype(o_ref.dtype)

    return kernel, L, L_ext


def _fused_double_conv(x_nhwc, w1, b1, w2, b2):
    """x_nhwc: (N,H,W,Cin) f32.  w*: (3,3,Cin*,Cout) BN-folded f32.  b*: (1,Cout) f32."""
    N, H, W, Cin = x_nhwc.shape
    Cout = w1.shape[-1]
    Cin_p = _round_up(Cin, 128)     # contraction-dim alignment
    Cout_p = _round_up(Cout, 128)   # lane-dense output stores
    Hp, Wp = H + 2, W + 2

    kernel, L, L_ext = _fused_double_conv_kernel_factory(H, W, Cin_p, Cout_p)

    # single pad: zero spatial ring + channel pad; flatten spatial; cast bf16.
    # (the flat halo is built in-kernel; the old second jnp.pad is gone)
    xp = jnp.pad(x_nhwc, ((0, 0), (1, 1), (1, 1), (0, Cin_p - Cin)))
    xf = xp.reshape(N, L, Cin_p).astype(jnp.bfloat16)

    # BN-folded, channel-padded, tap-major bf16 weights; biases stay f32
    w1p = jnp.pad(w1, ((0, 0), (0, 0), (0, Cin_p - Cin), (0, Cout_p - Cout)))
    w1p = w1p.reshape(9, Cin_p, Cout_p).astype(jnp.bfloat16)
    w2p = jnp.pad(w2, ((0, 0), (0, 0), (0, Cout_p - Cout), (0, Cout_p - Cout)))
    w2p = w2p.reshape(9, Cout_p, Cout_p).astype(jnp.bfloat16)
    b1p = jnp.pad(b1, ((0, 0), (0, Cout_p - Cout))).astype(jnp.float32)
    b2p = jnp.pad(b2, ((0, 0), (0, Cout_p - Cout))).astype(jnp.float32)

    # explicit scoped-VMEM budget: pipelined blocks + scratches + headroom
    vmem_need = (
        2 * L * Cin_p * 2                 # x blocks (bf16, double-buffered)
        + 2 * L * Cout_p * 2              # output blocks (bf16, double-buffered)
        + 2 * 9 * Cin_p * Cout_p * 2      # w1 blocks (bf16)
        + 2 * 9 * Cout_p * Cout_p * 2     # w2 blocks (bf16)
        + 2 * 2 * Cout_p * 4              # bias blocks (f32)
        + L_ext * (Cin_p + Cout_p) * 2    # x / y1 staging scratches (bf16)
        + L * Cout_p * 4                  # shared f32 accumulator scratch
    )
    vmem_limit = int(min(64 * 1024 * 1024, max(2 * vmem_need, 16 * 1024 * 1024)))

    out = pl.pallas_call(
        kernel,
        out_shape=jax.ShapeDtypeStruct((N, L, Cout_p), jnp.bfloat16),
        grid_spec=pltpu.PrefetchScalarGridSpec(
            num_scalar_prefetch=0,
            grid=(N,),
            in_specs=[
                pl.BlockSpec((1, L, Cin_p), lambda n: (n, 0, 0)),        # x (flat, no halo)
                pl.BlockSpec((9, Cin_p, Cout_p), lambda n: (0, 0, 0)),   # w1 (BN-folded)
                pl.BlockSpec((1, Cout_p), lambda n: (0, 0)),             # b1
                pl.BlockSpec((9, Cout_p, Cout_p), lambda n: (0, 0, 0)),  # w2 (BN-folded)
                pl.BlockSpec((1, Cout_p), lambda n: (0, 0)),             # b2
            ],
            out_specs=pl.BlockSpec((1, L, Cout_p), lambda n: (n, 0, 0)),
            scratch_shapes=[
                pltpu.VMEM((L_ext, Cin_p), jnp.bfloat16),   # x staging (with halo)
                pltpu.VMEM((L_ext, Cout_p), jnp.bfloat16),  # y1 staging (with halo)
                pltpu.VMEM((L, Cout_p), jnp.float32),       # shared f32 accumulator
            ],
        ),
        compiler_params=pltpu.CompilerParams(
            dimension_semantics=("parallel",),
            vmem_limit_bytes=vmem_limit),
    )(xf, w1p, b1p, w2p, b2p)

    # drop pad ring + channel pad; the f32 cast fuses with the slice/transpose
    return out.reshape(N, Hp, Wp, Cout_p)[:, 1:H + 1, 1:W + 1, :Cout].astype(jnp.float32)


# ---------------------------------------------------------------------------
# Glue (plain JAX): layout transform, nearest upsample, skip concat, BN fold
# ---------------------------------------------------------------------------
def _nearest_upsample(x_nhwc, scale_factor):
    s = int(scale_factor)
    N, H, W, C = x_nhwc.shape
    x = jnp.broadcast_to(x_nhwc[:, :, None, :, None, :], (N, H, s, W, s, C))
    return x.reshape(N, H * s, W * s, C)


def unet_decoder_block(x_nchw, skip_nchw, params, scale_factor=2.0):
    x = jnp.transpose(x_nchw, (0, 2, 3, 1))                 # NCHW -> NHWC
    if scale_factor != 1.0:
        x = _nearest_upsample(x, scale_factor)
    if skip_nchw is not None:
        x = jnp.concatenate([x, jnp.transpose(skip_nchw, (0, 2, 3, 1))], axis=-1)

    # fold BN scale into the conv weights (f32); bias stays a per-channel add
    w1 = params["w1"] * params["s1"].reshape(1, 1, 1, -1)
    w2 = params["w2"] * params["s2"].reshape(1, 1, 1, -1)
    y = _fused_double_conv(x, w1, params["b1"], w2, params["b2"])
    return jnp.transpose(y, (0, 3, 1, 2))                   # NHWC -> NCHW


# ---------------------------------------------------------------------------
# Deterministic parameter init (Conv2d 3x3 no-bias + BatchNorm2d eval stats)
# ---------------------------------------------------------------------------
def init_params(key, in_channels, out_channels, eps=1e-5):
    ks = jax.random.split(key, 10)

    def conv_w(k, cin, cout):
        bound = 1.0 / jnp.sqrt(9.0 * cin)
        return jax.random.uniform(k, (3, 3, cin, cout), jnp.float32, -bound, bound)

    def bn_fold(kg, kb, km, kv, c):
        gamma = 1.0 + 0.1 * jax.random.normal(kg, (c,), jnp.float32)
        beta = 0.1 * jax.random.normal(kb, (c,), jnp.float32)
        r_mean = 0.1 * jax.random.normal(km, (c,), jnp.float32)
        r_var = jnp.abs(jax.random.normal(kv, (c,), jnp.float32)) + 0.5
        scale = gamma / jnp.sqrt(r_var + eps)
        bias = beta - r_mean * scale
        return scale.reshape(1, c), bias.reshape(1, c)

    s1, b1 = bn_fold(ks[2], ks[3], ks[4], ks[5], out_channels)
    s2, b2 = bn_fold(ks[6], ks[7], ks[8], ks[9], out_channels)
    return {
        "w1": conv_w(ks[0], in_channels, out_channels),
        "s1": s1, "b1": b1,
        "w2": conv_w(ks[1], out_channels, out_channels),
        "s2": s2, "b2": b2,
    }


# ---------------------------------------------------------------------------
# Pure-JAX reference (mirrors the kernel's bf16-operand / f32-accum precision)
# ---------------------------------------------------------------------------
def _ref_conv_bn_relu(x_nhwc, w_hwio, scale, bias):
    w = (w_hwio * scale.reshape(1, 1, 1, -1)).astype(jnp.bfloat16)
    y = jax.lax.conv_general_dilated(
        x_nhwc.astype(jnp.bfloat16), w, window_strides=(1, 1), padding="SAME",
        dimension_numbers=("NHWC", "HWIO", "NHWC"),
        preferred_element_type=jnp.float32)
    return jnp.maximum(y + bias.reshape(1, 1, 1, -1), 0.0)


def ref_unet_decoder_block(x_nchw, skip_nchw, params, scale_factor=2.0):
    x = jnp.transpose(x_nchw, (0, 2, 3, 1))
    if scale_factor != 1.0:
        x = _nearest_upsample(x, scale_factor)
    if skip_nchw is not None:
        x = jnp.concatenate([x, jnp.transpose(skip_nchw, (0, 2, 3, 1))], axis=-1)
    y = _ref_conv_bn_relu(x, params["w1"], params["s1"], params["b1"])
    y = _ref_conv_bn_relu(y, params["w2"], params["s2"], params["b2"])
    y = y.astype(jnp.bfloat16).astype(jnp.float32)   # kernel writes bf16 to HBM
    return jnp.transpose(y, (0, 3, 1, 2))


# ---------------------------------------------------------------------------
if __name__ == "__main__":
    key = jax.random.PRNGKey(0)
    kx, ks, kp = jax.random.split(key, 3)

    # x: (N=2, C=4, H=8, W=8); skip: (2, 4, 16, 16); scale_factor=2
    # module in_channels = 4 (upsampled x) + 4 (skip) = 8, out_channels = 8
    x = jax.random.normal(kx, (2, 4, 8, 8), jnp.float32)
    skip = jax.random.normal(ks, (2, 4, 16, 16), jnp.float32)

    in_channels, out_channels = 8, 8
    params = init_params(kp, in_channels, out_channels)

    fwd = jax.jit(unet_decoder_block, static_argnames=("scale_factor",))
    out = jax.block_until_ready(fwd(x, skip, params, scale_factor=2.0))
    ref = jax.block_until_ready(ref_unet_decoder_block(x, skip, params, scale_factor=2.0))

    assert out.shape == (2, out_channels, 16, 16), out.shape
    max_err = float(jnp.max(jnp.abs(out - ref)))
    assert jnp.allclose(out, ref, rtol=2e-2, atol=2e-2), max_err
    print("KERNEL_OK")
</pallas_src>

<mosaic_0001>
module attributes {stable_mosaic.version = 11 : i64} {
  func.func @kernel(%arg0: i32, %arg1: memref<1x324x128xbf16, #tpu.memory_space<vmem>>, %arg2: memref<9x128x128xbf16, #tpu.memory_space<vmem>>, %arg3: memref<1x128xf32, #tpu.memory_space<vmem>>, %arg4: memref<9x128x128xbf16, #tpu.memory_space<vmem>>, %arg5: memref<1x128xf32, #tpu.memory_space<vmem>>, %arg6: memref<1x324x128xbf16, #tpu.memory_space<vmem>>, %arg7: memref<375x128xbf16, #tpu.memory_space<vmem>>, %arg8: memref<375x128xbf16, #tpu.memory_space<vmem>>, %arg9: memref<324x128xf32, #tpu.memory_space<vmem>>) attributes {dimension_semantics = [#tpu.dimension_semantics<parallel>], iteration_bounds = array<i64: 2>, scalar_prefetch = 0 : i64, scratch_operands = 3 : i64, tpu.core_type = #tpu.core_type<tc>, window_params = [{transform_indices = @transform_0, window_bounds = array<i64: 1, 324, 128>}, {pipeline_mode = #tpu.pipeline_mode<synchronous>, transform_indices = @transform_1, window_bounds = array<i64: 9, 128, 128>}, {pipeline_mode = #tpu.pipeline_mode<synchronous>, transform_indices = @transform_2, window_bounds = array<i64: 1, 128>}, {pipeline_mode = #tpu.pipeline_mode<synchronous>, transform_indices = @transform_3, window_bounds = array<i64: 9, 128, 128>}, {pipeline_mode = #tpu.pipeline_mode<synchronous>, transform_indices = @transform_4, window_bounds = array<i64: 1, 128>}, {transform_indices = @transform_5, window_bounds = array<i64: 1, 324, 128>}]} {
    %cst = arith.constant 0.000000e+00 : bf16
    %0 = vector.broadcast %cst : bf16 to vector<32x128xbf16>
    %c0 = arith.constant 0 : index
    %c0_0 = arith.constant 0 : index
    %1 = vector.load %arg7[%c0, %c0_0] : memref<375x128xbf16, #tpu.memory_space<vmem>>, vector<32x128xbf16>
    tpu.vector_store %arg7[%c0, %c0_0], %0 {strides = array<i32>} : memref<375x128xbf16, #tpu.memory_space<vmem>>, vector<32x128xbf16>,
    %cst_1 = arith.constant 0.000000e+00 : bf16
    %2 = vector.broadcast %cst_1 : bf16 to vector<19x128xbf16>
    %c356 = arith.constant 356 : index
    %c0_2 = arith.constant 0 : index
    %3 = vector.load %arg7[%c356, %c0_2] : memref<375x128xbf16, #tpu.memory_space<vmem>>, vector<19x128xbf16>
    tpu.vector_store %arg7[%c356, %c0_2], %2 {strides = array<i32>} : memref<375x128xbf16, #tpu.memory_space<vmem>>, vector<19x128xbf16>,
    %c0_3 = arith.constant 0 : index
    %c0_4 = arith.constant 0 : index
    %c0_5 = arith.constant 0 : index
    %4 = vector.load %arg1[%c0_3, %c0_4, %c0_5] : memref<1x324x128xbf16, #tpu.memory_space<vmem>>, vector<1x324x128xbf16>
    %5 = vector.shape_cast %4 : vector<1x324x128xbf16> to vector<324x128xbf16>
    %c32 = arith.constant 32 : index
    %c0_6 = arith.constant 0 : index
    %6 = vector.load %arg7[%c32, %c0_6] : memref<375x128xbf16, #tpu.memory_space<vmem>>, vector<324x128xbf16>
    tpu.vector_store %arg7[%c32, %c0_6], %5 {strides = array<i32>} : memref<375x128xbf16, #tpu.memory_space<vmem>>, vector<324x128xbf16>,
    %c13 = arith.constant 13 : index
    %c0_7 = arith.constant 0 : index
    %7 = vector.load %arg7[%c13, %c0_7] : memref<375x128xbf16, #tpu.memory_space<vmem>>, vector<324x128xbf16>
    %c0_8 = arith.constant 0 : index
    %c0_9 = arith.constant 0 : index
    %c0_10 = arith.constant 0 : index
    %8 = vector.load %arg2[%c0_8, %c0_9, %c0_10] : memref<9x128x128xbf16, #tpu.memory_space<vmem>>, vector<1x128x128xbf16>
    %9 = vector.shape_cast %8 : vector<1x128x128xbf16> to vector<128x128xbf16>
    %cst_11 = arith.constant dense<0.000000e+00> : vector<324x128xf32>
    %10 = tpu.matmul %7, %9, %cst_11 {dimension_numbers = #tpu.dot_dimension_numbers<[1], [0], [0], [1], [0, 0, 1, 1], [], []>} : vector<324x128xbf16>, vector<128x128xbf16>, vector<324x128xf32> -> vector<324x128xf32>
    %c0_12 = arith.constant 0 : index
    %c0_13 = arith.constant 0 : index
    %11 = vector.load %arg9[%c0_12, %c0_13] : memref<324x128xf32, #tpu.memory_space<vmem>>, vector<324x128xf32>
    tpu.vector_store %arg9[%c0_12, %c0_13], %10 {strides = array<i32>} : memref<324x128xf32, #tpu.memory_space<vmem>>, vector<324x128xf32>,
    %c0_14 = arith.constant 0 : index
    %c0_15 = arith.constant 0 : index
    %12 = vector.load %arg9[%c0_14, %c0_15] : memref<324x128xf32, #tpu.memory_space<vmem>>, vector<324x128xf32>
    %c14 = arith.constant 14 : index
    %c0_16 = arith.constant 0 : index
    %13 = vector.load %arg7[%c14, %c0_16] : memref<375x128xbf16, #tpu.memory_space<vmem>>, vector<324x128xbf16>
    %c1 = arith.constant 1 : index
    %c0_17 = arith.constant 0 : index
    %c0_18 = arith.constant 0 : index
    %14 = vector.load %arg2[%c1, %c0_17, %c0_18] : memref<9x128x128xbf16, #tpu.memory_space<vmem>>, vector<1x128x128xbf16>
    %15 = vector.shape_cast %14 : vector<1x128x128xbf16> to vector<128x128xbf16>
    %cst_19 = arith.constant dense<0.000000e+00> : vector<324x128xf32>
    %16 = tpu.matmul %13, %15, %cst_19 {dimension_numbers = #tpu.dot_dimension_numbers<[1], [0], [0], [1], [0, 0, 1, 1], [], []>} : vector<324x128xbf16>, vector<128x128xbf16>, vector<324x128xf32> -> vector<324x128xf32>
    %17 = arith.addf %12, %16 : vector<324x128xf32>
    %c0_20 = arith.constant 0 : index
    %c0_21 = arith.constant 0 : index
    %18 = vector.load %arg9[%c0_20, %c0_21] : memref<324x128xf32, #tpu.memory_space<vmem>>, vector<324x128xf32>
    tpu.vector_store %arg9[%c0_20, %c0_21], %17 {strides = array<i32>} : memref<324x128xf32, #tpu.memory_space<vmem>>, vector<324x128xf32>,
    %c0_22 = arith.constant 0 : index
    %c0_23 = arith.constant 0 : index
    %19 = vector.load %arg9[%c0_22, %c0_23] : memref<324x128xf32, #tpu.memory_space<vmem>>, vector<324x128xf32>
    %c15 = arith.constant 15 : index
    %c0_24 = arith.constant 0 : index
    %20 = vector.load %arg7[%c15, %c0_24] : memref<375x128xbf16, #tpu.memory_space<vmem>>, vector<324x128xbf16>
    %c2 = arith.constant 2 : index
    %c0_25 = arith.constant 0 : index
    %c0_26 = arith.constant 0 : index
    %21 = vector.load %arg2[%c2, %c0_25, %c0_26] : memref<9x128x128xbf16, #tpu.memory_space<vmem>>, vector<1x128x128xbf16>
    %22 = vector.shape_cast %21 : vector<1x128x128xbf16> to vector<128x128xbf16>
    %cst_27 = arith.constant dense<0.000000e+00> : vector<324x128xf32>
    %23 = tpu.matmul %20, %22, %cst_27 {dimension_numbers = #tpu.dot_dimension_numbers<[1], [0], [0], [1], [0, 0, 1, 1], [], []>} : vector<324x128xbf16>, vector<128x128xbf16>, vector<324x128xf32> -> vector<324x128xf32>
    %24 = arith.addf %19, %23 : vector<324x128xf32>
    %c0_28 = arith.constant 0 : index
    %c0_29 = arith.constant 0 : index
    %25 = vector.load %arg9[%c0_28, %c0_29] : memref<324x128xf32, #tpu.memory_space<vmem>>, vector<324x128xf32>
    tpu.vector_store %arg9[%c0_28, %c0_29], %24 {strides = array<i32>} : memref<324x128xf32, #tpu.memory_space<vmem>>, vector<324x128xf32>,
    %c0_30 = arith.constant 0 : index
    %c0_31 = arith.constant 0 : index
    %26 = vector.load %arg9[%c0_30, %c0_31] : memref<324x128xf32, #tpu.memory_space<vmem>>, vector<324x128xf32>
    %c31 = arith.constant 31 : index
    %c0_32 = arith.constant 0 : index
    %27 = vector.load %arg7[%c31, %c0_32] : memref<375x128xbf16, #tpu.memory_space<vmem>>, vector<324x128xbf16>
    %c3 = arith.constant 3 : index
    %c0_33 = arith.constant 0 : index
    %c0_34 = arith.constant 0 : index
    %28 = vector.load %arg2[%c3, %c0_33, %c0_34] : memref<9x128x128xbf16, #tpu.memory_space<vmem>>, vector<1x128x128xbf16>
    %29 = vector.shape_cast %28 : vector<1x128x128xbf16> to vector<128x128xbf16>
    %cst_35 = arith.constant dense<0.000000e+00> : vector<324x128xf32>
    %30 = tpu.matmul %27, %29, %cst_35 {dimension_numbers = #tpu.dot_dimension_numbers<[1], [0], [0], [1], [0, 0, 1, 1], [], []>} : vector<324x128xbf16>, vector<128x128xbf16>, vector<324x128xf32> -> vector<324x128xf32>
    %31 = arith.addf %26, %30 : vector<324x128xf32>
    %c0_36 = arith.constant 0 : index
    %c0_37 = arith.constant 0 : index
    %32 = vector.load %arg9[%c0_36, %c0_37] : memref<324x128xf32, #tpu.memory_space<vmem>>, vector<324x128xf32>
    tpu.vector_store %arg9[%c0_36, %c0_37], %31 {strides = array<i32>} : memref<324x128xf32, #tpu.memory_space<vmem>>, vector<324x128xf32>,
    %c0_38 = arith.constant 0 : index
    %c0_39 = arith.constant 0 : index
    %33 = vector.load %arg9[%c0_38, %c0_39] : memref<324x128xf32, #tpu.memory_space<vmem>>, vector<324x128xf32>
    %c32_40 = arith.constant 32 : index
    %c0_41 = arith.constant 0 : index
    %34 = vector.load %arg7[%c32_40, %c0_41] : memref<375x128xbf16, #tpu.memory_space<vmem>>, vector<324x128xbf16>
    %c4 = arith.constant 4 : index
    %c0_42 = arith.constant 0 : index
    %c0_43 = arith.constant 0 : index
    %35 = vector.load %arg2[%c4, %c0_42, %c0_43] : memref<9x128x128xbf16, #tpu.memory_space<vmem>>, vector<1x128x128xbf16>
    %36 = vector.shape_cast %35 : vector<1x128x128xbf16> to vector<128x128xbf16>
    %cst_44 = arith.constant dense<0.000000e+00> : vector<324x128xf32>
    %37 = tpu.matmul %34, %36, %cst_44 {dimension_numbers = #tpu.dot_dimension_numbers<[1], [0], [0], [1], [0, 0, 1, 1], [], []>} : vector<324x128xbf16>, vector<128x128xbf16>, vector<324x128xf32> -> vector<324x128xf32>
    %38 = arith.addf %33, %37 : vector<324x128xf32>
    %c0_45 = arith.constant 0 : index
    %c0_46 = arith.constant 0 : index
    %39 = vector.load %arg9[%c0_45, %c0_46] : memref<324x128xf32, #tpu.memory_space<vmem>>, vector<324x128xf32>
    tpu.vector_store %arg9[%c0_45, %c0_46], %38 {strides = array<i32>} : memref<324x128xf32, #tpu.memory_space<vmem>>, vector<324x128xf32>,
    %c0_47 = arith.constant 0 : index
    %c0_48 = arith.constant 0 : index
    %40 = vector.load %arg9[%c0_47, %c0_48] : memref<324x128xf32, #tpu.memory_space<vmem>>, vector<324x128xf32>
    %c33 = arith.constant 33 : index
    %c0_49 = arith.constant 0 : index
    %41 = vector.load %arg7[%c33, %c0_49] : memref<375x128xbf16, #tpu.memory_space<vmem>>, vector<324x128xbf16>
    %c5 = arith.constant 5 : index
    %c0_50 = arith.constant 0 : index
    %c0_51 = arith.constant 0 : index
    %42 = vector.load %arg2[%c5, %c0_50, %c0_51] : memref<9x128x128xbf16, #tpu.memory_space<vmem>>, vector<1x128x128xbf16>
    %43 = vector.shape_cast %42 : vector<1x128x128xbf16> to vector<128x128xbf16>
    %cst_52 = arith.constant dense<0.000000e+00> : vector<324x128xf32>
    %44 = tpu.matmul %41, %43, %cst_52 {dimension_numbers = #tpu.dot_dimension_numbers<[1], [0], [0], [1], [0, 0, 1, 1], [], []>} : vector<324x128xbf16>, vector<128x128xbf16>, vector<324x128xf32> -> vector<324x128xf32>
    %45 = arith.addf %40, %44 : vector<324x128xf32>
    %c0_53 = arith.constant 0 : index
    %c0_54 = arith.constant 0 : index
    %46 = vector.load %arg9[%c0_53, %c0_54] : memref<324x128xf32, #tpu.memory_space<vmem>>, vector<324x128xf32>
    tpu.vector_store %arg9[%c0_53, %c0_54], %45 {strides = array<i32>} : memref<324x128xf32, #tpu.memory_space<vmem>>, vector<324x128xf32>,
    %c0_55 = arith.constant 0 : index
    %c0_56 = arith.constant 0 : index
    %47 = vector.load %arg9[%c0_55, %c0_56] : memref<324x128xf32, #tpu.memory_space<vmem>>, vector<324x128xf32>
    %c49 = arith.constant 49 : index
    %c0_57 = arith.constant 0 : index
    %48 = vector.load %arg7[%c49, %c0_57] : memref<375x128xbf16, #tpu.memory_space<vmem>>, vector<324x128xbf16>
    %c6 = arith.constant 6 : index
    %c0_58 = arith.constant 0 : index
    %c0_59 = arith.constant 0 : index
    %49 = vector.load %arg2[%c6, %c0_58, %c0_59] : memref<9x128x128xbf16, #tpu.memory_space<vmem>>, vector<1x128x128xbf16>
    %50 = vector.shape_cast %49 : vector<1x128x128xbf16> to vector<128x128xbf16>
    %cst_60 = arith.constant dense<0.000000e+00> : vector<324x128xf32>
    %51 = tpu.matmul %48, %50, %cst_60 {dimension_numbers = #tpu.dot_dimension_numbers<[1], [0], [0], [1], [0, 0, 1, 1], [], []>} : vector<324x128xbf16>, vector<128x128xbf16>, vector<324x128xf32> -> vector<324x128xf32>
    %52 = arith.addf %47, %51 : vector<324x128xf32>
    %c0_61 = arith.constant 0 : index
    %c0_62 = arith.constant 0 : index
    %53 = vector.load %arg9[%c0_61, %c0_62] : memref<324x128xf32, #tpu.memory_space<vmem>>, vector<324x128xf32>
    tpu.vector_store %arg9[%c0_61, %c0_62], %52 {strides = array<i32>} : memref<324x128xf32, #tpu.memory_space<vmem>>, vector<324x128xf32>,
    %c0_63 = arith.constant 0 : index
    %c0_64 = arith.constant 0 : index
    %54 = vector.load %arg9[%c0_63, %c0_64] : memref<324x128xf32, #tpu.memory_space<vmem>>, vector<324x128xf32>
    %c50 = arith.constant 50 : index
    %c0_65 = arith.constant 0 : index
    %55 = vector.load %arg7[%c50, %c0_65] : memref<375x128xbf16, #tpu.memory_space<vmem>>, vector<324x128xbf16>
    %c7 = arith.constant 7 : index
    %c0_66 = arith.constant 0 : index
    %c0_67 = arith.constant 0 : index
    %56 = vector.load %arg2[%c7, %c0_66, %c0_67] : memref<9x128x128xbf16, #tpu.memory_space<vmem>>, vector<1x128x128xbf16>
    %57 = vector.shape_cast %56 : vector<1x128x128xbf16> to vector<128x128xbf16>
    %cst_68 = arith.constant dense<0.000000e+00> : vector<324x128xf32>
    %58 = tpu.matmul %55, %57, %cst_68 {dimension_numbers = #tpu.dot_dimension_numbers<[1], [0], [0], [1], [0, 0, 1, 1], [], []>} : vector<324x128xbf16>, vector<128x128xbf16>, vector<324x128xf32> -> vector<324x128xf32>
    %59 = arith.addf %54, %58 : vector<324x128xf32>
    %c0_69 = arith.constant 0 : index
    %c0_70 = arith.constant 0 : index
    %60 = vector.load %arg9[%c0_69, %c0_70] : memref<324x128xf32, #tpu.memory_space<vmem>>, vector<324x128xf32>
    tpu.vector_store %arg9[%c0_69, %c0_70], %59 {strides = array<i32>} : memref<324x128xf32, #tpu.memory_space<vmem>>, vector<324x128xf32>,
    %c0_71 = arith.constant 0 : index
    %c0_72 = arith.constant 0 : index
    %61 = vector.load %arg9[%c0_71, %c0_72] : memref<324x128xf32, #tpu.memory_space<vmem>>, vector<324x128xf32>
    %c51 = arith.constant 51 : index
    %c0_73 = arith.constant 0 : index
    %62 = vector.load %arg7[%c51, %c0_73] : memref<375x128xbf16, #tpu.memory_space<vmem>>, vector<324x128xbf16>
    %c8 = arith.constant 8 : index
    %c0_74 = arith.constant 0 : index
    %c0_75 = arith.constant 0 : index
    %63 = vector.load %arg2[%c8, %c0_74, %c0_75] : memref<9x128x128xbf16, #tpu.memory_space<vmem>>, vector<1x128x128xbf16>
    %64 = vector.shape_cast %63 : vector<1x128x128xbf16> to vector<128x128xbf16>
    %cst_76 = arith.constant dense<0.000000e+00> : vector<324x128xf32>
    %65 = tpu.matmul %62, %64, %cst_76 {dimension_numbers = #tpu.dot_dimension_numbers<[1], [0], [0], [1], [0, 0, 1, 1], [], []>} : vector<324x128xbf16>, vector<128x128xbf16>, vector<324x128xf32> -> vector<324x128xf32>
    %66 = arith.addf %61, %65 : vector<324x128xf32>
    %c0_77 = arith.constant 0 : index
    %c0_78 = arith.constant 0 : index
    %67 = vector.load %arg9[%c0_77, %c0_78] : memref<324x128xf32, #tpu.memory_space<vmem>>, vector<324x128xf32>
    tpu.vector_store %arg9[%c0_77, %c0_78], %66 {strides = array<i32>} : memref<324x128xf32, #tpu.memory_space<vmem>>, vector<324x128xf32>,
    %68 = tpu.iota {dimensions = array<i32: 0>} : vector<324x128xi32>
    %69 = arith.sitofp %68 : vector<324x128xi32> to vector<324x128xf32>
    %cst_79 = arith.constant 0.055555556 : f32
    %70 = vector.broadcast %cst_79 : f32 to vector<324x128xf32>
    %71 = arith.mulf %69, %70 : vector<324x128xf32>
    %cst_80 = arith.constant 0.027777778 : f32
    %72 = vector.broadcast %cst_80 : f32 to vector<324x128xf32>
    %73 = arith.addf %71, %72 : vector<324x128xf32>
    %74 = arith.fptosi %73 : vector<324x128xf32> to vector<324x128xi32>
    %c18_i32 = arith.constant 18 : i32
    %75 = vector.broadcast %c18_i32 : i32 to vector<324x128xi32>
    %76 = arith.muli %74, %75 : vector<324x128xi32>
    %77 = arith.subi %68, %76 : vector<324x128xi32>
    %c1_i32 = arith.constant 1 : i32
    %78 = vector.broadcast %c1_i32 : i32 to vector<324x128xi32>
    %79 = arith.cmpi sge, %74, %78 : vector<324x128xi32>
    %c16_i32 = arith.constant 16 : i32
    %80 = vector.broadcast %c16_i32 : i32 to vector<324x128xi32>
    %81 = arith.cmpi sle, %74, %80 : vector<324x128xi32>
    %82 = arith.andi %79, %81 : vector<324x128xi1>
    %c1_i32_81 = arith.constant 1 : i32
    %83 = vector.broadcast %c1_i32_81 : i32 to vector<324x128xi32>
    %84 = arith.cmpi sge, %77, %83 : vector<324x128xi32>
    %85 = arith.andi %82, %84 : vector<324x128xi1>
    %c16_i32_82 = arith.constant 16 : i32
    %86 = vector.broadcast %c16_i32_82 : i32 to vector<324x128xi32>
    %87 = arith.cmpi sle, %77, %86 : vector<324x128xi32>
    %88 = arith.andi %85, %87 : vector<324x128xi1>
    %c0_83 = arith.constant 0 : index
    %c0_84 = arith.constant 0 : index
    %89 = vector.load %arg9[%c0_83, %c0_84] : memref<324x128xf32, #tpu.memory_space<vmem>>, vector<324x128xf32>
    %c0_85 = arith.constant 0 : index
    %c0_86 = arith.constant 0 : index
    %90 = vector.load %arg3[%c0_85, %c0_86] : memref<1x128xf32, #tpu.memory_space<vmem>>, vector<1x128xf32>
    %91 = vector.broadcast %90 : vector<1x128xf32> to vector<324x128xf32>
    %92 = arith.addf %89, %91 : vector<324x128xf32>
    %cst_87 = arith.constant 0.000000e+00 : f32
    %93 = vector.broadcast %cst_87 : f32 to vector<324x128xf32>
    %94 = arith.maximumf %92, %93 : vector<324x128xf32>
    %cst_88 = arith.constant 0.000000e+00 : f32
    %95 = vector.broadcast %cst_88 : f32 to vector<324x128xf32>
    %96 = arith.select %88, %94, %95 : vector<324x128xi1>, vector<324x128xf32>
    %97 = arith.truncf %96 : vector<324x128xf32> to vector<324x128xbf16>
    %cst_89 = arith.constant 0.000000e+00 : bf16
    %98 = vector.broadcast %cst_89 : bf16 to vector<32x128xbf16>
    %c0_90 = arith.constant 0 : index
    %c0_91 = arith.constant 0 : index
    %99 = vector.load %arg8[%c0_90, %c0_91] : memref<375x128xbf16, #tpu.memory_space<vmem>>, vector<32x128xbf16>
    tpu.vector_store %arg8[%c0_90, %c0_91], %98 {strides = array<i32>} : memref<375x128xbf16, #tpu.memory_space<vmem>>, vector<32x128xbf16>,
    %cst_92 = arith.constant 0.000000e+00 : bf16
    %100 = vector.broadcast %cst_92 : bf16 to vector<19x128xbf16>
    %c356_93 = arith.constant 356 : index
    %c0_94 = arith.constant 0 : index
    %101 = vector.load %arg8[%c356_93, %c0_94] : memref<375x128xbf16, #tpu.memory_space<vmem>>, vector<19x128xbf16>
    tpu.vector_store %arg8[%c356_93, %c0_94], %100 {strides = array<i32>} : memref<375x128xbf16, #tpu.memory_space<vmem>>, vector<19x128xbf16>,
    %c32_95 = arith.constant 32 : index
    %c0_96 = arith.constant 0 : index
    %102 = vector.load %arg8[%c32_95, %c0_96] : memref<375x128xbf16, #tpu.memory_space<vmem>>, vector<324x128xbf16>
    tpu.vector_store %arg8[%c32_95, %c0_96], %97 {strides = array<i32>} : memref<375x128xbf16, #tpu.memory_space<vmem>>, vector<324x128xbf16>,
    %c13_97 = arith.constant 13 : index
    %c0_98 = arith.constant 0 : index
    %103 = vector.load %arg8[%c13_97, %c0_98] : memref<375x128xbf16, #tpu.memory_space<vmem>>, vector<324x128xbf16>
    %c0_99 = arith.constant 0 : index
    %c0_100 = arith.constant 0 : index
    %c0_101 = arith.constant 0 : index
    %104 = vector.load %arg4[%c0_99, %c0_100, %c0_101] : memref<9x128x128xbf16, #tpu.memory_space<vmem>>, vector<1x128x128xbf16>
    %105 = vector.shape_cast %104 : vector<1x128x128xbf16> to vector<128x128xbf16>
    %cst_102 = arith.constant dense<0.000000e+00> : vector<324x128xf32>
    %106 = tpu.matmul %103, %105, %cst_102 {dimension_numbers = #tpu.dot_dimension_numbers<[1], [0], [0], [1], [0, 0, 1, 1], [], []>} : vector<324x128xbf16>, vector<128x128xbf16>, vector<324x128xf32> -> vector<324x128xf32>
    %c0_103 = arith.constant 0 : index
    %c0_104 = arith.constant 0 : index
    %107 = vector.load %arg9[%c0_103, %c0_104] : memref<324x128xf32, #tpu.memory_space<vmem>>, vector<324x128xf32>
    tpu.vector_store %arg9[%c0_103, %c0_104], %106 {strides = array<i32>} : memref<324x128xf32, #tpu.memory_space<vmem>>, vector<324x128xf32>,
    %c0_105 = arith.constant 0 : index
    %c0_106 = arith.constant 0 : index
    %108 = vector.load %arg9[%c0_105, %c0_106] : memref<324x128xf32, #tpu.memory_space<vmem>>, vector<324x128xf32>
    %c14_107 = arith.constant 14 : index
    %c0_108 = arith.constant 0 : index
    %109 = vector.load %arg8[%c14_107, %c0_108] : memref<375x128xbf16, #tpu.memory_space<vmem>>, vector<324x128xbf16>
    %c1_109 = arith.constant 1 : index
    %c0_110 = arith.constant 0 : index
    %c0_111 = arith.constant 0 : index
    %110 = vector.load %arg4[%c1_109, %c0_110, %c0_111] : memref<9x128x128xbf16, #tpu.memory_space<vmem>>, vector<1x128x128xbf16>
    %111 = vector.shape_cast %110 : vector<1x128x128xbf16> to vector<128x128xbf16>
    %cst_112 = arith.constant dense<0.000000e+00> : vector<324x128xf32>
    %112 = tpu.matmul %109, %111, %cst_112 {dimension_numbers = #tpu.dot_dimension_numbers<[1], [0], [0], [1], [0, 0, 1, 1], [], []>} : vector<324x128xbf16>, vector<128x128xbf16>, vector<324x128xf32> -> vector<324x128xf32>
    %113 = arith.addf %108, %112 : vector<324x128xf32>
    %c0_113 = arith.constant 0 : index
    %c0_114 = arith.constant 0 : index
    %114 = vector.load %arg9[%c0_113, %c0_114] : memref<324x128xf32, #tpu.memory_space<vmem>>, vector<324x128xf32>
    tpu.vector_store %arg9[%c0_113, %c0_114], %113 {strides = array<i32>} : memref<324x128xf32, #tpu.memory_space<vmem>>, vector<324x128xf32>,
    %c0_115 = arith.constant 0 : index
    %c0_116 = arith.constant 0 : index
    %115 = vector.load %arg9[%c0_115, %c0_116] : memref<324x128xf32, #tpu.memory_space<vmem>>, vector<324x128xf32>
    %c15_117 = arith.constant 15 : index
    %c0_118 = arith.constant 0 : index
    %116 = vector.load %arg8[%c15_117, %c0_118] : memref<375x128xbf16, #tpu.memory_space<vmem>>, vector<324x128xbf16>
    %c2_119 = arith.constant 2 : index
    %c0_120 = arith.constant 0 : index
    %c0_121 = arith.constant 0 : index
    %117 = vector.load %arg4[%c2_119, %c0_120, %c0_121] : memref<9x128x128xbf16, #tpu.memory_space<vmem>>, vector<1x128x128xbf16>
    %118 = vector.shape_cast %117 : vector<1x128x128xbf16> to vector<128x128xbf16>
    %cst_122 = arith.constant dense<0.000000e+00> : vector<324x128xf32>
    %119 = tpu.matmul %116, %118, %cst_122 {dimension_numbers = #tpu.dot_dimension_numbers<[1], [0], [0], [1], [0, 0, 1, 1], [], []>} : vector<324x128xbf16>, vector<128x128xbf16>, vector<324x128xf32> -> vector<324x128xf32>
    %120 = arith.addf %115, %119 : vector<324x128xf32>
    %c0_123 = arith.constant 0 : index
    %c0_124 = arith.constant 0 : index
    %121 = vector.load %arg9[%c0_123, %c0_124] : memref<324x128xf32, #tpu.memory_space<vmem>>, vector<324x128xf32>
    tpu.vector_store %arg9[%c0_123, %c0_124], %120 {strides = array<i32>} : memref<324x128xf32, #tpu.memory_space<vmem>>, vector<324x128xf32>,
    %c0_125 = arith.constant 0 : index
    %c0_126 = arith.constant 0 : index
    %122 = vector.load %arg9[%c0_125, %c0_126] : memref<324x128xf32, #tpu.memory_space<vmem>>, vector<324x128xf32>
    %c31_127 = arith.constant 31 : index
    %c0_128 = arith.constant 0 : index
    %123 = vector.load %arg8[%c31_127, %c0_128] : memref<375x128xbf16, #tpu.memory_space<vmem>>, vector<324x128xbf16>
    %c3_129 = arith.constant 3 : index
    %c0_130 = arith.constant 0 : index
    %c0_131 = arith.constant 0 : index
    %124 = vector.load %arg4[%c3_129, %c0_130, %c0_131] : memref<9x128x128xbf16, #tpu.memory_space<vmem>>, vector<1x128x128xbf16>
    %125 = vector.shape_cast %124 : vector<1x128x128xbf16> to vector<128x128xbf16>
    %cst_132 = arith.constant dense<0.000000e+00> : vector<324x128xf32>
    %126 = tpu.matmul %123, %125, %cst_132 {dimension_numbers = #tpu.dot_dimension_numbers<[1], [0], [0], [1], [0, 0, 1, 1], [], []>} : vector<324x128xbf16>, vector<128x128xbf16>, vector<324x128xf32> -> vector<324x128xf32>
    %127 = arith.addf %122, %126 : vector<324x128xf32>
    %c0_133 = arith.constant 0 : index
    %c0_134 = arith.constant 0 : index
    %128 = vector.load %arg9[%c0_133, %c0_134] : memref<324x128xf32, #tpu.memory_space<vmem>>, vector<324x128xf32>
    tpu.vector_store %arg9[%c0_133, %c0_134], %127 {strides = array<i32>} : memref<324x128xf32, #tpu.memory_space<vmem>>, vector<324x128xf32>,
    %c0_135 = arith.constant 0 : index
    %c0_136 = arith.constant 0 : index
    %129 = vector.load %arg9[%c0_135, %c0_136] : memref<324x128xf32, #tpu.memory_space<vmem>>, vector<324x128xf32>
    %c32_137 = arith.constant 32 : index
    %c0_138 = arith.constant 0 : index
    %130 = vector.load %arg8[%c32_137, %c0_138] : memref<375x128xbf16, #tpu.memory_space<vmem>>, vector<324x128xbf16>
    %c4_139 = arith.constant 4 : index
    %c0_140 = arith.constant 0 : index
    %c0_141 = arith.constant 0 : index
    %131 = vector.load %arg4[%c4_139, %c0_140, %c0_141] : memref<9x128x128xbf16, #tpu.memory_space<vmem>>, vector<1x128x128xbf16>
    %132 = vector.shape_cast %131 : vector<1x128x128xbf16> to vector<128x128xbf16>
    %cst_142 = arith.constant dense<0.000000e+00> : vector<324x128xf32>
    %133 = tpu.matmul %130, %132, %cst_142 {dimension_numbers = #tpu.dot_dimension_numbers<[1], [0], [0], [1], [0, 0, 1, 1], [], []>} : vector<324x128xbf16>, vector<128x128xbf16>, vector<324x128xf32> -> vector<324x128xf32>
    %134 = arith.addf %129, %133 : vector<324x128xf32>
    %c0_143 = arith.constant 0 : index
    %c0_144 = arith.constant 0 : index
    %135 = vector.load %arg9[%c0_143, %c0_144] : memref<324x128xf32, #tpu.memory_space<vmem>>, vector<324x128xf32>
    tpu.vector_store %arg9[%c0_143, %c0_144], %134 {strides = array<i32>} : memref<324x128xf32, #tpu.memory_space<vmem>>, vector<324x128xf32>,
    %c0_145 = arith.constant 0 : index
    %c0_146 = arith.constant 0 : index
    %136 = vector.load %arg9[%c0_145, %c0_146] : memref<324x128xf32, #tpu.memory_space<vmem>>, vector<324x128xf32>
    %c33_147 = arith.constant 33 : index
    %c0_148 = arith.constant 0 : index
    %137 = vector.load %arg8[%c33_147, %c0_148] : memref<375x128xbf16, #tpu.memory_space<vmem>>, vector<324x128xbf16>
    %c5_149 = arith.constant 5 : index
    %c0_150 = arith.constant 0 : index
    %c0_151 = arith.constant 0 : index
    %138 = vector.load %arg4[%c5_149, %c0_150, %c0_151] : memref<9x128x128xbf16, #tpu.memory_space<vmem>>, vector<1x128x128xbf16>
    %139 = vector.shape_cast %138 : vector<1x128x128xbf16> to vector<128x128xbf16>
    %cst_152 = arith.constant dense<0.000000e+00> : vector<324x128xf32>
    %140 = tpu.matmul %137, %139, %cst_152 {dimension_numbers = #tpu.dot_dimension_numbers<[1], [0], [0], [1], [0, 0, 1, 1], [], []>} : vector<324x128xbf16>, vector<128x128xbf16>, vector<324x128xf32> -> vector<324x128xf32>
    %141 = arith.addf %136, %140 : vector<324x128xf32>
    %c0_153 = arith.constant 0 : index
    %c0_154 = arith.constant 0 : index
    %142 = vector.load %arg9[%c0_153, %c0_154] : memref<324x128xf32, #tpu.memory_space<vmem>>, vector<324x128xf32>
    tpu.vector_store %arg9[%c0_153, %c0_154], %141 {strides = array<i32>} : memref<324x128xf32, #tpu.memory_space<vmem>>, vector<324x128xf32>,
    %c0_155 = arith.constant 0 : index
    %c0_156 = arith.constant 0 : index
    %143 = vector.load %arg9[%c0_155, %c0_156] : memref<324x128xf32, #tpu.memory_space<vmem>>, vector<324x128xf32>
    %c49_157 = arith.constant 49 : index
    %c0_158 = arith.constant 0 : index
    %144 = vector.load %arg8[%c49_157, %c0_158] : memref<375x128xbf16, #tpu.memory_space<vmem>>, vector<324x128xbf16>
    %c6_159 = arith.constant 6 : index
    %c0_160 = arith.constant 0 : index
    %c0_161 = arith.constant 0 : index
    %145 = vector.load %arg4[%c6_159, %c0_160, %c0_161] : memref<9x128x128xbf16, #tpu.memory_space<vmem>>, vector<1x128x128xbf16>
    %146 = vector.shape_cast %145 : vector<1x128x128xbf16> to vector<128x128xbf16>
    %cst_162 = arith.constant dense<0.000000e+00> : vector<324x128xf32>
    %147 = tpu.matmul %144, %146, %cst_162 {dimension_numbers = #tpu.dot_dimension_numbers<[1], [0], [0], [1], [0, 0, 1, 1], [], []>} : vector<324x128xbf16>, vector<128x128xbf16>, vector<324x128xf32> -> vector<324x128xf32>
    %148 = arith.addf %143, %147 : vector<324x128xf32>
    %c0_163 = arith.constant 0 : index
    %c0_164 = arith.constant 0 : index
    %149 = vector.load %arg9[%c0_163, %c0_164] : memref<324x128xf32, #tpu.memory_space<vmem>>, vector<324x128xf32>
    tpu.vector_store %arg9[%c0_163, %c0_164], %148 {strides = array<i32>} : memref<324x128xf32, #tpu.memory_space<vmem>>, vector<324x128xf32>,
    %c0_165 = arith.constant 0 : index
    %c0_166 = arith.constant 0 : index
    %150 = vector.load %arg9[%c0_165, %c0_166] : memref<324x128xf32, #tpu.memory_space<vmem>>, vector<324x128xf32>
    %c50_167 = arith.constant 50 : index
    %c0_168 = arith.constant 0 : index
    %151 = vector.load %arg8[%c50_167, %c0_168] : memref<375x128xbf16, #tpu.memory_space<vmem>>, vector<324x128xbf16>
    %c7_169 = arith.constant 7 : index
    %c0_170 = arith.constant 0 : index
    %c0_171 = arith.constant 0 : index
    %152 = vector.load %arg4[%c7_169, %c0_170, %c0_171] : memref<9x128x128xbf16, #tpu.memory_space<vmem>>, vector<1x128x128xbf16>
    %153 = vector.shape_cast %152 : vector<1x128x128xbf16> to vector<128x128xbf16>
    %cst_172 = arith.constant dense<0.000000e+00> : vector<324x128xf32>
    %154 = tpu.matmul %151, %153, %cst_172 {dimension_numbers = #tpu.dot_dimension_numbers<[1], [0], [0], [1], [0, 0, 1, 1], [], []>} : vector<324x128xbf16>, vector<128x128xbf16>, vector<324x128xf32> -> vector<324x128xf32>
    %155 = arith.addf %150, %154 : vector<324x128xf32>
    %c0_173 = arith.constant 0 : index
    %c0_174 = arith.constant 0 : index
    %156 = vector.load %arg9[%c0_173, %c0_174] : memref<324x128xf32, #tpu.memory_space<vmem>>, vector<324x128xf32>
    tpu.vector_store %arg9[%c0_173, %c0_174], %155 {strides = array<i32>} : memref<324x128xf32, #tpu.memory_space<vmem>>, vector<324x128xf32>,
    %c0_175 = arith.constant 0 : index
    %c0_176 = arith.constant 0 : index
    %157 = vector.load %arg9[%c0_175, %c0_176] : memref<324x128xf32, #tpu.memory_space<vmem>>, vector<324x128xf32>
    %c51_177 = arith.constant 51 : index
    %c0_178 = arith.constant 0 : index
    %158 = vector.load %arg8[%c51_177, %c0_178] : memref<375x128xbf16, #tpu.memory_space<vmem>>, vector<324x128xbf16>
    %c8_179 = arith.constant 8 : index
    %c0_180 = arith.constant 0 : index
    %c0_181 = arith.constant 0 : index
    %159 = vector.load %arg4[%c8_179, %c0_180, %c0_181] : memref<9x128x128xbf16, #tpu.memory_space<vmem>>, vector<1x128x128xbf16>
    %160 = vector.shape_cast %159 : vector<1x128x128xbf16> to vector<128x128xbf16>
    %cst_182 = arith.constant dense<0.000000e+00> : vector<324x128xf32>
    %161 = tpu.matmul %158, %160, %cst_182 {dimension_numbers = #tpu.dot_dimension_numbers<[1], [0], [0], [1], [0, 0, 1, 1], [], []>} : vector<324x128xbf16>, vector<128x128xbf16>, vector<324x128xf32> -> vector<324x128xf32>
    %162 = arith.addf %157, %161 : vector<324x128xf32>
    %c0_183 = arith.constant 0 : index
    %c0_184 = arith.constant 0 : index
    %163 = vector.load %arg9[%c0_183, %c0_184] : memref<324x128xf32, #tpu.memory_space<vmem>>, vector<324x128xf32>
    tpu.vector_store %arg9[%c0_183, %c0_184], %162 {strides = array<i32>} : memref<324x128xf32, #tpu.memory_space<vmem>>, vector<324x128xf32>,
    %c0_185 = arith.constant 0 : index
    %c0_186 = arith.constant 0 : index
    %164 = vector.load %arg9[%c0_185, %c0_186] : memref<324x128xf32, #tpu.memory_space<vmem>>, vector<324x128xf32>
    %c0_187 = arith.constant 0 : index
    %c0_188 = arith.constant 0 : index
    %165 = vector.load %arg5[%c0_187, %c0_188] : memref<1x128xf32, #tpu.memory_space<vmem>>, vector<1x128xf32>
    %166 = vector.broadcast %165 : vector<1x128xf32> to vector<324x128xf32>
    %167 = arith.addf %164, %166 : vector<324x128xf32>
    %cst_189 = arith.constant 0.000000e+00 : f32
    %168 = vector.broadcast %cst_189 : f32 to vector<324x128xf32>
    %169 = arith.maximumf %167, %168 : vector<324x128xf32>
    %170 = arith.truncf %169 : vector<324x128xf32> to vector<324x128xbf16>
    %c0_190 = arith.constant 0 : index
    %c0_191 = arith.constant 0 : index
    %c0_192 = arith.constant 0 : index
    %171 = vector.load %arg6[%c0_190, %c0_191, %c0_192] : memref<1x324x128xbf16, #tpu.memory_space<vmem>>, vector<1x324x128xbf16>
    %172 = vector.shape_cast %171 : vector<1x324x128xbf16> to vector<324x128xbf16>
    %173 = vector.shape_cast %170 : vector<324x128xbf16> to vector<1x324x128xbf16>
    tpu.vector_store %arg6[%c0_190, %c0_191, %c0_192], %173 {strides = array<i32>} : memref<1x324x128xbf16, #tpu.memory_space<vmem>>, vector<1x324x128xbf16>,
    return
  }
  func.func @transform_0(%arg0: i32) -> (i32, i32, i32) {
    %c0_i32 = arith.constant 0 : i32
    %c0_i32_0 = arith.constant 0 : i32
    %c0_i32_1 = arith.constant 0 : i32
    return %arg0, %c0_i32, %c0_i32_0 : i32, i32, i32
  }
  func.func @transform_1(%arg0: i32) -> (i32, i32, i32) {
    %c0_i32 = arith.constant 0 : i32
    %c0_i32_0 = arith.constant 0 : i32
    %c0_i32_1 = arith.constant 0 : i32
    %c0_i32_2 = arith.constant 0 : i32
    return %c0_i32, %c0_i32_0, %c0_i32_1 : i32, i32, i32
  }
  func.func @transform_2(%arg0: i32) -> (i32, i32) {
    %c0_i32 = arith.constant 0 : i32
    %c0_i32_0 = arith.constant 0 : i32
    %c0_i32_1 = arith.constant 0 : i32
    return %c0_i32, %c0_i32_0 : i32, i32
  }
  func.func @transform_3(%arg0: i32) -> (i32, i32, i32) {
    %c0_i32 = arith.constant 0 : i32
    %c0_i32_0 = arith.constant 0 : i32
    %c0_i32_1 = arith.constant 0 : i32
    %c0_i32_2 = arith.constant 0 : i32
    return %c0_i32, %c0_i32_0, %c0_i32_1 : i32, i32, i32
  }
  func.func @transform_4(%arg0: i32) -> (i32, i32) {
    %c0_i32 = arith.constant 0 : i32
    %c0_i32_0 = arith.constant 0 : i32
    %c0_i32_1 = arith.constant 0 : i32
    return %c0_i32, %c0_i32_0 : i32, i32
  }
  func.func @transform_5(%arg0: i32) -> (i32, i32, i32) {
    %c0_i32 = arith.constant 0 : i32
    %c0_i32_0 = arith.constant 0 : i32
    %c0_i32_1 = arith.constant 0 : i32
    return %arg0, %c0_i32, %c0_i32_0 : i32, i32, i32
  }
}

</mosaic_0001>

<bundles_post_ra>
// kernel: unet_decoder_block.1
= control target key start
LH: loop header
LB: loop body
LE: loop exit
PB: predicated region body
PF: predicated region fallthrough
CT: control target
= control target key end

     0   :  { %s17999_s18 = smov 0   ;;  %s22277_s0 = inlined_call_operand.vmem [shape: bf16[2,324,128], index: 0, kind: input, shape index: {}]   ;;  %s22278_s1 = inlined_call_operand.vmem [shape: bf16[9,128,128], index: 1, kind: input, shape index: {}]   ;;  %s22279_s2 = inlined_call_operand.vmem [shape: f32[1,128], index: 2, kind: input, shape index: {}]   ;;  %s22280_s3 = inlined_call_operand.vmem [shape: bf16[9,128,128], index: 3, kind: input, shape index: {}]   ;;  %s22281_s4 = inlined_call_operand.vmem [shape: f32[1,128], index: 4, kind: input, shape index: {}]   ;;  %s22282_s5 = inlined_call_operand.vmem [shape: bf16[2,324,128], index: 5, kind: output, shape index: {}]  }
   0x1 LB: > { %s13826_s19 = sadd.s32 4294967295, %s17964_s18   ;;  %p13830_p0 = scmp.ge.s32.totalorder %s17964_s18, 1  ;;  %s17964_s18 = sphi %s17999_s18, %s15_s18  }
   0x2   : > { %p187_p1 = scmp.lt.s32.totalorder %s17964_s18, 3 }
   0x4   : > { %p188_p2 = pnand %p13830_p0, %p187_p1 }
   0x6   : > { %191 = sbr.rel (%p188_p2) target bundleno = 2002 (0x7d2), region = 40 }
   0xb   : > { %v17434_v0 = vld [vmem:[%s22278_s1 + $0x38] sm:$0xff]   ;;  %v22291_v1 = vmov 0.0   ;;  %v17435_v2 = vld [vmem:[%s22278_s1 + $0x30] sm:$0xff]   ;;  %vm22288_vm0 = vmmov 0   ;;  %p215_p3 = scmp.lt.s32.totalorder %s13826_s19, 1  ;;  %v17968_v4 = vmov 0  }
   0xc   : > { %15540 = vmatprep.subr.bf16.mxu0 %v22291_v1  ;;  %15640 = vmatprep.subr.bf16.mxu1 %v22291_v1  ;;  %v17437_v3 = vld [vmem:[%s22278_s1 + $0x78] sm:$0xff]   ;;  %227 = vst [vmem:[#allocation2 + $0x4] sm:$0xf] %v17968_v4  ;;  %228 = vst [vmem:[#allocation2 + $0x8] sm:$0xf] %v17968_v4  ;;  %v17439_v5 = vld [vmem:[%s22278_s1 + $0x70] sm:$0xff]  }
   0xd   : > { %15541 = vmatpush3.bf16.msra.mxu0 %v17434_v0  ;;  %15556 = vmatprep.mubr.msk.bf16.mxu0 %vm22288_vm0, %v22291_v1  ;;  %s22759_s19 = smov (!%p215_p3, %s13826_s19), 1  ;;  %229 = vst [vmem:[#allocation2 + $0xc] sm:$0xf] %v17968_v4  ;;  %230 = vst [vmem:[#allocation2 + $0xb0] sm:$0xc] %v17968_v4  ;;  %v17436_v6 = vld [vmem:[%s22278_s1 + $0x28] sm:$0xff]  }
   0xe   : > { %15542 = vmatprep.subr.bf16.mxu0 %v22291_v1  ;;  %15656 = vmatprep.mubr.msk.bf16.mxu1 %vm22288_vm0, %v22291_v1  ;;  %231 = vst [vmem:[#allocation2 + $0xb4] sm:$0xf] %v17968_v4  ;;  %7168 = vst [vmem:[#allocation3 + $0x4] sm:$0xf] %v17968_v4  ;;  %s17340_s30 = smul.u32 164, %s22759_s19  ;;  %v17441_v7 = vld [vmem:[%s22278_s1 + $0x68] sm:$0xff]  }
   0xf   : > { %7169 = vst [vmem:[#allocation3 + $0x8] sm:$0xf] %v17968_v4  ;;  %7170 = vst [vmem:[#allocation3 + $0xc] sm:$0xf] %v17968_v4  ;;  %15641 = vmatpush3.bf16.msra.mxu1 %v17437_v3  ;;  %v17438_v8 = vld [vmem:[%s22278_s1 + $0x20] sm:$0xff]   ;;  %v17440_v9 = vld [vmem:[%s22278_s1 + $0x18] sm:$0xff]  }
  0x10   : > { %7171 = vst [vmem:[#allocation3 + $0xb0] sm:$0xc] %v17968_v4  ;;  %7172 = vst [vmem:[#allocation3 + $0xb4] sm:$0xf] %v17968_v4  ;;  %15642 = vmatprep.subr.bf16.mxu1 %v22291_v1  ;;  %s18047_s12 = scalar_lea.vmem %s22277_s0, %s17340_s30  ;;  %v17443_v10 = vld [vmem:[%s22278_s1 + $0x60] sm:$0xff]   ;;  %v17445_v13 = vld [vmem:[%s22278_s1 + $0x58] sm:$0xff]  }
  0x11   : > { %15543 = vmatpush3.bf16.msra.mxu0 %v17435_v2  ;;  %v238_v11 = vld [vmem:[%s18047_s12] sm:$0xff]   ;;  %v17442_v15 = vld [vmem:[%s22278_s1 + $0x10] sm:$0xff]   ;;  %v240_v17 = vld [vmem:[%s18047_s12 + $0x8] sm:$0xff]   ;;  %vm22287_vm1 = vsmask.f32 5376  ;;  %vm22290_vm2 = vcmask 1044480  }
  0x12   : > { %15544 = vmatprep.subr.bf16.mxu0 %v22291_v1  ;;  %279 = vst [vmem:[#allocation2 + $0x10] sm:$0xff] %v238_v11   ;;  %v17444_v18 = vld [vmem:[%s22278_s1 + $0x8] sm:$0xff]   ;;  %v17447_v19 = vld [vmem:[%s22278_s1 + $0x50] sm:$0xff]   ;;  %281 = vst [vmem:[#allocation2 + $0x18] sm:$0xff] %v240_v17   ;;  %vm22286_vm3 = vsmask.f32 4352 }
  0x13   : > { %15643 = vmatpush3.bf16.msra.mxu1 %v17439_v5  ;;  %v17448_v12 = vld [vmem:[#allocation2 + $0x4] sm:$0xfc]   ;;  %v242_v21 = vld [vmem:[%s18047_s12 + $0x10] sm:$0xff]   ;;  %v244_v30 = vld [vmem:[%s18047_s12 + $0x18] sm:$0xff]   ;;  %vm22285_vm4 = vsmask.f32 7424 }
  0x14   : > { %15644 = vmatprep.subr.bf16.mxu1 %v22291_v1  ;;  %v485_v14 = vshrl.u32 %v17448_v12, 16  ;;  %v488_v16 = vshll.u32 %v17448_v12, 16  ;;  %283 = vst [vmem:[#allocation2 + $0x20] sm:$0xff] %v242_v21   ;;  %v17450_v24 = vld [vmem:[%s22278_s1 + $0x48] sm:$0xff]   ;;  %v17446_v26 = vld [vmem:[%s22278_s1] sm:$0xff]   ;;  %285 = vst [vmem:[#allocation2 + $0x28] sm:$0xff] %v244_v30  }
  0x15   : > { %15545 = vmatpush3.bf16.msra.mxu0 %v17436_v6  ;;  %v17454_v25 = vld [vmem:[#allocation2 + $0x4] sm:$0xf8]   ;;  %v250_v36 = vld [vmem:[%s18047_s12 + $0x30] sm:$0xff]   ;;  %v252_v37 = vld [vmem:[%s18047_s12 + $0x38] sm:$0xff]   ;;  %vm22284_vm5 = vcmask 1046528   ;;  %vm232_vm6 = vcmask 1043456  }
  0x16   : > { %15546 = vmatprep.subr.bf16.mxu0 %v22291_v1  ;;  %v487_v20 = vrot.slane %v485_v14, 2  ;;  %v490_v23 = vrot.slane %v488_v16, 3  ;;  %v246_v31 = vld [vmem:[%s18047_s12 + $0x20] sm:$0xff]   ;;  %v248_v32 = vld [vmem:[%s18047_s12 + $0x28] sm:$0xff]   ;;  %291 = vst [vmem:[#allocation2 + $0x40] sm:$0xff] %v250_v36   ;;  %293 = vst [vmem:[#allocation2 + $0x48] sm:$0xff] %v252_v37  }
  0x17   : > { %15645 = vmatpush3.bf16.msra.mxu1 %v17441_v7  ;;  %287 = vst [vmem:[#allocation2 + $0x30] sm:$0xff] %v246_v31   ;;  %289 = vst [vmem:[#allocation2 + $0x38] sm:$0xff] %v248_v32   ;;  %v17451_v40 = vld [vmem:[%s22278_s1 + $0xb8] sm:$0xff]   ;;  %v17452_v41 = vld [vmem:[%s22278_s1 + $0x40] sm:$0xff]   ;;  %v1188_v42 = vrot.slane %v17454_v25, 3 }
  0x18   : > { %15646 = vmatprep.subr.bf16.mxu1 %v22291_v1  ;;  %v491_v33 = vor.u32 %v490_v23, %v487_v20  ;;  %v254_v48 = vld [vmem:[%s18047_s12 + $0x40] sm:$0xff]   ;;  %v17458_v53 = vld [vmem:[%s22278_s1 + $0xb0] sm:$0xff]   ;;  %v17465_v59 = vld [vmem:[%s22278_s1 + $0xa8] sm:$0xff]   ;;  %vm233_vm7 = vsmask.f32 3328 }
  0x19   : > { %15547 = vmatpush3.bf16.msra.mxu0 %v17438_v8  ;;  %v17449_v22 = vld [vmem:[#allocation2 + $0xc] sm:$0xff]   ;;  %v17453_v38 = vld [vmem:[#allocation2 + $0x14] sm:$0xff]   ;;  %295 = vst [vmem:[#allocation2 + $0x50] sm:$0xff] %v254_v48   ;;  %v262_v20 = vld [vmem:[%s18047_s12 + $0x60] sm:$0xff]   ;;  %vm22283_vm9 = vsmask.f32 6400 }
  0x1a   : > { %15548 = vmatprep.subr.bf16.mxu0 %v22291_v1  ;;  %v493_v27 = vshrl.u32 %v17449_v22, 16  ;;  %v496_v28 = vshll.u32 %v17449_v22, 16  ;;  %v18082_v29 = vld [vmem:[#allocation2 + $0xc] sm:$0xff]   ;;  %v502_v43 = vshrl.u32 %v17453_v38, 16  ;;  %v505_v44 = vshll.u32 %v17453_v38, 16  ;;  %v17457_v52 = vld [vmem:[#allocation2 + $0x14] sm:$0xff]   ;;  %vm18730_vm8 = vmand %vm232_vm6, %vm233_vm7 }
  0x1b   : > { %15647 = vmatpush3.bf16.msra.mxu1 %v17443_v10  ;;  %v1189_v45 = vrot.slane %v18082_v29, 3  ;;  %v17456_v46 = vld [vmem:[#allocation2 + $0x1c] sm:$0xff]   ;;  %v1191_v57 = vrot.slane %v17457_v52, 3  ;;  %v17459_v58 = vld [vmem:[#allocation2 + $0x24] sm:$0xff]   ;;  %303 = vst [vmem:[#allocation2 + $0x70] sm:$0xff] %v262_v20   ;;  %v17484_v22 = vld [vmem:[%s22278_s1 + $0x90] sm:$0xff]  }
  0x1c   : > { %15648 = vmatprep.subr.bf16.mxu1 %v22291_v1  ;;  %v495_v34 = vrot.slane %v493_v27, 2  ;;  %v498_v35 = vrot.slane %v496_v28, 3  ;;  %v504_v49 = vrot.slane %v502_v43, 2  ;;  %v507_v50 = vrot.slane %v505_v44, 3  ;;  %v17460_v63 = vld [vmem:[#allocation2 + $0x1c] sm:$0xff]   ;;  %v256_v11 = vld [vmem:[%s18047_s12 + $0x48] sm:$0xff]  }
  0x1d   : > { %15549 = vmatpush3.bf16.msra.mxu0 %v17440_v9  ;;  %v1190_v51 = vsel %vm22290_vm2, %v1188_v42, %v1189_v45  ;;  %v511_v55 = vshrl.u32 %v17456_v46, 16  ;;  %v514_v56 = vshll.u32 %v17456_v46, 16  ;;  %v1192_v0 = vsel %vm22290_vm2, %v1189_v45, %v1191_v57  ;;  %v17472_v10 = vld [vmem:[%s22278_s1 + $0xa0] sm:$0xff]   ;;  %297 = vst [vmem:[#allocation2 + $0x58] sm:$0xff] %v256_v11   ;;  %v260_v16 = vld [vmem:[%s18047_s12 + $0x58] sm:$0xff]   ;;  %v264_v21 = vld [vmem:[%s18047_s12 + $0x68] sm:$0xff]  }
  0x1e   : > { %15550 = vmatprep.subr.bf16.mxu0 %v22291_v1  ;;  %v499_v39 = vor.u32 %v498_v35, %v495_v34  ;;  %v508_v54 = vor.u32 %v507_v50, %v504_v49  ;;  %v520_v3 = vshrl.u32 %v17459_v58, 16  ;;  %v523_v4 = vshll.u32 %v17459_v58, 16  ;;  %v17461_v9 = vld [vmem:[#allocation2 + $0x2c] sm:$0xff]   ;;  %v17462_v12 = vld [vmem:[#allocation2 + $0x24] sm:$0xff]   ;;  %301 = vst [vmem:[#allocation2 + $0x68] sm:$0xff] %v260_v16   ;;  %305 = vst [vmem:[#allocation2 + $0x78] sm:$0xff] %v264_v21  }
  0x1f   : > { %15649 = vmatpush3.bf16.msra.mxu1 %v17445_v13  ;;  %v513_v61 = vrot.slane %v511_v55, 2  ;;  %v516_v62 = vrot.slane %v514_v56, 3  ;;  %v1193_v5 = vrot.slane %v17460_v63, 3  ;;  %v258_v13 = vld [vmem:[%s18047_s12 + $0x50] sm:$0xff]   ;;  %v1195_v25 = vrot.slane %v17462_v12, 3  ;;  %v270_v27 = vld [vmem:[%s18047_s12 + $0x80] sm:$0xff]  }
  0x20   : > { %15650 = vmatprep.subr.bf16.mxu1 %v22291_v1  ;;  %v500_v47 = vsel %vm22287_vm1, %v491_v33, %v499_v39  ;;  %v509_v60 = vsel %vm22287_vm1, %v499_v39, %v508_v54  ;;  %v522_v7 = vrot.slane %v520_v3, 2  ;;  %v525_v8 = vrot.slane %v523_v4, 3  ;;  %299 = vst [vmem:[#allocation2 + $0x60] sm:$0xff] %v258_v13   ;;  %v266_v23 = vld [vmem:[%s18047_s12 + $0x70] sm:$0xff]   ;;  %v272_v28 = vld [vmem:[%s18047_s12 + $0x88] sm:$0xff]   ;;  %311 = vst [vmem:[#allocation2 + $0x90] sm:$0xff] %v270_v27  }
  0x21   : > { %15551 = vmatpush3.bf16.msra.mxu0 %v17442_v15  ;;  %v517_v2 = vor.u32 %v516_v62, %v513_v61  ;;  %v1194_v14 = vsel %vm22290_vm2, %v1191_v57, %v1193_v5  ;;  %v17477_v15 = vld [vmem:[%s22278_s1 + $0x98] sm:$0xff]   ;;  %307 = vst [vmem:[#allocation2 + $0x80] sm:$0xff] %v266_v23   ;;  %313 = vst [vmem:[#allocation2 + $0x98] sm:$0xff] %v272_v28   ;;  %v17489_v32 = vld [vmem:[%s22278_s1 + $0x88] sm:$0xff]   ;;  %v1196_v33 = vsel %vm22290_vm2, %v1193_v5, %v1195_v25 }
  0x22   : > { %15552 = vmatprep.subr.bf16.mxu0 %v22291_v1  ;;  %v526_v17 = vor.u32 %v525_v8, %v522_v7  ;;  %v17464_v34 = vld [vmem:[#allocation2 + $0x2c] sm:$0xff]   ;;  %v17466_v39 = vld [vmem:[#allocation2 + $0x3c] sm:$0xff]   ;;  %v17467_v44 = vld [vmem:[#allocation2 + $0x34] sm:$0xff]  }
  0x23   : > { %15651 = vmatpush3.bf16.msra.mxu1 %v17447_v19  ;;  %v518_v6 = vsel %vm22287_vm1, %v508_v54, %v517_v2  ;;  %v532_v19 = vshll.u32 %v17461_v9, 16  ;;  %v1197_v38 = vrot.slane %v17464_v34, 3  ;;  %v547_v46 = vshrl.u32 %v17466_v39, 16  ;;  %v17468_v49 = vld [vmem:[#allocation2 + $0x44] sm:$0xff]   ;;  %v17469_v55 = vld [vmem:[#allocation2 + $0x3c] sm:$0xff]   ;;  %v274_v58 = vld [vmem:[%s18047_s12 + $0x90] sm:$0xff]  }
  0x24   : > { %15652 = vmatprep.subr.bf16.mxu1 %v22291_v1  ;;  %v527_v29 = vsel %vm22287_vm1, %v517_v2, %v526_v17  ;;  %v1199_v48 = vrot.slane %v17467_v44, 3  ;;  %v556_v54 = vshrl.u32 %v17468_v49, 16  ;;  %v559_v57 = vshll.u32 %v17468_v49, 16  ;;  %315 = vst [vmem:[#allocation2 + $0xa0] sm:$0xff] %v274_v58   ;;  %v17496_v62 = vld [vmem:[%s22278_s1 + $0xf8] sm:$0xff]   ;;  %v17497_v63 = vld [vmem:[%s22278_s1 + $0x80] sm:$0xff]  }
  0x25   : > { %15553 = vmatpush3.bf16.msra.mxu0 %v17444_v18  ;;  %v529_v18 = vshrl.u32 %v17461_v9, 16  ;;  %v534_v31 = vrot.slane %v532_v19, 3  ;;  %v1198_v43 = vsel %vm22290_vm2, %v1195_v25, %v1197_v38  ;;  %v1201_v61 = vrot.slane %v17469_v55, 3  ;;  %v17498_v3 = vld [vmem:[%s22278_s1 + $0xf0] sm:$0xff]   ;;  %v276_v4 = vld [vmem:[%s18047_s12 + $0x98] sm:$0xf] }
  0x26   : > { %15554 = vmatprep.subr.bf16.mxu0 %v22291_v1  ;;  %v561_v2 = vrot.slane %v559_v57, 3  ;;  %317 = vst [vmem:[#allocation2 + $0xa8] sm:$0xf] %v276_v4  ;;  %v17502_v16 = vld [vmem:[%s22278_s1 + $0xe0] sm:$0xff]   ;;  %v17505_v28 = vld [vmem:[%s22278_s1 + $0xd0] sm:$0xff]   ;;  %v17509_v34 = vld [vmem:[%s22278_s1 + $0xc8] sm:$0xff]  }
  0x27   : > { %15653 = vmatpush3.bf16.msra.mxu1 %v17450_v24  ;;  %v268_v24 = vld [vmem:[%s18047_s12 + $0x78] sm:$0xff]   ;;  %v531_v30 = vrot.slane %v529_v18, 2  ;;  %v1202_v5 = vsel %vm22290_vm2, %v1199_v48, %v1201_v61  ;;  %v17474_v18 = vld [vmem:[#allocation2 + $0x4c] sm:$0xff]  }
  0x28   : > { %15654 = vmatprep.subr.bf16.mxu1 %v22291_v1  ;;  %309 = vst [vmem:[#allocation2 + $0x88] sm:$0xff] %v268_v24   ;;  %v1205_v23 = vrot.slane %v17474_v18, 3  ;;  %v17475_v24 = vld [vmem:[#allocation2 + $0x5c] sm:$0xff]  }
  0x29   : > { %15555 = vmatpush3.bf16.msra.mxu0 %v17446_v26  ;;  %v17463_v26 = vld [vmem:[#allocation2 + $0x34] sm:$0xff]   ;;  %v535_v35 = vor.u32 %v534_v31, %v531_v30  ;;  %v583_v30 = vshrl.u32 %v17475_v24, 16  ;;  %v586_v31 = vshll.u32 %v17475_v24, 16 }
  0x2a   : > { %15740 = vmatprep.subr.bf16.mxu0 %v22291_v1  ;;  %v538_v36 = vshrl.u32 %v17463_v26, 16  ;;  %v541_v37 = vshll.u32 %v17463_v26, 16 }
  0x2b   : > { %15655 = vmatpush3.bf16.msra.mxu1 %v17452_v41 }
  0x2c   : > { %15557 = vmatmul.mubr.bf16.vlgmr.msra.gmra.mxu0 %v500_v47  ;;  %15840 = vmatprep.subr.bf16.mxu1 %v22291_v1  ;;  %v540_v41 = vrot.slane %v538_v36, 2  ;;  %v543_v42 = vrot.slane %v541_v37, 3  ;;  %v550_v47 = vshll.u32 %v17466_v39, 16  ;;  %v585_v37 = vrot.slane %v583_v30, 2  ;;  %v17478_v39 = vld [vmem:[#allocation2 + $0x64] sm:$0xff]  }
  0x2d   : > { %15741 = vmatpush3.bf16.msra.mxu0 %v17451_v40  ;;  %15560 = vmatprep.mubr.msk.bf16.mxu0 %vm22288_vm0, %v22291_v1  ;;  %v536_v40 = vsel %vm22287_vm1, %v526_v17, %v535_v35  ;;  %v592_v44 = vshrl.u32 %v17478_v39, 16 }
  0x2e   : > { %15742 = vmatprep.subr.bf16.mxu0 %v22291_v1  ;;  %15657 = vmatmul.mubr.bf16.vlgmr.msra.gmra.mxu1 %v1190_v51  ;;  %v544_v45 = vor.u32 %v543_v42, %v540_v41  ;;  %v549_v51 = vrot.slane %v547_v46, 2  ;;  %v552_v52 = vrot.slane %v550_v47, 3  ;;  %v17479_v42 = vld [vmem:[#allocation2 + $0x5c] sm:$0xff]   ;;  %v17480_v46 = vld [vmem:[#allocation2 + $0x6c] sm:$0xff]  }
  0x2f   : > { %15660 = vmatprep.mubr.msk.bf16.mxu1 %vm22288_vm0, %v22291_v1  ;;  %15841 = vmatpush3.bf16.msra.mxu1 %v17496_v62  ;;  %v1209_v47 = vrot.slane %v17479_v42, 3  ;;  %v594_v49 = vrot.slane %v592_v44, 2 }
  0x30   : > { %v545_v50 = vsel %vm22287_vm1, %v535_v35, %v544_v45  ;;  %v553_v56 = vor.u32 %v552_v52, %v549_v51  ;;  %15842 = vmatprep.subr.bf16.mxu1 %v22291_v1  ;;  %v601_v51 = vshrl.u32 %v17480_v46, 16 }
  0x31   : > { %15743 = vmatpush3.bf16.msra.mxu0 %v17458_v53  ;;  %v1200_v53 = vsel %vm22290_vm2, %v1197_v38, %v1199_v48  ;;  %v588_v38 = vrot.slane %v586_v31, 3  ;;  %v17491_v31 = vld [vmem:[#allocation2 + $0x84] sm:$0xff]  }
  0x32   : > { %15744 = vmatprep.subr.bf16.mxu0 %v22291_v1  ;;  %v603_v57 = vrot.slane %v601_v51, 2 }
  0x33   : > { %15843 = vmatpush3.bf16.msra.mxu1 %v17498_v3 }
  0x34   : > { %15561 = vmatmul.mubr.bf16.gmra.mxu0 %v509_v60  ;;  %v558_v60 = vrot.slane %v556_v54, 2  ;;  %15844 = vmatprep.subr.bf16.mxu1 %v22291_v1  ;;  %v17481_v54 = vld [vmem:[#allocation2 + $0x64] sm:$0xff]  }
  0x35   : > { %15564 = vmatprep.mubr.msk.bf16.mxu0 %vm22288_vm0, %v22291_v1  ;;  %15745 = vmatpush3.bf16.msra.mxu0 %v17465_v59  ;;  %v17470_v59 = vld [vmem:[#allocation2 + $0x4c] sm:$0xff]  }
  0x36   : > { %15746 = vmatprep.subr.bf16.mxu0 %v22291_v1  ;;  %15661 = vmatmul.mubr.bf16.gmra.mxu1 %v1192_v0  ;;  %v554_v0 = vsel %vm22287_vm1, %v544_v45, %v553_v56  ;;  %v562_v7 = vor.u32 %v561_v2, %v558_v60  ;;  %v565_v8 = vshrl.u32 %v17470_v59, 16  ;;  %v568_v9 = vshll.u32 %v17470_v59, 16 }
  0x37   : > { %15664 = vmatprep.mubr.msk.bf16.mxu1 %vm22288_vm0, %v22291_v1  ;;  %v595_v45 = vshll.u32 %v17478_v39, 16  ;;  %v1211_v59 = vrot.slane %v17481_v54, 3 }
  0x38   : > { %v563_v12 = vsel %vm22287_vm1, %v553_v56, %v562_v7  ;;  %v567_v13 = vrot.slane %v565_v8, 2  ;;  %v17482_v56 = vld [vmem:[#allocation2 + $0x74] sm:$0xff]  }
  0x39   : > { %15747 = vmatpush3.bf16.msra.mxu0 %v17472_v10  ;;  %v17501_v10 = vld [vmem:[%s22278_s1 + $0xe8] sm:$0xff]   ;;  %v613_v62 = vshll.u32 %v17482_v56, 16  ;;  %v17486_v8 = vld [vmem:[#allocation2 + $0x74] sm:$0xff]  }
  0x3a   : > { %15748 = vmatprep.subr.bf16.mxu0 %v22291_v1  ;;  %15845 = vmatpush3.bf16.msra.mxu1 %v17501_v10 }
  0x3b   : > { %15846 = vmatprep.subr.bf16.mxu1 %v22291_v1  ;;  %v615_v4 = vrot.slane %v613_v62, 3  ;;  %v17503_v62 = vld [vmem:[#allocation2 + $0xa4] sm:$0x1f]  }
  0x3c   : > { %15565 = vmatmul.mubr.bf16.gmra.mxu0 %v518_v6  ;;  %v17471_v6 = vld [vmem:[#allocation2 + $0x44] sm:$0xff]  }
  0x3d   : > { %15568 = vmatprep.mubr.msk.bf16.mxu0 %vm22288_vm0, %v22291_v1  ;;  %15749 = vmatpush3.bf16.msra.mxu0 %v17477_v15  ;;  %v1203_v11 = vrot.slane %v17471_v6, 3  ;;  %v17473_v15 = vld [vmem:[#allocation2 + $0x54] sm:$0xff]   ;;  %v17485_v6 = vld [vmem:[#allocation2 + $0x7c] sm:$0xff]  }
  0x3e   : > { %15665 = vmatmul.mubr.bf16.gmra.mxu1 %v1194_v14  ;;  %15750 = vmatprep.subr.bf16.mxu0 %v22291_v1  ;;  %v570_v14 = vrot.slane %v568_v9, 3  ;;  %v574_v20 = vshrl.u32 %v17473_v15, 16  ;;  %v577_v21 = vshll.u32 %v17473_v15, 16  ;;  %v619_v10 = vshrl.u32 %v17485_v6, 16 }
  0x3f   : > { %15668 = vmatprep.mubr.msk.bf16.mxu1 %vm22288_vm0, %v22291_v1  ;;  %v1204_v17 = vsel %vm22290_vm2, %v1201_v61, %v1203_v11  ;;  %15847 = vmatpush3.bf16.msra.mxu1 %v17502_v16  ;;  %v610_v61 = vshrl.u32 %v17482_v56, 16  ;;  %v1215_v15 = vrot.slane %v17486_v8, 3  ;;  %v17487_v16 = vld [vmem:[#allocation2 + $0x84] sm:$0xff]  }
  0x40   : > { %v571_v19 = vor.u32 %v570_v14, %v567_v13  ;;  %15848 = vmatprep.subr.bf16.mxu1 %v22291_v1  ;;  %v576_v26 = vrot.slane %v574_v20, 2  ;;  %v579_v27 = vrot.slane %v577_v21, 3  ;;  %v621_v13 = vrot.slane %v619_v10, 2  ;;  %v17488_v21 = vld [vmem:[#allocation2 + $0x7c] sm:$0xff]   ;;  %v17499_v56 = vld [vmem:[#allocation2 + $0xa4] sm:$0x1f]  }
  0x41   : > { %15751 = vmatpush3.bf16.msra.mxu0 %v17484_v22  ;;  %v17504_v22 = vld [vmem:[%s22278_s1 + $0xd8] sm:$0xff]   ;;  %v612_v3 = vrot.slane %v610_v61, 2  ;;  %v631_v20 = vshll.u32 %v17487_v16, 16  ;;  %v667_v61 = vshll.u32 %v17499_v56, 16 }
  0x42   : > { %15752 = vmatprep.subr.bf16.mxu0 %v22291_v1  ;;  %v572_v25 = vsel %vm22287_vm1, %v562_v7, %v571_v19  ;;  %v17511_v10 = vld [vmem:[#allocation2 + $0x14] sm:$0xff]  }
  0x43   : > { %15849 = vmatpush3.bf16.msra.mxu1 %v17504_v22 }
  0x44   : > { %15569 = vmatmul.mubr.bf16.gmra.mxu0 %v527_v29  ;;  %15850 = vmatprep.subr.bf16.mxu1 %v22291_v1  ;;  %v1206_v29 = vsel %vm22290_vm2, %v1203_v11, %v1205_v23  ;;  %v622_v11 = vshll.u32 %v17485_v6, 16 }
  0x45   : > { %15572 = vmatprep.mubr.msk.bf16.mxu0 %vm22288_vm0, %v22291_v1  ;;  %15753 = vmatpush3.bf16.msra.mxu0 %v17489_v32  ;;  %v17476_v32 = vld [vmem:[#allocation2 + $0x54] sm:$0xff]  }
  0x46   : > { %15669 = vmatmul.mubr.bf16.gmra.mxu1 %v1196_v33  ;;  %15754 = vmatprep.subr.bf16.mxu0 %v22291_v1  ;;  %v580_v33 = vor.u32 %v579_v27, %v576_v26  ;;  %v1207_v35 = vrot.slane %v17476_v32, 3  ;;  %v624_v14 = vrot.slane %v622_v11, 3  ;;  %v1217_v26 = vrot.slane %v17488_v21, 3  ;;  %v17513_v21 = vld [vmem:[#allocation2 + $0x14] sm:$0xff]  }
  0x47   : > { %15672 = vmatprep.mubr.msk.bf16.mxu1 %vm22288_vm0, %v22291_v1  ;;  %15851 = vmatpush3.bf16.msra.mxu1 %v17505_v28 }
  0x48   : > { %15852 = vmatprep.subr.bf16.mxu1 %v22291_v1  ;;  %v581_v36 = vsel %vm22287_vm1, %v571_v19, %v580_v33  ;;  %v1208_v41 = vsel %vm22290_vm2, %v1205_v23, %v1207_v35  ;;  %v1210_v52 = vsel %vm22290_vm2, %v1207_v35, %v1209_v47  ;;  %v628_v19 = vshrl.u32 %v17487_v16, 16  ;;  %v17490_v23 = vld [vmem:[#allocation2 + $0x8c] sm:$0xff]  }
  0x49   : > { %15755 = vmatpush3.bf16.msra.mxu0 %v17497_v63  ;;  %v17483_v63 = vld [vmem:[#allocation2 + $0x6c] sm:$0xff]   ;;  %v625_v22 = vor.u32 %v624_v14, %v621_v13  ;;  %v637_v28 = vshrl.u32 %v17490_v23, 16  ;;  %v640_v30 = vshll.u32 %v17490_v23, 16  ;;  %v1219_v35 = vrot.slane %v17491_v31, 3 }
  0x4a   : > { %15940 = vmatprep.subr.bf16.mxu0 %v22291_v1  ;;  %v630_v24 = vrot.slane %v628_v19, 2  ;;  %v1804_v16 = vshrl.u32 %v17511_v10, 16 }
  0x4b   : > { %15853 = vmatpush3.bf16.msra.mxu1 %v17509_v34  ;;  %v642_v34 = vrot.slane %v640_v30, 3  ;;  %v1220_v39 = vsel %vm22290_vm2, %v1217_v26, %v1219_v35  ;;  %v2542_v30 = vshll.u32 %v17513_v21, 16 }
  0x4c   : > { %15573 = vmatmul.mubr.bf16.gmra.mxu0 %v536_v40  ;;  %v17510_v40 = vld [vmem:[%s22278_s1 + $0xc0] sm:$0xff]   ;;  %15854 = vmatprep.subr.bf16.mxu1 %v22291_v1  ;;  %v1806_v23 = vrot.slane %v1804_v16, 3 }
  0x4d   : > { %15576 = vmatprep.mubr.msk.bf16.mxu0 %vm22288_vm0, %v22291_v1 }
  0x4e   : > { %15673 = vmatmul.mubr.bf16.gmra.mxu1 %v1198_v43  ;;  %v589_v43 = vor.u32 %v588_v38, %v585_v37  ;;  %v17493_v38 = vld [vmem:[#allocation2 + $0x8c] sm:$0xff]  }
  0x4f   : > { %15676 = vmatprep.mubr.msk.bf16.mxu1 %vm22288_vm0, %v22291_v1  ;;  %15855 = vmatpush3.bf16.msra.mxu1 %v17510_v40 }
  0x50   : > { %16040 = vmatprep.subr.bf16.mxu1 %v22291_v1  ;;  %v590_v48 = vsel %vm22287_vm1, %v580_v33, %v589_v43  ;;  %v639_v33 = vrot.slane %v637_v28, 2 }
  0x52   : > { %v643_v42 = vor.u32 %v642_v34, %v639_v33 }
  0x54   : > { %15577 = vmatmul.mubr.bf16.gmra.mxu0 %v545_v50  ;;  %v597_v50 = vrot.slane %v595_v45, 3  ;;  %v1221_v45 = vrot.slane %v17493_v38, 3  ;;  %v2544_v38 = vrot.slane %v2542_v30, 4 }
  0x55   : > { %15580 = vmatprep.mubr.msk.bf16.mxu0 %vm22288_vm0, %v22291_v1 }
  0x56   : > { %15677 = vmatmul.mubr.bf16.gmra.mxu1 %v1200_v53  ;;  %v604_v53 = vshll.u32 %v17480_v46, 16  ;;  %v598_v55 = vor.u32 %v597_v50, %v594_v49  ;;  %v17494_v46 = vld [vmem:[#allocation2 + $0x9c] sm:$0xff]   ;;  %v1222_v49 = vsel %vm22290_vm2, %v1219_v35, %v1221_v45 }
  0x57   : > { %15680 = vmatprep.mubr.msk.bf16.mxu1 %vm22288_vm0, %v22291_v1  ;;  %v655_v50 = vshrl.u32 %v17494_v46, 16  ;;  %v658_v51 = vshll.u32 %v17494_v46, 16  ;;  %v17515_v35 = vld [vmem:[#allocation2 + $0x1c] sm:$0xff]  }
  0x58   : > { %v606_v58 = vrot.slane %v604_v53, 3  ;;  %v599_v60 = vsel %vm22287_vm1, %v589_v43, %v598_v55  ;;  %v17508_v46 = vld [vmem:[%s22278_s1 + $0x138] sm:$0xff]  }
  0x59   : > { %v657_v54 = vrot.slane %v655_v50, 2 }
  0x5a   : > { %v607_v2 = vor.u32 %v606_v58, %v603_v57  ;;  %v17500_v58 = vld [vmem:[#allocation2 + $0x9c] sm:$0xff]  }
  0x5c   : > { %15581 = vmatmul.mubr.bf16.gmra.mxu0 %v554_v0  ;;  %v1212_v0 = vsel %vm22290_vm2, %v1209_v47, %v1211_v59  ;;  %v608_v7 = vsel %vm22287_vm1, %v598_v55, %v607_v2  ;;  %v660_v55 = vrot.slane %v658_v51, 3 }
  0x5d   : > { %15584 = vmatprep.mubr.msk.bf16.mxu0 %vm22288_vm0, %v22291_v1 }
  0x5e   : > { %15681 = vmatmul.mubr.bf16.gmra.mxu1 %v1202_v5  ;;  %v1213_v5 = vrot.slane %v17483_v63, 3  ;;  %v17507_v63 = vld [vmem:[#allocation2 + $0xc] sm:$0xff]  }
  0x5f   : > { %15684 = vmatprep.mubr.msk.bf16.mxu1 %vm22288_vm0, %v22291_v1  ;;  %v1798_v13 = vshll.u32 %v17507_v63, 16 }
  0x60   : > { %v1214_v9 = vsel %vm22290_vm2, %v1211_v59, %v1213_v5  ;;  %v1216_v18 = vsel %vm22290_vm2, %v1213_v5, %v1215_v15  ;;  %v1225_v5 = vrot.slane %v17500_v58, 3 }
  0x64   : > { %15585 = vmatmul.mubr.bf16.gmra.mxu0 %v563_v12  ;;  %v616_v12 = vor.u32 %v615_v4, %v612_v3  ;;  %v669_v4 = vrot.slane %v667_v61, 3 }
  0x65   : > { %15588 = vmatprep.mubr.msk.bf16.mxu0 %vm22288_vm0, %v22291_v1 }
  0x66   : > { %15685 = vmatmul.mubr.bf16.gmra.mxu1 %v1204_v17  ;;  %v617_v17 = vsel %vm22287_vm1, %v607_v2, %v616_v12  ;;  %v626_v27 = vsel %vm22287_vm1, %v616_v12, %v625_v22  ;;  %v17506_v2 = vld [vmem:[#allocation2 + $0x4] sm:$0xf8]  }
  0x67   : > { %15688 = vmatprep.mubr.msk.bf16.mxu1 %vm22288_vm0, %v22291_v1  ;;  %v1787_v8 = vshrl.u32 %v17506_v2, 16  ;;  %v1790_v12 = vshll.u32 %v17506_v2, 16 }
  0x69   : > { %v1792_v19 = vrot.slane %v1790_v12, 4 }
  0x6c   : > { %15589 = vmatmul.mubr.bf16.gmra.mxu0 %v572_v25  ;;  %v633_v25 = vrot.slane %v631_v20, 3  ;;  %v1800_v20 = vrot.slane %v1798_v13, 4  ;;  %v17522_v13 = vld [vmem:[#allocation2 + $0x34] sm:$0xff]  }
  0x6d   : > { %15592 = vmatprep.mubr.msk.bf16.mxu0 %vm22288_vm0, %v22291_v1 }
  0x6e   : > { %15689 = vmatmul.mubr.bf16.gmra.mxu1 %v1206_v29  ;;  %v1218_v29 = vsel %vm22290_vm2, %v1215_v15, %v1217_v26  ;;  %v634_v32 = vor.u32 %v633_v25, %v630_v24  ;;  %v1807_v24 = vshll.u32 %v17511_v10, 16  ;;  %v17514_v26 = vld [vmem:[#allocation2 + $0x1c] sm:$0xff]   ;;  %v17521_v10 = vld [vmem:[#allocation2 + $0x34] sm:$0xff]  }
  0x6f   : > { %15692 = vmatprep.mubr.msk.bf16.mxu1 %vm22288_vm0, %v22291_v1  ;;  %v1813_v31 = vshrl.u32 %v17514_v26, 16  ;;  %v1816_v34 = vshll.u32 %v17514_v26, 16  ;;  %v1843_v26 = vshll.u32 %v17521_v10, 16 }
  0x70   : > { %v635_v37 = vsel %vm22287_vm1, %v625_v22, %v634_v32  ;;  %v644_v47 = vsel %vm22287_vm1, %v634_v32, %v643_v42  ;;  %v1809_v32 = vrot.slane %v1807_v24, 4 }
  0x72   : > { %v1810_v61 = vor.u32 %v1809_v32, %v1806_v23  ;;  %v277_v23 = vld [vmem:[%s18047_s12 + $0x9c] sm:$0xf]  ;;  %v2578_v32 = vshll.u32 %v17522_v13, 16 }
  0x73   : > { %318 = vst [vmem:[#allocation2 + $0xac] sm:$0xf] %v277_v23 }
  0x74   : > { %15593 = vmatmul.mubr.bf16.gmra.mxu0 %v581_v36  ;;  %v17492_v36 = vld [vmem:[#allocation2 + $0x94] sm:$0xff]  }
  0x75   : > { %15596 = vmatprep.mubr.msk.bf16.mxu0 %vm22288_vm0, %v22291_v1  ;;  %v646_v40 = vshrl.u32 %v17492_v36, 16 }
  0x76   : > { %15693 = vmatmul.mubr.bf16.gmra.mxu1 %v1208_v41  ;;  %v649_v41 = vshll.u32 %v17492_v36, 16 }
  0x77   : > { %15696 = vmatprep.mubr.msk.bf16.mxu1 %vm22288_vm0, %v22291_v1  ;;  %v648_v43 = vrot.slane %v646_v40, 2  ;;  %v2548_v40 = vshrl.u32 %v17515_v35, 16 }
  0x78   : > { %v651_v44 = vrot.slane %v649_v41, 3  ;;  %v17517_v41 = vld [vmem:[#allocation2 + $0x24] sm:$0xff]  }
  0x79   : > { %v2550_v50 = vrot.slane %v2548_v40, 3 }
  0x7c   : > { %15597 = vmatmul.mubr.bf16.gmra.mxu0 %v590_v48  ;;  %v17495_v48 = vld [vmem:[#allocation2 + $0x94] sm:$0xff]  }
  0x7d   : > { %15600 = vmatprep.mubr.msk.bf16.mxu0 %vm22288_vm0, %v22291_v1  ;;  %v1223_v53 = vrot.slane %v17495_v48, 3 }
  0x7e   : > { %15697 = vmatmul.mubr.bf16.gmra.mxu1 %v1210_v52  ;;  %v652_v52 = vor.u32 %v651_v44, %v648_v43  ;;  %v2551_v44 = vshll.u32 %v17515_v35, 16 }
  0x7f   : > { %15700 = vmatprep.mubr.msk.bf16.mxu1 %vm22288_vm0, %v22291_v1  ;;  %v1224_v59 = vsel %vm22290_vm2, %v1221_v45, %v1223_v53  ;;  %v1226_v11 = vsel %vm22290_vm2, %v1223_v53, %v1225_v5  ;;  %v17518_v45 = vld [vmem:[#allocation2 + $0x24] sm:$0xff]   ;;  %v1822_v53 = vshrl.u32 %v17517_v41, 16 }
  0x80   : > { %v653_v57 = vsel %vm22287_vm1, %v643_v42, %v652_v52 }
  0x84   : > { %15601 = vmatmul.mubr.bf16.gmra.mxu0 %v599_v60  ;;  %v664_v60 = vshrl.u32 %v17499_v56, 16  ;;  %v17519_v56 = vld [vmem:[#allocation2 + $0x2c] sm:$0xff]  }
  0x85   : > { %15604 = vmatprep.mubr.msk.bf16.mxu0 %vm22288_vm0, %v22291_v1 }
  0x86   : > { %15701 = vmatmul.mubr.bf16.gmra.mxu1 %v1212_v0  ;;  %v661_v0 = vor.u32 %v660_v55, %v657_v54  ;;  %v666_v3 = vrot.slane %v664_v60, 2  ;;  %v1825_v54 = vshll.u32 %v17517_v41, 16  ;;  %v2557_v55 = vshrl.u32 %v17518_v45, 16  ;;  %v17520_v60 = vld [vmem:[#allocation2 + $0x2c] sm:$0xff]  }
  0x87   : > { %15704 = vmatprep.mubr.msk.bf16.mxu1 %vm22288_vm0, %v22291_v1 }
  0x88   : > { %v662_v6 = vsel %vm22287_vm1, %v652_v52, %v661_v0  ;;  %v670_v14 = vor.u32 %v669_v4, %v666_v3  ;;  %v2553_v52 = vrot.slane %v2551_v44, 4  ;;  %v2559_v2 = vrot.slane %v2557_v55, 3 }
  0x89   : > { %v1831_v4 = vshrl.u32 %v17519_v56, 16 }
  0x8a   : > { %v671_v22 = vsel %vm22287_vm1, %v661_v0, %v670_v14  ;;  %v2554_v0 = vor.u32 %v2553_v52, %v2550_v50 }
  0x8b   : > { %v18317_v12 = vrot.slane %v1831_v4, 3 }
  0x8c   : > { %15605 = vmatmul.mubr.bf16.gmra.mxu0 %v608_v7  ;;  %v1227_v7 = vrot.slane %v17503_v62, 3  ;;  %v1824_v62 = vrot.slane %v1822_v53, 3  ;;  %v17560_v53 = vld [vmem:[%s22278_s1 + $0x160] sm:$0xff]  }
  0x8d   : > { %15608 = vmatprep.mubr.msk.bf16.mxu0 %vm22288_vm0, %v22291_v1 }
  0x8e   : > { %15705 = vmatmul.mubr.bf16.gmra.mxu1 %v1214_v9  ;;  %v1795_v9 = vshrl.u32 %v17507_v63, 16  ;;  %v1827_v63 = vrot.slane %v1825_v54, 4 }
  0x8f   : > { %15708 = vmatprep.mubr.msk.bf16.mxu1 %vm22288_vm0, %v22291_v1 }
  0x90   : > { %v1797_v15 = vrot.slane %v1795_v9, 3  ;;  %v2569_v9 = vshll.u32 %v17520_v60, 16  ;;  %v1828_v35 = vor.u32 %v1827_v63, %v1824_v62  ;;  %v17562_v63 = vld [vmem:[%s22278_s1 + $0x158] sm:$0xff]  }
  0x92   : > { %v1801_v43 = vor.u32 %v1800_v20, %v1797_v15  ;;  %v1840_v20 = vshrl.u32 %v17521_v10, 16  ;;  %v17563_v10 = vld [vmem:[%s22278_s1 + $0x150] sm:$0xff]  }
  0x94   : > { %15609 = vmatmul.mubr.bf16.gmra.mxu0 %v617_v17  ;;  %v17512_v17 = vld [vmem:[#allocation2 + $0xc] sm:$0xf8]  }
  0x95   : > { %15612 = vmatprep.mubr.msk.bf16.mxu0 %vm22288_vm0, %v22291_v1  ;;  %v2531_v25 = vshrl.u32 %v17512_v17, 16  ;;  %v2534_v28 = vshll.u32 %v17512_v17, 16 }
  0x96   : > { %15709 = vmatmul.mubr.bf16.gmra.mxu1 %v1216_v18  ;;  %v1789_v18 = vrot.slane %v1787_v8, 3  ;;  %v2566_v8 = vshrl.u32 %v17520_v60, 16 }
  0x97   : > { %15712 = vmatprep.mubr.msk.bf16.mxu1 %vm22288_vm0, %v22291_v1  ;;  %v2533_v33 = vrot.slane %v2531_v25, 3  ;;  %v2536_v36 = vrot.slane %v2534_v28, 4  ;;  %v278_v25 = vld [vmem:[%s18047_s12 + $0xa0] sm:$0x3]  ;;  %s22151_s12 = scalar_lea.vmem %s22282_s5, %s17340_s30 }
  0x98   : > { %v1793_v42 = vor.u32 %v1792_v19, %v1789_v18  ;;  %v2568_v17 = vrot.slane %v2566_v8, 3  ;;  %v2571_v19 = vrot.slane %v2569_v9, 4  ;;  %v17524_v28 = vld [vmem:[#allocation2 + $0x3c] sm:$0xff]   ;;  %319 = vst [vmem:[#allocation2 + $0xb0] sm:$0x3] %v278_v25 }
  0x99   : > { %v1849_v41 = vshrl.u32 %v17524_v28, 16  ;;  %v1852_v44 = vshll.u32 %v17524_v28, 16 }
  0x9a   : > { %v1802_v51 = vsel %vm22286_vm3, %v1793_v42, %v1801_v43  ;;  %v17559_v42 = vld [vmem:[%s22278_s1 + $0x168] sm:$0xff]  }
  0x9b   : > { %v18363_v52 = vrot.slane %v1849_v41, 3  ;;  %v18371_v55 = vrot.slane %v1852_v44, 4 }
  0x9c   : > { %15613 = vmatmul.mubr.bf16.gmra.mxu0 %v626_v27  ;;  %v1228_v27 = vsel %vm22290_vm2, %v1225_v5, %v1227_v7  ;;  %v17523_v5 = vld [vmem:[%s22278_s1 + $0x128] sm:$0xff]  }
  0x9d   : > { %15616 = vmatprep.mubr.msk.bf16.mxu0 %vm22288_vm0, %v22291_v1 }
  0x9e   : > { %15713 = vmatmul.mubr.bf16.gmra.mxu1 %v1218_v29  ;;  %v2539_v29 = vshrl.u32 %v17513_v21, 16  ;;  %v17535_v21 = vld [vmem:[%s22278_s1 + $0x118] sm:$0xff]  }
  0x9f   : > { %15716 = vmatprep.mubr.msk.bf16.mxu1 %vm22288_vm0, %v22291_v1 }
  0xa4   : > { %15617 = vmatmul.mubr.bf16.gmra.mxu0 %v635_v37  ;;  %v2541_v37 = vrot.slane %v2539_v29, 3  ;;  %v17525_v29 = vld [vmem:[#allocation2 + $0x3c] sm:$0xff]  }
  0xa5   : > { %15620 = vmatprep.mubr.msk.bf16.mxu0 %vm22288_vm0, %v22291_v1 }
  0xa6   : > { %15717 = vmatmul.mubr.bf16.gmra.mxu1 %v1220_v39  ;;  %v1815_v39 = vrot.slane %v1813_v31, 3  ;;  %v2545_v48 = vor.u32 %v2544_v38, %v2541_v37  ;;  %v18339_v31 = vrot.slane %v1840_v20, 3  ;;  %v2587_v37 = vshll.u32 %v17525_v29, 16  ;;  %v17566_v20 = vld [vmem:[%s22278_s1 + $0x148] sm:$0xff]  }
  0xa7   : > { %15720 = vmatprep.mubr.msk.bf16.mxu1 %vm22288_vm0, %v22291_v1  ;;  %v2572_v38 = vor.u32 %v2571_v19, %v2568_v17 }
  0xac   : > { %15621 = vmatmul.mubr.bf16.gmra.mxu0 %v644_v47  ;;  %v2537_v47 = vor.u32 %v2536_v36, %v2533_v33  ;;  %v17542_v33 = vld [vmem:[%s22278_s1 + $0x110] sm:$0xff]   ;;  %v2584_v36 = vshrl.u32 %v17525_v29, 16 }
  0xad   : > { %15624 = vmatprep.mubr.msk.bf16.mxu0 %vm22288_vm0, %v22291_v1 }
  0xae   : > { %15721 = vmatmul.mubr.bf16.gmra.mxu1 %v1222_v49  ;;  %v1818_v49 = vrot.slane %v1816_v34, 4  ;;  %v2546_v58 = vsel %vm22286_vm3, %v2537_v47, %v2545_v48  ;;  %v17556_v34 = vld [vmem:[%s22278_s1 + $0x170] sm:$0xff]   ;;  %v2586_v47 = vrot.slane %v2584_v36, 3 }
  0xaf   : > { %15724 = vmatprep.mubr.msk.bf16.mxu1 %vm22288_vm0, %v22291_v1 }
  0xb0   : > { %v1819_v15 = vor.u32 %v1818_v49, %v1815_v39  ;;  %v1845_v39 = vrot.slane %v1843_v26, 4  ;;  %v17527_v49 = vld [vmem:[#allocation2 + $0x44] sm:$0xff]  }
  0xb1   : > { %v2593_v62 = vshrl.u32 %v17527_v49, 16  ;;  %v2596_v9 = vshll.u32 %v17527_v49, 16 }
  0xb2   : > { %v1820_v24 = vsel %vm22286_vm3, %v1810_v61, %v1819_v15 }
  0xb3   : > { %v2598_v19 = vrot.slane %v2596_v9, 4  ;;  %v17534_v9 = vld [vmem:[#allocation2 + $0x5c] sm:$0xff]  }
  0xb4   : > { %15625 = vmatmul.mubr.bf16.gmra.mxu0 %v653_v57  ;;  %v17516_v57 = vld [vmem:[%s22278_s1 + $0x130] sm:$0xff]  }
  0xb5   : > { %15628 = vmatprep.mubr.msk.bf16.mxu0 %vm22288_vm0, %v22291_v1 }
  0xb6   : > { %15725 = vmatmul.mubr.bf16.gmra.mxu1 %v1224_v59  ;;  %v2560_v59 = vshll.u32 %v17518_v45, 16  ;;  %v17547_v45 = vld [vmem:[%s22278_s1 + $0x108] sm:$0xff]  }
  0xb7   : > { %15728 = vmatprep.mubr.msk.bf16.mxu1 %vm22288_vm0, %v22291_v1 }
  0xb8   : > { %v2562_v3 = vrot.slane %v2560_v59, 4 }
  0xba   : > { %v2563_v18 = vor.u32 %v2562_v3, %v2559_v2 }
  0xbc   : > { %15629 = vmatmul.mubr.bf16.gmra.mxu0 %v662_v6  ;;  %v1811_v6 = vsel %vm22286_vm3, %v1801_v43, %v1810_v61  ;;  %v2564_v30 = vsel %vm22286_vm3, %v2554_v0, %v2563_v18  ;;  %v1829_v43 = vsel %vm22286_vm3, %v1819_v15, %v1828_v35 }
  0xbd   : > { %15632 = vmatprep.mubr.msk.bf16.mxu0 %vm22288_vm0, %v22291_v1 }
  0xbe   : > { %15729 = vmatmul.mubr.bf16.gmra.mxu1 %v1226_v11  ;;  %v2555_v11 = vsel %vm22286_vm3, %v2545_v48, %v2554_v0  ;;  %v2589_v48 = vrot.slane %v2587_v37, 4 }
  0xbf   : > { %15732 = vmatprep.mubr.msk.bf16.mxu1 %vm22288_vm0, %v22291_v1 }
  0xc0   : > { %v2590_v17 = vor.u32 %v2589_v48, %v2586_v47  ;;  %v17532_v48 = vld [vmem:[#allocation2 + $0x54] sm:$0xff]  }
  0xc4   : > { %15633 = vmatmul.mubr.bf16.gmra.mxu0 %v671_v22  ;;  %v17554_v22 = vld [vmem:[%s22278_s1 + $0x178] sm:$0xff]  }
  0xc5   : > { %15636 = vmatprep.mubr.msk.bf16.mxu0 %vm22288_vm0, %v22291_v1 }
  0xc6   : > { %15733 = vmatmul.mubr.bf16.gmra.mxu1 %v1228_v27  ;;  %v2575_v27 = vshrl.u32 %v17522_v13, 16 }
  0xc7   : > { %15736 = vmatprep.mubr.msk.bf16.mxu1 %vm22288_vm0, %v22291_v1 }
  0xc8   : > { %v2577_v40 = vrot.slane %v2575_v27, 3  ;;  %v17528_v27 = vld [vmem:[#allocation2 + $0x4c] sm:$0xff]  }
  0xc9   : > { %v1867_v41 = vshrl.u32 %v17528_v27, 16  ;;  %v1870_v47 = vshll.u32 %v17528_v27, 16 }
  0xcc   : > { %15637 = vmatmul.mubr.bf16.gmra.mxu0 %v670_v14  ;;  %v17529_v14 = vld [vmem:[%s22278_s1 + $0x120] sm:$0xff]  }
  0xcd   : > { %15756 = vmatprep.mubr.msk.bf16.mxu0 %vm22288_vm0, %v22291_v1 }
  0xce   : > { %15737 = vmatmul.mubr.bf16.gmra.mxu1 %v1227_v7  ;;  %v1834_v7 = vshll.u32 %v17519_v56, 16  ;;  %v17555_v56 = vld [vmem:[%s22278_s1 + $0x100] sm:$0xff]  }
  0xcf   : > { %15856 = vmatprep.mubr.msk.bf16.mxu1 %vm22288_vm0, %v22291_v1 }
  0xd0   : > { %v1836_v16 = vrot.slane %v1834_v7, 4 }
  0xd2   : > { %v1837_v54 = vor.u32 %v1836_v16, %v18317_v12  ;;  %v1846_v12 = vor.u32 %v1845_v39, %v18339_v31 }
  0xd4   : > { %15757 = vmatmul.mubr.bf16.vlgmr.msra.gmra.mxu0 %v1802_v51  ;;  %v2573_v51 = vsel %vm22286_vm3, %v2563_v18, %v2572_v38  ;;  %v1838_v0 = vsel %vm22286_vm3, %v1828_v35, %v1837_v54  ;;  %v2595_v18 = vrot.slane %v2593_v62, 3 }
  0xd5   : > { %15941 = vmatpush3.bf16.msra.mxu0 %v17508_v46  ;;  %15760 = vmatprep.mubr.msk.bf16.mxu0 %vm22288_vm0, %v22291_v1  ;;  %v2580_v46 = vrot.slane %v2578_v32, 4  ;;  %v17567_v32 = vld [vmem:[%s22278_s1 + $0x140] sm:$0xff]  }
  0xd6   : > { %15942 = vmatprep.subr.bf16.mxu0 %v22291_v1  ;;  %15857 = vmatmul.mubr.bf16.vlgmr.msra.gmra.mxu1 %v2546_v58 }
  0xd7   : > { %15860 = vmatprep.mubr.msk.bf16.mxu1 %vm22288_vm0, %v22291_v1  ;;  %16041 = vmatpush3.bf16.msra.mxu1 %v17554_v22  ;;  %v2581_v61 = vor.u32 %v2580_v46, %v2577_v40  ;;  %v2599_v40 = vor.u32 %v2598_v19, %v2595_v18 }
  0xd8   : > { %16042 = vmatprep.subr.bf16.mxu1 %v22291_v1 }
  0xd9   : > { %15943 = vmatpush3.bf16.msra.mxu0 %v17516_v57  ;;  %v2582_v8 = vsel %vm22286_vm3, %v2572_v38, %v2581_v61  ;;  %v2591_v31 = vsel %vm22286_vm3, %v2581_v61, %v2590_v17  ;;  %v2611_v61 = vshrl.u32 %v17532_v48, 16 }
  0xda   : > { %15944 = vmatprep.subr.bf16.mxu0 %v22291_v1 }
  0xdb   : > { %16043 = vmatpush3.bf16.msra.mxu1 %v17556_v34  ;;  %v1855_v34 = vor.u32 %v18371_v55, %v18363_v52  ;;  %v2600_v52 = vsel %vm22286_vm3, %v2590_v17, %v2599_v40  ;;  %v1869_v55 = vrot.slane %v1867_v41, 3 }
  0xdc   : > { %15761 = vmatmul.mubr.bf16.gmra.mxu0 %v1811_v6  ;;  %16044 = vmatprep.subr.bf16.mxu1 %v22291_v1 }
  0xdd   : > { %15764 = vmatprep.mubr.msk.bf16.mxu0 %vm22288_vm0, %v22291_v1  ;;  %15945 = vmatpush3.bf16.msra.mxu0 %v17523_v5  ;;  %v17526_v5 = vld [vmem:[#allocation2 + $0x44] sm:$0xff]  }
  0xde   : > { %15946 = vmatprep.subr.bf16.mxu0 %v22291_v1  ;;  %15861 = vmatmul.mubr.bf16.gmra.mxu1 %v2555_v11  ;;  %v1858_v23 = vshrl.u32 %v17526_v5, 16  ;;  %v1861_v26 = vshll.u32 %v17526_v5, 16 }
  0xdf   : > { %15864 = vmatprep.mubr.msk.bf16.mxu1 %vm22288_vm0, %v22291_v1  ;;  %16045 = vmatpush3.bf16.msra.mxu1 %v17559_v42 }
  0xe0   : > { %16046 = vmatprep.subr.bf16.mxu1 %v22291_v1  ;;  %v1860_v35 = vrot.slane %v1858_v23, 3  ;;  %v1863_v37 = vrot.slane %v1861_v26, 4 }
  0xe1   : > { %15947 = vmatpush3.bf16.msra.mxu0 %v17529_v14 }
  0xe2   : > { %15948 = vmatprep.subr.bf16.mxu0 %v22291_v1 }
  0xe3   : > { %16047 = vmatpush3.bf16.msra.mxu1 %v17560_v53 }
  0xe4   : > { %15765 = vmatmul.mubr.bf16.gmra.mxu0 %v1820_v24  ;;  %16048 = vmatprep.subr.bf16.mxu1 %v22291_v1  ;;  %v17530_v24 = vld [vmem:[#allocation2 + $0x4c] sm:$0xff]  }
  0xe5   : > { %15768 = vmatprep.mubr.msk.bf16.mxu0 %vm22288_vm0, %v22291_v1  ;;  %15949 = vmatpush3.bf16.msra.mxu0 %v17535_v21  ;;  %v1847_v21 = vsel %vm22286_vm3, %v1837_v54, %v1846_v12  ;;  %v2602_v38 = vshrl.u32 %v17530_v24, 16  ;;  %v2605_v42 = vshll.u32 %v17530_v24, 16 }
  0xe6   : > { %15950 = vmatprep.subr.bf16.mxu0 %v22291_v1  ;;  %15865 = vmatmul.mubr.bf16.gmra.mxu1 %v2564_v30 }
  0xe7   : > { %15868 = vmatprep.mubr.msk.bf16.mxu1 %vm22288_vm0, %v22291_v1  ;;  %16049 = vmatpush3.bf16.msra.mxu1 %v17562_v63 }
  0xe8   : > { %16050 = vmatprep.subr.bf16.mxu1 %v22291_v1 }
  0xe9   : > { %15951 = vmatpush3.bf16.msra.mxu0 %v17542_v33 }
  0xea   : > { %15952 = vmatprep.subr.bf16.mxu0 %v22291_v1 }
  0xeb   : > { %16051 = vmatpush3.bf16.msra.mxu1 %v17563_v10 }
  0xec   : > { %v775_v50 = vpop.f32.mrf.mxu0  ;;  %15769 = vmatmul.mubr.bf16.gmra.mxu0 %v1829_v43  ;;  %16052 = vmatprep.subr.bf16.mxu1 %v22291_v1 }
  0xed   : > { %15772 = vmatprep.mubr.msk.bf16.mxu0 %vm22288_vm0, %v22291_v1  ;;  %15953 = vmatpush3.bf16.msra.mxu0 %v17547_v45  ;;  %v1856_v45 = vsel %vm22286_vm3, %v1846_v12, %v1855_v34 }
  0xee   : > { %v15558_v57 = vpop.f32.mrf.mxu0  ;;  %15954 = vmatprep.subr.bf16.mxu0 %v22291_v1  ;;  %v1332_v58 = vpop.f32.mrf.mxu1  ;;  %15869 = vmatmul.mubr.bf16.gmra.mxu1 %v2573_v51 }
  0xef   : > { %v1498_v60 = vadd.f32 %v1332_v58, %v775_v50  ;;  %15872 = vmatprep.mubr.msk.bf16.mxu1 %vm22288_vm0, %v22291_v1  ;;  %16053 = vmatpush3.bf16.msra.mxu1 %v17566_v20  ;;  %v17531_v50 = vld [vmem:[#allocation2 + $0x54] sm:$0xff]   ;;  %v2607_v57 = vrot.slane %v2605_v42, 4 }
  0xf0   : > { %v778_v59 = vpop.f32.mrf.mxu0  ;;  %v15658_v2 = vpop.f32.mrf.mxu1  ;;  %16054 = vmatprep.subr.bf16.mxu1 %v22291_v1  ;;  %v1876_v63 = vshrl.u32 %v17531_v50, 16 }
  0xf1   : > { %15955 = vmatpush3.bf16.msra.mxu0 %v17555_v56  ;;  %1539 = vst [vmem:[#allocation4 + $0xb0] sm:$0xff] %v1498_v60  ;;  %v2604_v56 = vrot.slane %v2602_v38, 3  ;;  %v1872_v60 = vrot.slane %v1870_v47, 4 }
  0xf2   : > { %v15559_v3 = vpop.f32.mrf.mxu0  ;;  %16140 = vmatprep.subr.bf16.mxu0 %v22291_v1  ;;  %v1335_v4 = vpop.f32.mrf.mxu1  ;;  %v1878_v20 = vrot.slane %v1876_v63, 3 }
  0xf3   : > { %v1499_v7 = vadd.f32 %v1335_v4, %v778_v59  ;;  %16055 = vmatpush3.bf16.msra.mxu1 %v17567_v32  ;;  %v1864_v59 = vor.u32 %v1863_v37, %v1860_v35  ;;  %v2608_v5 = vor.u32 %v2607_v57, %v2604_v56  ;;  %v1873_v19 = vor.u32 %v1872_v60, %v1869_v55  ;;  %v17536_v35 = vld [vmem:[#allocation2 + $0x64] sm:$0xff]   ;;  %v17539_v57 = vld [vmem:[#allocation2 + $0x6c] sm:$0xff]  }
  0xf4   : > { %v783_v6 = vpop.f32.mrf.mxu0  ;;  %15773 = vmatmul.mubr.bf16.gmra.mxu0 %v1838_v0  ;;  %v15659_v11 = vpop.f32.mrf.mxu1  ;;  %16240 = vmatprep.subr.bf16.mxu1 %v22291_v1  ;;  %v2614_v0 = vshll.u32 %v17532_v48, 16  ;;  %v1894_v48 = vshrl.u32 %v17536_v35, 16  ;;  %v1897_v56 = vshll.u32 %v17536_v35, 16 }
  0xf5   : > { %15776 = vmatprep.mubr.msk.bf16.mxu0 %vm22288_vm0, %v22291_v1  ;;  %1540 = vst [vmem:[#allocation4 + $0xd0] sm:$0xff] %v1499_v7  ;;  %v17533_v11 = vld [vmem:[#allocation2 + $0x5c] sm:$0xff]  }
  0xf6   : > { %v15562_v13 = vpop.f32.mrf.mxu0  ;;  %v1340_v14 = vpop.f32.mrf.mxu1  ;;  %15873 = vmatmul.mubr.bf16.gmra.mxu1 %v2582_v8  ;;  %v1879_v8 = vshll.u32 %v17531_v50, 16  ;;  %v2616_v17 = vrot.slane %v2614_v0, 4  ;;  %v1885_v24 = vshrl.u32 %v17533_v11, 16  ;;  %v1888_v32 = vshll.u32 %v17533_v11, 16 }
  0xf7   : > { %v1500_v16 = vadd.f32 %v1340_v14, %v783_v6  ;;  %15876 = vmatprep.mubr.msk.bf16.mxu1 %vm22288_vm0, %v22291_v1  ;;  %v1865_v6 = vsel %vm22286_vm3, %v1855_v34, %v1864_v59 }
  0xf8   : > { %v786_v15 = vpop.f32.mrf.mxu0  ;;  %v15662_v22 = vpop.f32.mrf.mxu1 }
  0xf9   : > { %1541 = vst [vmem:[#allocation4 + $0x10] sm:$0xff] %v1500_v16  ;;  %v2613_v16 = vrot.slane %v2611_v61, 3  ;;  %v2620_v22 = vshrl.u32 %v17534_v9, 16 }
  0xfa   : > { %v15563_v25 = vpop.f32.mrf.mxu0  ;;  %v1343_v28 = vpop.f32.mrf.mxu1 }
  0xfb   : > { %v1501_v30 = vadd.f32 %v1343_v28, %v786_v15  ;;  %v2609_v15 = vsel %vm22286_vm3, %v2599_v40, %v2608_v5  ;;  %v2623_v25 = vshll.u32 %v17534_v9, 16  ;;  %v2622_v40 = vrot.slane %v2620_v22, 3 }
  0xfc   : > { %v791_v29 = vpop.f32.mrf.mxu0  ;;  %15777 = vmatmul.mubr.bf16.gmra.mxu0 %v1847_v21  ;;  %v15663_v33 = vpop.f32.mrf.mxu1  ;;  %v1881_v21 = vrot.slane %v1879_v8, 4 }
  0xfd   : > { %15780 = vmatprep.mubr.msk.bf16.mxu0 %vm22288_vm0, %v22291_v1  ;;  %1542 = vst [vmem:[#allocation4 + $0x48] sm:$0xff] %v1501_v30  ;;  %v1874_v30 = vsel %vm22286_vm3, %v1864_v59, %v1873_v19  ;;  %v17537_v33 = vld [vmem:[#allocation2 + $0x64] sm:$0xff]   ;;  %v2625_v41 = vrot.slane %v2623_v25, 4  ;;  %v17538_v59 = vld [vmem:[#allocation2 + $0x6c] sm:$0xff]  }
  0xfe   : > { %v15566_v36 = vpop.f32.mrf.mxu0  ;;  %v1348_v39 = vpop.f32.mrf.mxu1  ;;  %15877 = vmatmul.mubr.bf16.gmra.mxu1 %v2591_v31  ;;  %v1903_v9 = vshrl.u32 %v17538_v59, 16 }
  0xff   : > { %v1502_v44 = vadd.f32 %v1348_v39, %v791_v29  ;;  %15880 = vmatprep.mubr.msk.bf16.mxu1 %vm22288_vm0, %v22291_v1  ;;  %v2617_v29 = vor.u32 %v2616_v17, %v2613_v16  ;;  %v1906_v17 = vshll.u32 %v17538_v59, 16 }
 0x100   : > { %v794_v43 = vpop.f32.mrf.mxu0  ;;  %v15666_v46 = vpop.f32.mrf.mxu1 }
 0x101   : > { %1543 = vst [vmem:[#allocation4 + $0x120] sm:$0xff] %v1502_v44  ;;  %v2618_v39 = vsel %vm22286_vm3, %v2608_v5, %v2617_v29  ;;  %v1887_v44 = vrot.slane %v1885_v24, 3  ;;  %v2629_v46 = vshrl.u32 %v17537_v33, 16  ;;  %v1896_v5 = vrot.slane %v1894_v48, 3 }
 0x102   : > { %v15567_v49 = vpop.f32.mrf.mxu0  ;;  %v1351_v51 = vpop.f32.mrf.mxu1 }
 0x103   : > { %v1503_v54 = vadd.f32 %v1351_v51, %v794_v43  ;;  %v1882_v43 = vor.u32 %v1881_v21, %v1878_v20  ;;  %v2632_v49 = vshll.u32 %v17537_v33, 16  ;;  %v2631_v0 = vrot.slane %v2629_v46, 3  ;;  %v17540_v20 = vld [vmem:[#allocation2 + $0x74] sm:$0xff]  }
 0x104   : > { %v799_v53 = vpop.f32.mrf.mxu0  ;;  %15781 = vmatmul.mubr.bf16.gmra.mxu0 %v1856_v45  ;;  %v15667_v58 = vpop.f32.mrf.mxu1  ;;  %v1890_v45 = vrot.slane %v1888_v32, 4  ;;  %v1912_v33 = vshrl.u32 %v17540_v20, 16 }
 0x105   : > { %15784 = vmatprep.mubr.msk.bf16.mxu0 %vm22288_vm0, %v22291_v1  ;;  %1544 = vst [vmem:[#allocation4 + $0x38] sm:$0xff] %v1503_v54  ;;  %v1883_v54 = vsel %vm22286_vm3, %v1873_v19, %v1882_v43 }
 0x106   : > { %v15570_v62 = vpop.f32.mrf.mxu0  ;;  %v1356_v2 = vpop.f32.mrf.mxu1  ;;  %15881 = vmatmul.mubr.bf16.gmra.mxu1 %v2600_v52 }
 0x107   : > { %v1504_v4 = vadd.f32 %v1356_v2, %v799_v53  ;;  %15884 = vmatprep.mubr.msk.bf16.mxu1 %vm22288_vm0, %v22291_v1  ;;  %v2626_v53 = vor.u32 %v2625_v41, %v2622_v40  ;;  %v2634_v2 = vrot.slane %v2632_v49, 4  ;;  %v1915_v41 = vshll.u32 %v17540_v20, 16 }
 0x108   : > { %v802_v3 = vpop.f32.mrf.mxu0  ;;  %v15670_v7 = vpop.f32.mrf.mxu1 }
 0x109   : > { %1545 = vst [vmem:[#allocation4 + $0xf8] sm:$0xff] %v1504_v4  ;;  %v2627_v63 = vsel %vm22286_vm3, %v2617_v29, %v2626_v53  ;;  %v1891_v4 = vor.u32 %v1890_v45, %v1887_v44  ;;  %v2638_v7 = vshrl.u32 %v17539_v57, 16  ;;  %v1905_v29 = vrot.slane %v1903_v9, 3  ;;  %v17543_v44 = vld [vmem:[#allocation2 + $0x7c] sm:$0xff]  }
 0x10a   : > { %v15571_v10 = vpop.f32.mrf.mxu0  ;;  %v1359_v12 = vpop.f32.mrf.mxu1 }
 0x10b   : > { %v1505_v14 = vadd.f32 %v1359_v12, %v802_v3  ;;  %v2641_v10 = vshll.u32 %v17539_v57, 16  ;;  %v2640_v25 = vrot.slane %v2638_v7, 3  ;;  %v1921_v57 = vshrl.u32 %v17543_v44, 16 }
 0x10c   : > { %v807_v13 = vpop.f32.mrf.mxu0  ;;  %15785 = vmatmul.mubr.bf16.gmra.mxu0 %v1865_v6  ;;  %v15671_v18 = vpop.f32.mrf.mxu1  ;;  %v1899_v6 = vrot.slane %v1897_v56, 4 }
 0x10d   : > { %15788 = vmatprep.mubr.msk.bf16.mxu0 %vm22288_vm0, %v22291_v1  ;;  %1546 = vst [vmem:[#allocation4 + $0x100] sm:$0xff] %v1505_v14  ;;  %v2635_v14 = vor.u32 %v2634_v2, %v2631_v0  ;;  %v17541_v18 = vld [vmem:[#allocation2 + $0x74] sm:$0xff]   ;;  %v1924_v2 = vshll.u32 %v17543_v44, 16 }
 0x10e   : > { %v15574_v23 = vpop.f32.mrf.mxu0  ;;  %v1364_v26 = vpop.f32.mrf.mxu1  ;;  %15885 = vmatmul.mubr.bf16.gmra.mxu1 %v2609_v15  ;;  %v1892_v15 = vsel %vm22286_vm3, %v1882_v43, %v1891_v4 }
 0x10f   : > { %v1506_v28 = vadd.f32 %v1364_v26, %v807_v13  ;;  %15888 = vmatprep.mubr.msk.bf16.mxu1 %vm22288_vm0, %v22291_v1  ;;  %v2636_v24 = vsel %vm22286_vm3, %v2626_v53, %v2635_v14  ;;  %v2643_v26 = vrot.slane %v2641_v10, 4  ;;  %v1914_v53 = vrot.slane %v1912_v33, 3 }
 0x110   : > { %v810_v27 = vpop.f32.mrf.mxu0  ;;  %v15674_v31 = vpop.f32.mrf.mxu1 }
 0x111   : > { %1547 = vst [vmem:[#allocation4 + $0x80] sm:$0xff] %v1506_v28  ;;  %v1900_v28 = vor.u32 %v1899_v6, %v1896_v5  ;;  %v2647_v31 = vshrl.u32 %v17541_v18, 16 }
 0x112   : > { %v15575_v34 = vpop.f32.mrf.mxu0  ;;  %v1367_v36 = vpop.f32.mrf.mxu1 }
 0x113   : > { %v1507_v38 = vadd.f32 %v1367_v36, %v810_v27  ;;  %v2650_v34 = vshll.u32 %v17541_v18, 16  ;;  %v2649_v49 = vrot.slane %v2647_v31, 3 }
 0x114   : > { %v815_v37 = vpop.f32.mrf.mxu0  ;;  %15789 = vmatmul.mubr.bf16.gmra.mxu0 %v1874_v30  ;;  %v15675_v42 = vpop.f32.mrf.mxu1  ;;  %v1908_v30 = vrot.slane %v1906_v17, 4 }
 0x115   : > { %15792 = vmatprep.mubr.msk.bf16.mxu0 %vm22288_vm0, %v22291_v1  ;;  %1548 = vst [vmem:[#allocation4 + $0x108] sm:$0xff] %v1507_v38  ;;  %v2644_v38 = vor.u32 %v2643_v26, %v2640_v25  ;;  %v17544_v42 = vld [vmem:[#allocation2 + $0x7c] sm:$0xff]  }
 0x116   : > { %v15578_v47 = vpop.f32.mrf.mxu0  ;;  %v1372_v50 = vpop.f32.mrf.mxu1  ;;  %15889 = vmatmul.mubr.bf16.gmra.mxu1 %v2618_v39  ;;  %v1901_v39 = vsel %vm22286_vm3, %v1891_v4, %v1900_v28 }
 0x117   : > { %v1508_v52 = vadd.f32 %v1372_v50, %v815_v37  ;;  %15892 = vmatprep.mubr.msk.bf16.mxu1 %vm22288_vm0, %v22291_v1  ;;  %v2645_v48 = vsel %vm22286_vm3, %v2635_v14, %v2644_v38  ;;  %v2652_v50 = vrot.slane %v2650_v34, 4  ;;  %v1926_v14 = vrot.slane %v1924_v2, 4 }
 0x118   : > { %v818_v51 = vpop.f32.mrf.mxu0  ;;  %v15678_v55 = vpop.f32.mrf.mxu1 }
 0x119   : > { %1549 = vst [vmem:[#allocation4 + $0x138] sm:$0xff] %v1508_v52  ;;  %v1909_v52 = vor.u32 %v1908_v30, %v1905_v29  ;;  %v2656_v55 = vshrl.u32 %v17544_v42, 16 }
 0x11a   : > { %v15579_v58 = vpop.f32.mrf.mxu0  ;;  %v1375_v60 = vpop.f32.mrf.mxu1 }
 0x11b   : > { %v1509_v62 = vadd.f32 %v1375_v60, %v818_v51  ;;  %v2659_v58 = vshll.u32 %v17544_v42, 16  ;;  %v2658_v9 = vrot.slane %v2656_v55, 3 }
 0x11c   : > { %v823_v61 = vpop.f32.mrf.mxu0  ;;  %15793 = vmatmul.mubr.bf16.gmra.mxu0 %v1883_v54  ;;  %v15679_v3 = vpop.f32.mrf.mxu1  ;;  %v1917_v54 = vrot.slane %v1915_v41, 4 }
 0x11d   : > { %15796 = vmatprep.mubr.msk.bf16.mxu0 %vm22288_vm0, %v22291_v1  ;;  %1550 = vst [vmem:[#allocation4 + $0xf0] sm:$0xff] %v1509_v62  ;;  %v2653_v62 = vor.u32 %v2652_v50, %v2649_v49  ;;  %v17546_v3 = vld [vmem:[#allocation2 + $0x84] sm:$0xff]   ;;  %v2661_v10 = vrot.slane %v2659_v58, 4 }
 0x11e   : > { %v15582_v8 = vpop.f32.mrf.mxu0  ;;  %v1380_v11 = vpop.f32.mrf.mxu1  ;;  %15893 = vmatmul.mubr.bf16.gmra.mxu1 %v2627_v63  ;;  %v1910_v63 = vsel %vm22286_vm3, %v1900_v28, %v1909_v52  ;;  %v2668_v18 = vshll.u32 %v17546_v3, 16 }
 0x11f   : > { %v1510_v13 = vadd.f32 %v1380_v11, %v823_v61  ;;  %15896 = vmatprep.mubr.msk.bf16.mxu1 %vm22288_vm0, %v22291_v1  ;;  %v2654_v8 = vsel %vm22286_vm3, %v2644_v38, %v2653_v62 }
 0x120   : > { %v826_v12 = vpop.f32.mrf.mxu0  ;;  %v15682_v16 = vpop.f32.mrf.mxu1 }
 0x121   : > { %1551 = vst [vmem:[#allocation4 + $0x18] sm:$0xff] %v1510_v13  ;;  %v1923_v13 = vrot.slane %v1921_v57, 3  ;;  %v2665_v16 = vshrl.u32 %v17546_v3, 16 }
 0x122   : > { %v15583_v19 = vpop.f32.mrf.mxu0  ;;  %v1383_v21 = vpop.f32.mrf.mxu1 }
 0x123   : > { %v1511_v23 = vadd.f32 %v1383_v21, %v826_v12  ;;  %v1918_v12 = vor.u32 %v1917_v54, %v1914_v53  ;;  %v17549_v19 = vld [vmem:[#allocation2 + $0x8c] sm:$0xff]   ;;  %v2667_v34 = vrot.slane %v2665_v16, 3  ;;  %v17551_v54 = vld [vmem:[#allocation2 + $0x94] sm:$0xff]  }
 0x124   : > { %v831_v22 = vpop.f32.mrf.mxu0  ;;  %15797 = vmatmul.mubr.bf16.gmra.mxu0 %v1892_v15  ;;  %v15683_v27 = vpop.f32.mrf.mxu1  ;;  %v17545_v15 = vld [vmem:[#allocation2 + $0x84] sm:$0xff]   ;;  %v2674_v29 = vshrl.u32 %v17549_v19, 16  ;;  %v2686_v2 = vshll.u32 %v17551_v54, 16 }
 0x125   : > { %15800 = vmatprep.mubr.msk.bf16.mxu0 %vm22288_vm0, %v22291_v1  ;;  %1552 = vst [vmem:[#allocation4 + $0xc8] sm:$0xff] %v1511_v23  ;;  %v2662_v23 = vor.u32 %v2661_v10, %v2658_v9  ;;  %v1930_v26 = vshrl.u32 %v17545_v15, 16  ;;  %v1933_v27 = vshll.u32 %v17545_v15, 16  ;;  %v17550_v9 = vld [vmem:[#allocation2 + $0x94] sm:$0xff]  }
 0x126   : > { %v15586_v32 = vpop.f32.mrf.mxu0  ;;  %v1388_v35 = vpop.f32.mrf.mxu1  ;;  %15897 = vmatmul.mubr.bf16.gmra.mxu1 %v2636_v24  ;;  %v1919_v24 = vsel %vm22286_vm3, %v1909_v52, %v1918_v12  ;;  %v2676_v42 = vrot.slane %v2674_v29, 3 }
 0x127   : > { %v1512_v37 = vadd.f32 %v1388_v35, %v831_v22  ;;  %15900 = vmatprep.mubr.msk.bf16.mxu1 %vm22288_vm0, %v22291_v1  ;;  %v2663_v33 = vsel %vm22286_vm3, %v2653_v62, %v2662_v23  ;;  %v2670_v35 = vrot.slane %v2668_v18, 4  ;;  %v1932_v38 = vrot.slane %v1930_v26, 3 }
 0x128   : > { %v834_v36 = vpop.f32.mrf.mxu0  ;;  %v15686_v40 = vpop.f32.mrf.mxu1  ;;  %v2688_v18 = vrot.slane %v2686_v2, 4  ;;  %v17561_v2 = vld [vmem:[#allocation2 + $0xac] sm:$0x3f]  }
 0x129   : > { %1553 = vst [vmem:[#allocation4 + $0x70] sm:$0xff] %v1512_v37  ;;  %v1927_v37 = vor.u32 %v1926_v14, %v1923_v13  ;;  %v17548_v40 = vld [vmem:[#allocation2 + $0x8c] sm:$0xff]  }
 0x12a   : > { %v15587_v43 = vpop.f32.mrf.mxu0  ;;  %v1391_v45 = vpop.f32.mrf.mxu1  ;;  %v1939_v50 = vshrl.u32 %v17548_v40, 16 }
 0x12b   : > { %v1513_v47 = vadd.f32 %v1391_v45, %v834_v36  ;;  %v2677_v43 = vshll.u32 %v17549_v19, 16 }
 0x12c   : > { %v839_v46 = vpop.f32.mrf.mxu0  ;;  %15801 = vmatmul.mubr.bf16.gmra.mxu0 %v1901_v39  ;;  %v15687_v51 = vpop.f32.mrf.mxu1  ;;  %v1935_v39 = vrot.slane %v1933_v27, 4 }
 0x12d   : > { %15804 = vmatprep.mubr.msk.bf16.mxu0 %vm22288_vm0, %v22291_v1  ;;  %1554 = vst [vmem:[#allocation4 + $0x20] sm:$0xff] %v1513_v47  ;;  %v2671_v47 = vor.u32 %v2670_v35, %v2667_v34  ;;  %v1942_v51 = vshll.u32 %v17548_v40, 16  ;;  %v2679_v53 = vrot.slane %v2677_v43, 4 }
 0x12e   : > { %v15590_v56 = vpop.f32.mrf.mxu0  ;;  %v1396_v59 = vpop.f32.mrf.mxu1  ;;  %15901 = vmatmul.mubr.bf16.gmra.mxu1 %v2645_v48  ;;  %v1928_v48 = vsel %vm22286_vm3, %v1918_v12, %v1927_v37 }
 0x12f   : > { %v1514_v61 = vadd.f32 %v1396_v59, %v839_v46  ;;  %15904 = vmatprep.mubr.msk.bf16.mxu1 %vm22288_vm0, %v22291_v1  ;;  %v2672_v58 = vsel %vm22286_vm3, %v2662_v23, %v2671_v47  ;;  %v1944_v62 = vrot.slane %v1942_v51, 4 }
 0x130   : > { %v842_v60 = vpop.f32.mrf.mxu0  ;;  %v15690_v0 = vpop.f32.mrf.mxu1 }
 0x131   : > { %1555 = vst [vmem:[#allocation4 + $0x128] sm:$0xff] %v1514_v61  ;;  %v1941_v61 = vrot.slane %v1939_v50, 3  ;;  %v2683_v0 = vshrl.u32 %v17551_v54, 16 }
 0x132   : > { %v15591_v4 = vpop.f32.mrf.mxu0  ;;  %v1399_v5 = vpop.f32.mrf.mxu1 }
 0x133   : > { %v1515_v7 = vadd.f32 %v1399_v5, %v842_v60  ;;  %v1936_v60 = vor.u32 %v1935_v39, %v1932_v38  ;;  %v2680_v4 = vor.u32 %v2679_v53, %v2676_v42  ;;  %v1945_v16 = vor.u32 %v1944_v62, %v1941_v61 }
 0x134   : > { %v847_v6 = vpop.f32.mrf.mxu0  ;;  %15805 = vmatmul.mubr.bf16.gmra.mxu0 %v1910_v63  ;;  %v15691_v11 = vpop.f32.mrf.mxu1 }
 0x135   : > { %15808 = vmatprep.mubr.msk.bf16.mxu0 %vm22288_vm0, %v22291_v1  ;;  %1556 = vst [vmem:[#allocation4 + $0x110] sm:$0xff] %v1515_v7  ;;  %v1937_v7 = vsel %vm22286_vm3, %v1927_v37, %v1936_v60  ;;  %v17553_v11 = vld [vmem:[#allocation2 + $0x9c] sm:$0xff]   ;;  %v2681_v13 = vsel %vm22286_vm3, %v2671_v47, %v2680_v4  ;;  %v1946_v29 = vsel %vm22286_vm3, %v1936_v60, %v1945_v16  ;;  %v17558_v37 = vld [vmem:[#allocation2 + $0xa4] sm:$0xff]  }
 0x136   : > { %v15594_v17 = vpop.f32.mrf.mxu0  ;;  %v1404_v20 = vpop.f32.mrf.mxu1  ;;  %15905 = vmatmul.mubr.bf16.gmra.mxu1 %v2654_v8  ;;  %v2704_v50 = vshll.u32 %v17558_v37, 16 }
 0x137   : > { %v1516_v22 = vadd.f32 %v1404_v20, %v847_v6  ;;  %15908 = vmatprep.mubr.msk.bf16.mxu1 %vm22288_vm0, %v22291_v1  ;;  %v2685_v17 = vrot.slane %v2683_v0, 3  ;;  %v1948_v20 = vshrl.u32 %v17550_v9, 16 }
 0x138   : > { %v850_v21 = vpop.f32.mrf.mxu0  ;;  %v15694_v25 = vpop.f32.mrf.mxu1  ;;  %v2706_v0 = vrot.slane %v2704_v50, 4 }
 0x139   : > { %1557 = vst [vmem:[#allocation4 + $0x8] sm:$0xff] %v1516_v22  ;;  %v17552_v22 = vld [vmem:[#allocation2 + $0x9c] sm:$0xff]   ;;  %v2695_v25 = vshll.u32 %v17553_v11, 16 }
 0x13a   : > { %v15595_v28 = vpop.f32.mrf.mxu0  ;;  %v1407_v30 = vpop.f32.mrf.mxu1  ;;  %v1957_v34 = vshrl.u32 %v17552_v22, 16  ;;  %v1960_v35 = vshll.u32 %v17552_v22, 16 }
 0x13b   : > { %v1517_v32 = vadd.f32 %v1407_v30, %v850_v21  ;;  %v1951_v21 = vshll.u32 %v17550_v9, 16  ;;  %v2689_v30 = vor.u32 %v2688_v18, %v2685_v17  ;;  %v2697_v43 = vrot.slane %v2695_v25, 4 }
 0x13c   : > { %v855_v31 = vpop.f32.mrf.mxu0  ;;  %15809 = vmatmul.mubr.bf16.gmra.mxu0 %v1919_v24  ;;  %v15695_v36 = vpop.f32.mrf.mxu1  ;;  %v2692_v24 = vshrl.u32 %v17553_v11, 16  ;;  %v1962_v47 = vrot.slane %v1960_v35, 4 }
 0x13d   : > { %15812 = vmatprep.mubr.msk.bf16.mxu0 %vm22288_vm0, %v22291_v1  ;;  %1558 = vst [vmem:[#allocation4 + $0x98] sm:$0xff] %v1517_v32  ;;  %v1950_v32 = vrot.slane %v1948_v20, 3 }
 0x13e   : > { %v15598_v41 = vpop.f32.mrf.mxu0  ;;  %v1412_v44 = vpop.f32.mrf.mxu1  ;;  %15909 = vmatmul.mubr.bf16.gmra.mxu1 %v2663_v33  ;;  %v1953_v33 = vrot.slane %v1951_v21, 4  ;;  %v2694_v42 = vrot.slane %v2692_v24, 3 }
 0x13f   : > { %v1518_v46 = vadd.f32 %v1412_v44, %v855_v31  ;;  %15912 = vmatprep.mubr.msk.bf16.mxu1 %vm22288_vm0, %v22291_v1  ;;  %v2690_v41 = vsel %vm22286_vm3, %v2680_v4, %v2689_v30 }
 0x140   : > { %v858_v45 = vpop.f32.mrf.mxu0  ;;  %v15698_v49 = vpop.f32.mrf.mxu1  ;;  %v2698_v54 = vor.u32 %v2697_v43, %v2694_v42 }
 0x141   : > { %1559 = vst [vmem:[#allocation4 + $0xa8] sm:$0xff] %v1518_v46  ;;  %v1959_v46 = vrot.slane %v1957_v34, 3  ;;  %v2701_v49 = vshrl.u32 %v17558_v37, 16 }
 0x142   : > { %v15599_v52 = vpop.f32.mrf.mxu0  ;;  %v1415_v55 = vpop.f32.mrf.mxu1  ;;  %v2699_v62 = vsel %vm22286_vm3, %v2689_v30, %v2698_v54 }
 0x143   : > { %v1519_v57 = vadd.f32 %v1415_v55, %v858_v45  ;;  %v1954_v45 = vor.u32 %v1953_v33, %v1950_v32  ;;  %v1963_v4 = vor.u32 %v1962_v47, %v1959_v46 }
 0x144   : > { %v863_v56 = vpop.f32.mrf.mxu0  ;;  %15813 = vmatmul.mubr.bf16.gmra.mxu0 %v1928_v48  ;;  %v15699_v59 = vpop.f32.mrf.mxu1 }
 0x145   : > { %15816 = vmatprep.mubr.msk.bf16.mxu0 %vm22288_vm0, %v22291_v1  ;;  %1560 = vst [vmem:[#allocation4 + $0x90] sm:$0xff] %v1519_v57  ;;  %v1955_v55 = vsel %vm22286_vm3, %v1945_v16, %v1954_v45  ;;  %v17557_v57 = vld [vmem:[#allocation2 + $0xa4] sm:$0x3f]  }
 0x146   : > { %v15602_v63 = vpop.f32.mrf.mxu0  ;;  %v1420_v3 = vpop.f32.mrf.mxu1  ;;  %15913 = vmatmul.mubr.bf16.gmra.mxu1 %v2672_v58 }
 0x147   : > { %v1520_v6 = vadd.f32 %v1420_v3, %v863_v56  ;;  %15916 = vmatprep.mubr.msk.bf16.mxu1 %vm22288_vm0, %v22291_v1  ;;  %v2703_v63 = vrot.slane %v2701_v49, 3 }
 0x148   : > { %v866_v5 = vpop.f32.mrf.mxu0  ;;  %v15702_v8 = vpop.f32.mrf.mxu1 }
 0x149   : > { %1561 = vst [vmem:[#allocation4 + $0xe0] sm:$0xff] %v1520_v6  ;;  %v1969_v6 = vshll.u32 %v17557_v57, 16  ;;  %v2707_v11 = vor.u32 %v2706_v0, %v2703_v63  ;;  %v17572_v63 = vld [vmem:[#allocation2 + $0x20] sm:$0xff]   ;;  %v17565_v0 = vld [vmem:[%s22278_s1 + $0x1b8] sm:$0xff]  }
 0x14a   : > { %v15603_v10 = vpop.f32.mrf.mxu0  ;;  %v1423_v12 = vpop.f32.mrf.mxu1 }
 0x14b   : > { %v1521_v15 = vadd.f32 %v1423_v12, %v866_v5  ;;  %v1966_v5 = vshrl.u32 %v17557_v57, 16  ;;  %v2710_v12 = vshrl.u32 %v17561_v2, 16  ;;  %v1971_v17 = vrot.slane %v1969_v6, 4 }
 0x14c   : > { %v871_v14 = vpop.f32.mrf.mxu0  ;;  %15817 = vmatmul.mubr.bf16.gmra.mxu0 %v1937_v7  ;;  %v15703_v19 = vpop.f32.mrf.mxu1  ;;  %v2708_v22 = vsel %vm22286_vm3, %v2698_v54, %v2707_v11 }
 0x14d   : > { %15820 = vmatprep.mubr.msk.bf16.mxu0 %vm22288_vm0, %v22291_v1  ;;  %1562 = vst [vmem:[#allocation4 + $0x88] sm:$0xff] %v1521_v15  ;;  %v1968_v16 = vrot.slane %v1966_v5, 3 }
 0x14e   : > { %v15606_v23 = vpop.f32.mrf.mxu0  ;;  %v1428_v26 = vpop.f32.mrf.mxu1  ;;  %15917 = vmatmul.mubr.bf16.gmra.mxu1 %v2681_v13  ;;  %v2713_v13 = vshll.u32 %v17561_v2, 16 }
 0x14f   : > { %v1522_v28 = vadd.f32 %v1428_v26, %v871_v14  ;;  %15920 = vmatprep.mubr.msk.bf16.mxu1 %vm22288_vm0, %v22291_v1  ;;  %v1964_v14 = vsel %vm22286_vm3, %v1954_v45, %v1963_v4  ;;  %v2712_v23 = vrot.slane %v2710_v12, 3  ;;  %v1972_v26 = vor.u32 %v1971_v17, %v1968_v16  ;;  %v17570_v45 = vld [vmem:[#allocation2 + $0x18] sm:$0xff]  }
 0x150   : > { %v874_v27 = vpop.f32.mrf.mxu0  ;;  %v15706_v31 = vpop.f32.mrf.mxu1  ;;  %v2715_v24 = vrot.slane %v2713_v13, 4  ;;  %v3833_v54 = vshll.u32 %v17570_v45, 16  ;;  %v17568_v16 = vld [vmem:[#allocation2 + $0x18] sm:$0xff]  }
 0x151   : > { %1563 = vst [vmem:[#allocation4 + $0xc0] sm:$0xff] %v1522_v28  ;;  %v1973_v32 = vsel %vm22286_vm3, %v1963_v4, %v1972_v26 }
 0x152   : > { %v15607_v36 = vpop.f32.mrf.mxu0  ;;  %v1431_v38 = vpop.f32.mrf.mxu1  ;;  %v2716_v31 = vor.u32 %v2715_v24, %v2712_v23 }
 0x153   : > { %v1523_v40 = vadd.f32 %v1431_v38, %v874_v27 }
 0x154   : > { %v879_v39 = vpop.f32.mrf.mxu0  ;;  %15821 = vmatmul.mubr.bf16.gmra.mxu0 %v1946_v29  ;;  %v15707_v44 = vpop.f32.mrf.mxu1  ;;  %v2717_v38 = vsel %vm22286_vm3, %v2707_v11, %v2716_v31  ;;  %v17573_v11 = vld [vmem:[%s22278_s1 + $0x1b0] sm:$0xff]  }
 0x155   : > { %15824 = vmatprep.mubr.msk.bf16.mxu0 %vm22288_vm0, %v22291_v1  ;;  %1564 = vst [vmem:[#allocation4 + $0x118] sm:$0xff] %v1523_v40 }
 0x156   : > { %v15610_v48 = vpop.f32.mrf.mxu0  ;;  %v1436_v51 = vpop.f32.mrf.mxu1  ;;  %15921 = vmatmul.mubr.bf16.gmra.mxu1 %v2690_v41 }
 0x157   : > { %v1524_v53 = vadd.f32 %v1436_v51, %v879_v39  ;;  %15924 = vmatprep.mubr.msk.bf16.mxu1 %vm22288_vm0, %v22291_v1  ;;  %v17569_v39 = vld [vmem:[#allocation2 + $0x10] sm:$0xff]  }
 0x158   : > { %v882_v52 = vpop.f32.mrf.mxu0  ;;  %v15710_v56 = vpop.f32.mrf.mxu1  ;;  %v3828_v46 = vshll.u32 %v17569_v39, 16 }
 0x159   : > { %1565 = vst [vmem:[#allocation4 + $0xd8] sm:$0xff] %v1524_v53 }
 0x15a   : > { %v15611_v58 = vpop.f32.mrf.mxu0  ;;  %v1439_v59 = vpop.f32.mrf.mxu1  ;;  %v3830_v53 = vrot.slane %v3828_v46, 1 }
 0x15b   : > { %v1525_v61 = vadd.f32 %v1439_v59, %v882_v52  ;;  %v3826_v52 = vshrl.u32 %v17569_v39, 16  ;;  %v17611_v39 = vld [vmem:[%s22278_s1 + $0x1f8] sm:$0xff]  }
 0x15c   : > { %v887_v60 = vpop.f32.mrf.mxu0  ;;  %15825 = vmatmul.mubr.bf16.gmra.mxu0 %v1955_v55  ;;  %v15711_v3 = vpop.f32.mrf.mxu1 }
 0x15d   : > { %15828 = vmatprep.mubr.msk.bf16.mxu0 %vm22288_vm0, %v22291_v1  ;;  %1566 = vst [vmem:[#allocation4 + $0xa0] sm:$0xff] %v1525_v61  ;;  %v3831_v61 = vor.u32 %v3830_v53, %v3826_v52 }
 0x15e   : > { %v15614_v7 = vpop.f32.mrf.mxu0  ;;  %v1444_v8 = vpop.f32.mrf.mxu1  ;;  %15925 = vmatmul.mubr.bf16.gmra.mxu1 %v2699_v62  ;;  %v3835_v62 = vrot.slane %v3833_v54, 1 }
 0x15f   : > { %v1526_v10 = vadd.f32 %v1444_v8, %v887_v60  ;;  %15928 = vmatprep.mubr.msk.bf16.mxu1 %vm22288_vm0, %v22291_v1  ;;  %v17564_v60 = vld [vmem:[#allocation2 + $0x10] sm:$0xff]   ;;  %v3837_v8 = vshrl.u32 %v17570_v45, 16 }
 0x160   : > { %v890_v9 = vpop.f32.mrf.mxu0  ;;  %v15714_v15 = vpop.f32.mrf.mxu1  ;;  %v3836_v7 = vsel %vm22285_vm4, %v3831_v61, %v3835_v62  ;;  %v17604_v61 = vld [vmem:[%s22278_s1 + $0x188] sm:$0xff]  }
 0x161   : > { %1567 = vst [vmem:[#allocation4 + $0x68] sm:$0xff] %v1526_v10  ;;  %v3839_v17 = vor.u32 %v3837_v8, %v3835_v62 }
 0x162   : > { %v15615_v18 = vpop.f32.mrf.mxu0  ;;  %v1447_v19 = vpop.f32.mrf.mxu1 }
 0x163   : > { %v1527_v21 = vadd.f32 %v1447_v19, %v890_v9  ;;  %v3841_v9 = vshll.u32 %v17572_v63, 16  ;;  %v18512_v19 = vld [vmem:[#allocation2 + $0x28] sm:$0xff]  }
 0x164   : > { %v895_v20 = vpop.f32.mrf.mxu0  ;;  %15829 = vmatmul.mubr.bf16.gmra.mxu0 %v1964_v14  ;;  %v15715_v25 = vpop.f32.mrf.mxu1 }
 0x165   : > { %15832 = vmatprep.mubr.msk.bf16.mxu0 %vm22288_vm0, %v22291_v1  ;;  %1568 = vst [vmem:[#allocation4 + $0x130] sm:$0xff] %v1527_v21  ;;  %v3843_v18 = vrot.slane %v3841_v9, 1  ;;  %v17580_v21 = vld [vmem:[%s22278_s1 + $0x1a8] sm:$0xff]  }
 0x166   : > { %v15618_v27 = vpop.f32.mrf.mxu0  ;;  %v1452_v28 = vpop.f32.mrf.mxu1  ;;  %15929 = vmatmul.mubr.bf16.gmra.mxu1 %v2708_v22 }
 0x167   : > { %v1528_v30 = vadd.f32 %v1452_v28, %v895_v20  ;;  %15932 = vmatprep.mubr.msk.bf16.mxu1 %vm22288_vm0, %v22291_v1  ;;  %v3845_v27 = vshrl.u32 %v17572_v63, 16  ;;  %v3849_v28 = vshll.u32 %v18512_v19, 16 }
 0x168   : > { %v898_v29 = vpop.f32.mrf.mxu0  ;;  %v15718_v33 = vpop.f32.mrf.mxu1 }
 0x169   : > { %1569 = vst [vmem:[#allocation4 + $0x50] sm:$0xff] %v1528_v30  ;;  %v17586_v30 = vld [vmem:[%s22278_s1 + $0x1a0] sm:$0xff]  }
 0x16a   : > { %v15619_v34 = vpop.f32.mrf.mxu0  ;;  %v1455_v35 = vpop.f32.mrf.mxu1 }
 0x16b   : > { %v1529_v37 = vadd.f32 %v1455_v35, %v898_v29  ;;  %v17571_v35 = vld [vmem:[#allocation2 + $0x20] sm:$0xff]  }
 0x16c   : > { %v903_v36 = vpop.f32.mrf.mxu0  ;;  %15833 = vmatmul.mubr.bf16.gmra.mxu0 %v1973_v32  ;;  %v15719_v40 = vpop.f32.mrf.mxu1 }
 0x16d   : > { %15836 = vmatprep.mubr.msk.bf16.mxu0 %vm22288_vm0, %v22291_v1  ;;  %1570 = vst [vmem:[#allocation4 + $0xe8] sm:$0xff] %v1529_v37  ;;  %v3851_v37 = vrot.slane %v3849_v28, 1 }
 0x16e   : > { %v15622_v41 = vpop.f32.mrf.mxu0  ;;  %v1460_v42 = vpop.f32.mrf.mxu1  ;;  %15933 = vmatmul.mubr.bf16.gmra.mxu1 %v2717_v38  ;;  %v18528_v38 = vld [vmem:[#allocation2 + $0x30] sm:$0xff]  }
 0x16f   : > { %v1530_v44 = vadd.f32 %v1460_v42, %v903_v36  ;;  %15936 = vmatprep.mubr.msk.bf16.mxu1 %vm22288_vm0, %v22291_v1  ;;  %v3847_v36 = vor.u32 %v3845_v27, %v3843_v18  ;;  %v17592_v41 = vld [vmem:[%s22278_s1 + $0x198] sm:$0xff]  }
 0x170   : > { %v906_v43 = vpop.f32.mrf.mxu0  ;;  %v15722_v47 = vpop.f32.mrf.mxu1 }
 0x171   : > { %1571 = vst [vmem:[#allocation4] sm:$0xff] %v1530_v44  ;;  %v3852_v46 = vsel %vm22285_vm4, %v3847_v36, %v3851_v37  ;;  %v3853_v47 = vshrl.u32 %v18512_v19, 16  ;;  %v1583_v36 = vld [vmem:[#allocation4 + $0x48] sm:$0xff] }
 0x172   : > { %v15623_v48 = vpop.f32.mrf.mxu0  ;;  %v1463_v49 = vpop.f32.mrf.mxu1 }
 0x173   : > { %v1531_v51 = vadd.f32 %v1463_v49, %v906_v43  ;;  %v3857_v48 = vshll.u32 %v18528_v38, 16  ;;  %v17613_v49 = vld [vmem:[%s22278_s1 + $0x1f0] sm:$0xff]  }
 0x174   : > { %v911_v50 = vpop.f32.mrf.mxu0  ;;  %15837 = vmatmul.mubr.bf16.gmra.mxu0 %v1972_v26  ;;  %v15723_v55 = vpop.f32.mrf.mxu1  ;;  %v3844_v26 = vsel %vm22285_vm4, %v3839_v17, %v3843_v18 }
 0x175   : > { %15956 = vmatprep.mubr.msk.bf16.mxu0 %vm22288_vm0, %v22291_v1  ;;  %1572 = vst [vmem:[#allocation4 + $0x40] sm:$0xff] %v1531_v51  ;;  %v17599_v51 = vld [vmem:[%s22278_s1 + $0x190] sm:$0xff]   ;;  %v17574_v55 = vld [vmem:[#allocation2 + $0x28] sm:$0xff]  }
 0x176   : > { %v15626_v56 = vpop.f32.mrf.mxu0  ;;  %v1468_v57 = vpop.f32.mrf.mxu1  ;;  %15937 = vmatmul.mubr.bf16.gmra.mxu1 %v2716_v31 }
 0x177   : > { %v1532_v59 = vadd.f32 %v1468_v57, %v911_v50  ;;  %16056 = vmatprep.mubr.msk.bf16.mxu1 %vm22288_vm0, %v22291_v1  ;;  %v3855_v56 = vor.u32 %v3853_v47, %v3851_v37  ;;  %v3859_v57 = vrot.slane %v3857_v48, 1 }
 0x178   : > { %v914_v58 = vpop.f32.mrf.mxu0  ;;  %v15726_v2 = vpop.f32.mrf.mxu1 }
 0x179   : > { %1573 = vst [vmem:[#allocation4 + $0x78] sm:$0xff] %v1532_v59  ;;  %v17616_v59 = vld [vmem:[%s22278_s1 + $0x1e8] sm:$0xff]  }
 0x17a   : > { %v15627_v3 = vpop.f32.mrf.mxu0  ;;  %v1471_v4 = vpop.f32.mrf.mxu1  ;;  %v1580_v2 = vld [vmem:[#allocation4 + $0xb0] sm:$0xff] }
 0x17b   : > { %v1533_v6 = vadd.f32 %v1471_v4, %v914_v58  ;;  %v18553_v58 = vld [vmem:[#allocation2 + $0x38] sm:$0xff]   ;;  %v3860_v4 = vsel %vm22285_vm4, %v3855_v56, %v3859_v57 }
 0x17c   : > { %v919_v5 = vpop.f32.mrf.mxu0  ;;  %15957 = vmatmul.mubr.bf16.vlgmr.msra.gmra.mxu0 %v17564_v60  ;;  %v15727_v10 = vpop.f32.mrf.mxu1 }
 0x17d   : > { %16141 = vmatpush3.bf16.msra.mxu0 %v17565_v0  ;;  %15960 = vmatprep.mubr.msk.bf16.mxu0 %vm22288_vm0, %v22291_v1  ;;  %1574 = vst [vmem:[#allocation4 + $0x30] sm:$0xff] %v1533_v6  ;;  %v3865_v6 = vshll.u32 %v18553_v58, 16 }
 0x17e   : > { %v15630_v12 = vpop.f32.mrf.mxu0  ;;  %16142 = vmatprep.subr.bf16.mxu0 %v22291_v1  ;;  %v1476_v13 = vpop.f32.mrf.mxu1  ;;  %16057 = vmatmul.mubr.bf16.vlgmr.msra.gmra.mxu1 %v3836_v7  ;;  %v17617_v7 = vld [vmem:[%s22278_s1 + $0x1e0] sm:$0xff]  }
 0x17f   : > { %v1534_v15 = vadd.f32 %v1476_v13, %v919_v5  ;;  %16060 = vmatprep.mubr.msk.bf16.mxu1 %vm22288_vm0, %v22291_v1  ;;  %16241 = vmatpush3.bf16.msra.mxu1 %v17611_v39  ;;  %v3861_v5 = vshrl.u32 %v18528_v38, 16  ;;  %v1581_v13 = vld [vmem:[#allocation4 + $0xd0] sm:$0xff]  ;;  %v3867_v19 = vrot.slane %v3865_v6, 1  ;;  %v17578_v39 = vld [vmem:[#allocation2 + $0x38] sm:$0xff]  }
 0x180   : > { %v922_v14 = vpop.f32.mrf.mxu0  ;;  %v15730_v20 = vpop.f32.mrf.mxu1  ;;  %16242 = vmatprep.subr.bf16.mxu1 %v22291_v1 }
 0x181   : > { %16143 = vmatpush3.bf16.msra.mxu0 %v17573_v11  ;;  %1575 = vst [vmem:[#allocation4 + $0xb8] sm:$0xff] %v1534_v15  ;;  %v17612_v11 = vld [vmem:[%s22278_s1 + $0x180] sm:$0xff]   ;;  %v3863_v18 = vor.u32 %v3861_v5, %v3859_v57 }
 0x182   : > { %v15631_v22 = vpop.f32.mrf.mxu0  ;;  %16144 = vmatprep.subr.bf16.mxu0 %v22291_v1  ;;  %v1479_v23 = vpop.f32.mrf.mxu1  ;;  %v18578_v20 = vld [vmem:[#allocation2 + $0x40] sm:$0xff]  }
 0x183   : > { %v1535_v25 = vadd.f32 %v1479_v23, %v922_v14  ;;  %16243 = vmatpush3.bf16.msra.mxu1 %v17613_v49  ;;  %v1584_v49 = vld [vmem:[#allocation4 + $0x120] sm:$0xff] }
 0x184   : > { %v927_v24 = vpop.f32.mrf.mxu0  ;;  %15961 = vmatmul.mubr.bf16.gmra.mxu0 %v17568_v16  ;;  %v15731_v29 = vpop.f32.mrf.mxu1  ;;  %16244 = vmatprep.subr.bf16.mxu1 %v22291_v1  ;;  %v17576_v16 = vld [vmem:[#allocation2 + $0x30] sm:$0xff]  }
 0x185   : > { %15964 = vmatprep.mubr.msk.bf16.mxu0 %vm22288_vm0, %v22291_v1  ;;  %16145 = vmatpush3.bf16.msra.mxu0 %v17580_v21  ;;  %1576 = vst [vmem:[#allocation4 + $0x60] sm:$0xff] %v1535_v25  ;;  %v17620_v21 = vld [vmem:[%s22278_s1 + $0x1d8] sm:$0xff]   ;;  %v3868_v29 = vsel %vm22285_vm4, %v3863_v18, %v3867_v19 }
 0x186   : > { %v15634_v31 = vpop.f32.mrf.mxu0  ;;  %16146 = vmatprep.subr.bf16.mxu0 %v22291_v1  ;;  %v1484_v32 = vpop.f32.mrf.mxu1  ;;  %16061 = vmatmul.mubr.bf16.gmra.mxu1 %v3844_v26  ;;  %v1582_v26 = vld [vmem:[#allocation4 + $0x10] sm:$0xff]  ;;  %v1587_v18 = vld [vmem:[#allocation4 + $0x100] sm:$0xff] }
 0x187   : > { %v1536_v34 = vadd.f32 %v1484_v32, %v927_v24  ;;  %16064 = vmatprep.mubr.msk.bf16.mxu1 %vm22288_vm0, %v22291_v1  ;;  %16245 = vmatpush3.bf16.msra.mxu1 %v17616_v59  ;;  %v3873_v31 = vshll.u32 %v18578_v20, 16  ;;  %v17621_v32 = vld [vmem:[%s22278_s1 + $0x1d0] sm:$0xff]  }
 0x188   : > { %v930_v33 = vpop.f32.mrf.mxu0  ;;  %v15734_v40 = vpop.f32.mrf.mxu1  ;;  %16246 = vmatprep.subr.bf16.mxu1 %v22291_v1 }
 0x189   : > { %16147 = vmatpush3.bf16.msra.mxu0 %v17586_v30  ;;  %1577 = vst [vmem:[#allocation4 + $0x28] sm:$0xff] %v1536_v34  ;;  %v3869_v30 = vshrl.u32 %v18553_v58, 16 }
 0x18a   : > { %v15635_v42 = vpop.f32.mrf.mxu0  ;;  %16148 = vmatprep.subr.bf16.mxu0 %v22291_v1  ;;  %v1487_v43 = vpop.f32.mrf.mxu1 }
 0x18b   : > { %v1537_v45 = vadd.f32 %v1487_v43, %v930_v33  ;;  %16247 = vmatpush3.bf16.msra.mxu1 %v17617_v7  ;;  %v3875_v42 = vrot.slane %v3873_v31, 1  ;;  %v17584_v43 = vld [vmem:[#allocation2 + $0x48] sm:$0xff]  }
 0x18c   : > { %v935_v44 = vpop.f32.mrf.mxu0  ;;  %15965 = vmatmul.mubr.bf16.gmra.mxu0 %v17571_v35  ;;  %v15735_v50 = vpop.f32.mrf.mxu1  ;;  %16248 = vmatprep.subr.bf16.mxu1 %v22291_v1 }
 0x18d   : > { %981 = vst [vmem:[#allocation4 + $0x58] sm:$0xf] %v935_v44  ;;  %15968 = vmatprep.mubr.msk.bf16.mxu0 %vm22288_vm0, %v22291_v1  ;;  %16149 = vmatpush3.bf16.msra.mxu0 %v17592_v41  ;;  %1578 = vst [vmem:[#allocation4 + $0x140] sm:$0xff] %v1537_v45  ;;  %v3871_v41 = vor.u32 %v3869_v30, %v3867_v19  ;;  %v17625_v44 = vld [vmem:[%s22278_s1 + $0x1c8] sm:$0xff]  }
 0x18e   : > { %v15638_v52 = vpop.f32.mrf.mxu0  ;;  %16150 = vmatprep.subr.bf16.mxu0 %v22291_v1  ;;  %v1492_v53 = vpop.f32.mrf.mxu1  ;;  %16065 = vmatmul.mubr.bf16.gmra.mxu1 %v3852_v46 }
 0x18f   : > { %16068 = vmatprep.mubr.msk.bf16.mxu1 %vm22288_vm0, %v22291_v1  ;;  %16249 = vmatpush3.bf16.msra.mxu1 %v17620_v21  ;;  %v3876_v52 = vsel %vm22285_vm4, %v3871_v41, %v3875_v42  ;;  %v17585_v41 = vld [vmem:[#allocation2 + $0x50] sm:$0xff]  }
 0x190   : > { %v938_v54 = vpop.f32.mrf.mxu0  ;;  %v15738_v60 = vpop.f32.mrf.mxu1  ;;  %16250 = vmatprep.subr.bf16.mxu1 %v22291_v1 }
 0x191   : > { %16151 = vmatpush3.bf16.msra.mxu0 %v17599_v51  ;;  %v3881_v54 = vshll.u32 %v17584_v43, 16  ;;  %v1585_v60 = vld [vmem:[#allocation4 + $0x38] sm:$0xff] }
 0x192   : > { %v15639_v62 = vpop.f32.mrf.mxu0  ;;  %16152 = vmatprep.subr.bf16.mxu0 %v22291_v1  ;;  %v1495_v63 = vpop.f32.mrf.mxu1 }
 0x193   : > { %16251 = vmatpush3.bf16.msra.mxu1 %v17621_v32  ;;  %v17581_v62 = vld [vmem:[#allocation2 + $0x40] sm:$0xff]  }
 0x194   : > { %v1022_v0 = vld [vmem:[#allocation4 + $0x58] sm:$0xf]  ;;  %v2077_v3 = vpop.f32.mrf.mxu0  ;;  %15969 = vmatmul.mubr.bf16.gmra.mxu0 %v17574_v55  ;;  %v15739_v10 = vpop.f32.mrf.mxu1  ;;  %16252 = vmatprep.subr.bf16.mxu1 %v22291_v1  ;;  %v17626_v55 = vld [vmem:[%s22278_s1 + $0x1c0] sm:$0xff]  }
 0x195   : > { %v2243_v8 = vadd.f32 %v2077_v3, %v1580_v2  ;;  %v1538_v9 = vadd.f32 %v1492_v53, %v1022_v0  ;;  %15972 = vmatprep.mubr.msk.bf16.mxu0 %vm22288_vm0, %v22291_v1  ;;  %16153 = vmatpush3.bf16.msra.mxu0 %v17604_v61  ;;  %v3877_v53 = vshrl.u32 %v18578_v20, 16  ;;  %v3883_v2 = vrot.slane %v3881_v54, 1  ;;  %v17587_v3 = vld [vmem:[#allocation2 + $0x50] sm:$0xff]   ;;  %v17583_v20 = vld [vmem:[#allocation2 + $0x48] sm:$0xff]  }
 0x196   : > { %v15758_v12 = vpop.f32.mrf.mxu0  ;;  %16154 = vmatprep.subr.bf16.mxu0 %v22291_v1  ;;  %v2821_v14 = vpop.f32.mrf.mxu1  ;;  %16069 = vmatmul.mubr.bf16.gmra.mxu1 %v3860_v4 }
 0x197   : > { %1579 = vst [vmem:[#allocation4 + $0x58] sm:$0xf] %v1538_v9  ;;  %v2987_v17 = vadd.f32 %v2821_v14, %v2243_v8  ;;  %16072 = vmatprep.mubr.msk.bf16.mxu1 %vm22288_vm0, %v22291_v1  ;;  %16253 = vmatpush3.bf16.msra.mxu1 %v17625_v44  ;;  %v3879_v0 = vor.u32 %v3877_v53, %v3875_v42  ;;  %v1586_v8 = vld [vmem:[#allocation4 + $0xf8] sm:$0xff]  ;;  %v3885_v12 = vshrl.u32 %v17584_v43, 16 }
 0x198   : > { %v2080_v15 = vpop.f32.mrf.mxu0  ;;  %v15858_v23 = vpop.f32.mrf.mxu1  ;;  %16254 = vmatprep.subr.bf16.mxu1 %v22291_v1 }
 0x199   : > { %v2244_v22 = vadd.f32 %v2080_v15, %v1581_v13  ;;  %16155 = vmatpush3.bf16.msra.mxu0 %v17612_v11  ;;  %3028 = vst [vmem:[#allocation4 + $0xb0] sm:$0xff] %v2987_v17  ;;  %v3884_v11 = vsel %vm22285_vm4, %v3879_v0, %v3883_v2  ;;  %v3889_v13 = vshll.u32 %v17587_v3, 16 }
 0x19a   : > { %v15759_v24 = vpop.f32.mrf.mxu0  ;;  %16340 = vmatprep.subr.bf16.mxu0 %v22291_v1  ;;  %v2824_v25 = vpop.f32.mrf.mxu1 }
 0x19b   : > { %v2988_v28 = vadd.f32 %v2824_v25, %v2244_v22  ;;  %16255 = vmatpush3.bf16.msra.mxu1 %v17626_v55  ;;  %v3887_v22 = vor.u32 %v3885_v12, %v3883_v2  ;;  %v3891_v23 = vrot.slane %v3889_v13, 1  ;;  %v17589_v24 = vld [vmem:[#allocation2 + $0x58] sm:$0xff]  }
 0x19c   : > { %v2085_v27 = vpop.f32.mrf.mxu0  ;;  %15973 = vmatmul.mubr.bf16.gmra.mxu0 %v17576_v16  ;;  %v15859_v34 = vpop.f32.mrf.mxu1  ;;  %16440 = vmatprep.subr.bf16.mxu1 %v22291_v1  ;;  %v3901_v54 = vshrl.u32 %v17589_v24, 16 }
 0x19d   : > { %v2245_v33 = vadd.f32 %v2085_v27, %v1582_v26  ;;  %15976 = vmatprep.mubr.msk.bf16.mxu0 %vm22288_vm0, %v22291_v1  ;;  %3029 = vst [vmem:[#allocation4 + $0xd0] sm:$0xff] %v2988_v28  ;;  %v3892_v32 = vsel %vm22285_vm4, %v3887_v22, %v3891_v23  ;;  %v3897_v34 = vshll.u32 %v17589_v24, 16  ;;  %v17596_v24 = vld [vmem:[#allocation2 + $0x70] sm:$0xff]  }
 0x19e   : > { %v15762_v35 = vpop.f32.mrf.mxu0  ;;  %v2829_v37 = vpop.f32.mrf.mxu1  ;;  %16073 = vmatmul.mubr.bf16.gmra.mxu1 %v3868_v29  ;;  %v1588_v29 = vld [vmem:[#allocation4 + $0x80] sm:$0xff] }
 0x19f   : > { %v2989_v40 = vadd.f32 %v2829_v37, %v2245_v33  ;;  %16076 = vmatprep.mubr.msk.bf16.mxu1 %vm22288_vm0, %v22291_v1  ;;  %v3893_v33 = vshrl.u32 %v17587_v3, 16  ;;  %v3899_v44 = vrot.slane %v3897_v34, 1  ;;  %v17594_v3 = vld [vmem:[#allocation2 + $0x68] sm:$0xff]   ;;  %v3921_v34 = vshll.u32 %v17596_v24, 16 }
 0x1a0   : > { %v2088_v38 = vpop.f32.mrf.mxu0  ;;  %v15862_v46 = vpop.f32.mrf.mxu1  ;;  %v3913_v13 = vshll.u32 %v17594_v3, 16 }
 0x1a1   : > { %v2246_v45 = vadd.f32 %v2088_v38, %v1583_v36  ;;  %3030 = vst [vmem:[#allocation4 + $0x10] sm:$0xff] %v2989_v40  ;;  %v3895_v43 = vor.u32 %v3893_v33, %v3891_v23  ;;  %v3903_v0 = vor.u32 %v3901_v54, %v3899_v44  ;;  %v3917_v33 = vshrl.u32 %v17594_v3, 16  ;;  %v17601_v3 = vld [vmem:[#allocation2 + $0x80] sm:$0xff]  }
 0x1a2   : > { %v15763_v47 = vpop.f32.mrf.mxu0  ;;  %v2832_v48 = vpop.f32.mrf.mxu1  ;;  %v3915_v23 = vrot.slane %v3913_v13, 1  ;;  %v3925_v54 = vshrl.u32 %v17596_v24, 16  ;;  %v3937_v13 = vshll.u32 %v17601_v3, 16  ;;  %v17603_v24 = vld [vmem:[#allocation2 + $0x88] sm:$0xff]  }
 0x1a3   : > { %v2990_v51 = vadd.f32 %v2832_v48, %v2246_v45  ;;  %v17591_v45 = vld [vmem:[#allocation2 + $0x60] sm:$0xff]   ;;  %v3900_v53 = vsel %vm22285_vm4, %v3895_v43, %v3899_v44  ;;  %v3923_v44 = vrot.slane %v3921_v34, 1  ;;  %v3945_v34 = vshll.u32 %v17603_v24, 16 }
 0x1a4   : > { %v2093_v50 = vpop.f32.mrf.mxu0  ;;  %15977 = vmatmul.mubr.bf16.gmra.mxu0 %v17578_v39  ;;  %v15863_v57 = vpop.f32.mrf.mxu1  ;;  %v1589_v39 = vld [vmem:[#allocation4 + $0x108] sm:$0xff]  ;;  %v3905_v55 = vshll.u32 %v17591_v45, 16  ;;  %v3909_v12 = vshrl.u32 %v17591_v45, 16  ;;  %v3919_v43 = vor.u32 %v3917_v33, %v3915_v23  ;;  %v17598_v45 = vld [vmem:[#allocation2 + $0x78] sm:$0xff]   ;;  %v3941_v33 = vshrl.u32 %v17601_v3, 16 }
 0x1a5   : > { %v2247_v56 = vadd.f32 %v2093_v50, %v1584_v49  ;;  %15980 = vmatprep.mubr.msk.bf16.mxu0 %vm22288_vm0, %v22291_v1  ;;  %3031 = vst [vmem:[#allocation4 + $0x48] sm:$0xff] %v2990_v51  ;;  %v1590_v50 = vld [vmem:[#allocation4 + $0x138] sm:$0xff]  ;;  %v17608_v3 = vld [vmem:[#allocation2 + $0x98] sm:$0xff]  }
 0x1a6   : > { %v15766_v58 = vpop.f32.mrf.mxu0  ;;  %v2837_v59 = vpop.f32.mrf.mxu1  ;;  %16077 = vmatmul.mubr.bf16.gmra.mxu1 %v3876_v52  ;;  %v3907_v2 = vrot.slane %v3905_v55, 1  ;;  %v3929_v55 = vshll.u32 %v17598_v45, 16 }
 0x1a7   : > { %v2991_v63 = vadd.f32 %v2837_v59, %v2247_v56  ;;  %16080 = vmatprep.mubr.msk.bf16.mxu1 %vm22288_vm0, %v22291_v1 }
 0x1a8   : > { %v2096_v61 = vpop.f32.mrf.mxu0  ;;  %v15866_v5 = vpop.f32.mrf.mxu1  ;;  %v3911_v22 = vor.u32 %v3909_v12, %v3907_v2  ;;  %v3933_v12 = vshrl.u32 %v17598_v45, 16  ;;  %v17606_v45 = vld [vmem:[#allocation2 + $0x90] sm:$0xff]  }
 0x1a9   : > { %v2248_v4 = vadd.f32 %v2096_v61, %v1585_v60  ;;  %3032 = vst [vmem:[#allocation4 + $0x120] sm:$0xff] %v2991_v63  ;;  %v1591_v60 = vld [vmem:[#allocation4 + $0xf0] sm:$0xff] }
 0x1aa   : > { %v15767_v6 = vpop.f32.mrf.mxu0  ;;  %v2840_v7 = vpop.f32.mrf.mxu1 }
 0x1ab   : > { %v2992_v10 = vadd.f32 %v2840_v7, %v2248_v4 }
 0x1ac   : > { %v2101_v9 = vpop.f32.mrf.mxu0  ;;  %15981 = vmatmul.mubr.bf16.gmra.mxu0 %v17581_v62  ;;  %v15867_v15 = vpop.f32.mrf.mxu1  ;;  %v17588_v62 = vld [vmem:[#allocation2 + $0x58] sm:$0xff]  }
 0x1ad   : > { %v2249_v14 = vadd.f32 %v2101_v9, %v1586_v8  ;;  %15984 = vmatprep.mubr.msk.bf16.mxu0 %vm22288_vm0, %v22291_v1  ;;  %3033 = vst [vmem:[#allocation4 + $0x38] sm:$0xff] %v2992_v10  ;;  %v1592_v8 = vld [vmem:[#allocation4 + $0x18] sm:$0xff] }
 0x1ae   : > { %v15770_v16 = vpop.f32.mrf.mxu0  ;;  %v2845_v17 = vpop.f32.mrf.mxu1  ;;  %16081 = vmatmul.mubr.bf16.gmra.mxu1 %v3884_v11  ;;  %v3908_v11 = vsel %vm22285_vm4, %v3903_v0, %v3907_v2  ;;  %v3927_v0 = vor.u32 %v3925_v54, %v3923_v44  ;;  %v3931_v2 = vrot.slane %v3929_v55, 1  ;;  %v3949_v54 = vshrl.u32 %v17603_v24, 16  ;;  %v17610_v24 = vld [vmem:[#allocation2 + $0xa0] sm:$0xff]  }
 0x1af   : > { %v2993_v21 = vadd.f32 %v2845_v17, %v2249_v14  ;;  %16084 = vmatprep.mubr.msk.bf16.mxu1 %vm22288_vm0, %v22291_v1  ;;  %v3953_v55 = vshll.u32 %v17606_v45, 16 }
 0x1b0   : > { %v2104_v19 = vpop.f32.mrf.mxu0  ;;  %v15870_v26 = vpop.f32.mrf.mxu1 }
 0x1b1   : > { %v2250_v25 = vadd.f32 %v2104_v19, %v1587_v18  ;;  %3034 = vst [vmem:[#allocation4 + $0xf8] sm:$0xff] %v2993_v21  ;;  %v1593_v18 = vld [vmem:[#allocation4 + $0xc8] sm:$0xff] }
 0x1b2   : > { %v15771_v27 = vpop.f32.mrf.mxu0  ;;  %v2848_v28 = vpop.f32.mrf.mxu1 }
 0x1b3   : > { %v2994_v31 = vadd.f32 %v2848_v28, %v2250_v25 }
 0x1b4   : > { %v2109_v30 = vpop.f32.mrf.mxu0  ;;  %15985 = vmatmul.mubr.bf16.gmra.mxu0 %v17583_v20  ;;  %v15871_v36 = vpop.f32.mrf.mxu1  ;;  %v17590_v20 = vld [vmem:[#allocation2 + $0x60] sm:$0xff]  }
 0x1b5   : > { %v2251_v35 = vadd.f32 %v2109_v30, %v1588_v29  ;;  %15988 = vmatprep.mubr.msk.bf16.mxu0 %vm22288_vm0, %v22291_v1  ;;  %3035 = vst [vmem:[#allocation4 + $0x100] sm:$0xff] %v2994_v31  ;;  %v1594_v29 = vld [vmem:[#allocation4 + $0x70] sm:$0xff] }
 0x1b6   : > { %v15774_v37 = vpop.f32.mrf.mxu0  ;;  %v2853_v38 = vpop.f32.mrf.mxu1  ;;  %16085 = vmatmul.mubr.bf16.gmra.mxu1 %v3892_v32  ;;  %v3916_v32 = vsel %vm22285_vm4, %v3911_v22, %v3915_v23  ;;  %v3935_v22 = vor.u32 %v3933_v12, %v3931_v2  ;;  %v3939_v23 = vrot.slane %v3937_v13, 1  ;;  %v3957_v12 = vshrl.u32 %v17606_v45, 16  ;;  %v17615_v45 = vld [vmem:[#allocation2 + $0xa8] sm:$0xff]  }
 0x1b7   : > { %v2995_v42 = vadd.f32 %v2853_v38, %v2251_v35  ;;  %16088 = vmatprep.mubr.msk.bf16.mxu1 %vm22288_vm0, %v22291_v1  ;;  %v3961_v13 = vshll.u32 %v17608_v3, 16 }
 0x1b8   : > { %v2112_v40 = vpop.f32.mrf.mxu0  ;;  %v15874_v47 = vpop.f32.mrf.mxu1 }
 0x1b9   : > { %v2252_v46 = vadd.f32 %v2112_v40, %v1589_v39  ;;  %3036 = vst [vmem:[#allocation4 + $0x80] sm:$0xff] %v2995_v42  ;;  %v1595_v39 = vld [vmem:[#allocation4 + $0x20] sm:$0xff] }
 0x1ba   : > { %v15775_v48 = vpop.f32.mrf.mxu0  ;;  %v2856_v49 = vpop.f32.mrf.mxu1 }
 0x1bb   : > { %v2996_v52 = vadd.f32 %v2856_v49, %v2252_v46 }
 0x1bc   : > { %v2117_v51 = vpop.f32.mrf.mxu0  ;;  %15989 = vmatmul.mubr.bf16.gmra.mxu0 %v17585_v41  ;;  %v15875_v57 = vpop.f32.mrf.mxu1  ;;  %v17593_v41 = vld [vmem:[#allocation2 + $0x68] sm:$0xff]  }
 0x1bd   : > { %v2253_v56 = vadd.f32 %v2117_v51, %v1590_v50  ;;  %15992 = vmatprep.mubr.msk.bf16.mxu0 %vm22288_vm0, %v22291_v1  ;;  %3037 = vst [vmem:[#allocation4 + $0x108] sm:$0xff] %v2996_v52  ;;  %v1596_v50 = vld [vmem:[#allocation4 + $0x128] sm:$0xff] }
 0x1be   : > { %v15778_v58 = vpop.f32.mrf.mxu0  ;;  %v2861_v59 = vpop.f32.mrf.mxu1  ;;  %16089 = vmatmul.mubr.bf16.gmra.mxu1 %v3900_v53  ;;  %v3924_v53 = vsel %vm22285_vm4, %v3919_v43, %v3923_v44  ;;  %v3943_v43 = vor.u32 %v3941_v33, %v3939_v23  ;;  %v3947_v44 = vrot.slane %v3945_v34, 1  ;;  %v3965_v33 = vshrl.u32 %v17608_v3, 16  ;;  %v17619_v3 = vld [vmem:[#allocation2 + $0xb0] ss:$0 sps:$4 sm:$0x77]  }
 0x1bf   : > { %v2997_v63 = vadd.f32 %v2861_v59, %v2253_v56  ;;  %16092 = vmatprep.mubr.msk.bf16.mxu1 %vm22288_vm0, %v22291_v1  ;;  %v3969_v34 = vshll.u32 %v17610_v24, 16 }
 0x1c0   : > { %v2120_v61 = vpop.f32.mrf.mxu0  ;;  %v15878_v5 = vpop.f32.mrf.mxu1 }
 0x1c1   : > { %v2254_v4 = vadd.f32 %v2120_v61, %v1591_v60  ;;  %3038 = vst [vmem:[#allocation4 + $0x138] sm:$0xff] %v2997_v63  ;;  %v1597_v60 = vld [vmem:[#allocation4 + $0x110] sm:$0xff] }
 0x1c2   : > { %v15779_v6 = vpop.f32.mrf.mxu0  ;;  %v2864_v7 = vpop.f32.mrf.mxu1 }
 0x1c3   : > { %v2998_v10 = vadd.f32 %v2864_v7, %v2254_v4 }
 0x1c4   : > { %v2125_v9 = vpop.f32.mrf.mxu0  ;;  %15993 = vmatmul.mubr.bf16.gmra.mxu0 %v17588_v62  ;;  %v15879_v15 = vpop.f32.mrf.mxu1  ;;  %v17595_v62 = vld [vmem:[#allocation2 + $0x70] sm:$0xff]  }
 0x1c5   : > { %v2255_v14 = vadd.f32 %v2125_v9, %v1592_v8  ;;  %15996 = vmatprep.mubr.msk.bf16.mxu0 %vm22288_vm0, %v22291_v1  ;;  %3039 = vst [vmem:[#allocation4 + $0xf0] sm:$0xff] %v2998_v10  ;;  %v1598_v8 = vld [vmem:[#allocation4 + $0x8] sm:$0xff] }
 0x1c6   : > { %v15782_v16 = vpop.f32.mrf.mxu0  ;;  %v2869_v17 = vpop.f32.mrf.mxu1  ;;  %16093 = vmatmul.mubr.bf16.gmra.mxu1 %v3908_v11  ;;  %v3932_v11 = vsel %vm22285_vm4, %v3927_v0, %v3931_v2  ;;  %v3951_v0 = vor.u32 %v3949_v54, %v3947_v44  ;;  %v3955_v2 = vrot.slane %v3953_v55, 1  ;;  %v3973_v54 = vshrl.u32 %v17610_v24, 16  ;;  %v17622_v24 = vld [vmem:[#allocation2 + $0x18] sm:$0xff]  }
 0x1c7   : > { %v2999_v21 = vadd.f32 %v2869_v17, %v2255_v14  ;;  %16096 = vmatprep.mubr.msk.bf16.mxu1 %vm22288_vm0, %v22291_v1  ;;  %v3977_v55 = vshll.u32 %v17615_v45, 16 }
 0x1c8   : > { %v2128_v19 = vpop.f32.mrf.mxu0  ;;  %v15882_v26 = vpop.f32.mrf.mxu1 }
 0x1c9   : > { %v2256_v25 = vadd.f32 %v2128_v19, %v1593_v18  ;;  %3040 = vst [vmem:[#allocation4 + $0x18] sm:$0xff] %v2999_v21  ;;  %v1599_v18 = vld [vmem:[#allocation4 + $0x98] sm:$0xff] }
 0x1ca   : > { %v15783_v27 = vpop.f32.mrf.mxu0  ;;  %v2872_v28 = vpop.f32.mrf.mxu1 }
 0x1cb   : > { %v3000_v31 = vadd.f32 %v2872_v28, %v2256_v25 }
 0x1cc   : > { %v2133_v30 = vpop.f32.mrf.mxu0  ;;  %15997 = vmatmul.mubr.bf16.gmra.mxu0 %v17590_v20  ;;  %v15883_v36 = vpop.f32.mrf.mxu1  ;;  %v17597_v20 = vld [vmem:[#allocation2 + $0x78] sm:$0xff]  }
 0x1cd   : > { %v2257_v35 = vadd.f32 %v2133_v30, %v1594_v29  ;;  %16000 = vmatprep.mubr.msk.bf16.mxu0 %vm22288_vm0, %v22291_v1  ;;  %3041 = vst [vmem:[#allocation4 + $0xc8] sm:$0xff] %v3000_v31  ;;  %v1600_v29 = vld [vmem:[#allocation4 + $0xa8] sm:$0xff] }
 0x1ce   : > { %v15786_v37 = vpop.f32.mrf.mxu0  ;;  %v2877_v38 = vpop.f32.mrf.mxu1  ;;  %16097 = vmatmul.mubr.bf16.gmra.mxu1 %v3916_v32  ;;  %v3940_v32 = vsel %vm22285_vm4, %v3935_v22, %v3939_v23  ;;  %v3959_v22 = vor.u32 %v3957_v12, %v3955_v2  ;;  %v3963_v23 = vrot.slane %v3961_v13, 1  ;;  %v3981_v12 = vshrl.u32 %v17615_v45, 16 }
 0x1cf   : > { %v3001_v42 = vadd.f32 %v2877_v38, %v2257_v35  ;;  %16100 = vmatprep.mubr.msk.bf16.mxu1 %vm22288_vm0, %v22291_v1  ;;  %v3985_v13 = vshll.u32 %v17619_v3, 16 }
 0x1d0   : > { %v2136_v40 = vpop.f32.mrf.mxu0  ;;  %v15886_v47 = vpop.f32.mrf.mxu1 }
 0x1d1   : > { %v2258_v46 = vadd.f32 %v2136_v40, %v1595_v39  ;;  %3042 = vst [vmem:[#allocation4 + $0x70] sm:$0xff] %v3001_v42  ;;  %v1601_v39 = vld [vmem:[#allocation4 + $0x90] sm:$0xff] }
 0x1d2   : > { %v15787_v48 = vpop.f32.mrf.mxu0  ;;  %v2880_v49 = vpop.f32.mrf.mxu1 }
 0x1d3   : > { %v3002_v52 = vadd.f32 %v2880_v49, %v2258_v46 }
 0x1d4   : > { %v2141_v51 = vpop.f32.mrf.mxu0  ;;  %16001 = vmatmul.mubr.bf16.gmra.mxu0 %v17593_v41  ;;  %v15887_v57 = vpop.f32.mrf.mxu1  ;;  %v17600_v41 = vld [vmem:[#allocation2 + $0x80] sm:$0xff]  }
 0x1d5   : > { %v2259_v56 = vadd.f32 %v2141_v51, %v1596_v50  ;;  %16004 = vmatprep.mubr.msk.bf16.mxu0 %vm22288_vm0, %v22291_v1  ;;  %3043 = vst [vmem:[#allocation4 + $0x20] sm:$0xff] %v3002_v52  ;;  %v1602_v50 = vld [vmem:[#allocation4 + $0xe0] sm:$0xff] }
 0x1d6   : > { %v15790_v58 = vpop.f32.mrf.mxu0  ;;  %v2885_v59 = vpop.f32.mrf.mxu1  ;;  %16101 = vmatmul.mubr.bf16.gmra.mxu1 %v3924_v53  ;;  %v3948_v53 = vsel %vm22285_vm4, %v3943_v43, %v3947_v44  ;;  %v3967_v43 = vor.u32 %v3965_v33, %v3963_v23  ;;  %v3971_v44 = vrot.slane %v3969_v34, 1  ;;  %v18676_v33 = vld [vmem:[#allocation2 + $0x20] sm:$0xff]   ;;  %v4548_v34 = vshll.u32 %v17622_v24, 16 }
 0x1d7   : > { %v3003_v63 = vadd.f32 %v2885_v59, %v2259_v56  ;;  %16104 = vmatprep.mubr.msk.bf16.mxu1 %vm22288_vm0, %v22291_v1 }
 0x1d8   : > { %v2144_v61 = vpop.f32.mrf.mxu0  ;;  %v15890_v5 = vpop.f32.mrf.mxu1  ;;  %v4550_v45 = vrot.slane %v4548_v34, 1 }
 0x1d9   : > { %v2260_v4 = vadd.f32 %v2144_v61, %v1597_v60  ;;  %3044 = vst [vmem:[#allocation4 + $0x128] sm:$0xff] %v3003_v63  ;;  %v1603_v60 = vld [vmem:[#allocation4 + $0x88] sm:$0xff] }
 0x1da   : > { %v15791_v6 = vpop.f32.mrf.mxu0  ;;  %v2888_v7 = vpop.f32.mrf.mxu1 }
 0x1db   : > { %v3004_v10 = vadd.f32 %v2888_v7, %v2260_v4 }
 0x1dc   : > { %v2149_v9 = vpop.f32.mrf.mxu0  ;;  %16005 = vmatmul.mubr.bf16.gmra.mxu0 %v17595_v62  ;;  %v15891_v15 = vpop.f32.mrf.mxu1  ;;  %v17602_v62 = vld [vmem:[#allocation2 + $0x88] sm:$0xff]  }
 0x1dd   : > { %v2261_v14 = vadd.f32 %v2149_v9, %v1598_v8  ;;  %16008 = vmatprep.mubr.msk.bf16.mxu0 %vm22288_vm0, %v22291_v1  ;;  %3045 = vst [vmem:[#allocation4 + $0x110] sm:$0xff] %v3004_v10  ;;  %v1604_v8 = vld [vmem:[#allocation4 + $0xc0] sm:$0xff] }
 0x1de   : > { %v15794_v16 = vpop.f32.mrf.mxu0  ;;  %v2893_v17 = vpop.f32.mrf.mxu1  ;;  %16105 = vmatmul.mubr.bf16.gmra.mxu1 %v3932_v11  ;;  %v3956_v11 = vsel %vm22285_vm4, %v3951_v0, %v3955_v2  ;;  %v3975_v0 = vor.u32 %v3973_v54, %v3971_v44  ;;  %v3979_v2 = vrot.slane %v3977_v55, 1 }
 0x1df   : > { %v3005_v21 = vadd.f32 %v2893_v17, %v2261_v14  ;;  %16108 = vmatprep.mubr.msk.bf16.mxu1 %vm22288_vm0, %v22291_v1 }
 0x1e0   : > { %v2152_v19 = vpop.f32.mrf.mxu0  ;;  %v15894_v26 = vpop.f32.mrf.mxu1 }
 0x1e1   : > { %v2262_v25 = vadd.f32 %v2152_v19, %v1599_v18  ;;  %3046 = vst [vmem:[#allocation4 + $0x8] sm:$0xff] %v3005_v21  ;;  %v1605_v18 = vld [vmem:[#allocation4 + $0x118] sm:$0xff] }
 0x1e2   : > { %v15795_v27 = vpop.f32.mrf.mxu0  ;;  %v2896_v28 = vpop.f32.mrf.mxu1 }
 0x1e3   : > { %v3006_v31 = vadd.f32 %v2896_v28, %v2262_v25 }
 0x1e4   : > { %v2157_v30 = vpop.f32.mrf.mxu0  ;;  %16009 = vmatmul.mubr.bf16.gmra.mxu0 %v17597_v20  ;;  %v15895_v36 = vpop.f32.mrf.mxu1  ;;  %v17605_v20 = vld [vmem:[#allocation2 + $0x90] sm:$0xff]  }
 0x1e5   : > { %v2263_v35 = vadd.f32 %v2157_v30, %v1600_v29  ;;  %16012 = vmatprep.mubr.msk.bf16.mxu0 %vm22288_vm0, %v22291_v1  ;;  %3047 = vst [vmem:[#allocation4 + $0x98] sm:$0xff] %v3006_v31  ;;  %v1606_v29 = vld [vmem:[#allocation4 + $0xd8] sm:$0xff] }
 0x1e6   : > { %v15798_v37 = vpop.f32.mrf.mxu0  ;;  %v2901_v38 = vpop.f32.mrf.mxu1  ;;  %16109 = vmatmul.mubr.bf16.gmra.mxu1 %v3940_v32  ;;  %v3964_v32 = vsel %vm22285_vm4, %v3959_v22, %v3963_v23  ;;  %v3983_v22 = vor.u32 %v3981_v12, %v3979_v2  ;;  %v3987_v23 = vrot.slane %v3985_v13, 1 }
 0x1e7   : > { %v3007_v42 = vadd.f32 %v2901_v38, %v2263_v35  ;;  %16112 = vmatprep.mubr.msk.bf16.mxu1 %vm22288_vm0, %v22291_v1 }
 0x1e8   : > { %v2160_v40 = vpop.f32.mrf.mxu0  ;;  %v15898_v47 = vpop.f32.mrf.mxu1 }
 0x1e9   : > { %v2264_v46 = vadd.f32 %v2160_v40, %v1601_v39  ;;  %3048 = vst [vmem:[#allocation4 + $0xa8] sm:$0xff] %v3007_v42  ;;  %v1607_v39 = vld [vmem:[#allocation4 + $0xa0] sm:$0xff] }
 0x1ea   : > { %v15799_v48 = vpop.f32.mrf.mxu0  ;;  %v2904_v49 = vpop.f32.mrf.mxu1 }
 0x1eb   : > { %v3008_v52 = vadd.f32 %v2904_v49, %v2264_v46 }
 0x1ec   : > { %v2165_v51 = vpop.f32.mrf.mxu0  ;;  %16013 = vmatmul.mubr.bf16.gmra.mxu0 %v17600_v41  ;;  %v15899_v57 = vpop.f32.mrf.mxu1  ;;  %v17607_v41 = vld [vmem:[#allocation2 + $0x98] sm:$0xff]  }
 0x1ed   : > { %v2265_v56 = vadd.f32 %v2165_v51, %v1602_v50  ;;  %16016 = vmatprep.mubr.msk.bf16.mxu0 %vm22288_vm0, %v22291_v1  ;;  %3049 = vst [vmem:[#allocation4 + $0x90] sm:$0xff] %v3008_v52  ;;  %v1608_v50 = vld [vmem:[#allocation4 + $0x68] sm:$0xff] }
 0x1ee   : > { %v15802_v58 = vpop.f32.mrf.mxu0  ;;  %v2909_v59 = vpop.f32.mrf.mxu1  ;;  %16113 = vmatmul.mubr.bf16.gmra.mxu1 %v3948_v53  ;;  %v3972_v53 = vsel %vm22285_vm4, %v3967_v43, %v3971_v44  ;;  %v4546_v44 = vshrl.u32 %v17622_v24, 16  ;;  %v17632_v24 = vld [vmem:[%s22278_s1 + $0x230] sm:$0xff]  }
 0x1ef   : > { %v3009_v63 = vadd.f32 %v2909_v59, %v2265_v56  ;;  %16116 = vmatprep.mubr.msk.bf16.mxu1 %vm22288_vm0, %v22291_v1 }
 0x1f0   : > { %v2168_v61 = vpop.f32.mrf.mxu0  ;;  %v15902_v5 = vpop.f32.mrf.mxu1  ;;  %v4551_v55 = vor.u32 %v4550_v45, %v4546_v44 }
 0x1f1   : > { %v2266_v4 = vadd.f32 %v2168_v61, %v1603_v60  ;;  %3050 = vst [vmem:[#allocation4 + $0xe0] sm:$0xff] %v3009_v63  ;;  %v1609_v60 = vld [vmem:[#allocation4 + $0x130] sm:$0xff] }
 0x1f2   : > { %v15803_v6 = vpop.f32.mrf.mxu0  ;;  %v2912_v7 = vpop.f32.mrf.mxu1 }
 0x1f3   : > { %v3010_v10 = vadd.f32 %v2912_v7, %v2266_v4 }
 0x1f4   : > { %v2173_v9 = vpop.f32.mrf.mxu0  ;;  %16017 = vmatmul.mubr.bf16.gmra.mxu0 %v17602_v62  ;;  %v15903_v15 = vpop.f32.mrf.mxu1  ;;  %v17609_v62 = vld [vmem:[#allocation2 + $0xa0] sm:$0xff]  }
 0x1f5   : > { %v2267_v14 = vadd.f32 %v2173_v9, %v1604_v8  ;;  %16020 = vmatprep.mubr.msk.bf16.mxu0 %vm22288_vm0, %v22291_v1  ;;  %3051 = vst [vmem:[#allocation4 + $0x88] sm:$0xff] %v3010_v10  ;;  %v1610_v8 = vld [vmem:[#allocation4 + $0x50] sm:$0xff] }
 0x1f6   : > { %v15806_v16 = vpop.f32.mrf.mxu0  ;;  %v2917_v17 = vpop.f32.mrf.mxu1  ;;  %16117 = vmatmul.mubr.bf16.gmra.mxu1 %v3956_v11  ;;  %v3980_v11 = vsel %vm22285_vm4, %v3975_v0, %v3979_v2  ;;  %v1615_v0 = vld [vmem:[#allocation4 + $0x30] sm:$0xff] }
 0x1f7   : > { %v3011_v21 = vadd.f32 %v2917_v17, %v2267_v14  ;;  %16120 = vmatprep.mubr.msk.bf16.mxu1 %vm22288_vm0, %v22291_v1 }
 0x1f8   : > { %v2176_v19 = vpop.f32.mrf.mxu0  ;;  %v15906_v26 = vpop.f32.mrf.mxu1 }
 0x1f9   : > { %v2268_v25 = vadd.f32 %v2176_v19, %v1605_v18  ;;  %3052 = vst [vmem:[#allocation4 + $0xc0] sm:$0xff] %v3011_v21  ;;  %v1611_v18 = vld [vmem:[#allocation4 + $0xe8] sm:$0xff] }
 0x1fa   : > { %v15807_v27 = vpop.f32.mrf.mxu0  ;;  %v2920_v28 = vpop.f32.mrf.mxu1 }
 0x1fb   : > { %v3012_v31 = vadd.f32 %v2920_v28, %v2268_v25 }
 0x1fc   : > { %v2181_v30 = vpop.f32.mrf.mxu0  ;;  %16021 = vmatmul.mubr.bf16.gmra.mxu0 %v17605_v20  ;;  %v15907_v36 = vpop.f32.mrf.mxu1  ;;  %v17614_v20 = vld [vmem:[#allocation2 + $0xa8] sm:$0xff]  }
 0x1fd   : > { %v2269_v35 = vadd.f32 %v2181_v30, %v1606_v29  ;;  %16024 = vmatprep.mubr.msk.bf16.mxu0 %vm22288_vm0, %v22291_v1  ;;  %3053 = vst [vmem:[#allocation4 + $0x118] sm:$0xff] %v3012_v31  ;;  %v1612_v29 = vld [vmem:[#allocation4] sm:$0xff] }
 0x1fe   : > { %v15810_v37 = vpop.f32.mrf.mxu0  ;;  %v2925_v38 = vpop.f32.mrf.mxu1  ;;  %16121 = vmatmul.mubr.bf16.gmra.mxu1 %v3964_v32  ;;  %v3988_v32 = vsel %vm22285_vm4, %v3983_v22, %v3987_v23 }
 0x1ff   : > { %v3013_v42 = vadd.f32 %v2925_v38, %v2269_v35  ;;  %16124 = vmatprep.mubr.msk.bf16.mxu1 %vm22288_vm0, %v22291_v1  ;;  %v1613_v38 = vld [vmem:[#allocation4 + $0x40] sm:$0xff] }
 0x200   : > { %v2184_v40 = vpop.f32.mrf.mxu0  ;;  %v15910_v47 = vpop.f32.mrf.mxu1 }
 0x201   : > { %v2270_v46 = vadd.f32 %v2184_v40, %v1607_v39  ;;  %3054 = vst [vmem:[#allocation4 + $0xd8] sm:$0xff] %v3013_v42  ;;  %v3989_v40 = vshrl.u32 %v17619_v3, 16  ;;  %v17618_v42 = vld [vmem:[#allocation2 + $0xb0] ss:$0 sps:$4 sm:$0x33]  }
 0x202   : > { %v15811_v48 = vpop.f32.mrf.mxu0  ;;  %v2928_v49 = vpop.f32.mrf.mxu1 }
 0x203   : > { %v3014_v52 = vadd.f32 %v2928_v49, %v2270_v46  ;;  %v4553_v46 = vshll.u32 %v18676_v33, 16 }
 0x204   : > { %v2189_v51 = vpop.f32.mrf.mxu0  ;;  %16025 = vmatmul.mubr.bf16.gmra.mxu0 %v17607_v41  ;;  %v15911_v57 = vpop.f32.mrf.mxu1 }
 0x205   : > { %v2271_v56 = vadd.f32 %v2189_v51, %v1608_v50  ;;  %16028 = vmatprep.mubr.msk.bf16.mxu0 %vm22288_vm0, %v22291_v1  ;;  %3055 = vst [vmem:[#allocation4 + $0xa0] sm:$0xff] %v3014_v52  ;;  %v3991_v51 = vor.u32 %v3989_v40, %v3987_v23  ;;  %v1614_v52 = vld [vmem:[#allocation4 + $0x78] sm:$0xff]  ;;  %v17628_v57 = vld [vmem:[#allocation2 + $0x18] sm:$0xfe]  }
 0x206   : > { %v15814_v58 = vpop.f32.mrf.mxu0  ;;  %v2933_v59 = vpop.f32.mrf.mxu1  ;;  %16125 = vmatmul.mubr.bf16.gmra.mxu1 %v3972_v53  ;;  %v18703_v23 = vld [vmem:[#allocation2 + $0x30] sm:$0xff]  }
 0x207   : > { %v3015_v63 = vadd.f32 %v2933_v59, %v2271_v56  ;;  %16128 = vmatprep.mubr.msk.bf16.mxu1 %vm22288_vm0, %v22291_v1  ;;  %v4555_v56 = vrot.slane %v4553_v46, 1  ;;  %v18683_v58 = vld [vmem:[#allocation2 + $0x20] sm:$0xff]  }
 0x208   : > { %v2192_v61 = vpop.f32.mrf.mxu0  ;;  %v15914_v5 = vpop.f32.mrf.mxu1 }
 0x209   : > { %v2272_v4 = vadd.f32 %v2192_v61, %v1609_v60  ;;  %3056 = vst [vmem:[#allocation4 + $0x68] sm:$0xff] %v3015_v63  ;;  %v18687_v61 = vld [vmem:[#allocation2 + $0x28] sm:$0xff]   ;;  %v4556_v3 = vsel %vm22285_vm4, %v4551_v55, %v4555_v56  ;;  %v5266_v5 = vrot.slane %v17628_v57, 1 }
 0x20a   : > { %v15815_v6 = vpop.f32.mrf.mxu0  ;;  %v2936_v7 = vpop.f32.mrf.mxu1  ;;  %v4565_v34 = vshrl.u32 %v18687_v61, 16 }
 0x20b   : > { %v3016_v10 = vadd.f32 %v2936_v7, %v2272_v4  ;;  %v5267_v6 = vrot.slane %v18683_v58, 1 }
 0x20c   : > { %v2197_v9 = vpop.f32.mrf.mxu0  ;;  %16029 = vmatmul.mubr.bf16.gmra.mxu0 %v17609_v62  ;;  %v15915_v15 = vpop.f32.mrf.mxu1 }
 0x20d   : > { %v2273_v14 = vadd.f32 %v2197_v9, %v1610_v8  ;;  %16032 = vmatprep.mubr.msk.bf16.mxu0 %vm22288_vm0, %v22291_v1  ;;  %3057 = vst [vmem:[#allocation4 + $0x130] sm:$0xff] %v3016_v10  ;;  %v17624_v8 = vld [vmem:[%s22278_s1 + $0x238] sm:$0xff]   ;;  %v4557_v10 = vshrl.u32 %v18676_v33, 16 }
 0x20e   : > { %v15818_v16 = vpop.f32.mrf.mxu0  ;;  %v2941_v17 = vpop.f32.mrf.mxu1  ;;  %16129 = vmatmul.mubr.bf16.gmra.mxu1 %v3980_v11  ;;  %v4561_v11 = vshll.u32 %v18687_v61, 16 }
 0x20f   : > { %v3017_v21 = vadd.f32 %v2941_v17, %v2273_v14  ;;  %16132 = vmatprep.mubr.msk.bf16.mxu1 %vm22288_vm0, %v22291_v1  ;;  %v1616_v14 = vld [vmem:[#allocation4 + $0xb8] sm:$0xff]  ;;  %v5268_v17 = vsel %vm22284_vm5, %v5266_v5, %v5267_v6 }
 0x210   : > { %v2200_v19 = vpop.f32.mrf.mxu0  ;;  %v15918_v26 = vpop.f32.mrf.mxu1  ;;  %v4563_v22 = vrot.slane %v4561_v11, 1 }
 0x211   : > { %v2274_v25 = vadd.f32 %v2200_v19, %v1611_v18  ;;  %3058 = vst [vmem:[#allocation4 + $0x50] sm:$0xff] %v3017_v21  ;;  %v18699_v18 = vld [vmem:[#allocation2 + $0x28] sm:$0xff]   ;;  %v4559_v21 = vor.u32 %v4557_v10, %v4555_v56 }
 0x212   : > { %v15819_v27 = vpop.f32.mrf.mxu0  ;;  %v2944_v28 = vpop.f32.mrf.mxu1  ;;  %v4567_v46 = vor.u32 %v4565_v34, %v4563_v22  ;;  %v18772_v34 = vld [vmem:[#allocation2 + $0x48] sm:$0xff]  }
 0x213   : > { %v3018_v31 = vadd.f32 %v2944_v28, %v2274_v25  ;;  %v1617_v27 = vld [vmem:[#allocation4 + $0x60] sm:$0xff] }
 0x214   : > { %v2205_v30 = vpop.f32.mrf.mxu0  ;;  %16033 = vmatmul.mubr.bf16.gmra.mxu0 %v17614_v20  ;;  %v15919_v36 = vpop.f32.mrf.mxu1 }
 0x215   : > { %v2275_v35 = vadd.f32 %v2205_v30, %v1612_v29  ;;  %16036 = vmatprep.mubr.msk.bf16.mxu0 %vm22288_vm0, %v22291_v1  ;;  %3059 = vst [vmem:[#allocation4 + $0xe8] sm:$0xff] %v3018_v31  ;;  %v5269_v30 = vrot.slane %v18699_v18, 1  ;;  %v17639_v36 = vld [vmem:[%s22278_s1 + $0x228] sm:$0xff]  }
 0x216   : > { %v15822_v37 = vpop.f32.mrf.mxu0  ;;  %v2949_v39 = vpop.f32.mrf.mxu1  ;;  %16133 = vmatmul.mubr.bf16.gmra.mxu1 %v3988_v32  ;;  %v4564_v32 = vsel %vm22285_vm4, %v4559_v21, %v4563_v22 }
 0x217   : > { %v3019_v43 = vadd.f32 %v2949_v39, %v2275_v35  ;;  %16136 = vmatprep.mubr.msk.bf16.mxu1 %vm22288_vm0, %v22291_v1  ;;  %v4569_v35 = vshll.u32 %v18703_v23, 16  ;;  %v1618_v39 = vld [vmem:[#allocation4 + $0x28] sm:$0xff] }
 0x218   : > { %v2208_v41 = vpop.f32.mrf.mxu0  ;;  %v15922_v48 = vpop.f32.mrf.mxu1 }
 0x219   : > { %v2276_v47 = vadd.f32 %v2208_v41, %v1613_v38  ;;  %3060 = vst [vmem:[#allocation4] sm:$0xff] %v3019_v43  ;;  %v18720_v43 = vld [vmem:[#allocation2 + $0x30] sm:$0xff]   ;;  %v18724_v48 = vld [vmem:[#allocation2 + $0x38] sm:$0xff]  }
 0x21a   : > { %v15823_v49 = vpop.f32.mrf.mxu0  ;;  %v2952_v50 = vpop.f32.mrf.mxu1  ;;  %v5271_v57 = vrot.slane %v18720_v43, 1  ;;  %v4581_v21 = vshrl.u32 %v18724_v48, 16 }
 0x21b   : > { %v3020_v54 = vadd.f32 %v2952_v50, %v2276_v47  ;;  %v4571_v47 = vrot.slane %v4569_v35, 1  ;;  %v17645_v49 = vld [vmem:[%s22278_s1 + $0x220] sm:$0xff]  }
 0x21c   : > { %v2213_v53 = vpop.f32.mrf.mxu0  ;;  %16037 = vmatmul.mubr.bf16.gmra.mxu0 %v17618_v42  ;;  %v15923_v60 = vpop.f32.mrf.mxu1  ;;  %v5270_v42 = vsel %vm22284_vm5, %v5267_v6, %v5269_v30  ;;  %v17670_v35 = vld [vmem:[%s22278_s1 + $0x200] sm:$0xff]  }
 0x21d   : > { %v2277_v59 = vadd.f32 %v2213_v53, %v1614_v52  ;;  %16156 = vmatprep.mubr.msk.bf16.mxu0 %vm22288_vm0, %v22291_v1  ;;  %3061 = vst [vmem:[#allocation4 + $0x40] sm:$0xff] %v3020_v54  ;;  %v235_v53 = vld [vmem:[#allocation2 + $0xb8] sm:$0xf]  ;;  %v4572_v60 = vsel %vm22285_vm4, %v4567_v46, %v4571_v47 }
 0x21e   : > { %v15826_v62 = vpop.f32.mrf.mxu0  ;;  %v2957_v63 = vpop.f32.mrf.mxu1  ;;  %16137 = vmatmul.mubr.bf16.gmra.mxu1 %v3991_v51  ;;  %v1619_v54 = vld [vmem:[#allocation4 + $0x140] sm:$0xff]  ;;  %v236_v58 = vsel %vm18730_vm8, 0, %v235_v53 }
 0x21f   : > { %v3021_v4 = vadd.f32 %v2957_v63, %v2277_v59  ;;  %16256 = vmatprep.mubr.msk.bf16.mxu1 %vm22288_vm0, %v22291_v1  ;;  %v4573_v62 = vshrl.u32 %v18703_v23, 16  ;;  %v4577_v63 = vshll.u32 %v18724_v48, 16  ;;  %237 = vst [vmem:[#allocation2 + $0xb8] sm:$0xf] %v236_v58  ;;  %v17663_v23 = vld [vmem:[%s22278_s1 + $0x208] sm:$0xff]   ;;  %v4593_v48 = vshll.u32 %v18772_v34, 16 }
 0x220   : > { %v2216_v2 = vpop.f32.mrf.mxu0  ;;  %v15926_v9 = vpop.f32.mrf.mxu1 }
 0x221   : > { %v2278_v7 = vadd.f32 %v2216_v2, %v1615_v0  ;;  %3062 = vst [vmem:[#allocation4 + $0x78] sm:$0xff] %v3021_v4  ;;  %v17651_v0 = vld [vmem:[%s22278_s1 + $0x218] sm:$0xff]   ;;  %v1620_v4 = vld [vmem:[#allocation4 + $0x58] sm:$0xf]  ;;  %v4575_v11 = vor.u32 %v4573_v62, %v4571_v47 }
 0x222   : > { %v15827_v12 = vpop.f32.mrf.mxu0  ;;  %v2960_v13 = vpop.f32.mrf.mxu1 }
 0x223   : > { %v3022_v16 = vadd.f32 %v2960_v13, %v2278_v7  ;;  %v5272_v7 = vsel %vm22284_vm5, %v5269_v30, %v5271_v57  ;;  %v4579_v12 = vrot.slane %v4577_v63, 1  ;;  %v18751_v13 = vld [vmem:[#allocation2 + $0x40] sm:$0xff]  }
 0x224   : > { %v2221_v15 = vpop.f32.mrf.mxu0  ;;  %16157 = vmatmul.mubr.bf16.vlgmr.msra.gmra.mxu0 %v4556_v3  ;;  %v15927_v20 = vpop.f32.mrf.mxu1  ;;  %v4585_v22 = vshll.u32 %v18751_v13, 16  ;;  %v4589_v47 = vshrl.u32 %v18751_v13, 16 }
 0x225   : > { %v2279_v19 = vadd.f32 %v2221_v15, %v1616_v14  ;;  %16341 = vmatpush3.bf16.msra.mxu0 %v17624_v8  ;;  %16160 = vmatprep.mubr.msk.bf16.mxu0 %vm22288_vm0, %v22291_v1  ;;  %3063 = vst [vmem:[#allocation4 + $0x30] sm:$0xff] %v3022_v16  ;;  %v18747_v8 = vld [vmem:[#allocation2 + $0x38] sm:$0xff]   ;;  %v17658_v14 = vld [vmem:[%s22278_s1 + $0x210] sm:$0xff]  }
 0x226   : > { %v15830_v25 = vpop.f32.mrf.mxu0  ;;  %16342 = vmatprep.subr.bf16.mxu0 %v22291_v1  ;;  %v2965_v26 = vpop.f32.mrf.mxu1  ;;  %16257 = vmatmul.mubr.bf16.vlgmr.msra.gmra.mxu1 %v5268_v17  ;;  %v5273_v18 = vrot.slane %v18747_v8, 1  ;;  %v4597_v8 = vshrl.u32 %v18772_v34, 16 }
 0x227   : > { %v3023_v29 = vadd.f32 %v2965_v26, %v2279_v19  ;;  %16260 = vmatprep.mubr.msk.bf16.mxu1 %vm22288_vm0, %v22291_v1  ;;  %v4580_v19 = vsel %vm22285_vm4, %v4575_v11, %v4579_v12  ;;  %v3069_v26 = vld [vmem:[#allocation4 + $0xb0] sm:$0xff] }
 0x228   : > { %v2224_v28 = vpop.f32.mrf.mxu0  ;;  %v15930_v33 = vpop.f32.mrf.mxu1 }
 0x229   : > { %v2280_v31 = vadd.f32 %v2224_v28, %v1617_v27  ;;  %16343 = vmatpush3.bf16.msra.mxu0 %v17632_v24  ;;  %3064 = vst [vmem:[#allocation4 + $0xb8] sm:$0xff] %v3023_v29  ;;  %v5274_v28 = vsel %vm22284_vm5, %v5271_v57, %v5273_v18  ;;  %v18768_v29 = vld [vmem:[#allocation2 + $0x40] sm:$0xff]   ;;  %v4587_v33 = vrot.slane %v4585_v22, 1 }
 0x22a   : > { %v15831_v37 = vpop.f32.mrf.mxu0  ;;  %16344 = vmatprep.subr.bf16.mxu0 %v22291_v1  ;;  %v2968_v38 = vpop.f32.mrf.mxu1  ;;  %v5275_v43 = vrot.slane %v18768_v29, 1 }
 0x22b   : > { %v3024_v41 = vadd.f32 %v2968_v38, %v2280_v31 }
 0x22c   : > { %v2229_v40 = vpop.f32.mrf.mxu0  ;;  %16161 = vmatmul.mubr.bf16.gmra.mxu0 %v4564_v32  ;;  %v15931_v45 = vpop.f32.mrf.mxu1  ;;  %v4583_v32 = vor.u32 %v4581_v21, %v4579_v12  ;;  %v3073_v12 = vld [vmem:[#allocation4 + $0x120] sm:$0xff] }
 0x22d   : > { %v2281_v44 = vadd.f32 %v2229_v40, %v1618_v39  ;;  %16164 = vmatprep.mubr.msk.bf16.mxu0 %vm22288_vm0, %v22291_v1  ;;  %16345 = vmatpush3.bf16.msra.mxu0 %v17639_v36  ;;  %3065 = vst [vmem:[#allocation4 + $0x60] sm:$0xff] %v3024_v41  ;;  %v3070_v40 = vld [vmem:[#allocation4 + $0xd0] sm:$0xff]  ;;  %v17642_v21 = vld [vmem:[#allocation2 + $0x58] sm:$0xff]  }
 0x22e   : > { %v15834_v50 = vpop.f32.mrf.mxu0  ;;  %16346 = vmatprep.subr.bf16.mxu0 %v22291_v1  ;;  %v2973_v51 = vpop.f32.mrf.mxu1  ;;  %16261 = vmatmul.mubr.bf16.gmra.mxu1 %v5270_v42  ;;  %v4588_v45 = vsel %vm22285_vm4, %v4583_v32, %v4587_v33  ;;  %v4609_v32 = vshll.u32 %v17642_v21, 16 }
 0x22f   : > { %v3025_v56 = vadd.f32 %v2973_v51, %v2281_v44  ;;  %16264 = vmatprep.mubr.msk.bf16.mxu1 %vm22288_vm0, %v22291_v1  ;;  %v3071_v51 = vld [vmem:[#allocation4 + $0x10] sm:$0xff] }
 0x230   : > { %v2232_v55 = vpop.f32.mrf.mxu0  ;;  %v15934_v61 = vpop.f32.mrf.mxu1 }
 0x231   : > { %v2282_v59 = vadd.f32 %v2232_v55, %v1619_v54  ;;  %16347 = vmatpush3.bf16.msra.mxu0 %v17645_v49  ;;  %3066 = vst [vmem:[#allocation4 + $0x28] sm:$0xff] %v3025_v56  ;;  %v5276_v55 = vsel %vm22284_vm5, %v5273_v18, %v5275_v43  ;;  %v17641_v56 = vld [vmem:[#allocation2 + $0x48] sm:$0xff]   ;;  %v17640_v61 = vld [vmem:[#allocation2 + $0x50] sm:$0xff]  }
 0x232   : > { %v15835_v2 = vpop.f32.mrf.mxu0  ;;  %16348 = vmatprep.subr.bf16.mxu0 %v22291_v1  ;;  %v2976_v3 = vpop.f32.mrf.mxu1 }
 0x233   : > { %v3026_v6 = vadd.f32 %v2976_v3, %v2282_v59  ;;  %v4591_v59 = vor.u32 %v4589_v47, %v4587_v33  ;;  %v3076_v47 = vld [vmem:[#allocation4 + $0x100] sm:$0xff] }
 0x234   : > { %v2237_v5 = vpop.f32.mrf.mxu0  ;;  %16165 = vmatmul.mubr.bf16.gmra.mxu0 %v4572_v60  ;;  %v15935_v10 = vpop.f32.mrf.mxu1  ;;  %v4595_v60 = vrot.slane %v4593_v48, 1 }
 0x235   : > { %v2283_v9 = vadd.f32 %v2237_v5, %v1620_v4  ;;  %16168 = vmatprep.mubr.msk.bf16.mxu0 %vm22288_vm0, %v22291_v1  ;;  %16349 = vmatpush3.bf16.msra.mxu0 %v17651_v0  ;;  %3067 = vst [vmem:[#allocation4 + $0x140] sm:$0xff] %v3026_v6  ;;  %v3072_v0 = vld [vmem:[#allocation4 + $0x48] sm:$0xff]  ;;  %v5277_v4 = vrot.slane %v17641_v56, 1 }
 0x236   : > { %v15838_v15 = vpop.f32.mrf.mxu0  ;;  %16350 = vmatprep.subr.bf16.mxu0 %v22291_v1  ;;  %v2981_v16 = vpop.f32.mrf.mxu1  ;;  %16265 = vmatmul.mubr.bf16.gmra.mxu1 %v5272_v7  ;;  %v4596_v6 = vsel %vm22285_vm4, %v4591_v59, %v4595_v60  ;;  %v3077_v59 = vld [vmem:[#allocation4 + $0x80] sm:$0xff] }
 0x237   : > { %2324 = vst [vmem:[#allocation4 + $0x58] sm:$0xf] %v2283_v9  ;;  %16268 = vmatprep.mubr.msk.bf16.mxu1 %vm22288_vm0, %v22291_v1  ;;  %v4601_v9 = vshll.u32 %v17640_v61, 16  ;;  %v5278_v15 = vsel %vm22284_vm5, %v5275_v43, %v5277_v4  ;;  %v4611_v43 = vrot.slane %v4609_v32, 1 }
 0x238   : > { %v2240_v17 = vpop.f32.mrf.mxu0  ;;  %v15938_v20 = vpop.f32.mrf.mxu1 }
 0x239   : > { %16351 = vmatpush3.bf16.msra.mxu0 %v17658_v14  ;;  %v4603_v20 = vrot.slane %v4601_v9, 1 }
 0x23a   : > { %v15839_v24 = vpop.f32.mrf.mxu0  ;;  %16352 = vmatprep.subr.bf16.mxu0 %v22291_v1  ;;  %v2984_v25 = vpop.f32.mrf.mxu1 }
 0x23b   : > { %v3074_v24 = vld [vmem:[#allocation4 + $0x38] sm:$0xff] }
 0x23c   : > { %v3374_v27 = vpop.f32.mrf.mxu0  ;;  %16169 = vmatmul.mubr.bf16.gmra.mxu0 %v4580_v19  ;;  %v15939_v31 = vpop.f32.mrf.mxu1  ;;  %v4599_v19 = vor.u32 %v4597_v8, %v4595_v60  ;;  %v3078_v8 = vld [vmem:[#allocation4 + $0x108] sm:$0xff] }
 0x23d   : > { %v3540_v30 = vadd.f32 %v3374_v27, %v3069_v26  ;;  %16172 = vmatprep.mubr.msk.bf16.mxu0 %vm22288_vm0, %v22291_v1  ;;  %16353 = vmatpush3.bf16.msra.mxu0 %v17663_v23  ;;  %v4605_v31 = vshrl.u32 %v17640_v61, 16 }
 0x23e   : > { %v2365_v36 = vld [vmem:[#allocation4 + $0x58] sm:$0xf]  ;;  %v15958_v37 = vpop.f32.mrf.mxu0  ;;  %16354 = vmatprep.subr.bf16.mxu0 %v22291_v1  ;;  %v4095_v39 = vpop.f32.mrf.mxu1  ;;  %16269 = vmatmul.mubr.bf16.gmra.mxu1 %v5274_v28  ;;  %v4604_v29 = vsel %vm22285_vm4, %v4599_v19, %v4603_v20 }
 0x23f   : > { %v3027_v38 = vadd.f32 %v2981_v16, %v2365_v36  ;;  %v4261_v42 = vadd.f32 %v4095_v39, %v3540_v30  ;;  %16272 = vmatprep.mubr.msk.bf16.mxu1 %vm22288_vm0, %v22291_v1  ;;  %v17643_v16 = vld [vmem:[#allocation2 + $0x50] sm:$0xff]   ;;  %v17646_v39 = vld [vmem:[#allocation2 + $0x58] sm:$0xff]  }
 0x240   : > { %v3377_v41 = vpop.f32.mrf.mxu0  ;;  %v16058_v46 = vpop.f32.mrf.mxu1  ;;  %v5279_v27 = vrot.slane %v17643_v16, 1  ;;  %v3079_v19 = vld [vmem:[#allocation4 + $0x138] sm:$0xff] }
 0x241   : > { %3068 = vst [vmem:[#allocation4 + $0x58] sm:$0xf] %v3027_v38  ;;  %v3541_v44 = vadd.f32 %v3377_v41, %v3070_v40  ;;  %16355 = vmatpush3.bf16.msra.mxu0 %v17670_v35  ;;  %4302 = vst [vmem:[#allocation4 + $0xb0] sm:$0xff] %v4261_v42  ;;  %v3075_v35 = vld [vmem:[#allocation4 + $0xf8] sm:$0xff]  ;;  %v4607_v42 = vor.u32 %v4605_v31, %v4603_v20  ;;  %v3080_v31 = vld [vmem:[#allocation4 + $0xf0] sm:$0xff] }
 0x242   : > { %v15959_v49 = vpop.f32.mrf.mxu0  ;;  %16540 = vmatprep.subr.bf16.mxu0 %v22291_v1  ;;  %v4098_v50 = vpop.f32.mrf.mxu1  ;;  %v5280_v38 = vsel %vm22284_vm5, %v5277_v4, %v5279_v27 }
 0x243   : > { %v4262_v54 = vadd.f32 %v4098_v50, %v3541_v44  ;;  %v17644_v44 = vld [vmem:[#allocation2 + $0x60] sm:$0xff]   ;;  %v5281_v50 = vrot.slane %v17646_v39, 1 }
 0x244   : > { %v3382_v53 = vpop.f32.mrf.mxu0  ;;  %16173 = vmatmul.mubr.bf16.gmra.mxu0 %v4588_v45  ;;  %v16059_v58 = vpop.f32.mrf.mxu1  ;;  %v4617_v56 = vshll.u32 %v17644_v44, 16 }
 0x245   : > { %v3542_v57 = vadd.f32 %v3382_v53, %v3071_v51  ;;  %16176 = vmatprep.mubr.msk.bf16.mxu0 %vm22288_vm0, %v22291_v1  ;;  %4303 = vst [vmem:[#allocation4 + $0xd0] sm:$0xff] %v4262_v54  ;;  %v4612_v53 = vsel %vm22285_vm4, %v4607_v42, %v4611_v43  ;;  %v3081_v42 = vld [vmem:[#allocation4 + $0x18] sm:$0xff] }
 0x246   : > { %v15962_v62 = vpop.f32.mrf.mxu0  ;;  %v4103_v63 = vpop.f32.mrf.mxu1  ;;  %16273 = vmatmul.mubr.bf16.gmra.mxu1 %v5276_v55  ;;  %v4613_v55 = vshrl.u32 %v17642_v21, 16  ;;  %v4619_v4 = vrot.slane %v4617_v56, 1 }
 0x247   : > { %v4263_v3 = vadd.f32 %v4103_v63, %v3542_v57  ;;  %16276 = vmatprep.mubr.msk.bf16.mxu1 %vm22288_vm0, %v22291_v1  ;;  %v5282_v62 = vsel %vm22284_vm5, %v5279_v27, %v5281_v50  ;;  %v17648_v63 = vld [vmem:[#allocation2 + $0x60] sm:$0xff]  }
 0x248   : > { %v3385_v2 = vpop.f32.mrf.mxu0  ;;  %v16062_v7 = vpop.f32.mrf.mxu1 }
 0x249   : > { %v3543_v5 = vadd.f32 %v3385_v2, %v3072_v0  ;;  %4304 = vst [vmem:[#allocation4 + $0x10] sm:$0xff] %v4263_v3  ;;  %v4615_v3 = vor.u32 %v4613_v55, %v4611_v43  ;;  %v3082_v55 = vld [vmem:[#allocation4 + $0xc8] sm:$0xff] }
 0x24a   : > { %v15963_v10 = vpop.f32.mrf.mxu0  ;;  %v4106_v11 = vpop.f32.mrf.mxu1 }
 0x24b   : > { %v4264_v14 = vadd.f32 %v4106_v11, %v3543_v5  ;;  %v17647_v5 = vld [vmem:[#allocation2 + $0x68] sm:$0xff]   ;;  %v5283_v11 = vrot.slane %v17648_v63, 1 }
 0x24c   : > { %v3390_v13 = vpop.f32.mrf.mxu0  ;;  %16177 = vmatmul.mubr.bf16.gmra.mxu0 %v4596_v6  ;;  %v16063_v18 = vpop.f32.mrf.mxu1  ;;  %v4625_v16 = vshll.u32 %v17647_v5, 16 }
 0x24d   : > { %v3544_v17 = vadd.f32 %v3390_v13, %v3073_v12  ;;  %16180 = vmatprep.mubr.msk.bf16.mxu0 %vm22288_vm0, %v22291_v1  ;;  %4305 = vst [vmem:[#allocation4 + $0x48] sm:$0xff] %v4264_v14  ;;  %v4620_v13 = vsel %vm22285_vm4, %v4615_v3, %v4619_v4  ;;  %v3083_v3 = vld [vmem:[#allocation4 + $0x70] sm:$0xff] }
 0x24e   : > { %v15966_v22 = vpop.f32.mrf.mxu0  ;;  %v4111_v23 = vpop.f32.mrf.mxu1  ;;  %16277 = vmatmul.mubr.bf16.gmra.mxu1 %v5278_v15  ;;  %v4621_v15 = vshrl.u32 %v17644_v44, 16  ;;  %v4627_v27 = vrot.slane %v4625_v16, 1 }
 0x24f   : > { %v4265_v26 = vadd.f32 %v4111_v23, %v3544_v17  ;;  %16280 = vmatprep.mubr.msk.bf16.mxu1 %vm22288_vm0, %v22291_v1  ;;  %v5284_v22 = vsel %vm22284_vm5, %v5281_v50, %v5283_v11  ;;  %v17650_v23 = vld [vmem:[#allocation2 + $0x68] sm:$0xff]  }
 0x250   : > { %v3393_v25 = vpop.f32.mrf.mxu0  ;;  %v16066_v30 = vpop.f32.mrf.mxu1 }
 0x251   : > { %v3545_v28 = vadd.f32 %v3393_v25, %v3074_v24  ;;  %4306 = vst [vmem:[#allocation4 + $0x120] sm:$0xff] %v4265_v26  ;;  %v4623_v26 = vor.u32 %v4621_v15, %v4619_v4  ;;  %v3084_v15 = vld [vmem:[#allocation4 + $0x20] sm:$0xff] }
 0x252   : > { %v15967_v33 = vpop.f32.mrf.mxu0  ;;  %v4114_v34 = vpop.f32.mrf.mxu1 }
 0x253   : > { %v4266_v37 = vadd.f32 %v4114_v34, %v3545_v28  ;;  %v17649_v28 = vld [vmem:[#allocation2 + $0x70] sm:$0xff]   ;;  %v5285_v34 = vrot.slane %v17650_v23, 1 }
 0x254   : > { %v3398_v36 = vpop.f32.mrf.mxu0  ;;  %16181 = vmatmul.mubr.bf16.gmra.mxu0 %v4604_v29  ;;  %v16067_v41 = vpop.f32.mrf.mxu1  ;;  %v4633_v39 = vshll.u32 %v17649_v28, 16 }
 0x255   : > { %v3546_v40 = vadd.f32 %v3398_v36, %v3075_v35  ;;  %16184 = vmatprep.mubr.msk.bf16.mxu0 %vm22288_vm0, %v22291_v1  ;;  %4307 = vst [vmem:[#allocation4 + $0x38] sm:$0xff] %v4266_v37  ;;  %v4628_v36 = vsel %vm22285_vm4, %v4623_v26, %v4627_v27  ;;  %v3085_v26 = vld [vmem:[#allocation4 + $0x128] sm:$0xff] }
 0x256   : > { %v15970_v45 = vpop.f32.mrf.mxu0  ;;  %v4119_v46 = vpop.f32.mrf.mxu1  ;;  %16281 = vmatmul.mubr.bf16.gmra.mxu1 %v5280_v38  ;;  %v4629_v38 = vshrl.u32 %v17647_v5, 16  ;;  %v4635_v50 = vrot.slane %v4633_v39, 1 }
 0x257   : > { %v4267_v49 = vadd.f32 %v4119_v46, %v3546_v40  ;;  %16284 = vmatprep.mubr.msk.bf16.mxu1 %vm22288_vm0, %v22291_v1  ;;  %v5286_v45 = vsel %vm22284_vm5, %v5283_v11, %v5285_v34  ;;  %v17653_v46 = vld [vmem:[#allocation2 + $0x70] sm:$0xff]  }
 0x258   : > { %v3401_v48 = vpop.f32.mrf.mxu0  ;;  %v16070_v54 = vpop.f32.mrf.mxu1 }
 0x259   : > { %v3547_v51 = vadd.f32 %v3401_v48, %v3076_v47  ;;  %4308 = vst [vmem:[#allocation4 + $0xf8] sm:$0xff] %v4267_v49  ;;  %v4631_v49 = vor.u32 %v4629_v38, %v4627_v27  ;;  %v3086_v38 = vld [vmem:[#allocation4 + $0x110] sm:$0xff] }
 0x25a   : > { %v15971_v57 = vpop.f32.mrf.mxu0  ;;  %v4122_v58 = vpop.f32.mrf.mxu1 }
 0x25b   : > { %v4268_v61 = vadd.f32 %v4122_v58, %v3547_v51  ;;  %v17652_v51 = vld [vmem:[#allocation2 + $0x78] sm:$0xff]   ;;  %v5287_v58 = vrot.slane %v17653_v46, 1 }
 0x25c   : > { %v3406_v60 = vpop.f32.mrf.mxu0  ;;  %16185 = vmatmul.mubr.bf16.gmra.mxu0 %v4612_v53  ;;  %v16071_v2 = vpop.f32.mrf.mxu1  ;;  %v4641_v63 = vshll.u32 %v17652_v51, 16 }
 0x25d   : > { %v3548_v0 = vadd.f32 %v3406_v60, %v3077_v59  ;;  %16188 = vmatprep.mubr.msk.bf16.mxu0 %vm22288_vm0, %v22291_v1  ;;  %4309 = vst [vmem:[#allocation4 + $0x100] sm:$0xff] %v4268_v61  ;;  %v4636_v60 = vsel %vm22285_vm4, %v4631_v49, %v4635_v50  ;;  %v3087_v49 = vld [vmem:[#allocation4 + $0x8] sm:$0xff] }
 0x25e   : > { %v15974_v6 = vpop.f32.mrf.mxu0  ;;  %v4127_v7 = vpop.f32.mrf.mxu1  ;;  %16285 = vmatmul.mubr.bf16.gmra.mxu1 %v5282_v62  ;;  %v4637_v62 = vshrl.u32 %v17649_v28, 16  ;;  %v4643_v11 = vrot.slane %v4641_v63, 1 }
 0x25f   : > { %v4269_v10 = vadd.f32 %v4127_v7, %v3548_v0  ;;  %16288 = vmatprep.mubr.msk.bf16.mxu1 %vm22288_vm0, %v22291_v1  ;;  %v5288_v6 = vsel %vm22284_vm5, %v5285_v34, %v5287_v58  ;;  %v17655_v7 = vld [vmem:[#allocation2 + $0x78] sm:$0xff]  }
 0x260   : > { %v3409_v9 = vpop.f32.mrf.mxu0  ;;  %v16074_v14 = vpop.f32.mrf.mxu1 }
 0x261   : > { %v3549_v12 = vadd.f32 %v3409_v9, %v3078_v8  ;;  %4310 = vst [vmem:[#allocation4 + $0x80] sm:$0xff] %v4269_v10  ;;  %v4639_v10 = vor.u32 %v4637_v62, %v4635_v50  ;;  %v3088_v62 = vld [vmem:[#allocation4 + $0x98] sm:$0xff] }
 0x262   : > { %v15975_v17 = vpop.f32.mrf.mxu0  ;;  %v4130_v18 = vpop.f32.mrf.mxu1 }
 0x263   : > { %v4270_v21 = vadd.f32 %v4130_v18, %v3549_v12  ;;  %v17654_v12 = vld [vmem:[#allocation2 + $0x80] sm:$0xff]   ;;  %v5289_v18 = vrot.slane %v17655_v7, 1 }
 0x264   : > { %v3414_v20 = vpop.f32.mrf.mxu0  ;;  %16189 = vmatmul.mubr.bf16.gmra.mxu0 %v4620_v13  ;;  %v16075_v25 = vpop.f32.mrf.mxu1  ;;  %v4649_v23 = vshll.u32 %v17654_v12, 16 }
 0x265   : > { %v3550_v24 = vadd.f32 %v3414_v20, %v3079_v19  ;;  %16192 = vmatprep.mubr.msk.bf16.mxu0 %vm22288_vm0, %v22291_v1  ;;  %4311 = vst [vmem:[#allocation4 + $0x108] sm:$0xff] %v4270_v21  ;;  %v4644_v20 = vsel %vm22285_vm4, %v4639_v10, %v4643_v11  ;;  %v3089_v10 = vld [vmem:[#allocation4 + $0xa8] sm:$0xff] }
 0x266   : > { %v15978_v29 = vpop.f32.mrf.mxu0  ;;  %v4135_v30 = vpop.f32.mrf.mxu1  ;;  %16289 = vmatmul.mubr.bf16.gmra.mxu1 %v5284_v22  ;;  %v4645_v22 = vshrl.u32 %v17652_v51, 16  ;;  %v4651_v34 = vrot.slane %v4649_v23, 1  ;;  %v3090_v23 = vld [vmem:[#allocation4 + $0x90] sm:$0xff] }
 0x267   : > { %v4271_v33 = vadd.f32 %v4135_v30, %v3550_v24  ;;  %16292 = vmatprep.mubr.msk.bf16.mxu1 %vm22288_vm0, %v22291_v1  ;;  %v5290_v29 = vsel %vm22284_vm5, %v5287_v58, %v5289_v18  ;;  %v17657_v30 = vld [vmem:[#allocation2 + $0x80] sm:$0xff]  }
 0x268   : > { %v3417_v32 = vpop.f32.mrf.mxu0  ;;  %v16078_v37 = vpop.f32.mrf.mxu1 }
 0x269   : > { %v3551_v35 = vadd.f32 %v3417_v32, %v3080_v31  ;;  %4312 = vst [vmem:[#allocation4 + $0x138] sm:$0xff] %v4271_v33  ;;  %v4647_v33 = vor.u32 %v4645_v22, %v4643_v11 }
 0x26a   : > { %v15979_v40 = vpop.f32.mrf.mxu0  ;;  %v4138_v41 = vpop.f32.mrf.mxu1 }
 0x26b   : > { %v4272_v44 = vadd.f32 %v4138_v41, %v3551_v35  ;;  %v17656_v35 = vld [vmem:[#allocation2 + $0x88] sm:$0xff]   ;;  %v5291_v41 = vrot.slane %v17657_v30, 1 }
 0x26c   : > { %v3422_v43 = vpop.f32.mrf.mxu0  ;;  %16193 = vmatmul.mubr.bf16.gmra.mxu0 %v4628_v36  ;;  %v16079_v48 = vpop.f32.mrf.mxu1  ;;  %v4657_v46 = vshll.u32 %v17656_v35, 16 }
 0x26d   : > { %v3552_v47 = vadd.f32 %v3422_v43, %v3081_v42  ;;  %16196 = vmatprep.mubr.msk.bf16.mxu0 %vm22288_vm0, %v22291_v1  ;;  %4313 = vst [vmem:[#allocation4 + $0xf0] sm:$0xff] %v4272_v44  ;;  %v4652_v43 = vsel %vm22285_vm4, %v4647_v33, %v4651_v34 }
 0x26e   : > { %v15982_v53 = vpop.f32.mrf.mxu0  ;;  %v4143_v54 = vpop.f32.mrf.mxu1  ;;  %16293 = vmatmul.mubr.bf16.gmra.mxu1 %v5286_v45  ;;  %v4653_v45 = vshrl.u32 %v17654_v12, 16  ;;  %v4659_v58 = vrot.slane %v4657_v46, 1  ;;  %v3092_v46 = vld [vmem:[#allocation4 + $0x88] sm:$0xff] }
 0x26f   : > { %v4273_v57 = vadd.f32 %v4143_v54, %v3552_v47  ;;  %16296 = vmatprep.mubr.msk.bf16.mxu1 %vm22288_vm0, %v22291_v1  ;;  %v5292_v53 = vsel %vm22284_vm5, %v5289_v18, %v5291_v41  ;;  %v17660_v54 = vld [vmem:[#allocation2 + $0x88] sm:$0xff]  }
 0x270   : > { %v3425_v56 = vpop.f32.mrf.mxu0  ;;  %v16082_v61 = vpop.f32.mrf.mxu1 }
 0x271   : > { %v3553_v59 = vadd.f32 %v3425_v56, %v3082_v55  ;;  %4314 = vst [vmem:[#allocation4 + $0x18] sm:$0xff] %v4273_v57  ;;  %v4655_v57 = vor.u32 %v4653_v45, %v4651_v34  ;;  %v3091_v34 = vld [vmem:[#allocation4 + $0xe0] sm:$0xff] }
 0x272   : > { %v15983_v0 = vpop.f32.mrf.mxu0  ;;  %v4146_v2 = vpop.f32.mrf.mxu1 }
 0x273   : > { %v4274_v5 = vadd.f32 %v4146_v2, %v3553_v59  ;;  %v17659_v59 = vld [vmem:[#allocation2 + $0x90] sm:$0xff]   ;;  %v5293_v2 = vrot.slane %v17660_v54, 1 }
 0x274   : > { %v3430_v4 = vpop.f32.mrf.mxu0  ;;  %16197 = vmatmul.mubr.bf16.gmra.mxu0 %v4636_v60  ;;  %v16083_v9 = vpop.f32.mrf.mxu1  ;;  %v4665_v7 = vshll.u32 %v17659_v59, 16  ;;  %v4669_v30 = vshrl.u32 %v17659_v59, 16 }
 0x275   : > { %v3554_v8 = vadd.f32 %v3430_v4, %v3083_v3  ;;  %16200 = vmatprep.mubr.msk.bf16.mxu0 %vm22288_vm0, %v22291_v1  ;;  %4315 = vst [vmem:[#allocation4 + $0xc8] sm:$0xff] %v4274_v5  ;;  %v4660_v4 = vsel %vm22285_vm4, %v4655_v57, %v4659_v58 }
 0x276   : > { %v15986_v13 = vpop.f32.mrf.mxu0  ;;  %v4151_v14 = vpop.f32.mrf.mxu1  ;;  %16297 = vmatmul.mubr.bf16.gmra.mxu1 %v5288_v6  ;;  %v4661_v6 = vshrl.u32 %v17656_v35, 16  ;;  %v4667_v18 = vrot.slane %v4665_v7, 1  ;;  %v3094_v7 = vld [vmem:[#allocation4 + $0x118] sm:$0xff] }
 0x277   : > { %v4275_v17 = vadd.f32 %v4151_v14, %v3554_v8  ;;  %16300 = vmatprep.mubr.msk.bf16.mxu1 %vm22288_vm0, %v22291_v1  ;;  %v5294_v13 = vsel %vm22284_vm5, %v5291_v41, %v5293_v2  ;;  %v17662_v14 = vld [vmem:[#allocation2 + $0x90] sm:$0xff]  }
 0x278   : > { %v3433_v16 = vpop.f32.mrf.mxu0  ;;  %v16086_v21 = vpop.f32.mrf.mxu1  ;;  %v4671_v41 = vor.u32 %v4669_v30, %v4667_v18 }
 0x279   : > { %v3555_v19 = vadd.f32 %v3433_v16, %v3084_v15  ;;  %4316 = vst [vmem:[#allocation4 + $0x70] sm:$0xff] %v4275_v17  ;;  %v4663_v17 = vor.u32 %v4661_v6, %v4659_v58  ;;  %v3093_v58 = vld [vmem:[#allocation4 + $0xc0] sm:$0xff] }
 0x27a   : > { %v15987_v24 = vpop.f32.mrf.mxu0  ;;  %v4154_v25 = vpop.f32.mrf.mxu1 }
 0x27b   : > { %v4276_v28 = vadd.f32 %v4154_v25, %v3555_v19  ;;  %v17661_v19 = vld [vmem:[#allocation2 + $0x98] sm:$0xff]  }
 0x27c   : > { %v3438_v27 = vpop.f32.mrf.mxu0  ;;  %16201 = vmatmul.mubr.bf16.gmra.mxu0 %v4644_v20  ;;  %v16087_v32 = vpop.f32.mrf.mxu1  ;;  %v17684_v20 = vld [vmem:[%s22280_s3 + $0x38] sm:$0xff]   ;;  %v4677_v54 = vshrl.u32 %v17661_v19, 16 }
 0x27d   : > { %v3556_v31 = vadd.f32 %v3438_v27, %v3085_v26  ;;  %16204 = vmatprep.mubr.msk.bf16.mxu0 %vm22288_vm0, %v22291_v1  ;;  %4317 = vst [vmem:[#allocation4 + $0x20] sm:$0xff] %v4276_v28  ;;  %v5295_v26 = vrot.slane %v17662_v14, 1  ;;  %16441 = vmatpush3.bf16.msra.mxu1 %v17684_v20  ;;  %v4668_v28 = vsel %vm22285_vm4, %v4663_v17, %v4667_v18 }
 0x27e   : > { %v15990_v36 = vpop.f32.mrf.mxu0  ;;  %v4159_v37 = vpop.f32.mrf.mxu1  ;;  %16301 = vmatmul.mubr.bf16.gmra.mxu1 %v5290_v29  ;;  %16442 = vmatprep.subr.bf16.mxu1 %v22291_v1 }
 0x27f   : > { %v4277_v40 = vadd.f32 %v4159_v37, %v3556_v31  ;;  %16304 = vmatprep.mubr.msk.bf16.mxu1 %vm22288_vm0, %v22291_v1  ;;  %v4673_v31 = vshll.u32 %v17661_v19, 16  ;;  %v5296_v37 = vsel %vm22284_vm5, %v5293_v2, %v5295_v26  ;;  %v3095_v19 = vld [vmem:[#allocation4 + $0xd8] sm:$0xff] }
 0x280   : > { %v3441_v39 = vpop.f32.mrf.mxu0  ;;  %v16090_v44 = vpop.f32.mrf.mxu1 }
 0x281   : > { %v3557_v42 = vadd.f32 %v3441_v39, %v3086_v38  ;;  %4318 = vst [vmem:[#allocation4 + $0x128] sm:$0xff] %v4277_v40  ;;  %v17665_v38 = vld [vmem:[#allocation2 + $0x98] sm:$0xff]  }
 0x282   : > { %v15991_v47 = vpop.f32.mrf.mxu0  ;;  %v4162_v48 = vpop.f32.mrf.mxu1 }
 0x283   : > { %v4278_v51 = vadd.f32 %v4162_v48, %v3557_v42  ;;  %v4675_v42 = vrot.slane %v4673_v31, 1  ;;  %v3096_v31 = vld [vmem:[#allocation4 + $0xa0] sm:$0xff] }
 0x284   : > { %v3446_v50 = vpop.f32.mrf.mxu0  ;;  %16205 = vmatmul.mubr.bf16.gmra.mxu0 %v4652_v43  ;;  %v16091_v56 = vpop.f32.mrf.mxu1  ;;  %v17664_v43 = vld [vmem:[#allocation2 + $0xa0] sm:$0xff]  }
 0x285   : > { %v3558_v55 = vadd.f32 %v3446_v50, %v3087_v49  ;;  %16208 = vmatprep.mubr.msk.bf16.mxu0 %vm22288_vm0, %v22291_v1  ;;  %4319 = vst [vmem:[#allocation4 + $0x110] sm:$0xff] %v4278_v51  ;;  %v5297_v49 = vrot.slane %v17665_v38, 1  ;;  %v4676_v51 = vsel %vm22285_vm4, %v4671_v41, %v4675_v42  ;;  %v4679_v2 = vor.u32 %v4677_v54, %v4675_v42  ;;  %v3097_v42 = vld [vmem:[#allocation4 + $0x68] sm:$0xff] }
 0x286   : > { %v15994_v60 = vpop.f32.mrf.mxu0  ;;  %v4167_v61 = vpop.f32.mrf.mxu1  ;;  %16305 = vmatmul.mubr.bf16.gmra.mxu1 %v5292_v53  ;;  %v4685_v14 = vshrl.u32 %v17664_v43, 16 }
 0x287   : > { %v4279_v0 = vadd.f32 %v4167_v61, %v3558_v55  ;;  %16308 = vmatprep.mubr.msk.bf16.mxu1 %vm22288_vm0, %v22291_v1  ;;  %v4681_v55 = vshll.u32 %v17664_v43, 16  ;;  %v5298_v61 = vsel %vm22284_vm5, %v5295_v26, %v5297_v49 }
 0x288   : > { %v3449_v63 = vpop.f32.mrf.mxu0  ;;  %v16094_v5 = vpop.f32.mrf.mxu1 }
 0x289   : > { %v3559_v3 = vadd.f32 %v3449_v63, %v3088_v62  ;;  %4320 = vst [vmem:[#allocation4 + $0x8] sm:$0xff] %v4279_v0  ;;  %v17667_v62 = vld [vmem:[#allocation2 + $0xa0] sm:$0xff]  }
 0x28a   : > { %v15995_v8 = vpop.f32.mrf.mxu0  ;;  %v4170_v9 = vpop.f32.mrf.mxu1 }
 0x28b   : > { %v4280_v12 = vadd.f32 %v4170_v9, %v3559_v3  ;;  %v4683_v3 = vrot.slane %v4681_v55, 1  ;;  %v3098_v55 = vld [vmem:[#allocation4 + $0x130] sm:$0xff] }
 0x28c   : > { %v3454_v11 = vpop.f32.mrf.mxu0  ;;  %16209 = vmatmul.mubr.bf16.gmra.mxu0 %v4660_v4  ;;  %v16095_v16 = vpop.f32.mrf.mxu1  ;;  %v17666_v4 = vld [vmem:[#allocation2 + $0xa8] sm:$0xff]  }
 0x28d   : > { %v3560_v15 = vadd.f32 %v3454_v11, %v3089_v10  ;;  %16212 = vmatprep.mubr.msk.bf16.mxu0 %vm22288_vm0, %v22291_v1  ;;  %4321 = vst [vmem:[#allocation4 + $0x98] sm:$0xff] %v4280_v12  ;;  %v5299_v10 = vrot.slane %v17667_v62, 1  ;;  %v4684_v12 = vsel %vm22285_vm4, %v4679_v2, %v4683_v3  ;;  %v17687_v16 = vld [vmem:[%s22280_s3 + $0x30] sm:$0xff]   ;;  %v4687_v26 = vor.u32 %v4685_v14, %v4683_v3  ;;  %v18881_v3 = vld [vmem:[#allocation2 + $0xb8] ss:$0 sps:$4 sm:$0x77]  }
 0x28e   : > { %v15998_v21 = vpop.f32.mrf.mxu0  ;;  %v4175_v22 = vpop.f32.mrf.mxu1  ;;  %16309 = vmatmul.mubr.bf16.gmra.mxu1 %v5294_v13  ;;  %v4693_v38 = vshrl.u32 %v17666_v4, 16 }
 0x28f   : > { %v4281_v25 = vadd.f32 %v4175_v22, %v3560_v15  ;;  %16312 = vmatprep.mubr.msk.bf16.mxu1 %vm22288_vm0, %v22291_v1  ;;  %v4689_v15 = vshll.u32 %v17666_v4, 16  ;;  %16443 = vmatpush3.bf16.msra.mxu1 %v17687_v16  ;;  %v5300_v22 = vsel %vm22284_vm5, %v5297_v49, %v5299_v10  ;;  %v3099_v4 = vld [vmem:[#allocation4 + $0x50] sm:$0xff]  ;;  %v3100_v16 = vld [vmem:[#allocation4 + $0xe8] sm:$0xff] }
 0x290   : > { %v3457_v24 = vpop.f32.mrf.mxu0  ;;  %v16098_v29 = vpop.f32.mrf.mxu1  ;;  %16444 = vmatprep.subr.bf16.mxu1 %v22291_v1 }
 0x291   : > { %v3561_v27 = vadd.f32 %v3457_v24, %v3090_v23  ;;  %4322 = vst [vmem:[#allocation4 + $0xa8] sm:$0xff] %v4281_v25  ;;  %v17669_v23 = vld [vmem:[#allocation2 + $0xa8] sm:$0xff]  }
 0x292   : > { %v15999_v32 = vpop.f32.mrf.mxu0  ;;  %v4178_v33 = vpop.f32.mrf.mxu1 }
 0x293   : > { %v4282_v36 = vadd.f32 %v4178_v33, %v3561_v27  ;;  %v4691_v27 = vrot.slane %v4689_v15, 1  ;;  %v5305_v15 = vrot.slane %v18881_v3, 1 }
 0x294   : > { %v3462_v35 = vpop.f32.mrf.mxu0  ;;  %16213 = vmatmul.mubr.bf16.gmra.mxu0 %v4668_v28  ;;  %v16099_v40 = vpop.f32.mrf.mxu1  ;;  %v17668_v28 = vld [vmem:[#allocation2 + $0xb0] sm:$0xff]  }
 0x295   : > { %v3562_v39 = vadd.f32 %v3462_v35, %v3091_v34  ;;  %16216 = vmatprep.mubr.msk.bf16.mxu0 %vm22288_vm0, %v22291_v1  ;;  %4323 = vst [vmem:[#allocation4 + $0x90] sm:$0xff] %v4282_v36  ;;  %v5301_v34 = vrot.slane %v17669_v23, 1  ;;  %v4692_v36 = vsel %vm22285_vm4, %v4687_v26, %v4691_v27  ;;  %v4695_v49 = vor.u32 %v4693_v38, %v4691_v27  ;;  %v17675_v23 = vld [vmem:[#allocation2 + $0x20] sm:$0xff]   ;;  %v3101_v27 = vld [vmem:[#allocation4] sm:$0xff] }
 0x296   : > { %v16002_v44 = vpop.f32.mrf.mxu0  ;;  %v4183_v45 = vpop.f32.mrf.mxu1  ;;  %16313 = vmatmul.mubr.bf16.gmra.mxu1 %v5296_v37  ;;  %v4701_v62 = vshrl.u32 %v17668_v28, 16 }
 0x297   : > { %v4283_v48 = vadd.f32 %v4183_v45, %v3562_v39  ;;  %16316 = vmatprep.mubr.msk.bf16.mxu1 %vm22288_vm0, %v22291_v1  ;;  %v4697_v39 = vshll.u32 %v17668_v28, 16  ;;  %v5302_v45 = vsel %vm22284_vm5, %v5299_v10, %v5301_v34 }
 0x298   : > { %v3465_v47 = vpop.f32.mrf.mxu0  ;;  %v16102_v53 = vpop.f32.mrf.mxu1 }
 0x299   : > { %v3563_v50 = vadd.f32 %v3465_v47, %v3092_v46  ;;  %4324 = vst [vmem:[#allocation4 + $0xe0] sm:$0xff] %v4283_v48  ;;  %v17672_v46 = vld [vmem:[#allocation2 + $0xb0] sm:$0xff]  }
 0x29a   : > { %v16003_v56 = vpop.f32.mrf.mxu0  ;;  %v4186_v57 = vpop.f32.mrf.mxu1 }
 0x29b   : > { %v4284_v60 = vadd.f32 %v4186_v57, %v3563_v50  ;;  %v4699_v50 = vrot.slane %v4697_v39, 1  ;;  %v3102_v39 = vld [vmem:[#allocation4 + $0x40] sm:$0xff] }
 0x29c   : > { %v3470_v59 = vpop.f32.mrf.mxu0  ;;  %16217 = vmatmul.mubr.bf16.gmra.mxu0 %v4676_v51  ;;  %v16103_v0 = vpop.f32.mrf.mxu1  ;;  %v18875_v51 = vld [vmem:[#allocation2 + $0xb8] ss:$0 sps:$4 sm:$0x77]  }
 0x29d   : > { %v3564_v63 = vadd.f32 %v3470_v59, %v3093_v58  ;;  %16220 = vmatprep.mubr.msk.bf16.mxu0 %vm22288_vm0, %v22291_v1  ;;  %4325 = vst [vmem:[#allocation4 + $0x88] sm:$0xff] %v4284_v60  ;;  %v5303_v58 = vrot.slane %v17672_v46, 1  ;;  %v4700_v60 = vsel %vm22285_vm4, %v4695_v49, %v4699_v50  ;;  %v4703_v10 = vor.u32 %v4701_v62, %v4699_v50  ;;  %v17676_v49 = vld [vmem:[#allocation2 + $0x28] sm:$0xff]  }
 0x29e   : > { %v16006_v5 = vpop.f32.mrf.mxu0  ;;  %v4191_v6 = vpop.f32.mrf.mxu1  ;;  %16317 = vmatmul.mubr.bf16.gmra.mxu1 %v5298_v61 }
 0x29f   : > { %v4285_v9 = vadd.f32 %v4191_v6, %v3564_v63  ;;  %16320 = vmatprep.mubr.msk.bf16.mxu1 %vm22288_vm0, %v22291_v1  ;;  %v4705_v63 = vshll.u32 %v18875_v51, 16  ;;  %v5306_v26 = vsel %vm22284_vm5, %v5303_v58, %v5305_v15 }
 0x2a0   : > { %v3473_v8 = vpop.f32.mrf.mxu0  ;;  %v16106_v13 = vpop.f32.mrf.mxu1 }
 0x2a1   : > { %v3565_v11 = vadd.f32 %v3473_v8, %v3094_v7  ;;  %4326 = vst [vmem:[#allocation4 + $0xc0] sm:$0xff] %v4285_v9  ;;  %v5304_v7 = vsel %vm22284_vm5, %v5301_v34, %v5303_v58  ;;  %v17691_v13 = vld [vmem:[%s22280_s3 + $0x28] sm:$0xff]  }
 0x2a2   : > { %v16007_v17 = vpop.f32.mrf.mxu0  ;;  %v4194_v18 = vpop.f32.mrf.mxu1  ;;  %16445 = vmatpush3.bf16.msra.mxu1 %v17691_v13  ;;  %v3105_v13 = vld [vmem:[#allocation4 + $0xb8] sm:$0xff] }
 0x2a3   : > { %v4286_v21 = vadd.f32 %v4194_v18, %v3565_v11  ;;  %v4707_v11 = vrot.slane %v4705_v63, 1  ;;  %16446 = vmatprep.subr.bf16.mxu1 %v22291_v1 }
 0x2a4   : > { %v3478_v20 = vpop.f32.mrf.mxu0  ;;  %16221 = vmatmul.mubr.bf16.gmra.mxu0 %v4684_v12  ;;  %v16107_v25 = vpop.f32.mrf.mxu1 }
 0x2a5   : > { %v3566_v24 = vadd.f32 %v3478_v20, %v3095_v19  ;;  %16224 = vmatprep.mubr.msk.bf16.mxu0 %vm22288_vm0, %v22291_v1  ;;  %4327 = vst [vmem:[#allocation4 + $0x118] sm:$0xff] %v4286_v21  ;;  %v17674_v19 = vld [vmem:[#allocation2 + $0x18] sm:$0xfe]   ;;  %v4708_v21 = vsel %vm22285_vm4, %v4703_v10, %v4707_v11 }
 0x2a6   : > { %v16010_v29 = vpop.f32.mrf.mxu0  ;;  %v4199_v30 = vpop.f32.mrf.mxu1  ;;  %16321 = vmatmul.mubr.bf16.gmra.mxu1 %v5300_v22 }
 0x2a7   : > { %v4287_v33 = vadd.f32 %v4199_v30, %v3566_v24  ;;  %16324 = vmatprep.mubr.msk.bf16.mxu1 %vm22288_vm0, %v22291_v1  ;;  %v4709_v30 = vshrl.u32 %v18875_v51, 16 }
 0x2a8   : > { %v3481_v32 = vpop.f32.mrf.mxu0  ;;  %v16110_v37 = vpop.f32.mrf.mxu1 }
 0x2a9   : > { %v3567_v35 = vadd.f32 %v3481_v32, %v3096_v31  ;;  %4328 = vst [vmem:[#allocation4 + $0xd8] sm:$0xff] %v4287_v33  ;;  %v5862_v31 = vshrl.u32 %v17674_v19, 16  ;;  %v5865_v32 = vshll.u32 %v17674_v19, 16 }
 0x2aa   : > { %v16011_v40 = vpop.f32.mrf.mxu0  ;;  %v4202_v41 = vpop.f32.mrf.mxu1 }
 0x2ab   : > { %v4288_v44 = vadd.f32 %v4202_v41, %v3567_v35  ;;  %v5870_v35 = vshrl.u32 %v17675_v23, 16  ;;  %v4711_v41 = vor.u32 %v4709_v30, %v4707_v11  ;;  %v17694_v11 = vld [vmem:[%s22280_s3 + $0x20] sm:$0xff]  }
 0x2ac   : > { %v3486_v43 = vpop.f32.mrf.mxu0  ;;  %16225 = vmatmul.mubr.bf16.gmra.mxu0 %v4692_v36  ;;  %v16111_v48 = vpop.f32.mrf.mxu1  ;;  %v5873_v36 = vshll.u32 %v17675_v23, 16  ;;  %16447 = vmatpush3.bf16.msra.mxu1 %v17694_v11  ;;  %v3106_v23 = vld [vmem:[#allocation4 + $0x60] sm:$0xff] }
 0x2ad   : > { %v3568_v47 = vadd.f32 %v3486_v43, %v3097_v42  ;;  %16228 = vmatprep.mubr.msk.bf16.mxu0 %vm22288_vm0, %v22291_v1  ;;  %4329 = vst [vmem:[#allocation4 + $0xa0] sm:$0xff] %v4288_v44  ;;  %v5864_v43 = vrot.slane %v5862_v31, 1  ;;  %v5867_v44 = vrot.slane %v5865_v32, 2  ;;  %16448 = vmatprep.subr.bf16.mxu1 %v22291_v1  ;;  %v17678_v31 = vld [vmem:[#allocation2 + $0x38] sm:$0xff]  }
 0x2ae   : > { %v16014_v53 = vpop.f32.mrf.mxu0  ;;  %v4207_v54 = vpop.f32.mrf.mxu1  ;;  %16325 = vmatmul.mubr.bf16.gmra.mxu1 %v5302_v45  ;;  %v5875_v48 = vrot.slane %v5873_v36, 2 }
 0x2af   : > { %v4289_v57 = vadd.f32 %v4207_v54, %v3568_v47  ;;  %16328 = vmatprep.mubr.msk.bf16.mxu1 %vm22288_vm0, %v22291_v1  ;;  %v5872_v47 = vrot.slane %v5870_v35, 1  ;;  %v3103_v53 = vld [vmem:[#allocation4 + $0x78] sm:$0xff] }
 0x2b0   : > { %v3489_v56 = vpop.f32.mrf.mxu0  ;;  %v16114_v61 = vpop.f32.mrf.mxu1 }
 0x2b1   : > { %v3569_v59 = vadd.f32 %v3489_v56, %v3098_v55  ;;  %4330 = vst [vmem:[#allocation4 + $0x68] sm:$0xff] %v4289_v57  ;;  %v5868_v56 = vor.u32 %v5867_v44, %v5864_v43  ;;  %v5882_v61 = vshll.u32 %v17676_v49, 16  ;;  %v3108_v44 = vld [vmem:[#allocation4 + $0x140] sm:$0xff] }
 0x2b2   : > { %v16015_v0 = vpop.f32.mrf.mxu0  ;;  %v4210_v2 = vpop.f32.mrf.mxu1 }
 0x2b3   : > { %v4290_v6 = vadd.f32 %v4210_v2, %v3569_v59  ;;  %v5876_v59 = vor.u32 %v5875_v48, %v5872_v47  ;;  %v3104_v0 = vld [vmem:[#allocation4 + $0x30] sm:$0xff] }
 0x2b4   : > { %v3494_v5 = vpop.f32.mrf.mxu0  ;;  %16229 = vmatmul.mubr.bf16.gmra.mxu0 %v4700_v60  ;;  %v16115_v9 = vpop.f32.mrf.mxu1  ;;  %v5879_v60 = vshrl.u32 %v17676_v49, 16 }
 0x2b5   : > { %v3570_v8 = vadd.f32 %v3494_v5, %v3099_v4  ;;  %16232 = vmatprep.mubr.msk.bf16.mxu0 %vm22288_vm0, %v22291_v1  ;;  %4331 = vst [vmem:[#allocation4 + $0x130] sm:$0xff] %v4290_v6  ;;  %v5877_v5 = vsel %vm22283_vm9, %v5868_v56, %v5876_v59  ;;  %v17677_v9 = vld [vmem:[#allocation2 + $0x30] sm:$0xff]  }
 0x2b6   : > { %v16018_v12 = vpop.f32.mrf.mxu0  ;;  %v4215_v14 = vpop.f32.mrf.mxu1  ;;  %16329 = vmatmul.mubr.bf16.gmra.mxu1 %v5304_v7  ;;  %v5881_v7 = vrot.slane %v5879_v60, 1  ;;  %v5888_v19 = vshrl.u32 %v17677_v9, 16  ;;  %v3109_v56 = vld [vmem:[#allocation4 + $0x58] sm:$0xf] }
 0x2b7   : > { %v4291_v18 = vadd.f32 %v4215_v14, %v3570_v8  ;;  %16332 = vmatprep.mubr.msk.bf16.mxu1 %vm22288_vm0, %v22291_v1  ;;  %v5884_v8 = vrot.slane %v5882_v61, 2 }
 0x2b8   : > { %v3497_v17 = vpop.f32.mrf.mxu0  ;;  %v16118_v22 = vpop.f32.mrf.mxu1 }
 0x2b9   : > { %v3571_v20 = vadd.f32 %v3497_v17, %v3100_v16  ;;  %4332 = vst [vmem:[#allocation4 + $0x50] sm:$0xff] %v4291_v18  ;;  %v5885_v18 = vor.u32 %v5884_v8, %v5881_v7  ;;  %v17680_v8 = vld [vmem:[#allocation2 + $0x48] sm:$0xff]  }
 0x2ba   : > { %v16019_v24 = vpop.f32.mrf.mxu0  ;;  %v4218_v25 = vpop.f32.mrf.mxu1 }
 0x2bb   : > { %v4292_v29 = vadd.f32 %v4218_v25, %v3571_v20  ;;  %v5891_v20 = vshll.u32 %v17677_v9, 16  ;;  %v17698_v9 = vld [vmem:[%s22280_s3 + $0x18] sm:$0xff]  }
 0x2bc   : > { %v3502_v28 = vpop.f32.mrf.mxu0  ;;  %16233 = vmatmul.mubr.bf16.gmra.mxu0 %v4708_v21  ;;  %v16119_v34 = vpop.f32.mrf.mxu1  ;;  %16449 = vmatpush3.bf16.msra.mxu1 %v17698_v9 }
 0x2bd   : > { %v3572_v33 = vadd.f32 %v3502_v28, %v3101_v27  ;;  %16236 = vmatprep.mubr.msk.bf16.mxu0 %vm22288_vm0, %v22291_v1  ;;  %4333 = vst [vmem:[#allocation4 + $0xe8] sm:$0xff] %v4292_v29  ;;  %v5886_v27 = vsel %vm22283_vm9, %v5876_v59, %v5885_v18  ;;  %v5890_v29 = vrot.slane %v5888_v19, 1  ;;  %v5893_v30 = vrot.slane %v5891_v20, 2  ;;  %v3107_v34 = vld [vmem:[#allocation4 + $0x28] sm:$0xff]  ;;  %16450 = vmatprep.subr.bf16.mxu1 %v22291_v1 }
 0x2be   : > { %v16022_v37 = vpop.f32.mrf.mxu0  ;;  %v4223_v38 = vpop.f32.mrf.mxu1  ;;  %16333 = vmatmul.mubr.bf16.gmra.mxu1 %v5306_v26 }
 0x2bf   : > { %v4293_v42 = vadd.f32 %v4223_v38, %v3572_v33  ;;  %16336 = vmatprep.mubr.msk.bf16.mxu1 %vm22288_vm0, %v22291_v1 }
 0x2c0   : > { %v3505_v40 = vpop.f32.mrf.mxu0  ;;  %v16122_v46 = vpop.f32.mrf.mxu1 }
 0x2c1   : > { %v3573_v45 = vadd.f32 %v3505_v40, %v3102_v39  ;;  %4334 = vst [vmem:[#allocation4] sm:$0xff] %v4293_v42  ;;  %v5894_v39 = vor.u32 %v5893_v30, %v5890_v29  ;;  %v5897_v40 = vshrl.u32 %v17678_v31, 16 }
 0x2c2   : > { %v16023_v50 = vpop.f32.mrf.mxu0  ;;  %v4226_v51 = vpop.f32.mrf.mxu1 }
 0x2c3   : > { %v4294_v55 = vadd.f32 %v4226_v51, %v3573_v45  ;;  %v5895_v48 = vsel %vm22283_vm9, %v5885_v18, %v5894_v39  ;;  %v5899_v50 = vrot.slane %v5897_v40, 1  ;;  %v5918_v18 = vshll.u32 %v17680_v8, 16 }
 0x2c4   : > { %v3510_v54 = vpop.f32.mrf.mxu0  ;;  %16237 = vmatmul.mubr.bf16.gmra.mxu0 %v4711_v41  ;;  %v16123_v58 = vpop.f32.mrf.mxu1  ;;  %v5900_v41 = vshll.u32 %v17678_v31, 16  ;;  %v17681_v31 = vld [vmem:[#allocation2 + $0x50] sm:$0xff]  }
 0x2c5   : > { %v3574_v57 = vadd.f32 %v3510_v54, %v3103_v53  ;;  %16356 = vmatprep.mubr.msk.bf16.mxu0 %vm22288_vm0, %v22291_v1  ;;  %4335 = vst [vmem:[#allocation4 + $0x40] sm:$0xff] %v4294_v55  ;;  %v17679_v53 = vld [vmem:[#allocation2 + $0x40] sm:$0xff]   ;;  %v5920_v30 = vrot.slane %v5918_v18, 2  ;;  %v5924_v40 = vshrl.u32 %v17681_v31, 16 }
 0x2c6   : > { %v16026_v62 = vpop.f32.mrf.mxu0  ;;  %v4231_v63 = vpop.f32.mrf.mxu1  ;;  %16337 = vmatmul.mubr.bf16.gmra.mxu1 %v5305_v15  ;;  %v5902_v51 = vrot.slane %v5900_v41, 2  ;;  %v5927_v41 = vshll.u32 %v17681_v31, 16 }
 0x2c7   : > { %v4295_v3 = vadd.f32 %v4231_v63, %v3574_v57  ;;  %16456 = vmatprep.mubr.msk.bf16.mxu1 %vm22288_vm0, %v22291_v1  ;;  %v5906_v62 = vshrl.u32 %v17679_v53, 16  ;;  %v5909_v63 = vshll.u32 %v17679_v53, 16  ;;  %v17682_v53 = vld [vmem:[#allocation2 + $0x58] sm:$0xff]  }
 0x2c8   : > { %v3513_v2 = vpop.f32.mrf.mxu0  ;;  %v16126_v6 = vpop.f32.mrf.mxu1  ;;  %v5903_v61 = vor.u32 %v5902_v51, %v5899_v50  ;;  %v5926_v50 = vrot.slane %v5924_v40, 1  ;;  %v5929_v51 = vrot.slane %v5927_v41, 2 }
 0x2c9   : > { %v3575_v4 = vadd.f32 %v3513_v2, %v3104_v0  ;;  %4336 = vst [vmem:[#allocation4 + $0x78] sm:$0xff] %v4295_v3  ;;  %v5908_v6 = vrot.slane %v5906_v62, 1  ;;  %v5911_v7 = vrot.slane %v5909_v63, 2  ;;  %v5933_v62 = vshrl.u32 %v17682_v53, 16 }
 0x2ca   : > { %v16027_v10 = vpop.f32.mrf.mxu0  ;;  %v4234_v12 = vpop.f32.mrf.mxu1  ;;  %v5936_v63 = vshll.u32 %v17682_v53, 16 }
 0x2cb   : > { %v4296_v15 = vadd.f32 %v4234_v12, %v3575_v4  ;;  %v5904_v4 = vsel %vm22283_vm9, %v5894_v39, %v5903_v61  ;;  %v4343_v12 = vld [vmem:[#allocation4 + $0xb0] sm:$0xff] }
 0x2cc   : > { %v3518_v14 = vpop.f32.mrf.mxu0  ;;  %16357 = vmatmul.mubr.bf16.vlgmr.msra.gmra.mxu0 %v5877_v5  ;;  %v16127_v17 = vpop.f32.mrf.mxu1 }
 0x2cd   : > { %v3576_v16 = vadd.f32 %v3518_v14, %v3105_v13  ;;  %16360 = vmatprep.mubr.msk.bf16.mxu0 %vm22288_vm0, %v22291_v1  ;;  %4337 = vst [vmem:[#allocation4 + $0x30] sm:$0xff] %v4296_v15  ;;  %v5915_v17 = vshrl.u32 %v17680_v8, 16 }
 0x2ce   : > { %v16030_v21 = vpop.f32.mrf.mxu0  ;;  %v4239_v22 = vpop.f32.mrf.mxu1 }
 0x2cf   : > { %v4297_v25 = vadd.f32 %v4239_v22, %v3576_v16  ;;  %v5912_v16 = vor.u32 %v5911_v7, %v5908_v6  ;;  %v5917_v29 = vrot.slane %v5915_v17, 1 }
 0x2d0   : > { %v3521_v24 = vpop.f32.mrf.mxu0  ;;  %v16130_v28 = vpop.f32.mrf.mxu1 }
 0x2d1   : > { %v3577_v26 = vadd.f32 %v3521_v24, %v3106_v23  ;;  %4338 = vst [vmem:[#allocation4 + $0xb8] sm:$0xff] %v4297_v25  ;;  %v4344_v23 = vld [vmem:[#allocation4 + $0xd0] sm:$0xff]  ;;  %v5921_v39 = vor.u32 %v5920_v30, %v5917_v29 }
 0x2d2   : > { %v16031_v32 = vpop.f32.mrf.mxu0  ;;  %v4242_v33 = vpop.f32.mrf.mxu1 }
 0x2d3   : > { %v4298_v36 = vadd.f32 %v4242_v33, %v3577_v26 }
 0x2d4   : > { %v3526_v35 = vpop.f32.mrf.mxu0  ;;  %16361 = vmatmul.mubr.bf16.gmra.mxu0 %v5886_v27  ;;  %v16131_v38 = vpop.f32.mrf.mxu1  ;;  %v5913_v27 = vsel %vm22283_vm9, %v5903_v61, %v5912_v16  ;;  %v5930_v61 = vor.u32 %v5929_v51, %v5926_v50 }
 0x2d5   : > { %v3578_v37 = vadd.f32 %v3526_v35, %v3107_v34  ;;  %16364 = vmatprep.mubr.msk.bf16.mxu0 %vm22288_vm0, %v22291_v1  ;;  %4339 = vst [vmem:[#allocation4 + $0x60] sm:$0xff] %v4298_v36  ;;  %v4345_v34 = vld [vmem:[#allocation4 + $0x10] sm:$0xff] }
 0x2d6   : > { %v16034_v42 = vpop.f32.mrf.mxu0  ;;  %v4247_v43 = vpop.f32.mrf.mxu1  ;;  %v5931_v8 = vsel %vm22283_vm9, %v5921_v39, %v5930_v61 }
 0x2d7   : > { %v4299_v46 = vadd.f32 %v4247_v43, %v3578_v37 }
 0x2d8   : > { %v3529_v45 = vpop.f32.mrf.mxu0  ;;  %v16134_v49 = vpop.f32.mrf.mxu1 }
 0x2d9   : > { %v3579_v47 = vadd.f32 %v3529_v45, %v3108_v44  ;;  %4340 = vst [vmem:[#allocation4 + $0x28] sm:$0xff] %v4299_v46  ;;  %v4346_v44 = vld [vmem:[#allocation4 + $0x48] sm:$0xff] }
 0x2da   : > { %v16035_v54 = vpop.f32.mrf.mxu0  ;;  %v4250_v55 = vpop.f32.mrf.mxu1 }
 0x2db   : > { %v4300_v58 = vadd.f32 %v4250_v55, %v3579_v47 }
 0x2dc   : > { %v3534_v57 = vpop.f32.mrf.mxu0  ;;  %16365 = vmatmul.mubr.bf16.gmra.mxu0 %v5895_v48  ;;  %v16135_v60 = vpop.f32.mrf.mxu1  ;;  %v5922_v48 = vsel %vm22283_vm9, %v5912_v16, %v5921_v39 }
 0x2dd   : > { %v3580_v59 = vadd.f32 %v3534_v57, %v3109_v56  ;;  %16368 = vmatprep.mubr.msk.bf16.mxu0 %vm22288_vm0, %v22291_v1  ;;  %4341 = vst [vmem:[#allocation4 + $0x140] sm:$0xff] %v4300_v58  ;;  %v4347_v56 = vld [vmem:[#allocation4 + $0x120] sm:$0xff] }
 0x2de   : > { %v16038_v0 = vpop.f32.mrf.mxu0  ;;  %v4255_v2 = vpop.f32.mrf.mxu1 }
 0x2df   : > { %3621 = vst [vmem:[#allocation4 + $0x58] sm:$0xf] %v3580_v59  ;;  %v17700_v0 = vld [vmem:[%s22280_s3 + $0x10] sm:$0xff]  }
 0x2e0   : > { %v3537_v3 = vpop.f32.mrf.mxu0  ;;  %v16138_v5 = vpop.f32.mrf.mxu1  ;;  %16451 = vmatpush3.bf16.msra.mxu1 %v17700_v0 }
 0x2e1   : > { %16452 = vmatprep.subr.bf16.mxu1 %v22291_v1 }
 0x2e2   : > { %v16039_v10 = vpop.f32.mrf.mxu0  ;;  %v4258_v11 = vpop.f32.mrf.mxu1 }
 0x2e3   : > { %v5935_v10 = vrot.slane %v5933_v62, 1  ;;  %v5938_v11 = vrot.slane %v5936_v63, 2  ;;  %v17703_v63 = vld [vmem:[%s22280_s3 + $0x70] sm:$0xff]  }
 0x2e4   : > { %v4815_v13 = vpop.f32.mrf.mxu0  ;;  %16369 = vmatmul.mubr.bf16.gmra.mxu0 %v5904_v4  ;;  %v16139_v15 = vpop.f32.mrf.mxu1  ;;  %v4348_v4 = vld [vmem:[#allocation4 + $0x38] sm:$0xff] }
 0x2e5   : > { %v4981_v14 = vadd.f32 %v4815_v13, %v4343_v12  ;;  %16372 = vmatprep.mubr.msk.bf16.mxu0 %vm22288_vm0, %v22291_v1  ;;  %v17683_v12 = vld [vmem:[#allocation2 + $0x60] sm:$0xff]   ;;  %v4349_v15 = vld [vmem:[#allocation4 + $0xf8] sm:$0xff] }
 0x2e6   : > { %v3662_v19 = vld [vmem:[#allocation4 + $0x58] sm:$0xf]  ;;  %v16158_v20 = vpop.f32.mrf.mxu0  ;;  %v5410_v22 = vpop.f32.mrf.mxu1 }
 0x2e7   : > { %v4301_v21 = vadd.f32 %v4255_v2, %v3662_v19  ;;  %v5576_v25 = vadd.f32 %v5410_v22, %v4981_v14  ;;  %v5939_v20 = vor.u32 %v5938_v11, %v5935_v10  ;;  %v5945_v22 = vshll.u32 %v17683_v12, 16  ;;  %v17704_v11 = vld [vmem:[%s22280_s3 + $0x68] sm:$0xff]  }
 0x2e8   : > { %v4818_v24 = vpop.f32.mrf.mxu0  ;;  %v16258_v28 = vpop.f32.mrf.mxu1 }
 0x2e9   : > { %4342 = vst [vmem:[#allocation4 + $0x58] sm:$0xf] %v4301_v21  ;;  %v4982_v26 = vadd.f32 %v4818_v24, %v4344_v23  ;;  %5617 = vst [vmem:[#allocation4 + $0xb0] sm:$0xff] %v5576_v25  ;;  %v5942_v21 = vshrl.u32 %v17683_v12, 16  ;;  %v4350_v25 = vld [vmem:[#allocation4 + $0x100] sm:$0xff]  ;;  %v5940_v29 = vsel %vm22283_vm9, %v5930_v61, %v5939_v20 }
 0x2ea   : > { %v16159_v32 = vpop.f32.mrf.mxu0  ;;  %v5413_v33 = vpop.f32.mrf.mxu1 }
 0x2eb   : > { %v5577_v36 = vadd.f32 %v5413_v33, %v4982_v26  ;;  %v5944_v31 = vrot.slane %v5942_v21, 1  ;;  %v5947_v32 = vrot.slane %v5945_v22, 2  ;;  %v17685_v33 = vld [vmem:[#allocation2 + $0x68] sm:$0xff]  }
 0x2ec   : > { %v4823_v35 = vpop.f32.mrf.mxu0  ;;  %16373 = vmatmul.mubr.bf16.gmra.mxu0 %v5913_v27  ;;  %v16259_v38 = vpop.f32.mrf.mxu1 }
 0x2ed   : > { %v4983_v37 = vadd.f32 %v4823_v35, %v4345_v34  ;;  %16376 = vmatprep.mubr.msk.bf16.mxu0 %vm22288_vm0, %v22291_v1  ;;  %5618 = vst [vmem:[#allocation4 + $0xd0] sm:$0xff] %v5577_v36  ;;  %v4351_v36 = vld [vmem:[#allocation4 + $0x80] sm:$0xff]  ;;  %v5948_v41 = vor.u32 %v5947_v32, %v5944_v31  ;;  %v4356_v31 = vld [vmem:[#allocation4 + $0xc8] sm:$0xff] }
 0x2ee   : > { %v16162_v42 = vpop.f32.mrf.mxu0  ;;  %v5418_v43 = vpop.f32.mrf.mxu1 }
 0x2ef   : > { %v5578_v46 = vadd.f32 %v5418_v43, %v4983_v37  ;;  %v5951_v42 = vshrl.u32 %v17685_v33, 16  ;;  %v5954_v43 = vshll.u32 %v17685_v33, 16  ;;  %v5949_v51 = vsel %vm22283_vm9, %v5939_v20, %v5948_v41  ;;  %v4355_v20 = vld [vmem:[#allocation4 + $0x18] sm:$0xff] }
 0x2f0   : > { %v4826_v45 = vpop.f32.mrf.mxu0  ;;  %v16262_v49 = vpop.f32.mrf.mxu1 }
 0x2f1   : > { %v4984_v47 = vadd.f32 %v4826_v45, %v4346_v44  ;;  %5619 = vst [vmem:[#allocation4 + $0x10] sm:$0xff] %v5578_v46  ;;  %v4352_v46 = vld [vmem:[#allocation4 + $0x108] sm:$0xff]  ;;  %v17702_v49 = vld [vmem:[%s22280_s3 + $0x78] sm:$0xff]  }
 0x2f2   : > { %v16163_v54 = vpop.f32.mrf.mxu0  ;;  %v5421_v55 = vpop.f32.mrf.mxu1  ;;  %16541 = vmatpush3.bf16.msra.mxu0 %v17702_v49 }
 0x2f3   : > { %v5579_v58 = vadd.f32 %v5421_v55, %v4984_v47  ;;  %v5953_v54 = vrot.slane %v5951_v42, 1  ;;  %v5956_v55 = vrot.slane %v5954_v43, 2  ;;  %16542 = vmatprep.subr.bf16.mxu0 %v22291_v1  ;;  %v4357_v43 = vld [vmem:[#allocation4 + $0x70] sm:$0xff] }
 0x2f4   : > { %v4831_v57 = vpop.f32.mrf.mxu0  ;;  %16377 = vmatmul.mubr.bf16.gmra.mxu0 %v5922_v48  ;;  %v16263_v60 = vpop.f32.mrf.mxu1 }
 0x2f5   : > { %v4985_v59 = vadd.f32 %v4831_v57, %v4347_v56  ;;  %16380 = vmatprep.mubr.msk.bf16.mxu0 %vm22288_vm0, %v22291_v1  ;;  %5620 = vst [vmem:[#allocation4 + $0x48] sm:$0xff] %v5579_v58  ;;  %v17686_v56 = vld [vmem:[#allocation2 + $0x70] sm:$0xff]   ;;  %v17701_v58 = vld [vmem:[%s22280_s3 + $0x8] sm:$0xff]  }
 0x2f6   : > { %v16166_v2 = vpop.f32.mrf.mxu0  ;;  %v5426_v3 = vpop.f32.mrf.mxu1  ;;  %v4353_v60 = vld [vmem:[#allocation4 + $0x138] sm:$0xff]  ;;  %16453 = vmatpush3.bf16.msra.mxu1 %v17701_v58  ;;  %16543 = vmatpush3.bf16.msra.mxu0 %v17703_v63  ;;  %v17709_v58 = vld [vmem:[%s22280_s3 + $0x48] sm:$0xff]  }
 0x2f7   : > { %v5580_v6 = vadd.f32 %v5426_v3, %v4985_v59  ;;  %v5957_v3 = vor.u32 %v5956_v55, %v5953_v54  ;;  %16454 = vmatprep.subr.bf16.mxu1 %v22291_v1  ;;  %16544 = vmatprep.subr.bf16.mxu0 %v22291_v1  ;;  %v4358_v55 = vld [vmem:[#allocation4 + $0x20] sm:$0xff] }
 0x2f8   : > { %v4834_v5 = vpop.f32.mrf.mxu0  ;;  %v16266_v9 = vpop.f32.mrf.mxu1 }
 0x2f9   : > { %v4986_v7 = vadd.f32 %v4834_v5, %v4348_v4  ;;  %5621 = vst [vmem:[#allocation4 + $0x120] sm:$0xff] %v5580_v6  ;;  %v5960_v4 = vshrl.u32 %v17686_v56, 16  ;;  %v5963_v5 = vshll.u32 %v17686_v56, 16 }
 0x2fa   : > { %v16167_v13 = vpop.f32.mrf.mxu0  ;;  %v5429_v14 = vpop.f32.mrf.mxu1  ;;  %16545 = vmatpush3.bf16.msra.mxu0 %v17704_v11 }
 0x2fb   : > { %v5581_v17 = vadd.f32 %v5429_v14, %v4986_v7  ;;  %v5958_v13 = vsel %vm22283_vm9, %v5948_v41, %v5957_v3  ;;  %16546 = vmatprep.subr.bf16.mxu0 %v22291_v1 }
 0x2fc   : > { %v4839_v16 = vpop.f32.mrf.mxu0  ;;  %16381 = vmatmul.mubr.bf16.gmra.mxu0 %v5931_v8  ;;  %v16267_v19 = vpop.f32.mrf.mxu1  ;;  %v4354_v8 = vld [vmem:[#allocation4 + $0xf0] sm:$0xff] }
 0x2fd   : > { %v4987_v18 = vadd.f32 %v4839_v16, %v4349_v15  ;;  %16384 = vmatprep.mubr.msk.bf16.mxu0 %vm22288_vm0, %v22291_v1  ;;  %5622 = vst [vmem:[#allocation4 + $0x38] sm:$0xff] %v5581_v17  ;;  %v5962_v15 = vrot.slane %v5960_v4, 1  ;;  %v5965_v16 = vrot.slane %v5963_v5, 2  ;;  %v17688_v17 = vld [vmem:[#allocation2 + $0x78] sm:$0xff]   ;;  %v17706_v4 = vld [vmem:[%s22280_s3] sm:$0xff]  }
 0x2fe   : > { %v16170_v23 = vpop.f32.mrf.mxu0  ;;  %v5434_v24 = vpop.f32.mrf.mxu1  ;;  %v4359_v5 = vld [vmem:[#allocation4 + $0x128] sm:$0xff]  ;;  %16455 = vmatpush3.bf16.msra.mxu1 %v17706_v4 }
 0x2ff   : > { %v5582_v27 = vadd.f32 %v5434_v24, %v4987_v18  ;;  %v17705_v23 = vld [vmem:[%s22280_s3 + $0x60] sm:$0xff]   ;;  %16640 = vmatprep.subr.bf16.mxu1 %v22291_v1 }
 0x300   : > { %v4842_v26 = vpop.f32.mrf.mxu0  ;;  %v16270_v30 = vpop.f32.mrf.mxu1  ;;  %16547 = vmatpush3.bf16.msra.mxu0 %v17705_v23  ;;  %v17695_v4 = vld [vmem:[#allocation2 + $0xa0] sm:$0xff]  }
 0x301   : > { %v4988_v28 = vadd.f32 %v4842_v26, %v4350_v25  ;;  %5623 = vst [vmem:[#allocation4 + $0xf8] sm:$0xff] %v5582_v27  ;;  %v5966_v26 = vor.u32 %v5965_v16, %v5962_v15  ;;  %v5969_v27 = vshrl.u32 %v17688_v17, 16  ;;  %16548 = vmatprep.subr.bf16.mxu0 %v22291_v1  ;;  %v4360_v16 = vld [vmem:[#allocation4 + $0x110] sm:$0xff] }
 0x302   : > { %v16171_v34 = vpop.f32.mrf.mxu0  ;;  %v5437_v35 = vpop.f32.mrf.mxu1 }
 0x303   : > { %v5583_v38 = vadd.f32 %v5437_v35, %v4988_v28  ;;  %v5972_v28 = vshll.u32 %v17688_v17, 16  ;;  %v17707_v34 = vld [vmem:[%s22280_s3 + $0x58] sm:$0xff]  }
 0x304   : > { %v4847_v37 = vpop.f32.mrf.mxu0  ;;  %16385 = vmatmul.mubr.bf16.gmra.mxu0 %v5940_v29  ;;  %v16271_v40 = vpop.f32.mrf.mxu1 }
 0x305   : > { %v4989_v39 = vadd.f32 %v4847_v37, %v4351_v36  ;;  %16388 = vmatprep.mubr.msk.bf16.mxu0 %vm22288_vm0, %v22291_v1  ;;  %5624 = vst [vmem:[#allocation4 + $0x100] sm:$0xff] %v5583_v38  ;;  %v5967_v36 = vsel %vm22283_vm9, %v5957_v3, %v5966_v26  ;;  %v5971_v38 = vrot.slane %v5969_v27, 1  ;;  %v17689_v40 = vld [vmem:[#allocation2 + $0x80] sm:$0xff]   ;;  %16549 = vmatpush3.bf16.msra.mxu0 %v17707_v34 }
 0x306   : > { %v16174_v44 = vpop.f32.mrf.mxu0  ;;  %v5442_v45 = vpop.f32.mrf.mxu1  ;;  %16550 = vmatprep.subr.bf16.mxu0 %v22291_v1  ;;  %v4361_v27 = vld [vmem:[#allocation4 + $0x8] sm:$0xff] }
 0x307   : > { %v5584_v48 = vadd.f32 %v5442_v45, %v4989_v39  ;;  %v5974_v39 = vrot.slane %v5972_v28, 2 }
 0x308   : > { %v4850_v47 = vpop.f32.mrf.mxu0  ;;  %v16274_v53 = vpop.f32.mrf.mxu1 }
 0x309   : > { %v4990_v50 = vadd.f32 %v4850_v47, %v4352_v46  ;;  %5625 = vst [vmem:[#allocation4 + $0x80] sm:$0xff] %v5584_v48  ;;  %v17708_v46 = vld [vmem:[%s22280_s3 + $0x50] sm:$0xff]   ;;  %v5975_v49 = vor.u32 %v5974_v39, %v5971_v38 }
 0x30a   : > { %v16175_v57 = vpop.f32.mrf.mxu0  ;;  %v5445_v59 = vpop.f32.mrf.mxu1  ;;  %16551 = vmatpush3.bf16.msra.mxu0 %v17708_v46 }
 0x30b   : > { %v5585_v62 = vadd.f32 %v5445_v59, %v4990_v50  ;;  %v5978_v50 = vshrl.u32 %v17689_v40, 16  ;;  %16552 = vmatprep.subr.bf16.mxu0 %v22291_v1 }
 0x30c   : > { %v4855_v61 = vpop.f32.mrf.mxu0  ;;  %16389 = vmatmul.mubr.bf16.gmra.mxu0 %v5949_v51  ;;  %v16275_v2 = vpop.f32.mrf.mxu1  ;;  %v5981_v51 = vshll.u32 %v17689_v40, 16 }
 0x30d   : > { %v4991_v0 = vadd.f32 %v4855_v61, %v4353_v60  ;;  %16392 = vmatprep.mubr.msk.bf16.mxu0 %vm22288_vm0, %v22291_v1  ;;  %5626 = vst [vmem:[#allocation4 + $0x108] sm:$0xff] %v5585_v62  ;;  %v5976_v60 = vsel %vm22283_vm9, %v5966_v26, %v5975_v49  ;;  %v5980_v62 = vrot.slane %v5978_v50, 1 }
 0x30e   : > { %v16178_v6 = vpop.f32.mrf.mxu0  ;;  %v5450_v7 = vpop.f32.mrf.mxu1  ;;  %v5983_v63 = vrot.slane %v5981_v51, 2  ;;  %16553 = vmatpush3.bf16.msra.mxu0 %v17709_v58 }
 0x30f   : > { %v5586_v10 = vadd.f32 %v5450_v7, %v4991_v0  ;;  %v17690_v0 = vld [vmem:[#allocation2 + $0x88] sm:$0xff]   ;;  %16554 = vmatprep.subr.bf16.mxu0 %v22291_v1 }
 0x310   : > { %v4858_v9 = vpop.f32.mrf.mxu0  ;;  %v16278_v14 = vpop.f32.mrf.mxu1  ;;  %v5984_v11 = vor.u32 %v5983_v63, %v5980_v62 }
 0x311   : > { %v4992_v12 = vadd.f32 %v4858_v9, %v4354_v8  ;;  %5627 = vst [vmem:[#allocation4 + $0x138] sm:$0xff] %v5586_v10  ;;  %v17710_v8 = vld [vmem:[%s22280_s3 + $0x40] sm:$0xff]  }
 0x312   : > { %v16179_v18 = vpop.f32.mrf.mxu0  ;;  %v5453_v19 = vpop.f32.mrf.mxu1  ;;  %16555 = vmatpush3.bf16.msra.mxu0 %v17710_v8 }
 0x313   : > { %v5587_v22 = vadd.f32 %v5453_v19, %v4992_v12  ;;  %v5987_v12 = vshrl.u32 %v17690_v0, 16  ;;  %16740 = vmatprep.subr.bf16.mxu0 %v22291_v1 }
 0x314   : > { %v4863_v21 = vpop.f32.mrf.mxu0  ;;  %16393 = vmatmul.mubr.bf16.gmra.mxu0 %v5958_v13  ;;  %v16279_v25 = vpop.f32.mrf.mxu1  ;;  %v5990_v13 = vshll.u32 %v17690_v0, 16 }
 0x315   : > { %v4993_v24 = vadd.f32 %v4863_v21, %v4355_v20  ;;  %16396 = vmatprep.mubr.msk.bf16.mxu0 %vm22288_vm0, %v22291_v1  ;;  %5628 = vst [vmem:[#allocation4 + $0xf0] sm:$0xff] %v5587_v22  ;;  %v5985_v20 = vsel %vm22283_vm9, %v5975_v49, %v5984_v11  ;;  %v5989_v22 = vrot.slane %v5987_v12, 1 }
 0x316   : > { %v16182_v29 = vpop.f32.mrf.mxu0  ;;  %v5458_v30 = vpop.f32.mrf.mxu1  ;;  %v5992_v23 = vrot.slane %v5990_v13, 2  ;;  %v6014_v13 = vshrl.u32 %v17695_v4, 16 }
 0x317   : > { %v5588_v33 = vadd.f32 %v5458_v30, %v4993_v24  ;;  %v17692_v24 = vld [vmem:[#allocation2 + $0x90] sm:$0xff]  }
 0x318   : > { %v4866_v32 = vpop.f32.mrf.mxu0  ;;  %v16282_v37 = vpop.f32.mrf.mxu1  ;;  %v5999_v34 = vshll.u32 %v17692_v24, 16 }
 0x319   : > { %v4994_v35 = vadd.f32 %v4866_v32, %v4356_v31  ;;  %5629 = vst [vmem:[#allocation4 + $0x18] sm:$0xff] %v5588_v33  ;;  %v5993_v32 = vor.u32 %v5992_v23, %v5989_v22  ;;  %v5996_v33 = vshrl.u32 %v17692_v24, 16  ;;  %v4362_v37 = vld [vmem:[#allocation4 + $0x98] sm:$0xff]  ;;  %v6016_v23 = vrot.slane %v6014_v13, 1 }
 0x31a   : > { %v16183_v41 = vpop.f32.mrf.mxu0  ;;  %v5461_v42 = vpop.f32.mrf.mxu1 }
 0x31b   : > { %v5589_v45 = vadd.f32 %v5461_v42, %v4994_v35  ;;  %v5994_v41 = vsel %vm22283_vm9, %v5984_v11, %v5993_v32 }
 0x31c   : > { %v4871_v44 = vpop.f32.mrf.mxu0  ;;  %16397 = vmatmul.mubr.bf16.gmra.mxu0 %v5967_v36  ;;  %v16283_v48 = vpop.f32.mrf.mxu1 }
 0x31d   : > { %v4995_v47 = vadd.f32 %v4871_v44, %v4357_v43  ;;  %16400 = vmatprep.mubr.msk.bf16.mxu0 %vm22288_vm0, %v22291_v1  ;;  %5630 = vst [vmem:[#allocation4 + $0xc8] sm:$0xff] %v5589_v45  ;;  %v5998_v43 = vrot.slane %v5996_v33, 1  ;;  %v6001_v44 = vrot.slane %v5999_v34, 2  ;;  %v17693_v45 = vld [vmem:[#allocation2 + $0x98] sm:$0xff]   ;;  %v4363_v48 = vld [vmem:[#allocation4 + $0xa8] sm:$0xff] }
 0x31e   : > { %v16186_v53 = vpop.f32.mrf.mxu0  ;;  %v5466_v54 = vpop.f32.mrf.mxu1 }
 0x31f   : > { %v5590_v57 = vadd.f32 %v5466_v54, %v4995_v47  ;;  %v6002_v54 = vor.u32 %v6001_v44, %v5998_v43 }
 0x320   : > { %v4874_v56 = vpop.f32.mrf.mxu0  ;;  %v16286_v61 = vpop.f32.mrf.mxu1 }
 0x321   : > { %v4996_v59 = vadd.f32 %v4874_v56, %v4358_v55  ;;  %5631 = vst [vmem:[#allocation4 + $0x70] sm:$0xff] %v5590_v57  ;;  %v6005_v55 = vshrl.u32 %v17693_v45, 16  ;;  %v6008_v56 = vshll.u32 %v17693_v45, 16  ;;  %v6003_v63 = vsel %vm22283_vm9, %v5993_v32, %v6002_v54 }
 0x322   : > { %v16187_v2 = vpop.f32.mrf.mxu0  ;;  %v5469_v3 = vpop.f32.mrf.mxu1 }
 0x323   : > { %v5591_v7 = vadd.f32 %v5469_v3, %v4996_v59  ;;  %v4364_v59 = vld [vmem:[#allocation4 + $0x90] sm:$0xff]  ;;  %v6007_v2 = vrot.slane %v6005_v55, 1  ;;  %v6010_v3 = vrot.slane %v6008_v56, 2 }
 0x324   : > { %v4879_v6 = vpop.f32.mrf.mxu0  ;;  %16401 = vmatmul.mubr.bf16.gmra.mxu0 %v5976_v60  ;;  %v16287_v10 = vpop.f32.mrf.mxu1 }
 0x325   : > { %v4997_v9 = vadd.f32 %v4879_v6, %v4359_v5  ;;  %16404 = vmatprep.mubr.msk.bf16.mxu0 %vm22288_vm0, %v22291_v1  ;;  %5632 = vst [vmem:[#allocation4 + $0x20] sm:$0xff] %v5591_v7  ;;  %v4365_v7 = vld [vmem:[#allocation4 + $0xe0] sm:$0xff]  ;;  %v6011_v12 = vor.u32 %v6010_v3, %v6007_v2 }
 0x326   : > { %v16190_v14 = vpop.f32.mrf.mxu0  ;;  %v5474_v15 = vpop.f32.mrf.mxu1 }
 0x327   : > { %v5592_v18 = vadd.f32 %v5474_v15, %v4997_v9  ;;  %v6017_v14 = vshll.u32 %v17695_v4, 16 }
 0x328   : > { %v4882_v17 = vpop.f32.mrf.mxu0  ;;  %v16290_v21 = vpop.f32.mrf.mxu1 }
 0x329   : > { %v4998_v19 = vadd.f32 %v4882_v17, %v4360_v16  ;;  %5633 = vst [vmem:[#allocation4 + $0x128] sm:$0xff] %v5592_v18  ;;  %v4366_v17 = vld [vmem:[#allocation4 + $0x88] sm:$0xff]  ;;  %v6012_v21 = vsel %vm22283_vm9, %v6002_v54, %v6011_v12  ;;  %v6019_v24 = vrot.slane %v6017_v14, 2 }
 0x32a   : > { %v16191_v25 = vpop.f32.mrf.mxu0  ;;  %v5477_v26 = vpop.f32.mrf.mxu1 }
 0x32b   : > { %v5593_v29 = vadd.f32 %v5477_v26, %v4998_v19  ;;  %v17696_v25 = vld [vmem:[#allocation2 + $0xa8] sm:$0xff]   ;;  %v6020_v33 = vor.u32 %v6019_v24, %v6016_v23 }
 0x32c   : > { %v4887_v28 = vpop.f32.mrf.mxu0  ;;  %16405 = vmatmul.mubr.bf16.gmra.mxu0 %v5985_v20  ;;  %v16291_v31 = vpop.f32.mrf.mxu1  ;;  %v6023_v34 = vshrl.u32 %v17696_v25, 16 }
 0x32d   : > { %v4999_v30 = vadd.f32 %v4887_v28, %v4361_v27  ;;  %16408 = vmatprep.mubr.msk.bf16.mxu0 %vm22288_vm0, %v22291_v1  ;;  %5634 = vst [vmem:[#allocation4 + $0x110] sm:$0xff] %v5593_v29  ;;  %v4367_v28 = vld [vmem:[#allocation4 + $0xc0] sm:$0xff] }
 0x32e   : > { %v16194_v35 = vpop.f32.mrf.mxu0  ;;  %v5482_v36 = vpop.f32.mrf.mxu1  ;;  %v6025_v44 = vrot.slane %v6023_v34, 1 }
 0x32f   : > { %v5594_v39 = vadd.f32 %v5482_v36, %v4999_v30  ;;  %v6026_v35 = vshll.u32 %v17696_v25, 16 }
 0x330   : > { %v4890_v38 = vpop.f32.mrf.mxu0  ;;  %v16294_v42 = vpop.f32.mrf.mxu1 }
 0x331   : > { %v5000_v40 = vadd.f32 %v4890_v38, %v4362_v37  ;;  %5635 = vst [vmem:[#allocation4 + $0x8] sm:$0xff] %v5594_v39  ;;  %v4368_v38 = vld [vmem:[#allocation4 + $0x118] sm:$0xff]  ;;  %v6021_v42 = vsel %vm22283_vm9, %v6011_v12, %v6020_v33  ;;  %v6028_v45 = vrot.slane %v6026_v35, 2  ;;  %v6400_v35 = vlaneseq }
 0x332   : > { %v16195_v46 = vpop.f32.mrf.mxu0  ;;  %v5485_v47 = vpop.f32.mrf.mxu1 }
 0x333   : > { %v5595_v50 = vadd.f32 %v5485_v47, %v5000_v40  ;;  %v17697_v46 = vld [vmem:[#allocation2 + $0xb0] sm:$0xff]   ;;  %v6029_v55 = vor.u32 %v6028_v45, %v6025_v44  ;;  %v19014_v44 = vshrl.u32 %v6400_v35, 7 }
 0x334   : > { %v4895_v49 = vpop.f32.mrf.mxu0  ;;  %16409 = vmatmul.mubr.bf16.gmra.mxu0 %v5994_v41  ;;  %v16295_v53 = vpop.f32.mrf.mxu1  ;;  %v6032_v56 = vshrl.u32 %v17697_v46, 16 }
 0x335   : > { %v5001_v51 = vadd.f32 %v4895_v49, %v4363_v48  ;;  %16412 = vmatprep.mubr.msk.bf16.mxu0 %vm22288_vm0, %v22291_v1  ;;  %5636 = vst [vmem:[#allocation4 + $0x98] sm:$0xff] %v5595_v50  ;;  %v4369_v49 = vld [vmem:[#allocation4 + $0xd8] sm:$0xff] }
 0x336   : > { %v16198_v57 = vpop.f32.mrf.mxu0  ;;  %v5490_v58 = vpop.f32.mrf.mxu1  ;;  %v6034_v3 = vrot.slane %v6032_v56, 1 }
 0x337   : > { %v5596_v61 = vadd.f32 %v5490_v58, %v5001_v51  ;;  %v6035_v57 = vshll.u32 %v17697_v46, 16  ;;  %v4375_v46 = vld [vmem:[#allocation4] sm:$0xff] }
 0x338   : > { %v4898_v60 = vpop.f32.mrf.mxu0  ;;  %v16298_v0 = vpop.f32.mrf.mxu1 }
 0x339   : > { %v5002_v62 = vadd.f32 %v4898_v60, %v4364_v59  ;;  %5637 = vst [vmem:[#allocation4 + $0xa8] sm:$0xff] %v5596_v61  ;;  %v4370_v60 = vld [vmem:[#allocation4 + $0xa0] sm:$0xff]  ;;  %v6030_v0 = vsel %vm22283_vm9, %v6020_v33, %v6029_v55  ;;  %v6037_v4 = vrot.slane %v6035_v57, 2 }
 0x33a   : > { %v16199_v5 = vpop.f32.mrf.mxu0  ;;  %v5493_v6 = vpop.f32.mrf.mxu1  ;;  %v4376_v57 = vld [vmem:[#allocation4 + $0x40] sm:$0xff] }
 0x33b   : > { %v5597_v9 = vadd.f32 %v5493_v6, %v5002_v62  ;;  %v17699_v5 = vld [vmem:[#allocation2 + $0xb8] ss:$0 sps:$4 sm:$0xff]   ;;  %v6038_v13 = vor.u32 %v6037_v4, %v6034_v3  ;;  %v19028_v4 = vadd.s32 24, %v19014_v44 }
 0x33c   : > { %v4903_v8 = vpop.f32.mrf.mxu0  ;;  %16413 = vmatmul.mubr.bf16.gmra.mxu0 %v6003_v63  ;;  %v16299_v11 = vpop.f32.mrf.mxu1  ;;  %v6041_v14 = vshrl.u32 %v17699_v5, 16 }
 0x33d   : > { %v5003_v10 = vadd.f32 %v4903_v8, %v4365_v7  ;;  %16416 = vmatprep.mubr.msk.bf16.mxu0 %vm22288_vm0, %v22291_v1  ;;  %5638 = vst [vmem:[#allocation4 + $0x90] sm:$0xff] %v5597_v9  ;;  %v4371_v8 = vld [vmem:[#allocation4 + $0x68] sm:$0xff] }
 0x33e   : > { %v16202_v15 = vpop.f32.mrf.mxu0  ;;  %v5498_v16 = vpop.f32.mrf.mxu1  ;;  %v6043_v24 = vrot.slane %v6041_v14, 1 }
 0x33f   : > { %v5598_v19 = vadd.f32 %v5498_v16, %v5003_v10  ;;  %v6044_v15 = vshll.u32 %v17699_v5, 16  ;;  %v4377_v5 = vld [vmem:[#allocation4 + $0x78] sm:$0xff] }
 0x340   : > { %v4906_v18 = vpop.f32.mrf.mxu0  ;;  %v16302_v22 = vpop.f32.mrf.mxu1 }
 0x341   : > { %v5004_v20 = vadd.f32 %v4906_v18, %v4366_v17  ;;  %5639 = vst [vmem:[#allocation4 + $0xe0] sm:$0xff] %v5598_v19  ;;  %v4372_v18 = vld [vmem:[#allocation4 + $0x130] sm:$0xff]  ;;  %v6039_v22 = vsel %vm22283_vm9, %v6029_v55, %v6038_v13  ;;  %v6046_v25 = vrot.slane %v6044_v15, 2  ;;  %v19023_v55 = vadd.s32 16, %v19014_v44 }
 0x342   : > { %v16203_v26 = vpop.f32.mrf.mxu0  ;;  %v5501_v27 = vpop.f32.mrf.mxu1  ;;  %v6445_v15 = vcvt.s32.f32 %v19028_v4 }
 0x343   : > { %v5599_v30 = vadd.f32 %v5501_v27, %v5004_v20  ;;  %v6047_v33 = vor.u32 %v6046_v25, %v6043_v24 }
 0x344   : > { %v4911_v29 = vpop.f32.mrf.mxu0  ;;  %16417 = vmatmul.mubr.bf16.gmra.mxu0 %v6012_v21  ;;  %v16303_v32 = vpop.f32.mrf.mxu1 }
 0x345   : > { %v5005_v31 = vadd.f32 %v4911_v29, %v4367_v28  ;;  %16420 = vmatprep.mubr.msk.bf16.mxu0 %vm22288_vm0, %v22291_v1  ;;  %5640 = vst [vmem:[#allocation4 + $0x88] sm:$0xff] %v5599_v30  ;;  %v4373_v28 = vld [vmem:[#allocation4 + $0x50] sm:$0xff] }
 0x346   : > { %v16206_v36 = vpop.f32.mrf.mxu0  ;;  %v5506_v37 = vpop.f32.mrf.mxu1 }
 0x347   : > { %v5600_v40 = vadd.f32 %v5506_v37, %v5005_v31  ;;  %v4374_v37 = vld [vmem:[#allocation4 + $0xe8] sm:$0xff] }
 0x348   : > { %v4914_v39 = vpop.f32.mrf.mxu0  ;;  %v16306_v43 = vpop.f32.mrf.mxu1 }
 0x349   : > { %v5006_v41 = vadd.f32 %v4914_v39, %v4368_v38  ;;  %5641 = vst [vmem:[#allocation4 + $0xc0] sm:$0xff] %v5600_v40 }
 0x34a   : > { %v16207_v47 = vpop.f32.mrf.mxu0  ;;  %v5509_v48 = vpop.f32.mrf.mxu1 }
 0x34b   : > { %v5601_v51 = vadd.f32 %v5509_v48, %v5006_v41  ;;  %v6048_v41 = vsel %vm22283_vm9, %v6038_v13, %v6047_v33 }
 0x34c   : > { %v4919_v50 = vpop.f32.mrf.mxu0  ;;  %16421 = vmatmul.mubr.bf16.gmra.mxu0 %v6021_v42  ;;  %v16307_v54 = vpop.f32.mrf.mxu1 }
 0x34d   : > { %v5007_v53 = vadd.f32 %v4919_v50, %v4369_v49  ;;  %16424 = vmatprep.mubr.msk.bf16.mxu0 %vm22288_vm0, %v22291_v1  ;;  %5642 = vst [vmem:[#allocation4 + $0x118] sm:$0xff] %v5601_v51  ;;  %v19020_v54 = vadd.s32 8, %v19014_v44 }
 0x34e   : > { %v16210_v58 = vpop.f32.mrf.mxu0  ;;  %v5514_v59 = vpop.f32.mrf.mxu1 }
 0x34f   : > { %v5602_v62 = vadd.f32 %v5514_v59, %v5007_v53  ;;  %v6442_v53 = vcvt.s32.f32 %v19014_v44 }
 0x350   : > { %v4922_v61 = vpop.f32.mrf.mxu0  ;;  %v16310_v2 = vpop.f32.mrf.mxu1 }
 0x351   : > { %v5008_v63 = vadd.f32 %v4922_v61, %v4370_v60  ;;  %5643 = vst [vmem:[#allocation4 + $0xd8] sm:$0xff] %v5602_v62  ;;  %v6444_v2 = vcvt.s32.f32 %v19023_v55 }
 0x352   : > { %v16211_v6 = vpop.f32.mrf.mxu0  ;;  %v5517_v7 = vpop.f32.mrf.mxu1 }
 0x353   : > { %v5603_v10 = vadd.f32 %v5517_v7, %v5008_v63  ;;  %v6483_v63 = vmul.f32 0.055555556, %v6442_v53  ;;  %v6485_v13 = vmul.f32 0.055555556, %v6444_v2 }
 0x354   : > { %v4927_v9 = vpop.f32.mrf.mxu0  ;;  %16425 = vmatmul.mubr.bf16.gmra.mxu0 %v6030_v0  ;;  %v16311_v12 = vpop.f32.mrf.mxu1  ;;  %v6443_v0 = vcvt.s32.f32 %v19020_v54 }
 0x355   : > { %v5009_v11 = vadd.f32 %v4927_v9, %v4371_v8  ;;  %16428 = vmatprep.mubr.msk.bf16.mxu0 %vm22288_vm0, %v22291_v1  ;;  %5644 = vst [vmem:[#allocation4 + $0xa0] sm:$0xff] %v5603_v10 }
 0x356   : > { %v16214_v16 = vpop.f32.mrf.mxu0  ;;  %v5522_v17 = vpop.f32.mrf.mxu1  ;;  %v6484_v12 = vmul.f32 0.055555556, %v6443_v0 }
 0x357   : > { %v5604_v20 = vadd.f32 %v5522_v17, %v5009_v11  ;;  %v6524_v11 = vadd.f32 0.027777778, %v6483_v63  ;;  %v19034_v16 = vadd.s32 32, %v19014_v44  ;;  %v19037_v17 = vadd.s32 40, %v19014_v44 }
 0x358   : > { %v4930_v19 = vpop.f32.mrf.mxu0  ;;  %v16314_v23 = vpop.f32.mrf.mxu1  ;;  %v6525_v25 = vadd.f32 0.027777778, %v6484_v12 }
 0x359   : > { %v5010_v21 = vadd.f32 %v4930_v19, %v4372_v18  ;;  %5645 = vst [vmem:[#allocation4 + $0x68] sm:$0xff] %v5604_v20  ;;  %v4378_v18 = vld [vmem:[#allocation4 + $0x30] sm:$0xff]  ;;  %v17341_v24 = vtrunc.f32 %v6524_v11 }
 0x35a   : > { %v16215_v26 = vpop.f32.mrf.mxu0  ;;  %v5525_v27 = vpop.f32.mrf.mxu1 }
 0x35b   : > { %v5605_v30 = vadd.f32 %v5525_v27, %v5010_v21  ;;  %v6526_v26 = vadd.f32 0.027777778, %v6485_v13  ;;  %v19064_v13 = vadd.s32 80, %v19014_v44 }
 0x35c   : > { %v4935_v29 = vpop.f32.mrf.mxu0  ;;  %16429 = vmatmul.mubr.bf16.gmra.mxu0 %v6039_v22  ;;  %v16315_v32 = vpop.f32.mrf.mxu1 }
 0x35d   : > { %v5011_v31 = vadd.f32 %v4935_v29, %v4373_v28  ;;  %16432 = vmatprep.mubr.msk.bf16.mxu0 %vm22288_vm0, %v22291_v1  ;;  %5646 = vst [vmem:[#allocation4 + $0x130] sm:$0xff] %v5605_v30  ;;  %v6486_v28 = vmul.f32 0.055555556, %v6445_v15  ;;  %v6446_v29 = vcvt.s32.f32 %v19034_v16  ;;  %v6447_v30 = vcvt.s32.f32 %v19037_v17  ;;  %v4379_v32 = vld [vmem:[#allocation4 + $0xb8] sm:$0xff] }
 0x35e   : > { %v16218_v34 = vpop.f32.mrf.mxu0  ;;  %v5530_v36 = vpop.f32.mrf.mxu1 }
 0x35f   : > { %v5606_v39 = vadd.f32 %v5530_v36, %v5011_v31  ;;  %v19042_v31 = vadd.s32 48, %v19014_v44 }
 0x360   : > { %v4938_v38 = vpop.f32.mrf.mxu0  ;;  %v16318_v42 = vpop.f32.mrf.mxu1 }
 0x361   : > { %v5012_v40 = vadd.f32 %v4938_v38, %v4374_v37  ;;  %5647 = vst [vmem:[#allocation4 + $0x50] sm:$0xff] %v5606_v39  ;;  %v19045_v37 = vadd.s32 56, %v19014_v44  ;;  %v19047_v39 = vcvt.f32.s32 %v17341_v24 }
 0x362   : > { %v16219_v43 = vpop.f32.mrf.mxu0  ;;  %v5533_v45 = vpop.f32.mrf.mxu1 }
 0x363   : > { %v5607_v48 = vadd.f32 %v5533_v45, %v5012_v40  ;;  %v17343_v40 = vtrunc.f32 %v6525_v25  ;;  %v6527_v43 = vadd.f32 0.027777778, %v6486_v28  ;;  %v6487_v45 = vmul.f32 0.055555556, %v6446_v29 }
 0x364   : > { %v4943_v47 = vpop.f32.mrf.mxu0  ;;  %16433 = vmatmul.mubr.bf16.gmra.mxu0 %v6048_v41  ;;  %v16319_v50 = vpop.f32.mrf.mxu1  ;;  %v17345_v41 = vtrunc.f32 %v6526_v26  ;;  %v4382_v26 = vld [vmem:[#allocation4 + $0x140] sm:$0xff]  ;;  %vm6688_vm10 = vcmp.ge.s32.totalorder %v19047_v39, 1  ;;  %vm6729_vm11 = vcmp.le.s32.totalorder %v19047_v39, 16 }
 0x365   : > { %v5013_v49 = vadd.f32 %v4943_v47, %v4375_v46  ;;  %16436 = vmatprep.mubr.msk.bf16.mxu0 %vm22288_vm0, %v22291_v1  ;;  %5648 = vst [vmem:[#allocation4 + $0xe8] sm:$0xff] %v5607_v48  ;;  %v6488_v46 = vmul.f32 0.055555556, %v6447_v30  ;;  %v6448_v47 = vcvt.s32.f32 %v19042_v31  ;;  %v4380_v48 = vld [vmem:[#allocation4 + $0x60] sm:$0xff]  ;;  %v17347_v63 = vtrunc.f32 %v6527_v43 }
 0x366   : > { %v16222_v51 = vpop.f32.mrf.mxu0  ;;  %v5538_v56 = vpop.f32.mrf.mxu1  ;;  %v6528_v0 = vadd.f32 0.027777778, %v6487_v45 }
 0x367   : > { %v5608_v59 = vadd.f32 %v5538_v56, %v5013_v49  ;;  %v19051_v51 = vadd.s32 64, %v19014_v44  ;;  %v6529_v2 = vadd.f32 0.027777778, %v6488_v46 }
 0x368   : > { %v4946_v58 = vpop.f32.mrf.mxu0  ;;  %v16322_v61 = vpop.f32.mrf.mxu1 }
 0x369   : > { %v5014_v60 = vadd.f32 %v4946_v58, %v4376_v57  ;;  %5649 = vst [vmem:[#allocation4] sm:$0xff] %v5608_v59  ;;  %v6449_v57 = vcvt.s32.f32 %v19045_v37  ;;  %v6606_v59 = vmul.u32 18, %v19047_v39  ;;  %v19057_v61 = vcvt.f32.s32 %v17345_v41  ;;  %v19142_v39 = vld [vmem:[%s22279_s2] ss:$0 sm:$0xff] }
 0x36a   : > { %v16223_v62 = vpop.f32.mrf.mxu0  ;;  %v5541_v3 = vpop.f32.mrf.mxu1  ;;  %v17351_v24 = vtrunc.f32 %v6529_v2 }
 0x36b   : > { %v5609_v7 = vadd.f32 %v5541_v3, %v5014_v60  ;;  %v19055_v60 = vcvt.f32.s32 %v17343_v40  ;;  %v6489_v3 = vmul.f32 0.055555556, %v6448_v47  ;;  %v6490_v12 = vmul.f32 0.055555556, %v6449_v57 }
 0x36c   : > { %v4951_v6 = vpop.f32.mrf.mxu0  ;;  %16437 = vmatmul.mubr.bf16.gmra.mxu0 %v6047_v33  ;;  %v16323_v9 = vpop.f32.mrf.mxu1  ;;  %v19067_v15 = vsub.s32 %v19014_v44, %v6606_v59  ;;  %v19091_v47 = vcvt.f32.s32 %v17351_v24  ;;  %vm6690_vm7 = vcmp.ge.s32.totalorder %v19057_v61, 1  ;;  %vm6731_vm5 = vcmp.le.s32.totalorder %v19057_v61, 16 }
 0x36d   : > { %v5015_v8 = vadd.f32 %v4951_v6, %v4377_v5  ;;  %16556 = vmatprep.mubr.msk.bf16.mxu0 %vm22288_vm0, %v22291_v1  ;;  %5650 = vst [vmem:[#allocation4 + $0x40] sm:$0xff] %v5609_v7  ;;  %v4381_v5 = vld [vmem:[#allocation4 + $0x28] sm:$0xff]  ;;  %v19061_v9 = vadd.s32 72, %v19014_v44  ;;  %v6530_v25 = vadd.f32 0.027777778, %v6489_v3  ;;  %vm6689_vm13 = vcmp.ge.s32.totalorder %v19055_v60, 1  ;;  %vm19128_vm0 = vmand %vm6688_vm10, %vm6729_vm11 }
 0x36e   : > { %v16226_v10 = vpop.f32.mrf.mxu0  ;;  %v5546_v14 = vpop.f32.mrf.mxu1  ;;  %vm6811_vm12 = vcmp.ge.s32.totalorder %v19067_v15, 1  ;;  %vm6893_vm14 = vcmp.le.s32.totalorder %v19067_v15, 16  ;;  %vm6730_vm15 = vcmp.le.s32.totalorder %v19055_v60, 16  ;;  %vm6734_vm2 = vcmp.le.s32.totalorder %v19091_v47, 16 }
 0x36f   : > { %v5610_v20 = vadd.f32 %v5546_v14, %v5015_v8  ;;  %v6450_v8 = vcvt.s32.f32 %v19051_v51  ;;  %v6451_v30 = vcvt.s32.f32 %v19061_v9  ;;  %vm19148_vm10 = vmand %vm6689_vm13, %vm6730_vm15 }
 0x370   : > { %v4954_v19 = vpop.f32.mrf.mxu0  ;;  %v16326_v22 = vpop.f32.mrf.mxu1  ;;  %vm19164_vm13 = vmand %vm19128_vm0, %vm6811_vm12 }
 0x371   : > { %v5016_v21 = vadd.f32 %v4954_v19, %v4378_v18  ;;  %5651 = vst [vmem:[#allocation4 + $0x78] sm:$0xff] %v5610_v20  ;;  %v6607_v18 = vmul.u32 18, %v19055_v60  ;;  %v6608_v19 = vmul.u32 18, %v19057_v61  ;;  %v19072_v20 = vadd.s32 88, %v19014_v44  ;;  %vm19193_vm15 = vmand %vm6690_vm7, %vm6731_vm5 }
 0x372   : > { %v16227_v23 = vpop.f32.mrf.mxu0  ;;  %v5549_v27 = vpop.f32.mrf.mxu1  ;;  %v19074_v22 = vcvt.f32.s32 %v17347_v63  ;;  %v6491_v29 = vmul.f32 0.055555556, %v6450_v8 }
 0x373   : > { %v5611_v34 = vadd.f32 %v5549_v27, %v5016_v21  ;;  %v17349_v23 = vtrunc.f32 %v6528_v0  ;;  %v19084_v40 = vsub.s32 %v19023_v55, %v6608_v19  ;;  %v6453_v41 = vcvt.s32.f32 %v19072_v20 }
 0x374   : > { %v4959_v33 = vpop.f32.mrf.mxu0  ;;  %v16327_v36 = vpop.f32.mrf.mxu1  ;;  %v6609_v45 = vmul.u32 18, %v19074_v22  ;;  %v19094_v55 = vadd.s32 96, %v19014_v44  ;;  %vm6732_vm1 = vcmp.le.s32.totalorder %v19074_v22, 16 }
 0x375   : > { %v5017_v35 = vadd.f32 %v4959_v33, %v4379_v32  ;;  %5652 = vst [vmem:[#allocation4 + $0x30] sm:$0xff] %v5611_v34  ;;  %v6531_v34 = vadd.f32 0.027777778, %v6490_v12  ;;  %v19089_v46 = vcvt.f32.s32 %v17349_v23  ;;  %v6494_v63 = vmul.f32 0.055555556, %v6453_v41 }
 0x376   : > { %v16230_v38 = vpop.f32.mrf.mxu0  ;;  %v5554_v42 = vpop.f32.mrf.mxu1  ;;  %v19104_v2 = vsub.s32 %v19028_v4, %v6609_v45  ;;  %vm6813_vm4 = vcmp.ge.s32.totalorder %v19084_v40, 1  ;;  %v6454_v12 = vcvt.s32.f32 %v19094_v55  ;;  %v19119_v23 = vld [vmem:[#allocation3 + $0x4] sm:$0xf8]  }
 0x377   : > { %v5612_v50 = vadd.f32 %v5554_v42, %v5017_v35  ;;  %v6452_v35 = vcvt.s32.f32 %v19064_v13  ;;  %v19081_v38 = vsub.s32 %v19020_v54, %v6607_v18  ;;  %v4383_v42 = vld [vmem:[#allocation4 + $0x58] sm:$0xf]  ;;  %v6532_v54 = vadd.f32 0.027777778, %v6491_v29 }
 0x378   : > { %v4962_v49 = vpop.f32.mrf.mxu0  ;;  %v16330_v56 = vpop.f32.mrf.mxu1  ;;  %v6610_v3 = vmul.u32 18, %v19089_v46  ;;  %v19116_v18 = vadd.s32 104, %v19014_v44  ;;  %v6535_v24 = vadd.f32 0.027777778, %v6494_v63  ;;  %vm6814_vm11 = vcmp.ge.s32.totalorder %v19104_v2, 1 }
 0x379   : > { %v5018_v53 = vadd.f32 %v4962_v49, %v4380_v48  ;;  %5653 = vst [vmem:[#allocation4 + $0xb8] sm:$0xff] %v5612_v50  ;;  %v17353_v48 = vtrunc.f32 %v6530_v25  ;;  %v6493_v59 = vmul.f32 0.055555556, %v6452_v35  ;;  %vm6812_vm6 = vcmp.ge.s32.totalorder %v19081_v38, 1 }
 0x37a   : > { %v16231_v58 = vpop.f32.mrf.mxu0  ;;  %v5557_v62 = vpop.f32.mrf.mxu1  ;;  %vm6894_vm9 = vcmp.le.s32.totalorder %v19081_v38, 16  ;;  %v19122_v25 = vadd.s32 112, %v19014_v44  ;;  %v6495_v41 = vmul.f32 0.055555556, %v6454_v12  ;;  %vm6733_vm3 = vcmp.le.s32.totalorder %v19089_v46, 16  ;;  %vm19180_vm0 = vmand %vm19148_vm10, %vm6812_vm6 }
 0x37b   : > { %v5613_v7 = vadd.f32 %v5557_v62, %v5018_v53  ;;  %v6492_v53 = vmul.f32 0.055555556, %v6451_v30  ;;  %v17355_v58 = vtrunc.f32 %v6531_v34  ;;  %v19109_v8 = vcvt.f32.s32 %v17353_v48  ;;  %vm19208_vm10 = vmand %vm19164_vm13, %vm6893_vm14 }
 0x37c   : > { %v4967_v6 = vpop.f32.mrf.mxu0  ;;  %v16331_v11 = vpop.f32.mrf.mxu1  ;;  %v6534_v4 = vadd.f32 0.027777778, %v6493_v59  ;;  %v6455_v45 = vcvt.s32.f32 %v19116_v18  ;;  %vm6896_vm12 = vcmp.le.s32.totalorder %v19104_v2, 16  ;;  %vm19222_vm7 = vmand %vm19180_vm0, %vm6894_vm9  ;;  %vm22311_vm14 = vcmp.ge.s32.totalorder %v19074_v22, 1 }
 0x37d   : > { %v5019_v10 = vadd.f32 %v4967_v6, %v4381_v5  ;;  %5654 = vst [vmem:[#allocation4 + $0x60] sm:$0xff] %v5613_v7  ;;  %v6611_v5 = vmul.u32 18, %v19091_v47  ;;  %v17713_v6 = vld [vmem:[#allocation3 + $0x4] sm:$0xfc]   ;;  %v6533_v11 = vadd.f32 0.027777778, %v6492_v53  ;;  %vm19239_vm9 = vmand %vm19193_vm15, %vm6813_vm4 }
 0x37e   : > { %v16234_v14 = vpop.f32.mrf.mxu0  ;;  %v5562_v21 = vpop.f32.mrf.mxu1  ;;  %v7525_v29 = vshrl.u32 %v17713_v6, 16  ;;  %v7528_v30 = vshll.u32 %v17713_v6, 16  ;;  %v17361_v60 = vtrunc.f32 %v6534_v4  ;;  %v8227_v53 = vrot.slane %v19119_v23, 3  ;;  %v5659_v6 = vld [vmem:[#allocation4 + $0xd0] sm:$0xff]  ;;  %vm19253_vm13 = vmand %vm22311_vm14, %vm6732_vm1 }
 0x37f   : > { %v5614_v28 = vadd.f32 %v5562_v21, %v5019_v10  ;;  %v17357_v10 = vtrunc.f32 %v6532_v54  ;;  %v19113_v14 = vcvt.f32.s32 %v17355_v58  ;;  %v19173_v58 = vadd.s32 120, %v19014_v44 }
 0x380   : > { %v4970_v27 = vpop.f32.mrf.mxu0  ;;  %v16334_v33 = vpop.f32.mrf.mxu1  ;;  %v6536_v4 = vadd.f32 0.027777778, %v6495_v41  ;;  %vm22314_vm1 = vcmp.le.s32.totalorder %v19084_v40, 16 }
 0x381   : > { %v5020_v32 = vadd.f32 %v4970_v27, %v4382_v26  ;;  %5655 = vst [vmem:[#allocation4 + $0x28] sm:$0xff] %v5614_v28  ;;  %v19134_v27 = vsub.s32 %v19034_v16, %v6610_v3  ;;  %v19137_v28 = vsub.s32 %v19037_v17, %v6611_v5  ;;  %v5658_v33 = vld [vmem:[#allocation4 + $0xb0] sm:$0xff]  ;;  %v6612_v17 = vmul.u32 18, %v19109_v8  ;;  %vm19271_vm14 = vmand %vm19239_vm9, %vm22314_vm1 }
 0x382   : > { %v16235_v36 = vpop.f32.mrf.mxu0  ;;  %v5565_v43 = vpop.f32.mrf.mxu1  ;;  %v19154_v35 = vcvt.f32.s32 %v17357_v10  ;;  %v19185_v3 = vrot.slane %v7525_v29, 2  ;;  %v19187_v5 = vrot.slane %v7528_v30, 3  ;;  %v6457_v30 = vcvt.s32.f32 %v19173_v58  ;;  %vm19286_vm9 = vmand %vm19253_vm13, %vm6814_vm11 }
 0x383   : > { %v5615_v50 = vadd.f32 %v5565_v43, %v5020_v32  ;;  %v17359_v36 = vtrunc.f32 %v6533_v11  ;;  %v6613_v43 = vmul.u32 18, %v19113_v14  ;;  %vm6815_vm6 = vcmp.ge.s32.totalorder %v19134_v27, 1  ;;  %vm19325_vm15 = vmand %vm19286_vm9, %vm6896_vm12 }
 0x384   : > { %v4975_v49 = vpop.f32.mrf.mxu0  ;;  %v16335_v57 = vpop.f32.mrf.mxu1  ;;  %v19199_v10 = vsub.s32 %v19042_v31, %v6612_v17  ;;  %v6614_v11 = vmul.u32 18, %v19154_v35  ;;  %vm6816_vm5 = vcmp.ge.s32.totalorder %v19137_v28, 1  ;;  %vm6897_vm0 = vcmp.le.s32.totalorder %v19134_v27, 16 }
 0x385   : > { %v5021_v56 = vadd.f32 %v4975_v49, %v4383_v42  ;;  %5656 = vst [vmem:[#allocation4 + $0x140] sm:$0xff] %v5615_v50  ;;  %v6456_v57 = vcvt.s32.f32 %v19122_v25  ;;  %v19202_v12 = vcvt.f32.s32 %v17359_v36  ;;  %v19214_v31 = vsub.s32 %v19045_v37, %v6613_v43  ;;  %v5660_v36 = vld [vmem:[#allocation4 + $0x10] sm:$0xff] }
 0x386   : > { %v16238_v62 = vpop.f32.mrf.mxu0  ;;  %v5570_v0 = vpop.f32.mrf.mxu1  ;;  %v7531_v16 = vor.u32 %v19187_v5, %v19185_v3  ;;  %v19247_v17 = vadd.s32 136, %v19014_v44  ;;  %vm6898_vm4 = vcmp.le.s32.totalorder %v19137_v28, 16  ;;  %v19259_v43 = vsub.s32 %v19051_v51, %v6614_v11 }
 0x387   : > { %5062 = vst [vmem:[#allocation4 + $0x58] sm:$0xf] %v5021_v56  ;;  %v17363_v56 = vtrunc.f32 %v6535_v24  ;;  %v6496_v24 = vmul.f32 0.055555556, %v6455_v45  ;;  %v6497_v37 = vmul.f32 0.055555556, %v6456_v57  ;;  %v17365_v45 = vtrunc.f32 %v6536_v4 }
 0x388   : > { %v4978_v7 = vpop.f32.mrf.mxu0  ;;  %v16338_v19 = vpop.f32.mrf.mxu1  ;;  %v6459_v11 = vcvt.s32.f32 %v19247_v17  ;;  %vm22322_vm13 = vcmp.ge.s32.totalorder %v19091_v47, 1  ;;  %vm6737_vm11 = vcmp.le.s32.totalorder %v19154_v35, 16  ;;  %vm22332_vm12 = vcmp.ge.s32.totalorder %v19109_v8, 1 }
 0x389   : > { %v19228_v29 = vcvt.f32.s32 %v17363_v56  ;;  %v19301_v15 = vcvt.f32.s32 %v17365_v45 }
 0x38a   : > { %v16239_v21 = vpop.f32.mrf.mxu0  ;;  %v5573_v32 = vpop.f32.mrf.mxu1 }
 0x38b   : > { %v19216_v21 = vcvt.f32.s32 %v17361_v60  ;;  %v19232_v32 = vadd.s32 128, %v19014_v44  ;;  %v6615_v60 = vmul.u32 18, %v19202_v12  ;;  %v6617_v57 = vmul.u32 18, %v19228_v29 }
 0x38c   : > { %v6152_v34 = vpop.f32.mrf.mxu0  ;;  %v16339_v48 = vpop.f32.mrf.mxu1 }
 0x38d   : > { %v6318_v42 = vadd.f32 %v6152_v34, %v5658_v33  ;;  %v19263_v48 = vadd.s32 144, %v19014_v44  ;;  %v6616_v22 = vmul.u32 18, %v19216_v21  ;;  %v6458_v63 = vcvt.s32.f32 %v19232_v32 }
 0x38e   : > { %v5103_v50 = vld [vmem:[#allocation4 + $0x58] sm:$0xf]  ;;  %v16358_v54 = vpop.f32.mrf.mxu0 }
 0x38f   : > { %v7023_v59 = vadd.f32 %v19142_v39, %v6318_v42  ;;  %v5616_v62 = vadd.f32 %v5570_v0, %v5103_v50  ;;  %v6537_v54 = vadd.f32 0.027777778, %v6496_v24  ;;  %v6499_v42 = vmul.f32 0.055555556, %v6458_v63 }
 0x390   : > { %v6155_v7 = vpop.f32.mrf.mxu0  ;;  %v19342_v45 = vsub.s32 %v19064_v13, %v6616_v22 }
 0x391   : > { %5657 = vst [vmem:[#allocation4 + $0x58] sm:$0xf] %v5616_v62  ;;  %v6319_v19 = vadd.f32 %v6155_v7, %v5659_v6  ;;  %v7064_v38 = vmax.f32 %v7023_v59, 0.0  ;;  %v6538_v59 = vadd.f32 0.027777778, %v6497_v37  ;;  %v19305_v37 = vadd.s32 152, %v19014_v44 }
 0x392   : > { %v16359_v26 = vpop.f32.mrf.mxu0  ;;  %v6498_v62 = vmul.f32 0.055555556, %v6457_v30 }
 0x393   : > { %v7024_v33 = vadd.f32 %v19142_v39, %v6319_v19  ;;  %v7105_v6 = vsel %vm19208_vm10, %v7064_v38, 0.0  ;;  %v5661_v19 = vld [vmem:[#allocation4 + $0x48] sm:$0xff]  ;;  %vm22319_vm10 = vcmp.ge.s32.totalorder %v19089_v46, 1  ;;  %v6460_v26 = vcvt.s32.f32 %v19263_v48 }
 0x394   : > { %v6160_v41 = vpop.f32.mrf.mxu0  ;;  %v19319_v38 = vsub.s32 %v19061_v9, %v6615_v60  ;;  %v6461_v22 = vcvt.s32.f32 %v19305_v37 }
 0x395   : > { %v7065_v49 = vmax.f32 %v7024_v33, 0.0  ;;  %v6320_v50 = vadd.f32 %v6160_v41, %v5660_v36  ;;  %v17367_v33 = vtrunc.f32 %v6537_v54  ;;  %v17369_v36 = vtrunc.f32 %v6538_v59 }
 0x396   : > { %v16362_v56 = vpop.f32.mrf.mxu0  ;;  %v6539_v41 = vadd.f32 0.027777778, %v6498_v62  ;;  %v19354_v59 = vsub.s32 %v19072_v20, %v6617_v57  ;;  %v6618_v62 = vmul.u32 18, %v19301_v15  ;;  %v6501_v13 = vmul.f32 0.055555556, %v6460_v26 }
 0x397   : > { %v7106_v7 = vsel %vm19222_vm7, %v7065_v49, 0.0  ;;  %v7025_v40 = vadd.f32 %v19142_v39, %v6320_v50  ;;  %vm19295_vm7 = vmand %vm22319_vm10, %vm6733_vm3  ;;  %vm6899_vm10 = vcmp.le.s32.totalorder %v19199_v10, 16  ;;  %v6500_v49 = vmul.f32 0.055555556, %v6459_v11  ;;  %v5662_v50 = vld [vmem:[#allocation4 + $0x120] sm:$0xff] }
 0x398   : > { %v14782_v4 = vpack.c.bf16 %v7106_v7, %v7105_v6  ;;  %v6163_v24 = vpop.f32.mrf.mxu0  ;;  %vm19311_vm3 = vmand %vm22322_vm13, %vm6734_vm2  ;;  %vm6697_vm2 = vcmp.ge.s32.totalorder %v19202_v12, 1  ;;  %vm6738_vm13 = vcmp.le.s32.totalorder %v19202_v12, 16  ;;  %v19370_v20 = vadd.s32 160, %v19014_v44 }
 0x399   : > { %v6321_v30 = vadd.f32 %v6163_v24, %v5661_v19  ;;  %v7066_v9 = vmax.f32 %v7025_v40, 0.0  ;;  %vm19336_vm1 = vmand %vm19295_vm7, %vm6815_vm6  ;;  %vm22331_vm7 = vcmp.le.s32.totalorder %v19109_v8, 16  ;;  %v19367_v40 = vcvt.f32.s32 %v17367_v33  ;;  %v5663_v33 = vld [vmem:[#allocation4 + $0x38] sm:$0xff] }
 0x39a   : > { %14979 = vst [vmem:[#allocation3 + $0x10] sm:$0xff] %v14782_v4   ;;  %v16363_v34 = vpop.f32.mrf.mxu0  ;;  %vm19348_vm9 = vmand %vm19311_vm3, %vm6816_vm5  ;;  %vm6820_vm3 = vcmp.ge.s32.totalorder %v19319_v38, 1  ;;  %v19380_v0 = vcvt.f32.s32 %v17369_v36  ;;  %v17371_v11 = vtrunc.f32 %v6539_v41  ;;  %v19382_v4 = vadd.f32 0.027777778, %v6499_v42 }
 0x39b   : > { %v7026_v60 = vadd.f32 %v19142_v39, %v6321_v30  ;;  %vm19362_vm5 = vmand %vm22332_vm12, %vm22331_vm7  ;;  %v19385_v19 = vadd.s32 168, %v19014_v44  ;;  %v7107_v24 = vsel %vm19271_vm14, %v7066_v9, 0.0  ;;  %v19400_v30 = vadd.f32 0.027777778, %v6500_v49 }
 0x39c   : > { %v6168_v54 = vpop.f32.mrf.mxu0  ;;  %vm19376_vm6 = vmand %vm19336_vm1, %vm6897_vm0  ;;  %vm22339_vm14 = vcmp.ge.s32.totalorder %v19199_v10, 1  ;;  %vm6900_vm1 = vcmp.le.s32.totalorder %v19214_v31, 16  ;;  %v19411_v28 = vadd.f32 0.027777778, %v6501_v13  ;;  %v6502_v47 = vmul.f32 0.055555556, %v6461_v22 }
 0x39d   : > { %v7067_v63 = vmax.f32 %v7026_v60, 0.0  ;;  %v6322_v6 = vadd.f32 %v6168_v54, %v5662_v50  ;;  %vm19396_vm0 = vmand %vm19348_vm9, %vm6898_vm4  ;;  %v19414_v36 = vadd.s32 176, %v19014_v44  ;;  %v19422_v9 = vsub.s32 %v19094_v55, %v6618_v62  ;;  %v5664_v62 = vld [vmem:[#allocation4 + $0xf8] sm:$0xff] }
 0x39e   : > { %v16366_v8 = vpop.f32.mrf.mxu0  ;;  %v6619_v60 = vmul.u32 18, %v19367_v40  ;;  %v6462_v2 = vcvt.s32.f32 %v19370_v20  ;;  %v6620_v54 = vmul.u32 18, %v19380_v0  ;;  %v19428_v56 = vcvt.f32.s32 %v17371_v11 }
 0x39f   : > { %v7108_v27 = vsel %vm19325_vm15, %v7067_v63, 0.0  ;;  %v7027_v61 = vadd.f32 %v19142_v39, %v6322_v6  ;;  %vm19406_vm15 = vmand %vm19362_vm5, %vm22339_vm14  ;;  %v17373_v13 = vtrunc.f32 %v19382_v4  ;;  %v6463_v22 = vcvt.s32.f32 %v19385_v19 }
 0x3a0   : > { %v14787_v46 = vpack.c.bf16 %v7108_v27, %v7107_v24  ;;  %v6171_v34 = vpop.f32.mrf.mxu0  ;;  %vm22342_vm5 = vcmp.le.s32.totalorder %v19113_v14, 16  ;;  %vm22343_vm14 = vcmp.ge.s32.totalorder %v19113_v14, 1  ;;  %vm6740_vm9 = vcmp.le.s32.totalorder %v19228_v29, 16  ;;  %vm19451_vm4 = vmand %vm19406_vm15, %vm6899_vm10 }
 0x3a1   : > { %v6323_v41 = vadd.f32 %v6171_v34, %v5663_v33  ;;  %v19417_v42 = vld [vmem:[#allocation3 + $0xc] sm:$0xff]   ;;  %v7068_v63 = vmax.f32 %v7027_v61, 0.0  ;;  %vm19437_vm12 = vmand %vm22343_vm14, %vm22342_vm5  ;;  %v19445_v8 = vadd.s32 184, %v19014_v44  ;;  %vm22348_vm5 = vcmp.ge.s32.totalorder %v19154_v35, 1  ;;  %v5666_v34 = vld [vmem:[#allocation4 + $0x80] sm:$0xff] }
 0x3a2   : > { %14980 = vst [vmem:[#allocation3 + $0x18] sm:$0xff] %v14787_v46   ;;  %v16367_v49 = vpop.f32.mrf.mxu0  ;;  %v17714_v50 = vld [vmem:[#allocation3 + $0xc] sm:$0xff]   ;;  %v8228_v7 = vrot.slane %v19417_v42, 3  ;;  %vm19459_vm14 = vmand %vm22348_vm5, %vm6737_vm11  ;;  %vm6821_vm7 = vcmp.ge.s32.totalorder %v19342_v45, 1  ;;  %v19464_v61 = vadd.f32 0.027777778, %v6502_v47  ;;  %v6464_v10 = vcvt.s32.f32 %v19414_v36 }
 0x3a3   : > { %v7028_v55 = vadd.f32 %v19142_v39, %v6323_v41  ;;  %v7533_v24 = vshrl.u32 %v17714_v50, 16  ;;  %v7536_v27 = vshll.u32 %v17714_v50, 16  ;;  %vm22351_vm10 = vcmask 1044480   ;;  %vm19476_vm11 = vmand %vm6697_vm2, %vm6738_vm13  ;;  %v5665_v41 = vld [vmem:[#allocation4 + $0x100] sm:$0xff]  ;;  %v17727_v42 = vld [vmem:[%s22280_s3 + $0xa8] sm:$0xff]  }
 0x3a4   : > { %v6176_v11 = vpop.f32.mrf.mxu0  ;;  %v8229_v35 = vsel %vm22351_vm10, %v8227_v53, %v8228_v7  ;;  %v6503_v51 = vmul.f32 0.055555556, %v6462_v2  ;;  %vm22354_vm15 = vcmp.ge.s32.totalorder %v19214_v31, 1  ;;  %v17375_v12 = vtrunc.f32 %v19400_v30  ;;  %v17715_v30 = vld [vmem:[%s22280_s3 + $0xb8] sm:$0xff]   ;;  %v17759_v31 = vld [vmem:[%s22280_s3 + $0xe8] sm:$0xff]  }
 0x3a5   : > { %v7069_v46 = vmax.f32 %v7028_v55, 0.0  ;;  %v6324_v33 = vadd.f32 %v6176_v11, %v5664_v62  ;;  %vm19484_vm5 = vmand %vm19437_vm12, %vm22354_vm15  ;;  %16557 = vmatmul.mubr.bf16.vlgmr.msra.gmra.mxu0 %v8229_v35  ;;  %v7535_v23 = vrot.slane %v7533_v24, 2  ;;  %v7538_v53 = vrot.slane %v7536_v27, 3 }
 0x3a6   : > { %v16370_v47 = vpop.f32.mrf.mxu0  ;;  %v6504_v50 = vmul.f32 0.055555556, %v6463_v22  ;;  %v7109_v55 = vsel %vm19376_vm6, %v7068_v63, 0.0  ;;  %vm22357_vm2 = vcmp.ge.s32.totalorder %v19259_v43, 1  ;;  %vm22360_vm12 = vmmov 0   ;;  %vm19512_vm6 = vmand %vm19476_vm11, %vm6820_vm3 }
 0x3a7   : > { %v7110_v2 = vsel %vm19396_vm0, %v7069_v46, 0.0  ;;  %v7029_v62 = vadd.f32 %v19142_v39, %v6324_v33  ;;  %vm19498_vm13 = vmand %vm19459_vm14, %vm22357_vm2  ;;  %16560 = vmatprep.mubr.msk.bf16.mxu0 %vm22360_vm12, %v22291_v1  ;;  %v6465_v57 = vcvt.s32.f32 %v19445_v8  ;;  %v19516_v11 = vor.u32 %v7538_v53, %v7535_v23 }
 0x3a8   : > { %v14792_v26 = vpack.c.bf16 %v7110_v2, %v7109_v55  ;;  %v6179_v22 = vpop.f32.mrf.mxu0  ;;  %vm6700_vm0 = vcmp.ge.s32.totalorder %v19301_v15, 1  ;;  %vm6741_vm14 = vcmp.le.s32.totalorder %v19301_v15, 16  ;;  %v19521_v4 = vsub.s32 %v19116_v18, %v6619_v60  ;;  %vm19544_vm3 = vmand %vm19484_vm5, %vm6900_vm1 }
 0x3a9   : > { %v6505_v24 = vmul.f32 0.055555556, %v6464_v10  ;;  %v6325_v27 = vadd.f32 %v6179_v22, %v5665_v41  ;;  %v19524_v46 = vld [vmem:[#allocation3 + $0x14] sm:$0xff]   ;;  %v6621_v33 = vmul.u32 18, %v19428_v56  ;;  %vm22363_vm15 = vsmask.f32 5376 }
 0x3aa   : > { %14981 = vst [vmem:[#allocation3 + $0x20] sm:$0xff] %v14792_v26   ;;  %v16371_v35 = vpop.f32.mrf.mxu0  ;;  %v7540_v18 = vsel %vm22363_vm15, %v7531_v16, %v19516_v11  ;;  %v17717_v60 = vld [vmem:[#allocation3 + $0x14] sm:$0xff]   ;;  %v19535_v10 = vcvt.f32.s32 %v17373_v13  ;;  %v19537_v47 = vcvt.f32.s32 %v17375_v12  ;;  %v17377_v41 = vtrunc.f32 %v19411_v28  ;;  %v5667_v26 = vld [vmem:[#allocation4 + $0x108] sm:$0xff] }
 0x3ab   : > { %v7070_v23 = vmax.f32 %v7029_v62, 0.0  ;;  %v7030_v3 = vadd.f32 %v19142_v39, %v6325_v27  ;;  %16457 = vmatmul.mubr.bf16.vlgmr.msra.gmra.mxu1 %v7540_v18  ;;  %v8230_v5 = vrot.slane %v19524_v46, 3  ;;  %v6506_v16 = vmul.f32 0.055555556, %v6465_v57  ;;  %v17721_v12 = vld [vmem:[%s22280_s3 + $0xb0] sm:$0xff]  }
 0x3ac   : > { %v6184_v13 = vpop.f32.mrf.mxu0  ;;  %vm22366_vm2 = vcmp.le.s32.totalorder %v19259_v43, 16  ;;  %vm22369_vm1 = vcmp.le.s32.totalorder %v19216_v21, 16  ;;  %vm22370_vm5 = vcmp.ge.s32.totalorder %v19216_v21, 1  ;;  %16641 = vmatpush3.bf16.msra.mxu1 %v17715_v30  ;;  %16460 = vmatprep.mubr.msk.bf16.mxu1 %vm22360_vm12, %v22291_v1  ;;  %v7542_v49 = vshrl.u32 %v17717_v60, 16 }
 0x3ad   : > { %vm19555_vm11 = vmand %vm19498_vm13, %vm22366_vm2  ;;  %v7545_v43 = vshll.u32 %v17717_v60, 16  ;;  %vm6824_vm15 = vcmp.ge.s32.totalorder %v19521_v4, 1  ;;  %v19573_v55 = vadd.f32 0.027777778, %v6503_v51  ;;  %v19576_v21 = vadd.s32 192, %v19014_v44  ;;  %16642 = vmatprep.subr.bf16.mxu1 %v22291_v1 }
 0x3ae   : > { %vm19563_vm10 = vmand %vm22370_vm5, %vm22369_vm1  ;;  %v7071_v2 = vmax.f32 %v7030_v3, 0.0  ;;  %v6326_v62 = vadd.f32 %v6184_v13, %v5666_v34  ;;  %vm22373_vm13 = vcmp.le.s32.totalorder %v19319_v38, 16  ;;  %vm22376_vm1 = vcmask 1044480   ;;  %v16374_v57 = vpop.f32.mrf.mxu0  ;;  %v17755_v3 = vld [vmem:[%s22280_s3 + $0xf8] sm:$0xff]  }
 0x3af   : > { %vm19582_vm2 = vmand %vm19512_vm6, %vm22373_vm13  ;;  %v8231_v51 = vsel %vm22376_vm1, %v8228_v7, %v8230_v5  ;;  %v19592_v30 = vadd.f32 0.027777778, %v6504_v50  ;;  %vm22377_vm6 = vcmp.ge.s32.totalorder %v19228_v29, 1  ;;  %v7544_v22 = vrot.slane %v7542_v49, 2  ;;  %16741 = vmatpush3.bf16.msra.mxu0 %v17755_v3  ;;  %v5669_v3 = vld [vmem:[#allocation4 + $0xf0] sm:$0xff] }
 0x3b0   : > { %16561 = vmatmul.mubr.bf16.gmra.mxu0 %v8231_v51  ;;  %vm19598_vm5 = vmand %vm22377_vm6, %vm6740_vm9  ;;  %v7547_v63 = vrot.slane %v7545_v43, 3  ;;  %v19605_v7 = vadd.f32 0.027777778, %v6505_v24  ;;  %v19608_v50 = vadd.s32 200, %v19014_v44  ;;  %v7111_v27 = vsel %vm19451_vm4, %v7070_v23, 0.0  ;;  %v6187_v18 = vpop.f32.mrf.mxu0  ;;  %16643 = vmatpush3.bf16.msra.mxu1 %v17721_v12  ;;  %v5668_v43 = vld [vmem:[#allocation4 + $0x138] sm:$0xff] }
 0x3b1   : > { %v7112_v29 = vsel %vm19544_vm3, %v7071_v2, 0.0  ;;  %v19615_v35 = vadd.f32 %v19142_v39, %v6326_v62  ;;  %vm19621_vm9 = vmand %vm19563_vm10, %vm6821_vm7  ;;  %16564 = vmatprep.mubr.msk.bf16.mxu0 %vm22360_vm12, %v22291_v1  ;;  %v19627_v24 = vadd.f32 0.027777778, %v6506_v16  ;;  %vm6904_vm4 = vcmp.le.s32.totalorder %v19354_v59, 16  ;;  %v19639_v16 = vld [vmem:[#allocation3 + $0x1c] sm:$0xff]   ;;  %16644 = vmatprep.subr.bf16.mxu1 %v22291_v1 }
 0x3b2   : > { %v14797_v14 = vpack.c.bf16 %v7112_v29, %v7111_v27  ;;  %v19630_v60 = vor.u32 %v7547_v63, %v7544_v22  ;;  %v19632_v23 = vcvt.f32.s32 %v17377_v41  ;;  %v6466_v53 = vcvt.s32.f32 %v19576_v21  ;;  %v16375_v41 = vpop.f32.mrf.mxu0  ;;  %v17719_v2 = vld [vmem:[#allocation3 + $0x1c] sm:$0xff]   ;;  %vm19665_vm13 = vmand %vm6700_vm0, %vm6741_vm14  ;;  %16742 = vmatprep.subr.bf16.mxu0 %v22291_v1 }
 0x3b3   : > { %v6327_v13 = vadd.f32 %v6187_v18, %v5667_v26  ;;  %vm6905_vm7 = vcmp.le.s32.totalorder %v19422_v9, 16  ;;  %v19644_v28 = vsub.s32 %v19122_v25, %v6620_v54  ;;  %v6622_v49 = vmul.u32 18, %v19535_v10  ;;  %v17757_v26 = vld [vmem:[%s22280_s3 + $0xf0] sm:$0xff]  }
 0x3b4   : > { %14982 = vst [vmem:[#allocation3 + $0x28] sm:$0xff] %v14797_v14   ;;  %vm22382_vm10 = vsmask.f32 5376  ;;  %v19655_v62 = vsub.s32 %v19173_v58, %v6621_v33  ;;  %v6623_v25 = vmul.u32 18, %v19537_v47  ;;  %v6467_v54 = vcvt.s32.f32 %v19608_v50  ;;  %v6192_v22 = vpop.f32.mrf.mxu0  ;;  %16645 = vmatpush3.bf16.msra.mxu1 %v17727_v42  ;;  %16743 = vmatpush3.bf16.msra.mxu0 %v17757_v26  ;;  %v17767_v14 = vld [vmem:[%s22280_s3 + $0xc8] sm:$0xff]  }
 0x3b5   : > { %v7549_v12 = vsel %vm22382_vm10, %v19516_v11, %v19630_v60  ;;  %v7072_v51 = vmax.f32 %v19615_v35, 0.0  ;;  %v7032_v57 = vadd.f32 %v19142_v39, %v6327_v13  ;;  %v8232_v58 = vrot.slane %v19639_v16, 3  ;;  %16646 = vmatprep.subr.bf16.mxu1 %v22291_v1  ;;  %16744 = vmatprep.subr.bf16.mxu0 %v22291_v1 }
 0x3b6   : > { %16461 = vmatmul.mubr.bf16.gmra.mxu1 %v7549_v12  ;;  %v17379_v33 = vtrunc.f32 %v19464_v61  ;;  %vm22385_vm0 = vcmp.le.s32.totalorder %v19342_v45, 16  ;;  %vm22388_vm10 = vcmp.le.s32.totalorder %v19367_v40, 16  ;;  %vm22389_vm1 = vcmp.ge.s32.totalorder %v19367_v40, 1  ;;  %v17734_v40 = vld [vmem:[%s22280_s3 + $0xa0] sm:$0xff]  }
 0x3b7   : > { %vm19681_vm14 = vmand %vm19621_vm9, %vm22385_vm0  ;;  %16464 = vmatprep.mubr.msk.bf16.mxu1 %vm22360_vm12, %v22291_v1  ;;  %v7551_v63 = vshrl.u32 %v17719_v2, 16  ;;  %v7554_v27 = vshll.u32 %v17719_v2, 16  ;;  %vm6703_vm3 = vcmp.ge.s32.totalorder %v19428_v56, 1  ;;  %v6624_v45 = vmul.u32 18, %v19632_v23 }
 0x3b8   : > { %vm19689_vm6 = vmand %vm22389_vm1, %vm22388_vm10  ;;  %v19697_v29 = vmul.f32 0.055555556, %v6466_v53  ;;  %v7073_v35 = vmax.f32 %v7032_v57, 0.0  ;;  %v6328_v34 = vadd.f32 %v6192_v22, %v5668_v43  ;;  %vm22392_vm9 = vcmp.ge.s32.totalorder %v19354_v59, 1  ;;  %v16378_v53 = vpop.f32.mrf.mxu0  ;;  %16647 = vmatpush3.bf16.msra.mxu1 %v17734_v40  ;;  %16745 = vmatpush3.bf16.msra.mxu0 %v17759_v31  ;;  %v17761_v59 = vld [vmem:[%s22280_s3 + $0xe0] sm:$0xff]  }
 0x3b9   : > { %vm19706_vm1 = vmand %vm19598_vm5, %vm22392_vm9  ;;  %vm22395_vm0 = vcmask 1044480   ;;  %v19717_v18 = vadd.s32 208, %v19014_v44  ;;  %vm22396_vm10 = vcmp.ge.s32.totalorder %v19422_v9, 1  ;;  %v7553_v13 = vrot.slane %v7551_v63, 2  ;;  %16648 = vmatprep.subr.bf16.mxu1 %v22291_v1  ;;  %v17746_v9 = vld [vmem:[%s22280_s3 + $0x90] sm:$0xff]   ;;  %16746 = vmatprep.subr.bf16.mxu0 %v22291_v1 }
 0x3ba   : > { %v8233_v42 = vsel %vm22395_vm0, %v8230_v5, %v8232_v58  ;;  %vm19723_vm5 = vmand %vm19665_vm13, %vm22396_vm10  ;;  %v7556_v46 = vrot.slane %v7554_v27, 3  ;;  %v19727_v41 = vmul.f32 0.055555556, %v6467_v54  ;;  %v7113_v5 = vsel %vm19555_vm11, %v7072_v51, 0.0  ;;  %v6195_v51 = vpop.f32.mrf.mxu0 }
 0x3bb   : > { %16565 = vmatmul.mubr.bf16.gmra.mxu0 %v8233_v42  ;;  %v7114_v43 = vsel %vm19582_vm2, %v7073_v35, 0.0  ;;  %v19734_v12 = vadd.f32 %v19142_v39, %v6328_v34  ;;  %vm19740_vm13 = vmand %vm19689_vm6, %vm6824_vm15  ;;  %v19746_v54 = vcvt.f32.s32 %v17379_v33  ;;  %vm6825_vm11 = vcmp.ge.s32.totalorder %v19644_v28, 1  ;;  %v17740_v33 = vld [vmem:[%s22280_s3 + $0x98] sm:$0xff]   ;;  %v19760_v22 = vld [vmem:[#allocation3 + $0x24] sm:$0xff]  }
 0x3bc   : > { %16568 = vmatprep.mubr.msk.bf16.mxu0 %vm22360_vm12, %v22291_v1  ;;  %v14802_v6 = vpack.c.bf16 %v7114_v43, %v7113_v5  ;;  %v19751_v57 = vor.u32 %v7556_v46, %v7553_v13  ;;  %vm6744_vm15 = vcmp.le.s32.totalorder %v19428_v56, 16  ;;  %v17381_v11 = vtrunc.f32 %v19573_v55  ;;  %v16379_v55 = vpop.f32.mrf.mxu0  ;;  %v17722_v40 = vld [vmem:[#allocation3 + $0x24] sm:$0xff]   ;;  %vm19789_vm10 = vmand %vm19706_vm1, %vm6904_vm4  ;;  %16649 = vmatpush3.bf16.msra.mxu1 %v17740_v33 }
 0x3bd   : > { %v6329_v26 = vadd.f32 %v6195_v51, %v5669_v3  ;;  %vm6826_vm2 = vcmp.ge.s32.totalorder %v19655_v62, 1  ;;  %v19766_v61 = vsub.s32 %v19232_v32, %v6622_v49  ;;  %v17383_v63 = vtrunc.f32 %v19592_v30  ;;  %vm19804_vm4 = vmand %vm19723_vm5, %vm6905_vm7  ;;  %16650 = vmatprep.subr.bf16.mxu1 %v22291_v1  ;;  %16747 = vmatpush3.bf16.msra.mxu0 %v17761_v59 }
 0x3be   : > { %14983 = vst [vmem:[#allocation3 + $0x30] sm:$0xff] %v14802_v6   ;;  %vm22401_vm6 = vsmask.f32 5376  ;;  %vm6745_vm0 = vcmp.le.s32.totalorder %v19535_v10, 16  ;;  %v19778_v32 = vsub.s32 %v19247_v17, %v6623_v25  ;;  %v19781_v30 = vsub.s32 %v19263_v48, %v6624_v45  ;;  %v5670_v25 = vld [vmem:[#allocation4 + $0x18] sm:$0xff]  ;;  %v6200_v45 = vpop.f32.mrf.mxu0  ;;  %16748 = vmatprep.subr.bf16.mxu0 %v22291_v1 }
 0x3bf   : > { %v7558_v27 = vsel %vm22401_vm6, %v19630_v60, %v19751_v57  ;;  %v6468_v49 = vcvt.s32.f32 %v19717_v18  ;;  %v7074_v35 = vmax.f32 %v19734_v12, 0.0  ;;  %v7034_v34 = vadd.f32 %v19142_v39, %v6329_v26  ;;  %v5671_v12 = vld [vmem:[#allocation4 + $0xc8] sm:$0xff]  ;;  %v5672_v60 = vld [vmem:[#allocation4 + $0x70] sm:$0xff] }
 0x3c0   : > { %16465 = vmatmul.mubr.bf16.gmra.mxu1 %v7558_v27  ;;  %v8234_v17 = vrot.slane %v19760_v22, 3  ;;  %v6625_v48 = vmul.u32 18, %v19746_v54  ;;  %v7560_v42 = vshrl.u32 %v17722_v40, 16  ;;  %v7563_v53 = vshll.u32 %v17722_v40, 16 }
 0x3c1   : > { %16468 = vmatprep.mubr.msk.bf16.mxu1 %vm22360_vm12, %v22291_v1  ;;  %v19811_v3 = vcvt.f32.s32 %v17381_v11  ;;  %v19814_v13 = vadd.f32 0.027777778, %v19697_v29  ;;  %v7075_v38 = vmax.f32 %v7034_v34, 0.0  ;;  %v6330_v46 = vadd.f32 %v6200_v45, %v5670_v25  ;;  %16651 = vmatpush3.bf16.msra.mxu1 %v17746_v9  ;;  %v5674_v9 = vld [vmem:[#allocation4 + $0x128] sm:$0xff] }
 0x3c2   : > { %vm22406_vm7 = vcmp.le.s32.totalorder %v19521_v4, 16  ;;  %vm22409_vm1 = vcmask 1044480   ;;  %vm6827_vm6 = vcmp.ge.s32.totalorder %v19766_v61, 1  ;;  %v19833_v43 = vcvt.f32.s32 %v17383_v63  ;;  %v16382_v4 = vpop.f32.mrf.mxu0  ;;  %16652 = vmatprep.subr.bf16.mxu1 %v22291_v1 }
 0x3c3   : > { %vm19823_vm5 = vmand %vm19740_vm13, %vm22406_vm7  ;;  %v8235_v29 = vsel %vm22409_vm1, %v8232_v58, %v8234_v17  ;;  %vm22410_vm13 = vcmp.le.s32.totalorder %v19380_v0, 16  ;;  %vm22411_vm7 = vcmp.ge.s32.totalorder %v19380_v0, 1  ;;  %v7562_v16 = vrot.slane %v7560_v42, 2 }
 0x3c4   : > { %vm19841_vm9 = vmand %vm22411_vm7, %vm22410_vm13  ;;  %16569 = vmatmul.mubr.bf16.gmra.mxu0 %v8235_v29  ;;  %v7565_v58 = vrot.slane %v7563_v53, 3  ;;  %v19846_v31 = vadd.f32 0.027777778, %v19727_v41  ;;  %v19848_v6 = vmul.f32 0.055555556, %v6468_v49  ;;  %v7115_v51 = vsel %vm19681_vm14, %v7074_v35, 0.0  ;;  %v6203_v63 = vpop.f32.mrf.mxu0 }
 0x3c5   : > { %v7116_v11 = vsel %vm19789_vm10, %v7075_v38, 0.0  ;;  %v19855_v0 = vadd.f32 %v19142_v39, %v6330_v46  ;;  %vm19861_vm1 = vmand %vm6703_vm3, %vm6744_vm15  ;;  %16572 = vmatprep.mubr.msk.bf16.mxu0 %vm22360_vm12, %v22291_v1  ;;  %v17385_v15 = vtrunc.f32 %v19605_v7  ;;  %v17764_v41 = vld [vmem:[%s22280_s3 + $0xd8] sm:$0xff]   ;;  %vm6705_vm14 = vcmp.ge.s32.totalorder %v19537_v47, 1  ;;  %v17752_v7 = vld [vmem:[%s22280_s3 + $0x88] sm:$0xff]  }
 0x3c6   : > { %v14807_v26 = vpack.c.bf16 %v7116_v11, %v7115_v51  ;;  %v19871_v55 = vor.u32 %v7565_v58, %v7562_v16  ;;  %vm6746_vm3 = vcmp.le.s32.totalorder %v19537_v47, 16  ;;  %v17387_v56 = vtrunc.f32 %v19627_v24  ;;  %v19883_v49 = vld [vmem:[#allocation3 + $0x2c] sm:$0xff]   ;;  %v16383_v24 = vpop.f32.mrf.mxu0  ;;  %vm19903_vm15 = vmand %vm19841_vm9, %vm6825_vm11  ;;  %16749 = vmatpush3.bf16.msra.mxu0 %v17764_v41  ;;  %16653 = vmatpush3.bf16.msra.mxu1 %v17752_v7  ;;  %v17763_v16 = vld [vmem:[%s22280_s3 + $0x80] sm:$0xff]  }
 0x3c7   : > { %v19877_v27 = vadd.s32 216, %v19014_v44  ;;  %v6331_v40 = vadd.f32 %v6203_v63, %v5671_v12  ;;  %vm6747_vm10 = vcmp.le.s32.totalorder %v19632_v23, 16  ;;  %v6626_v35 = vmul.u32 18, %v19811_v3  ;;  %v17724_v59 = vld [vmem:[#allocation3 + $0x2c] sm:$0xff]   ;;  %vm19918_vm11 = vmand %vm19861_vm1, %vm6826_vm2  ;;  %16654 = vmatprep.subr.bf16.mxu1 %v22291_v1  ;;  %16750 = vmatprep.subr.bf16.mxu0 %v22291_v1 }
 0x3c8   : > { %14984 = vst [vmem:[#allocation3 + $0x38] sm:$0xff] %v14807_v26   ;;  %vm22416_vm13 = vsmask.f32 5376  ;;  %vm6909_vm7 = vcmp.le.s32.totalorder %v19766_v61, 16  ;;  %v19894_v25 = vsub.s32 %v19305_v37, %v6625_v48  ;;  %v6627_v45 = vmul.u32 18, %v19833_v43  ;;  %v17766_v48 = vld [vmem:[%s22280_s3 + $0xd0] sm:$0xff]   ;;  %v6208_v38 = vpop.f32.mrf.mxu0 }
 0x3c9   : > { %v7567_v34 = vsel %vm22416_vm13, %v19751_v57, %v19871_v55  ;;  %v7076_v42 = vmax.f32 %v19855_v0, 0.0  ;;  %v7036_v53 = vadd.f32 %v19142_v39, %v6331_v40  ;;  %v8236_v57 = vrot.slane %v19883_v49, 3 }
 0x3ca   : > { %16469 = vmatmul.mubr.bf16.gmra.mxu1 %v7567_v34  ;;  %v19909_v37 = vcvt.f32.s32 %v17385_v15  ;;  %v7569_v29 = vshrl.u32 %v17724_v59, 16  ;;  %v7572_v4 = vshll.u32 %v17724_v59, 16  ;;  %v19925_v12 = vcvt.f32.s32 %v17387_v56  ;;  %v16386_v22 = vpop.f32.mrf.mxu0  ;;  %v5673_v15 = vld [vmem:[#allocation4 + $0x20] sm:$0xff]  ;;  %16751 = vmatpush3.bf16.msra.mxu0 %v17766_v48 }
 0x3cb   : > { %16472 = vmatprep.mubr.msk.bf16.mxu1 %vm22360_vm12, %v22291_v1  ;;  %v6469_v2 = vcvt.s32.f32 %v19877_v27  ;;  %v7077_v58 = vmax.f32 %v7036_v53, 0.0  ;;  %v6332_v51 = vadd.f32 %v6208_v38, %v5672_v60  ;;  %vm22421_vm2 = vcmp.ge.s32.totalorder %v19535_v10, 1  ;;  %16655 = vmatpush3.bf16.msra.mxu1 %v17763_v16  ;;  %v17768_v16 = vld [vmem:[%s22280_s3 + $0xc0] sm:$0xff]  }
 0x3cc   : > { %vm19935_vm1 = vmand %vm22421_vm2, %vm6745_vm0  ;;  %vm22424_vm9 = vcmask 1044480   ;;  %vm6707_vm13 = vcmp.ge.s32.totalorder %v19746_v54, 1  ;;  %v19946_v33 = vadd.s32 224, %v19014_v44  ;;  %vm22425_vm0 = vcmp.le.s32.totalorder %v19644_v28, 16  ;;  %16752 = vmatprep.subr.bf16.mxu0 %v22291_v1  ;;  %16840 = vmatprep.subr.bf16.mxu1 %v22291_v1 }
 0x3cd   : > { %v8237_v0 = vsel %vm22424_vm9, %v8234_v17, %v8236_v57  ;;  %vm19954_vm2 = vmand %vm19903_vm15, %vm22425_vm0  ;;  %v7571_v17 = vrot.slane %v7569_v29, 2  ;;  %v7574_v41 = vrot.slane %v7572_v4, 3  ;;  %v17389_v26 = vtrunc.f32 %v19814_v13  ;;  %v6211_v13 = vpop.f32.mrf.mxu0  ;;  %v20023_v4 = vld [vmem:[%s22279_s2] ss:$0 sm:$0xff] }
 0x3ce   : > { %16573 = vmatmul.mubr.bf16.gmra.mxu0 %v8237_v0  ;;  %v19960_v63 = vadd.f32 0.027777778, %v19848_v6  ;;  %v7117_v56 = vsel %vm19804_vm4, %v7076_v42, 0.0  ;;  %v7118_v28 = vsel %vm19823_vm5, %v7077_v58, 0.0  ;;  %v19967_v7 = vadd.f32 %v19142_v39, %v6332_v51  ;;  %vm19987_vm4 = vmand %vm19935_vm1, %vm6827_vm6 }
 0x3cf   : > { %vm22428_vm15 = vcmp.le.s32.totalorder %v19655_v62, 16  ;;  %16576 = vmatprep.mubr.msk.bf16.mxu0 %vm22360_vm12, %v22291_v1  ;;  %vm6748_vm0 = vcmp.le.s32.totalorder %v19746_v54, 16  ;;  %v14812_v39 = vpack.c.bf16 %v7118_v28, %v7117_v56  ;;  %v19991_v5 = vor.u32 %v7574_v41, %v7571_v17  ;;  %v19997_v34 = vld [vmem:[#allocation3 + $0x34] sm:$0xff]   ;;  %16753 = vmatpush3.bf16.msra.mxu0 %v17767_v14  ;;  %v5675_v28 = vld [vmem:[#allocation4 + $0x110] sm:$0xff] }
 0x3d0   : > { %vm19973_vm9 = vmand %vm19918_vm11, %vm22428_vm15  ;;  %vm6830_vm5 = vcmp.ge.s32.totalorder %v19894_v25, 1  ;;  %v17391_v6 = vtrunc.f32 %v19846_v31  ;;  %v6510_v24 = vmul.f32 0.055555556, %v6469_v2  ;;  %v6333_v60 = vadd.f32 %v6211_v13, %v5673_v15  ;;  %v16387_v31 = vpop.f32.mrf.mxu0  ;;  %v17726_v38 = vld [vmem:[#allocation3 + $0x34] sm:$0xff]   ;;  %16754 = vmatprep.subr.bf16.mxu0 %v22291_v1 }
 0x3d1   : > { %v20002_v59 = vsub.s32 %v19370_v20, %v6626_v35  ;;  %v6628_v42 = vmul.u32 18, %v19909_v37  ;;  %v6470_v53 = vcvt.s32.f32 %v19946_v33  ;;  %14985 = vst [vmem:[#allocation3 + $0x40] sm:$0xff] %v14812_v39   ;;  %vm22433_vm6 = vsmask.f32 5376  ;;  %vm20030_vm15 = vmand %vm6705_vm14, %vm6746_vm3 }
 0x3d2   : > { %v7576_v48 = vsel %vm22433_vm6, %v19871_v55, %v19991_v5  ;;  %v20014_v20 = vsub.s32 %v19385_v19, %v6627_v45  ;;  %v6629_v35 = vmul.u32 18, %v19925_v12  ;;  %v20017_v46 = vcvt.f32.s32 %v17389_v26  ;;  %v6216_v58 = vpop.f32.mrf.mxu0 }
 0x3d3   : > { %v7078_v29 = vmax.f32 %v19967_v7, 0.0  ;;  %v7038_v55 = vadd.f32 %v20023_v4, %v6333_v60  ;;  %16473 = vmatmul.mubr.bf16.gmra.mxu1 %v7576_v48  ;;  %v8238_v45 = vrot.slane %v19997_v34, 3  ;;  %v20037_v2 = vadd.s32 232, %v19014_v44  ;;  %16755 = vmatpush3.bf16.msra.mxu0 %v17768_v16 }
 0x3d4   : > { %vm22436_vm14 = vcmp.ge.s32.totalorder %v19632_v23, 1  ;;  %16476 = vmatprep.mubr.msk.bf16.mxu1 %vm22360_vm12, %v22291_v1  ;;  %v7578_v51 = vshrl.u32 %v17726_v38, 16  ;;  %v7581_v11 = vshll.u32 %v17726_v38, 16  ;;  %v20054_v0 = vcvt.f32.s32 %v17391_v6  ;;  %v16390_v56 = vpop.f32.mrf.mxu0  ;;  %16940 = vmatprep.subr.bf16.mxu0 %v22291_v1 }
 0x3d5   : > { %vm20046_vm3 = vmand %vm22436_vm14, %vm6747_vm10  ;;  %v20056_v22 = vadd.f32 0.027777778, %v6510_v24  ;;  %v7079_v23 = vmax.f32 %v7038_v55, 0.0  ;;  %v6334_v15 = vadd.f32 %v6216_v58, %v5674_v9  ;;  %vm22441_vm14 = vcmask 1044480   ;;  %v5676_v55 = vld [vmem:[#allocation4 + $0x8] sm:$0xff] }
 0x3d6   : > { %vm20063_vm10 = vmand %vm19987_vm4, %vm6909_vm7  ;;  %v8239_v41 = vsel %vm22441_vm14, %v8236_v57, %v8238_v45  ;;  %vm6709_vm6 = vcmp.ge.s32.totalorder %v19833_v43, 1  ;;  %vm6750_vm1 = vcmp.le.s32.totalorder %v19833_v43, 16  ;;  %v6511_v26 = vmul.f32 0.055555556, %v6470_v53  ;;  %v6219_v10 = vpop.f32.mrf.mxu0 }
 0x3d7   : > { %vm22442_vm11 = vcmp.ge.s32.totalorder %v19778_v32, 1  ;;  %16577 = vmatmul.mubr.bf16.gmra.mxu0 %v8239_v41  ;;  %v7580_v7 = vrot.slane %v7578_v51, 2  ;;  %v7583_v49 = vrot.slane %v7581_v11, 3  ;;  %v17393_v57 = vtrunc.f32 %v19960_v63 }
 0x3d8   : > { %vm20078_vm7 = vmand %vm20030_vm15, %vm22442_vm11  ;;  %v20084_v14 = vadd.s32 240, %v19014_v44  ;;  %v7119_v39 = vsel %vm19954_vm2, %v7078_v29, 0.0  ;;  %v7120_v13 = vsel %vm19973_vm9, %v7079_v23, 0.0  ;;  %v7039_v62 = vadd.f32 %v20023_v4, %v6334_v15  ;;  %16580 = vmatprep.mubr.msk.bf16.mxu0 %vm22360_vm12, %v22291_v1  ;;  %v20117_v9 = vld [vmem:[#allocation3 + $0x3c] sm:$0xff]   ;;  %v16391_v29 = vpop.f32.mrf.mxu0 }
 0x3d9   : > { %vm22445_vm4 = vcmp.ge.s32.totalorder %v19781_v30, 1  ;;  %v14817_v63 = vpack.c.bf16 %v7120_v13, %v7119_v39  ;;  %vm20105_vm2 = vmand %vm6707_vm13, %vm6748_vm0  ;;  %v20109_v24 = vor.u32 %v7583_v49, %v7580_v7  ;;  %vm6831_vm9 = vcmp.ge.s32.totalorder %v20002_v59, 1  ;;  %v17729_v16 = vld [vmem:[#allocation3 + $0x3c] sm:$0xff]   ;;  %v5677_v13 = vld [vmem:[#allocation4 + $0x98] sm:$0xff] }
 0x3da   : > { %vm20095_vm11 = vmand %vm20046_vm3, %vm22445_vm4  ;;  %v6471_v60 = vcvt.s32.f32 %v20037_v2  ;;  %v20114_v53 = vadd.s32 248, %v19014_v44  ;;  %v6335_v31 = vadd.f32 %v6219_v10, %v5675_v28  ;;  %vm6832_vm15 = vcmp.ge.s32.totalorder %v20014_v20, 1  ;;  %v6224_v15 = vpop.f32.mrf.mxu0 }
 0x3db   : > { %v20123_v54 = vsub.s32 %v19414_v36, %v6628_v42  ;;  %v6630_v48 = vmul.u32 18, %v20017_v46  ;;  %v17395_v38 = vtrunc.f32 %v20056_v22  ;;  %14986 = vst [vmem:[#allocation3 + $0x48] sm:$0xff] %v14817_v63   ;;  %vm22450_vm13 = vsmask.f32 5376  ;;  %vm20141_vm14 = vmand %vm20105_vm2, %vm6830_vm5 }
 0x3dc   : > { %v7585_v19 = vsel %vm22450_vm13, %v19991_v5, %v20109_v24  ;;  %vm6751_vm3 = vcmp.le.s32.totalorder %v19909_v37, 16  ;;  %v6631_v58 = vmul.u32 18, %v20054_v0  ;;  %v20133_v36 = vcvt.f32.s32 %v17393_v57  ;;  %v16394_v39 = vpop.f32.mrf.mxu0 }
 0x3dd   : > { %v6472_v42 = vcvt.s32.f32 %v20084_v14  ;;  %v7080_v47 = vmax.f32 %v7039_v62, 0.0  ;;  %v7040_v51 = vadd.f32 %v20023_v4, %v6335_v31  ;;  %16477 = vmatmul.mubr.bf16.gmra.mxu1 %v7585_v19  ;;  %v8240_v11 = vrot.slane %v20117_v9, 3 }
 0x3de   : > { %v20147_v22 = vadd.f32 0.027777778, %v6511_v26  ;;  %vm22453_vm13 = vcmp.le.s32.totalorder %v19778_v32, 16  ;;  %16480 = vmatprep.mubr.msk.bf16.mxu1 %vm22360_vm12, %v22291_v1  ;;  %v7587_v41 = vshrl.u32 %v17729_v16, 16  ;;  %v7590_v56 = vshll.u32 %v17729_v16, 16  ;;  %v6227_v31 = vpop.f32.mrf.mxu0 }
 0x3df   : > { %vm20153_vm0 = vmand %vm20078_vm7, %vm22453_vm13  ;;  %v6512_v28 = vmul.f32 0.055555556, %v6471_v60  ;;  %v6473_v26 = vcvt.s32.f32 %v20114_v53  ;;  %v7081_v7 = vmax.f32 %v7040_v51, 0.0  ;;  %v6336_v49 = vadd.f32 %v6224_v15, %v5676_v55 }
 0x3e0   : > { %vm22456_vm2 = vcmp.le.s32.totalorder %v19781_v30, 16  ;;  %vm22459_vm13 = vcmask 1044480   ;;  %vm6833_vm5 = vcmp.ge.s32.totalorder %v20123_v54, 1  ;;  %v20175_v57 = vcvt.f32.s32 %v17395_v38  ;;  %v16395_v16 = vpop.f32.mrf.mxu0 }
 0x3e1   : > { %vm20165_vm7 = vmand %vm20095_vm11, %vm22456_vm2  ;;  %v8241_v61 = vsel %vm22459_vm13, %v8238_v45, %v8240_v11  ;;  %vm22460_vm4 = vcmp.le.s32.totalorder %v19894_v25, 16  ;;  %v7589_v62 = vrot.slane %v7587_v41, 2  ;;  %v7592_v6 = vrot.slane %v7590_v56, 3 }
 0x3e2   : > { %vm20181_vm11 = vmand %vm20141_vm14, %vm22460_vm4  ;;  %16581 = vmatmul.mubr.bf16.gmra.mxu0 %v8241_v61  ;;  %v6513_v34 = vmul.f32 0.055555556, %v6472_v42  ;;  %v20186_v45 = vadd.s32 256, %v19014_v44  ;;  %v7121_v63 = vsel %vm20063_vm10, %v7080_v47, 0.0  ;;  %v7122_v10 = vsel %vm20153_vm0, %v7081_v7, 0.0  ;;  %v20223_v55 = vld [vmem:[#allocation3 + $0x44] sm:$0xff]  }
 0x3e3   : > { %v7041_v25 = vadd.f32 %v20023_v4, %v6336_v49  ;;  %vm22463_vm14 = vcmp.le.s32.totalorder %v19811_v3, 16  ;;  %vm22464_vm4 = vcmp.ge.s32.totalorder %v19811_v3, 1  ;;  %16584 = vmatprep.mubr.msk.bf16.mxu0 %vm22360_vm12, %v22291_v1  ;;  %v20206_v17 = vsub.s32 %v19445_v8, %v6629_v35  ;;  %vm20212_vm10 = vmand %vm6709_vm6, %vm6750_vm1  ;;  %v5678_v42 = vld [vmem:[#allocation4 + $0xa8] sm:$0xff] }
 0x3e4   : > { %vm20197_vm2 = vmand %vm22464_vm4, %vm22463_vm14  ;;  %v14822_v60 = vpack.c.bf16 %v7122_v10, %v7121_v63  ;;  %v20216_v38 = vor.u32 %v7592_v6, %v7589_v62  ;;  %vm6711_vm0 = vcmp.ge.s32.totalorder %v19925_v12, 1  ;;  %vm6752_vm13 = vcmp.le.s32.totalorder %v19925_v12, 16  ;;  %v5679_v6 = vld [vmem:[#allocation4 + $0x90] sm:$0xff] }
 0x3e5   : > { %v20221_v29 = vsub.s32 %v19576_v21, %v6630_v48  ;;  %v6514_v8 = vmul.f32 0.055555556, %v6473_v26  ;;  %v6337_v35 = vadd.f32 %v6227_v31, %v5677_v13  ;;  %v6632_v43 = vmul.u32 18, %v20133_v36  ;;  %v17731_v48 = vld [vmem:[#allocation3 + $0x44] sm:$0xff]   ;;  %vm20242_vm14 = vmand %vm20197_vm2, %vm6831_vm9 }
 0x3e6   : > { %v17397_v19 = vtrunc.f32 %v20147_v22  ;;  %14987 = vst [vmem:[#allocation3 + $0x50] sm:$0xff] %v14822_v60   ;;  %vm22469_vm6 = vsmask.f32 5376  ;;  %v20234_v47 = vsub.s32 %v19608_v50, %v6631_v58  ;;  %v6633_v51 = vmul.u32 18, %v20175_v57  ;;  %v6232_v58 = vpop.f32.mrf.mxu0  ;;  %vm20252_vm4 = vmand %vm20212_vm10, %vm6832_vm15 }
 0x3e7   : > { %v7594_v21 = vsel %vm22469_vm6, %v20109_v24, %v20216_v38  ;;  %v7082_v5 = vmax.f32 %v7041_v25, 0.0  ;;  %v7042_v23 = vadd.f32 %v20023_v4, %v6337_v35  ;;  %v8242_v24 = vrot.slane %v20223_v55, 3 }
 0x3e8   : > { %16481 = vmatmul.mubr.bf16.gmra.mxu1 %v7594_v21  ;;  %v6553_v50 = vadd.f32 0.027777778, %v6512_v28  ;;  %v7596_v41 = vshrl.u32 %v17731_v48, 16  ;;  %v7599_v56 = vshll.u32 %v17731_v48, 16  ;;  %v6554_v26 = vadd.f32 0.027777778, %v6513_v34  ;;  %v16398_v62 = vpop.f32.mrf.mxu0 }
 0x3e9   : > { %16484 = vmatprep.mubr.msk.bf16.mxu1 %vm22360_vm12, %v22291_v1  ;;  %v6474_v7 = vcvt.s32.f32 %v20186_v45  ;;  %v7083_v28 = vmax.f32 %v7042_v23, 0.0  ;;  %v6338_v49 = vadd.f32 %v6232_v58, %v5678_v42  ;;  %vm22474_vm2 = vcmp.ge.s32.totalorder %v19909_v37, 1 }
 0x3ea   : > { %vm20264_vm15 = vmand %vm22474_vm2, %vm6751_vm3  ;;  %vm22477_vm10 = vcmask 1044480   ;;  %vm6713_vm9 = vcmp.ge.s32.totalorder %v20054_v0, 1  ;;  %vm6754_vm6 = vcmp.le.s32.totalorder %v20054_v0, 16  ;;  %v20275_v13 = vcvt.f32.s32 %v17397_v19  ;;  %v6235_v32 = vpop.f32.mrf.mxu0 }
 0x3eb   : > { %v8243_v39 = vsel %vm22477_vm10, %v8240_v11, %v8242_v24  ;;  %vm22478_vm1 = vcmp.le.s32.totalorder %v20002_v59, 16  ;;  %v7598_v9 = vrot.slane %v7596_v41, 2  ;;  %v7601_v34 = vrot.slane %v7599_v56, 3 }
 0x3ec   : > { %vm20281_vm3 = vmand %vm20242_vm14, %vm22478_vm1  ;;  %16585 = vmatmul.mubr.bf16.gmra.mxu0 %v8243_v39  ;;  %v20285_v11 = vadd.f32 0.027777778, %v6514_v8  ;;  %v20288_v63 = vadd.s32 264, %v19014_v44  ;;  %v7123_v10 = vsel %vm20165_vm7, %v7082_v5, 0.0  ;;  %v7124_v59 = vsel %vm20181_vm11, %v7083_v28, 0.0  ;;  %v16399_v42 = vpop.f32.mrf.mxu0 }
 0x3ed   : > { %v7043_v25 = vadd.f32 %v20023_v4, %v6338_v49  ;;  %vm22481_vm14 = vcmp.le.s32.totalorder %v20014_v20, 16  ;;  %16588 = vmatprep.mubr.msk.bf16.mxu0 %vm22360_vm12, %v22291_v1  ;;  %v17399_v60 = vtrunc.f32 %v6553_v50  ;;  %v14827_v31 = vpack.c.bf16 %v7124_v59, %v7123_v10  ;;  %vm20309_vm7 = vmand %vm20264_vm15, %vm6833_vm5  ;;  %v20316_v19 = vld [vmem:[#allocation3 + $0x4c] sm:$0xff]   ;;  %v5682_v42 = vld [vmem:[#allocation4 + $0xc0] sm:$0xff] }
 0x3ee   : > { %vm20299_vm1 = vmand %vm20252_vm4, %vm22481_vm14  ;;  %v20313_v20 = vor.u32 %v7601_v34, %v7598_v9  ;;  %v17401_v3 = vtrunc.f32 %v6554_v26  ;;  %v6515_v8 = vmul.f32 0.055555556, %v6474_v7  ;;  %v6339_v35 = vadd.f32 %v6235_v32, %v5679_v6  ;;  %v17733_v48 = vld [vmem:[#allocation3 + $0x4c] sm:$0xff]   ;;  %v6240_v58 = vpop.f32.mrf.mxu0 }
 0x3ef   : > { %vm6836_vm4 = vcmp.ge.s32.totalorder %v20234_v47, 1  ;;  %v20320_v16 = vsub.s32 %v19717_v18, %v6632_v43  ;;  %14988 = vst [vmem:[#allocation3 + $0x58] sm:$0xff] %v14827_v31   ;;  %vm22486_vm5 = vsmask.f32 5376  ;;  %v20327_v5 = vsub.s32 %v19877_v27, %v6633_v51  ;;  %vm20336_vm15 = vmand %vm6711_vm0, %vm6752_vm13  ;;  %v5680_v51 = vld [vmem:[#allocation4 + $0xe0] sm:$0xff] }
 0x3f0   : > { %v7603_v21 = vsel %vm22486_vm5, %v20216_v38, %v20313_v20  ;;  %v6634_v23 = vmul.u32 18, %v20275_v13  ;;  %v6475_v22 = vcvt.s32.f32 %v20288_v63  ;;  %v7084_v50 = vmax.f32 %v7043_v25, 0.0  ;;  %vm22496_vm0 = vmmov %vm22477_vm10  ;;  %v16402_v39 = vpop.f32.mrf.mxu0  ;;  %v5681_v25 = vld [vmem:[#allocation4 + $0x88] sm:$0xff] }
 0x3f1   : > { %v7044_v18 = vadd.f32 %v20023_v4, %v6339_v35  ;;  %16485 = vmatmul.mubr.bf16.gmra.mxu1 %v7603_v21  ;;  %v8244_v38 = vrot.slane %v20316_v19, 3  ;;  %v20342_v27 = vcvt.f32.s32 %v17399_v60  ;;  %vm22489_vm14 = vcmp.le.s32.totalorder %v20017_v46, 16 }
 0x3f2   : > { %vm22490_vm5 = vcmp.ge.s32.totalorder %v20017_v46, 1  ;;  %16488 = vmatprep.mubr.msk.bf16.mxu1 %vm22360_vm12, %v22291_v1  ;;  %v7605_v12 = vshrl.u32 %v17733_v48, 16  ;;  %v7608_v41 = vshll.u32 %v17733_v48, 16  ;;  %v20356_v56 = vcvt.f32.s32 %v17401_v3  ;;  %v6243_v37 = vpop.f32.mrf.mxu0 }
 0x3f3   : > { %vm20348_vm2 = vmand %vm22490_vm5, %vm22489_vm14  ;;  %v20359_v26 = vadd.s32 272, %v19014_v44  ;;  %v7085_v7 = vmax.f32 %v7044_v18, 0.0  ;;  %v6340_v46 = vadd.f32 %v6240_v58, %v5680_v51  ;;  %vm22493_vm14 = vcmp.le.s32.totalorder %v20123_v54, 16  ;;  %v5683_v54 = vld [vmem:[#allocation4 + $0x118] sm:$0xff] }
 0x3f4   : > { %vm20365_vm5 = vmand %vm20309_vm7, %vm22493_vm14  ;;  %v8245_v49 = vsel %vm22496_vm0, %v8242_v24, %v8244_v38  ;;  %vm6715_vm13 = vcmp.ge.s32.totalorder %v20175_v57, 1  ;;  %vm6756_vm10 = vcmp.le.s32.totalorder %v20175_v57, 16  ;;  %v17403_v61 = vtrunc.f32 %v20285_v11  ;;  %v16403_v35 = vpop.f32.mrf.mxu0 }
 0x3f5   : > { %vm22497_vm11 = vcmp.ge.s32.totalorder %v20206_v17, 1  ;;  %16589 = vmatmul.mubr.bf16.gmra.mxu0 %v8245_v49  ;;  %v7607_v62 = vrot.slane %v7605_v12, 2  ;;  %v7610_v55 = vrot.slane %v7608_v41, 3  ;;  %v20385_v6 = vadd.f32 0.027777778, %v6515_v8 }
 0x3f6   : > { %vm20381_vm7 = vmand %vm20336_vm15, %vm22497_vm11  ;;  %v6516_v24 = vmul.f32 0.055555556, %v6475_v22  ;;  %v7125_v9 = vsel %vm20281_vm3, %v7084_v50, 0.0  ;;  %v7126_v34 = vsel %vm20299_vm1, %v7085_v7, 0.0  ;;  %v7045_v11 = vadd.f32 %v20023_v4, %v6340_v46  ;;  %16592 = vmatprep.mubr.msk.bf16.mxu0 %vm22360_vm12, %v22291_v1  ;;  %v20415_v3 = vld [vmem:[#allocation3 + $0x54] sm:$0xff]   ;;  %v6248_v58 = vpop.f32.mrf.mxu0 }
 0x3f7   : > { %vm22500_vm0 = vcmp.ge.s32.totalorder %v20221_v29, 1  ;;  %v14832_v59 = vpack.c.bf16 %v7126_v34, %v7125_v9  ;;  %vm20406_vm3 = vmand %vm6713_vm9, %vm6754_vm6  ;;  %v20410_v60 = vor.u32 %v7610_v55, %v7607_v62  ;;  %vm6837_vm1 = vcmp.ge.s32.totalorder %v20320_v16, 1  ;;  %v17736_v48 = vld [vmem:[#allocation3 + $0x54] sm:$0xff]  }
 0x3f8   : > { %vm20396_vm11 = vmand %vm20348_vm2, %vm22500_vm0  ;;  %v6635_v31 = vmul.u32 18, %v20342_v27  ;;  %v6476_v32 = vcvt.s32.f32 %v20359_v26  ;;  %v6341_v30 = vadd.f32 %v6243_v37, %v5681_v25  ;;  %vm6838_vm2 = vcmp.ge.s32.totalorder %v20327_v5, 1  ;;  %v16406_v39 = vpop.f32.mrf.mxu0 }
 0x3f9   : > { %v20419_v8 = vsub.s32 %v19946_v33, %v6634_v23  ;;  %v6636_v0 = vmul.u32 18, %v20356_v56  ;;  %14989 = vst [vmem:[#allocation3 + $0x60] sm:$0xff] %v14832_v59   ;;  %vm22505_vm6 = vsmask.f32 5376  ;;  %vm6757_vm15 = vcmp.le.s32.totalorder %v20275_v13, 16  ;;  %vm20435_vm14 = vmand %vm20406_vm3, %vm6836_vm4 }
 0x3fa   : > { %v7612_v21 = vsel %vm22505_vm6, %v20313_v20, %v20410_v60  ;;  %v20427_v22 = vcvt.f32.s32 %v17403_v61  ;;  %v17405_v50 = vtrunc.f32 %v20385_v6  ;;  %v7086_v33 = vmax.f32 %v7045_v11, 0.0  ;;  %v6251_v34 = vpop.f32.mrf.mxu0  ;;  %v5686_v11 = vld [vmem:[#allocation4 + $0x68] sm:$0xff] }
 0x3fb   : > { %v7046_v23 = vadd.f32 %v20023_v4, %v6341_v30  ;;  %16489 = vmatmul.mubr.bf16.gmra.mxu1 %v7612_v21  ;;  %v8246_v20 = vrot.slane %v20415_v3, 3  ;;  %v6557_v43 = vadd.f32 0.027777778, %v6516_v24  ;;  %vm22508_vm6 = vcmp.le.s32.totalorder %v20206_v17, 16  ;;  %v5684_v21 = vld [vmem:[#allocation4 + $0xd8] sm:$0xff] }
 0x3fc   : > { %vm20445_vm9 = vmand %vm20381_vm7, %vm22508_vm6  ;;  %16492 = vmatprep.mubr.msk.bf16.mxu1 %vm22360_vm12, %v22291_v1  ;;  %v7614_v15 = vshrl.u32 %v17736_v48, 16  ;;  %v7617_v12 = vshll.u32 %v17736_v48, 16  ;;  %v20453_v41 = vsub.s32 %v20037_v2, %v6635_v31  ;;  %v6517_v7 = vmul.f32 0.055555556, %v6476_v32  ;;  %v16407_v40 = vpop.f32.mrf.mxu0 }
 0x3fd   : > { %v7087_v46 = vmax.f32 %v7046_v23, 0.0  ;;  %v6342_v17 = vadd.f32 %v6248_v58, %v5682_v42  ;;  %vm22511_vm3 = vcmp.le.s32.totalorder %v20221_v29, 16  ;;  %vm22514_vm6 = vcmask 1044480  }
 0x3fe   : > { %vm20459_vm7 = vmand %vm20396_vm11, %vm22511_vm3  ;;  %v8247_v61 = vsel %vm22514_vm6, %v8244_v38, %v8246_v20  ;;  %vm6839_vm4 = vcmp.ge.s32.totalorder %v20419_v8, 1  ;;  %v20470_v2 = vsub.s32 %v20084_v14, %v6636_v0  ;;  %vm22515_vm0 = vcmp.le.s32.totalorder %v20234_v47, 16  ;;  %v6256_v48 = vpop.f32.mrf.mxu0 }
 0x3ff   : > { %vm20476_vm11 = vmand %vm20435_vm14, %vm22515_vm0  ;;  %16593 = vmatmul.mubr.bf16.gmra.mxu0 %v8247_v61  ;;  %v7616_v62 = vrot.slane %v7614_v15, 2  ;;  %v7619_v19 = vrot.slane %v7617_v12, 3  ;;  %v6637_v38 = vmul.u32 18, %v20427_v22  ;;  %v20482_v55 = vadd.s32 280, %v19014_v44 }
 0x400   : > { %v7127_v14 = vsel %vm20365_vm5, %v7086_v33, 0.0  ;;  %v7128_v47 = vsel %vm20445_vm9, %v7087_v46, 0.0  ;;  %v7047_v6 = vadd.f32 %v20023_v4, %v6342_v17  ;;  %vm22518_vm14 = vcmp.le.s32.totalorder %v20133_v36, 16  ;;  %16596 = vmatprep.mubr.msk.bf16.mxu0 %vm22360_vm12, %v22291_v1  ;;  %vm20505_vm5 = vmand %vm6715_vm13, %vm6756_vm10  ;;  %v20513_v37 = vld [vmem:[#allocation3 + $0x5c] sm:$0xff]  }
 0x401   : > { %vm22519_vm0 = vcmp.ge.s32.totalorder %v20133_v36, 1  ;;  %v20499_v9 = vcvt.f32.s32 %v17405_v50  ;;  %v14837_v28 = vpack.c.bf16 %v7128_v47, %v7127_v14  ;;  %v20509_v36 = vor.u32 %v7619_v19, %v7616_v62  ;;  %v17738_v31 = vld [vmem:[#allocation3 + $0x5c] sm:$0xff]   ;;  %vm20541_vm13 = vmand %vm20505_vm5, %vm6838_vm2 }
 0x402   : > { %vm20493_vm3 = vmand %vm22519_vm0, %vm22518_vm14  ;;  %vm6717_vm9 = vcmp.ge.s32.totalorder %v20342_v27, 1  ;;  %vm6758_vm6 = vcmp.le.s32.totalorder %v20342_v27, 16  ;;  %v17407_v10 = vtrunc.f32 %v6557_v43  ;;  %v6558_v59 = vadd.f32 0.027777778, %v6517_v7  ;;  %v5685_v17 = vld [vmem:[#allocation4 + $0xa0] sm:$0xff] }
 0x403   : > { %v6343_v25 = vadd.f32 %v6251_v34, %v5683_v54  ;;  %14990 = vst [vmem:[#allocation3 + $0x68] sm:$0xff] %v14837_v28   ;;  %vm22524_vm10 = vsmask.f32 5376  ;;  %v20522_v32 = vsub.s32 %v20114_v53, %v6637_v38  ;;  %v6477_v30 = vcvt.s32.f32 %v20482_v55  ;;  %vm20530_vm14 = vmand %vm20493_vm3, %vm6837_vm1 }
 0x404   : > { %v7621_v57 = vsel %vm22524_vm10, %v20410_v60, %v20509_v36  ;;  %v7088_v0 = vmax.f32 %v7047_v6, 0.0  ;;  %v8248_v60 = vrot.slane %v20513_v37, 3  ;;  %v6638_v53 = vmul.u32 18, %v20499_v9 }
 0x405   : > { %v7048_v35 = vadd.f32 %v20023_v4, %v6343_v25  ;;  %16493 = vmatmul.mubr.bf16.gmra.mxu1 %v7621_v57  ;;  %v7623_v33 = vshrl.u32 %v17738_v31, 16  ;;  %v7626_v23 = vshll.u32 %v17738_v31, 16  ;;  %v20548_v18 = vcvt.f32.s32 %v17407_v10 }
 0x406   : > { %16496 = vmatprep.mubr.msk.bf16.mxu1 %vm22360_vm12, %v22291_v1  ;;  %v20551_v43 = vadd.s32 288, %v19014_v44  ;;  %v6344_v58 = vadd.f32 %v6256_v48, %v5684_v21  ;;  %vm22529_vm2 = vcmp.ge.s32.totalorder %v20275_v13, 1  ;;  %vm22532_vm5 = vcmask 1044480   ;;  %v16410_v13 = vpop.f32.mrf.mxu0 }
 0x407   : > { %v7089_v51 = vmax.f32 %v7048_v35, 0.0  ;;  %vm20557_vm3 = vmand %vm22529_vm2, %vm6757_vm15  ;;  %v8249_v12 = vsel %vm22532_vm5, %v8246_v20, %v8248_v60  ;;  %vm6719_vm1 = vcmp.ge.s32.totalorder %v20427_v22, 1  ;;  %v17409_v7 = vtrunc.f32 %v6558_v59 }
 0x408   : > { %vm22533_vm10 = vcmp.le.s32.totalorder %v20320_v16, 16  ;;  %16597 = vmatmul.mubr.bf16.gmra.mxu0 %v8249_v12  ;;  %v7625_v61 = vrot.slane %v7623_v33, 2  ;;  %v7628_v39 = vrot.slane %v7626_v23, 3  ;;  %v6518_v54 = vmul.f32 0.055555556, %v6477_v30  ;;  %v6259_v14 = vpop.f32.mrf.mxu0 }
 0x409   : > { %vm20571_vm0 = vmand %vm20530_vm14, %vm22533_vm10  ;;  %v20576_v3 = vadd.s32 296, %v19014_v44  ;;  %v7129_v20 = vsel %vm20459_vm7, %v7088_v0, 0.0  ;;  %v7130_v16 = vsel %vm20476_vm11, %v7089_v51, 0.0  ;;  %v7049_v62 = vadd.f32 %v20023_v4, %v6344_v58  ;;  %16600 = vmatprep.mubr.msk.bf16.mxu0 %vm22360_vm12, %v22291_v1 }
 0x40a   : > { %vm22536_vm15 = vcmp.le.s32.totalorder %v20327_v5, 16  ;;  %v14842_v38 = vpack.c.bf16 %v7130_v16, %v7129_v20  ;;  %vm20597_vm7 = vmand %vm20557_vm3, %vm6839_vm4  ;;  %v20601_v5 = vor.u32 %v7628_v39, %v7625_v61  ;;  %v6639_v29 = vmul.u32 18, %v20548_v18  ;;  %v20606_v24 = vld [vmem:[#allocation3 + $0x64] sm:$0xff]   ;;  %v16411_v34 = vpop.f32.mrf.mxu0 }
 0x40b   : > { %vm20587_vm14 = vmand %vm20541_vm13, %vm22536_vm15  ;;  %v6478_v47 = vcvt.s32.f32 %v20551_v43  ;;  %v6345_v6 = vadd.f32 %v6259_v14, %v5685_v17  ;;  %vm6760_vm13 = vcmp.le.s32.totalorder %v20427_v22, 16  ;;  %v20609_v28 = vcvt.f32.s32 %v17409_v7  ;;  %v17741_v59 = vld [vmem:[#allocation3 + $0x64] sm:$0xff]  }
 0x40c   : > { %14991 = vst [vmem:[#allocation3 + $0x70] sm:$0xff] %v14842_v38   ;;  %vm22541_vm4 = vsmask.f32 5376  ;;  %vm6842_vm2 = vcmp.ge.s32.totalorder %v20522_v32, 1  ;;  %v20617_v25 = vsub.s32 %v20186_v45, %v6638_v53  ;;  %v6479_v40 = vcvt.s32.f32 %v20576_v3  ;;  %vm20625_vm3 = vmand %vm6717_vm9, %vm6758_vm6  ;;  %v6264_v0 = vpop.f32.mrf.mxu0 }
 0x40d   : > { %v7630_v10 = vsel %vm22541_vm4, %v20509_v36, %v20601_v5  ;;  %v7090_v57 = vmax.f32 %v7049_v62, 0.0  ;;  %v7050_v31 = vadd.f32 %v20023_v4, %v6345_v6  ;;  %v8250_v36 = vrot.slane %v20606_v24, 3  ;;  %vm22551_vm9 = vmmov %vm22532_vm5 }
 0x40e   : > { %16497 = vmatmul.mubr.bf16.gmra.mxu1 %v7630_v10  ;;  %v20631_v45 = vadd.f32 0.027777778, %v6518_v54  ;;  %vm22544_vm15 = vcmp.le.s32.totalorder %v20356_v56, 16  ;;  %vm22545_vm4 = vcmp.ge.s32.totalorder %v20356_v56, 1  ;;  %v7632_v27 = vshrl.u32 %v17741_v59, 16  ;;  %v16414_v23 = vpop.f32.mrf.mxu0 }
 0x40f   : > { %vm20637_vm10 = vmand %vm22545_vm4, %vm22544_vm15  ;;  %16500 = vmatprep.mubr.msk.bf16.mxu1 %vm22360_vm12, %v22291_v1  ;;  %v7635_v42 = vshll.u32 %v17741_v59, 16  ;;  %v20646_v53 = vsub.s32 %v20288_v63, %v6639_v29  ;;  %v6519_v21 = vmul.f32 0.055555556, %v6478_v47  ;;  %v7091_v48 = vmax.f32 %v7050_v31, 0.0 }
 0x410   : > { %v6346_v50 = vadd.f32 %v6264_v0, %v5686_v11  ;;  %vm22548_vm15 = vcmp.le.s32.totalorder %v20419_v8, 16  ;;  %v8251_v33 = vsel %vm22551_vm9, %v8248_v60, %v8250_v36  ;;  %vm6721_vm6 = vcmp.ge.s32.totalorder %v20548_v18, 1  ;;  %v5687_v8 = vld [vmem:[#allocation4 + $0x130] sm:$0xff]  ;;  %v6267_v39 = vpop.f32.mrf.mxu0 }
 0x411   : > { %vm20652_vm4 = vmand %vm20597_vm7, %vm22548_vm15  ;;  %vm6762_vm5 = vcmp.le.s32.totalorder %v20548_v18, 16  ;;  %v6640_v63 = vmul.u32 18, %v20609_v28  ;;  %vm22552_vm11 = vcmp.ge.s32.totalorder %v20453_v41, 1  ;;  %16601 = vmatmul.mubr.bf16.gmra.mxu0 %v8251_v33  ;;  %v7634_v37 = vrot.slane %v7632_v27, 2 }
 0x412   : > { %vm20668_vm7 = vmand %vm20625_vm3, %vm22552_vm11  ;;  %v7637_v58 = vrot.slane %v7635_v42, 3  ;;  %v6520_v60 = vmul.f32 0.055555556, %v6479_v40  ;;  %v20673_v15 = vadd.s32 304, %v19014_v44  ;;  %v7131_v12 = vsel %vm20571_vm0, %v7090_v57, 0.0  ;;  %16604 = vmatprep.mubr.msk.bf16.mxu0 %vm22360_vm12, %v22291_v1  ;;  %v16415_v19 = vpop.f32.mrf.mxu0 }
 0x413   : > { %v7132_v7 = vsel %vm20587_vm14, %v7091_v48, 0.0  ;;  %v7051_v13 = vadd.f32 %v20023_v4, %v6346_v50  ;;  %vm22555_vm11 = vcmp.ge.s32.totalorder %v20470_v2, 1  ;;  %vm6801_vm0 = vmand %vm6719_vm1, %vm6760_vm13  ;;  %v6560_v54 = vadd.f32 0.027777778, %v6519_v21  ;;  %v20695_v16 = vld [vmem:[#allocation3 + $0x6c] sm:$0xff]  }
 0x414   : > { %vm20684_vm3 = vmand %vm20637_vm10, %vm22555_vm11  ;;  %v14847_v61 = vpack.c.bf16 %v7132_v7, %v7131_v12  ;;  %v7638_v46 = vor.u32 %v7637_v58, %v7634_v37  ;;  %v6347_v20 = vadd.f32 %v6267_v39, %v5687_v8  ;;  %vm6843_vm14 = vcmp.ge.s32.totalorder %v20617_v25, 1  ;;  %v17743_v14 = vld [vmem:[#allocation3 + $0x6c] sm:$0xff]   ;;  %v6272_v34 = vpop.f32.mrf.mxu0 }
 0x415   : > { %v17411_v62 = vtrunc.f32 %v20631_v45  ;;  %vm22558_vm10 = vsmask.f32 5376  ;;  %vm6844_vm9 = vcmp.ge.s32.totalorder %v20646_v53, 1  ;;  %v7092_v49 = vmax.f32 %v7051_v13, 0.0  ;;  %vm20704_vm1 = vmand %vm6801_vm0, %vm6842_vm2 }
 0x416   : > { %14992 = vst [vmem:[#allocation3 + $0x78] sm:$0xff] %v14847_v61   ;;  %v7639_v38 = vsel %vm22558_vm10, %v20601_v5, %v7638_v46  ;;  %v7052_v22 = vadd.f32 %v20023_v4, %v6347_v20  ;;  %v8252_v47 = vrot.slane %v20695_v16, 3  ;;  %v20711_v6 = vsub.s32 %v20359_v26, %v6640_v63  ;;  %v5688_v5 = vld [vmem:[#allocation4 + $0x50] sm:$0xff]  ;;  %v16418_v45 = vpop.f32.mrf.mxu0  ;;  %v5690_v61 = vld [vmem:[#allocation4] sm:$0xff] }
 0x417   : > { %16501 = vmatmul.mubr.bf16.gmra.mxu1 %v7639_v38  ;;  %vm22561_vm15 = vcmp.le.s32.totalorder %v20453_v41, 16  ;;  %v7641_v11 = vshrl.u32 %v17743_v14, 16  ;;  %v7644_v10 = vshll.u32 %v17743_v14, 16  ;;  %v6480_v26 = vcvt.s32.f32 %v20673_v15 }
 0x418   : > { %vm20717_vm11 = vmand %vm20668_vm7, %vm22561_vm15  ;;  %16504 = vmatprep.mubr.msk.bf16.mxu1 %vm22360_vm12, %v22291_v1  ;;  %v20726_v59 = vadd.s32 312, %v19014_v44  ;;  %v7093_v41 = vmax.f32 %v7052_v22, 0.0  ;;  %v6348_v40 = vadd.f32 %v6272_v34, %v5688_v5  ;;  %vm22564_vm7 = vcmp.le.s32.totalorder %v20470_v2, 16  ;;  %v5689_v2 = vld [vmem:[#allocation4 + $0xe8] sm:$0xff]  ;;  %v6275_v33 = vpop.f32.mrf.mxu0 }
 0x419   : > { %vm20732_vm0 = vmand %vm20684_vm3, %vm22564_vm7  ;;  %vm22567_vm10 = vcmask 1044480   ;;  %vm6722_vm15 = vcmp.ge.s32.totalorder %v20609_v28, 1  ;;  %vm6763_vm2 = vcmp.le.s32.totalorder %v20609_v28, 16  ;;  %v20743_v30 = vcvt.f32.s32 %v17411_v62 }
 0x41a   : > { %v8253_v31 = vsel %vm22567_vm10, %v8250_v36, %v8252_v47  ;;  %vm22568_vm13 = vcmp.le.s32.totalorder %v20522_v32, 16  ;;  %v7643_v24 = vrot.slane %v7641_v11, 2  ;;  %v7646_v35 = vrot.slane %v7644_v10, 3  ;;  %v20760_v32 = vld [vmem:[%s22279_s2] ss:$0 sm:$0xff]  ;;  %v5691_v11 = vld [vmem:[#allocation4 + $0x40] sm:$0xff] }
 0x41b   : > { %vm20749_vm3 = vmand %vm20704_vm1, %vm22568_vm13  ;;  %16605 = vmatmul.mubr.bf16.gmra.mxu0 %v8253_v31  ;;  %v17413_v36 = vtrunc.f32 %v6560_v54  ;;  %v6561_v27 = vadd.f32 0.027777778, %v6520_v60  ;;  %v7133_v42 = vsel %vm20652_vm4, %v7092_v49, 0.0  ;;  %v7134_v21 = vsel %vm20717_vm11, %v7093_v41, 0.0  ;;  %v16419_v60 = vpop.f32.mrf.mxu0 }
 0x41c   : > { %v7053_v48 = vadd.f32 %v20760_v32, %v6348_v40  ;;  %vm22571_vm1 = vcmp.le.s32.totalorder %v20499_v9, 16  ;;  %vm22572_vm13 = vcmp.ge.s32.totalorder %v20499_v9, 1  ;;  %16608 = vmatprep.mubr.msk.bf16.mxu0 %vm22360_vm12, %v22291_v1  ;;  %v14852_v56 = vpack.c.bf16 %v7134_v21, %v7133_v42  ;;  %vm20777_vm4 = vmand %vm6721_vm6, %vm6762_vm5 }
 0x41d   : > { %vm20767_vm7 = vmand %vm22572_vm13, %vm22571_vm1  ;;  %v7647_v23 = vor.u32 %v7646_v35, %v7643_v24  ;;  %vm6845_vm11 = vcmp.ge.s32.totalorder %v20711_v6, 1  ;;  %v6521_v9 = vmul.f32 0.055555556, %v6480_v26  ;;  %v6481_v8 = vcvt.s32.f32 %v20726_v59  ;;  %v20783_v37 = vld [vmem:[#allocation3 + $0x74] sm:$0xff]   ;;  %v6280_v54 = vpop.f32.mrf.mxu0 }
 0x41e   : > { %v6349_v51 = vadd.f32 %v6275_v33, %v5689_v2  ;;  %v6641_v58 = vmul.u32 18, %v20743_v30  ;;  %14993 = vst [vmem:[#allocation3 + $0x80] sm:$0xff] %v14852_v56   ;;  %vm22577_vm10 = vsmask.f32 5376  ;;  %vm6723_vm5 = vcmp.ge.s32.totalorder %v20743_v30, 1  ;;  %v17745_v18 = vld [vmem:[#allocation3 + $0x74] sm:$0xff]   ;;  %vm20795_vm6 = vmand %vm20767_vm7, %vm6843_vm14 }
 0x41f   : > { %v7648_v12 = vsel %vm22577_vm10, %v7638_v46, %v7647_v23  ;;  %v20788_v7 = vcvt.f32.s32 %v17413_v36  ;;  %v7094_v13 = vmax.f32 %v7053_v48, 0.0  ;;  %vm6927_vm1 = vcmp.le.s32.totalorder %v20711_v6, 16  ;;  %vm20806_vm10 = vmand %vm20777_vm4, %vm6844_vm9  ;;  %v16422_v34 = vpop.f32.mrf.mxu0  ;;  %v5692_v56 = vld [vmem:[#allocation4 + $0x78] sm:$0xff] }
 0x420   : > { %v7054_v17 = vadd.f32 %v20760_v32, %v6349_v51  ;;  %16505 = vmatmul.mubr.bf16.gmra.mxu1 %v7648_v12  ;;  %v8254_v46 = vrot.slane %v20783_v37, 3  ;;  %vm6764_vm13 = vcmp.le.s32.totalorder %v20743_v30, 16  ;;  %v7650_v62 = vshrl.u32 %v17745_v18, 16  ;;  %v17770_v30 = vld [vmem:[#allocation3 + $0x14] sm:$0xff]  }
 0x421   : > { %16508 = vmatprep.mubr.msk.bf16.mxu1 %vm22360_vm12, %v22291_v1  ;;  %v7653_v19 = vshll.u32 %v17745_v18, 16  ;;  %v17415_v38 = vtrunc.f32 %v6561_v27  ;;  %v6522_v14 = vmul.f32 0.055555556, %v6481_v8  ;;  %v6350_v22 = vadd.f32 %v6280_v54, %v5690_v61  ;;  %v6283_v45 = vpop.f32.mrf.mxu0  ;;  %v5697_v54 = vld [vmem:[#allocation4 + $0x140] sm:$0xff] }
 0x422   : > { %v7095_v49 = vmax.f32 %v7054_v17, 0.0  ;;  %vm22582_vm14 = vcmask 1044480   ;;  %v20816_v4 = vsub.s32 %v20482_v55, %v6641_v58  ;;  %vm22583_vm9 = vcmp.le.s32.totalorder %v20617_v25, 16 }
 0x423   : > { %v8255_v29 = vsel %vm22582_vm14, %v8252_v47, %v8254_v46  ;;  %vm20822_vm7 = vmand %vm20795_vm6, %vm22583_vm9  ;;  %v7652_v10 = vrot.slane %v7650_v62, 2  ;;  %v7655_v26 = vrot.slane %v7653_v19, 3  ;;  %v6642_v16 = vmul.u32 18, %v20788_v7  ;;  %v16423_v36 = vpop.f32.mrf.mxu0 }
 0x424   : > { %16609 = vmatmul.mubr.bf16.gmra.mxu0 %v8255_v29  ;;  %v6562_v41 = vadd.f32 0.027777778, %v6521_v9  ;;  %v7135_v55 = vsel %vm20732_vm0, %v7094_v13, 0.0  ;;  %v7136_v25 = vsel %vm20749_vm3, %v7095_v49, 0.0  ;;  %v7055_v47 = vadd.f32 %v20760_v32, %v6350_v22  ;;  %vm20846_vm0 = vmand %vm6722_vm15, %vm6763_vm2  ;;  %v5693_v13 = vld [vmem:[#allocation4 + $0x30] sm:$0xff] }
 0x425   : > { %vm22586_vm4 = vcmp.le.s32.totalorder %v20646_v53, 16  ;;  %16612 = vmatprep.mubr.msk.bf16.mxu0 %vm22360_vm12, %v22291_v1  ;;  %v14857_v31 = vpack.c.bf16 %v7136_v25, %v7135_v55  ;;  %v7656_v53 = vor.u32 %v7655_v26, %v7652_v10  ;;  %v20850_v2 = vcvt.f32.s32 %v17415_v38  ;;  %v20853_v35 = vld [vmem:[#allocation3 + $0x7c] sm:$0xff]   ;;  %vm20865_vm15 = vmand %vm20846_vm0, %vm6845_vm11  ;;  %v6288_v33 = vpop.f32.mrf.mxu0 }
 0x426   : > { %vm20836_vm6 = vmand %vm20806_vm10, %vm22586_vm4  ;;  %v6563_v0 = vadd.f32 0.027777778, %v6522_v14  ;;  %v6351_v24 = vadd.f32 %v6283_v45, %v5691_v11  ;;  %vm6846_vm3 = vcmp.ge.s32.totalorder %v20816_v4, 1  ;;  %vm22591_vm10 = vsmask.f32 5376  ;;  %v17748_v28 = vld [vmem:[#allocation3 + $0x7c] sm:$0xff]  }
 0x427   : > { %14994 = vst [vmem:[#allocation3 + $0x88] sm:$0xff] %v14857_v31   ;;  %v7657_v27 = vsel %vm22591_vm10, %v7647_v23, %v7656_v53  ;;  %v20857_v42 = vsub.s32 %v20551_v43, %v6642_v16  ;;  %vm6724_vm2 = vcmp.ge.s32.totalorder %v20788_v7, 1  ;;  %v7096_v21 = vmax.f32 %v7055_v47, 0.0  ;;  %vm20875_vm9 = vmand %vm6723_vm5, %vm6764_vm13  ;;  %v16426_v18 = vpop.f32.mrf.mxu0  ;;  %v5694_v16 = vld [vmem:[#allocation4 + $0xb8] sm:$0xff] }
 0x428   : > { %v7056_v48 = vadd.f32 %v20760_v32, %v6351_v24  ;;  %16509 = vmatmul.mubr.bf16.gmra.mxu1 %v7657_v27  ;;  %vm6765_vm14 = vcmp.le.s32.totalorder %v20788_v7, 16  ;;  %v8256_v43 = vrot.slane %v20853_v35, 3  ;;  %v6643_v23 = vmul.u32 18, %v20850_v2  ;;  %vm20887_vm5 = vmand %vm20865_vm15, %vm6927_vm1  ;;  %v5695_v35 = vld [vmem:[#allocation4 + $0x60] sm:$0xff] }
 0x429   : > { %16512 = vmatprep.mubr.msk.bf16.mxu1 %vm22360_vm12, %v22291_v1  ;;  %v7659_v9 = vshrl.u32 %v17748_v28, 16  ;;  %v7662_v8 = vshll.u32 %v17748_v28, 16  ;;  %v17417_v51 = vtrunc.f32 %v6562_v41  ;;  %v6352_v58 = vadd.f32 %v6288_v33, %v5692_v56  ;;  %vm20902_vm1 = vmand %vm20875_vm9, %vm6846_vm3  ;;  %v6291_v62 = vpop.f32.mrf.mxu0 }
 0x42a   : > { %v7097_v37 = vmax.f32 %v7056_v48, 0.0  ;;  %vm22596_vm11 = vcmask 1044480   ;;  %v17419_v12 = vtrunc.f32 %v6563_v0  ;;  %vm6928_vm13 = vcmp.le.s32.totalorder %v20816_v4, 16  ;;  %vm22603_vm3 = vmmov %vm22591_vm10  ;;  %v5698_v4 = vld [vmem:[#allocation4 + $0x58] sm:$0xf] }
 0x42b   : > { %v8257_v60 = vsel %vm22596_vm11, %v8254_v46, %v8256_v43  ;;  %vm6725_vm4 = vcmp.ge.s32.totalorder %v20850_v2, 1  ;;  %v7661_v17 = vrot.slane %v7659_v9, 2  ;;  %v7664_v61 = vrot.slane %v7662_v8, 3  ;;  %v16427_v34 = vpop.f32.mrf.mxu0  ;;  %vm20930_vm10 = vmand %vm20902_vm1, %vm6928_vm13 }
 0x42c   : > { %16613 = vmatmul.mubr.bf16.gmra.mxu0 %v8257_v60  ;;  %v7137_v39 = vsel %vm20822_vm7, %v7096_v21, 0.0  ;;  %v7138_v6 = vsel %vm20836_vm6, %v7097_v37, 0.0  ;;  %v7057_v46 = vadd.f32 %v20760_v32, %v6352_v58  ;;  %vm20912_vm7 = vmand %vm6724_vm2, %vm6765_vm14  ;;  %v6684_v38 = vsub.s32 %v20576_v3, %v6643_v23  ;;  %v5696_v60 = vld [vmem:[#allocation4 + $0x28] sm:$0xff] }
 0x42d   : > { %16616 = vmatprep.mubr.msk.bf16.mxu0 %vm22360_vm12, %v22291_v1  ;;  %v14862_v20 = vpack.c.bf16 %v7138_v6, %v7137_v39  ;;  %v7665_v14 = vor.u32 %v7664_v61, %v7661_v17  ;;  %v20917_v49 = vcvt.f32.s32 %v17417_v51  ;;  %v6353_v22 = vadd.f32 %v6291_v62, %v5693_v13  ;;  %v6296_v55 = vpop.f32.mrf.mxu0 }
 0x42e   : > { %vm6847_vm6 = vcmp.ge.s32.totalorder %v20857_v42, 1  ;;  %v20920_v29 = vld [vmem:[#allocation3 + $0x84] sm:$0xff]   ;;  %v20922_v5 = vcvt.f32.s32 %v17419_v12  ;;  %vm6766_vm0 = vcmp.le.s32.totalorder %v20850_v2, 16  ;;  %v7098_v10 = vmax.f32 %v7057_v46, 0.0 }
 0x42f   : > { %14995 = vst [vmem:[#allocation3 + $0x90] sm:$0xff] %v14862_v20   ;;  %v7666_v7 = vsel %vm22603_vm3, %v7656_v53, %v7665_v14  ;;  %v17750_v11 = vld [vmem:[#allocation3 + $0x84] sm:$0xff]   ;;  %v7058_v26 = vadd.f32 %v20760_v32, %v6353_v22  ;;  %vm6929_vm2 = vcmp.le.s32.totalorder %v20857_v42, 16  ;;  %v8258_v41 = vrot.slane %v20920_v29, 3  ;;  %vm20941_vm15 = vmand %vm20912_vm7, %vm6847_vm6  ;;  %v16430_v24 = vpop.f32.mrf.mxu0 }
 0x430   : > { %16513 = vmatmul.mubr.bf16.gmra.mxu1 %v7666_v7  ;;  %vm6848_vm14 = vcmp.ge.s32.totalorder %v6684_v38, 1  ;;  %v6644_v25 = vmul.u32 18, %v20917_v49  ;;  %v7668_v47 = vshrl.u32 %v17750_v11, 16  ;;  %v7671_v40 = vshll.u32 %v17750_v11, 16  ;;  %vm20952_vm9 = vmand %vm6725_vm4, %vm6766_vm0 }
 0x431   : > { %16516 = vmatprep.mubr.msk.bf16.mxu1 %vm22360_vm12, %v22291_v1  ;;  %v7099_v31 = vmax.f32 %v7058_v26, 0.0  ;;  %v6354_v45 = vadd.f32 %v6296_v55, %v5694_v16  ;;  %v8259_v53 = vsel %vm22596_vm11, %v8256_v43, %v8258_v41  ;;  %v6645_v0 = vmul.u32 18, %v20922_v5  ;;  %vm20967_vm4 = vmand %vm20941_vm15, %vm6929_vm2  ;;  %v6299_v43 = vpop.f32.mrf.mxu0 }
 0x432   : > { %vm6930_vm13 = vcmp.le.s32.totalorder %v6684_v38, 16  ;;  %vm6726_vm1 = vcmp.ge.s32.totalorder %v20917_v49, 1  ;;  %v7670_v36 = vrot.slane %v7668_v47, 2  ;;  %v7673_v27 = vrot.slane %v7671_v40, 3 }
 0x433   : > { %v7139_v28 = vsel %vm20887_vm5, %v7098_v10, 0.0  ;;  %v7140_v2 = vsel %vm20930_vm10, %v7099_v31, 0.0  ;;  %v7059_v48 = vadd.f32 %v20760_v32, %v6354_v45  ;;  %vm6889_vm5 = vmand %vm20952_vm9, %vm6848_vm14  ;;  %v6685_v56 = vsub.s32 %v20673_v15, %v6644_v25  ;;  %v16431_v9 = vpop.f32.mrf.mxu0 }
 0x434   : > { %16617 = vmatmul.mubr.bf16.gmra.mxu0 %v8259_v53  ;;  %v14867_v50 = vpack.c.bf16 %v7140_v2, %v7139_v28  ;;  %vm6767_vm7 = vcmp.le.s32.totalorder %v20917_v49, 16  ;;  %v7674_v42 = vor.u32 %v7673_v27, %v7670_v36  ;;  %v6355_v33 = vadd.f32 %v6299_v43, %v5695_v35  ;;  %vm20984_vm10 = vmand %vm6889_vm5, %vm6930_vm13 }
 0x435   : > { %16620 = vmatprep.mubr.msk.bf16.mxu0 %vm22360_vm12, %v22291_v1  ;;  %v6686_v63 = vsub.s32 %v20726_v59, %v6645_v0  ;;  %vm6727_vm6 = vcmp.ge.s32.totalorder %v20922_v5, 1  ;;  %vm6768_vm0 = vcmp.le.s32.totalorder %v20922_v5, 16  ;;  %v7100_v37 = vmax.f32 %v7059_v48, 0.0  ;;  %v6304_v12 = vpop.f32.mrf.mxu0  ;;  %vm20993_vm2 = vmand %vm6726_vm1, %vm6767_vm7 }
 0x436   : > { %v17751_v23 = vld [vmem:[#allocation3 + $0x8c] sm:$0xff]   ;;  %14996 = vst [vmem:[#allocation3 + $0x98] sm:$0xff] %v14867_v50   ;;  %v7675_v8 = vsel %vm22603_vm3, %v7665_v14, %v7674_v42  ;;  %v7060_v58 = vadd.f32 %v20760_v32, %v6355_v33  ;;  %vm6849_vm15 = vcmp.ge.s32.totalorder %v6685_v56, 1  ;;  %v6356_v61 = vadd.f32 %v6304_v12, %v5696_v60  ;;  %vm21003_vm14 = vmand %vm6727_vm6, %vm6768_vm0 }
 0x437   : > { %v17753_v51 = vld [vmem:[#allocation3 + $0x8c] sm:$0xff]   ;;  %v8260_v59 = vrot.slane %v17751_v23, 3  ;;  %vm6850_vm9 = vcmp.ge.s32.totalorder %v6686_v63, 1  ;;  %v16434_v46 = vpop.f32.mrf.mxu0  ;;  %v7141_v19 = vsel %vm20967_vm4, %v7100_v37, 0.0  ;;  %vm21015_vm13 = vmand %vm20993_vm2, %vm6849_vm15  ;;  %vm6931_vm1 = vcmp.le.s32.totalorder %v6685_v56, 16 }
 0x438   : > { %16517 = vmatmul.mubr.bf16.gmra.mxu1 %v7675_v8  ;;  %v7677_v18 = vshrl.u32 %v17753_v51, 16  ;;  %v7680_v13 = vshll.u32 %v17753_v51, 16  ;;  %v7101_v17 = vmax.f32 %v7060_v58, 0.0  ;;  %v7061_v49 = vadd.f32 %v20760_v32, %v6356_v61  ;;  %vm6891_vm4 = vmand %vm21003_vm14, %vm6850_vm9  ;;  %v17771_v61 = vld [vmem:[#allocation3 + $0x4] sm:$0xf8]  }
 0x439   : > { %16520 = vmatprep.mubr.msk.bf16.mxu1 %vm22360_vm12, %v22291_v1  ;;  %v8261_v6 = vsel %vm22596_vm11, %v8258_v41, %v8260_v59  ;;  %v6307_v29 = vpop.f32.mrf.mxu0  ;;  %vm6932_vm5 = vcmp.le.s32.totalorder %v6686_v63, 16  ;;  %vm22620_vm7 = vmmov %vm22603_vm3  ;;  %v9577_v46 = vshrl.u32 %v17770_v30, 16 }
 0x43a   : > { %v7679_v20 = vrot.slane %v7677_v18, 2  ;;  %v7682_v62 = vrot.slane %v7680_v13, 3  ;;  %v7142_v38 = vsel %vm20984_vm10, %v7101_v17, 0.0  ;;  %v6357_v34 = vadd.f32 %v6307_v29, %v5697_v54  ;;  %vm21028_vm6 = vmand %vm21015_vm13, %vm6931_vm1  ;;  %v17769_v17 = vld [vmem:[#allocation3 + $0xc] sm:$0xf8]  }
 0x43b   : > { %v14872_v22 = vpack.c.bf16 %v7142_v38, %v7141_v19  ;;  %v16435_v11 = vpop.f32.mrf.mxu0  ;;  %v7102_v16 = vmax.f32 %v7061_v49, 0.0  ;;  %vm6973_vm0 = vmand %vm6891_vm4, %vm6932_vm5  ;;  %v9580_v54 = vshll.u32 %v17770_v30, 16  ;;  %v9569_v38 = vshrl.u32 %v17769_v17, 16 }
 0x43c   : > { %16621 = vmatmul.mubr.bf16.gmra.mxu0 %v8261_v6  ;;  %v7683_v5 = vor.u32 %v7682_v62, %v7679_v20  ;;  %v7062_v41 = vadd.f32 %v20760_v32, %v6357_v34  ;;  %vm22623_vm3 = vmmov %vm22596_vm11  ;;  %v6441_v6 = vadd.s32 320, %v19014_v44  ;;  %v17772_v62 = vld [vmem:[#allocation3 + $0xc] sm:$0xff]   ;;  %v9572_v14 = vshll.u32 %v17769_v17, 16 }
 0x43d   : > { %16624 = vmatprep.mubr.msk.bf16.mxu0 %vm22360_vm12, %v22291_v1  ;;  %v17754_v7 = vld [vmem:[#allocation3 + $0x94] sm:$0xff]   ;;  %14997 = vst [vmem:[#allocation3 + $0xa0] sm:$0xff] %v14872_v22   ;;  %v6312_v25 = vpop.f32.mrf.mxu0  ;;  %v7143_v35 = vsel %vm21028_vm6, %v7102_v16, 0.0  ;;  %vm22624_vm10 = vmmov %vm22620_vm7  ;;  %v8825_v49 = vshrl.u32 %v17771_v61, 16  ;;  %v9579_v29 = vrot.slane %v9577_v46, 3  ;;  %v8828_v34 = vshll.u32 %v17771_v61, 16 }
 0x43e   : > { %v7684_v10 = vsel %vm22620_vm7, %v7674_v42, %v7683_v5  ;;  %v17756_v3 = vld [vmem:[#allocation3 + $0x94] sm:$0xff]   ;;  %v8262_v55 = vrot.slane %v17754_v7, 3  ;;  %v7103_v31 = vmax.f32 %v7062_v41, 0.0  ;;  %v6358_v45 = vadd.f32 %v6312_v25, %v5698_v4  ;;  %vm22625_vm2 = vmmov %vm22623_vm3  ;;  %v17774_v7 = vld [vmem:[#allocation3 + $0x1c] sm:$0xff]  }
 0x43f   : > { %v7686_v47 = vshrl.u32 %v17756_v3, 16  ;;  %v7689_v40 = vshll.u32 %v17756_v3, 16  ;;  %v16438_v24 = vpop.f32.mrf.mxu0  ;;  %vm22626_vm15 = vmmov %vm22620_vm7  ;;  %v6482_v19 = vcvt.s32.f32 %v6441_v6  ;;  %v8833_v44 = vshrl.u32 %v17772_v62, 16 }
 0x440   : > { %16521 = vmatmul.mubr.bf16.gmra.mxu1 %v7684_v10  ;;  %v8263_v57 = vsel %vm22623_vm3, %v8260_v59, %v8262_v55  ;;  %v7144_v36 = vsel %vm6973_vm0, %v7103_v31, 0.0  ;;  %6399 = vst [vmem:[#allocation4 + $0x58] sm:$0xf] %v6358_v45  ;;  %vm22627_vm14 = vmmov %vm22625_vm2  ;;  %v8836_v11 = vshll.u32 %v17772_v62, 16  ;;  %v9571_v3 = vrot.slane %v9569_v38, 3  ;;  %v17775_v31 = vld [vmem:[#allocation3 + $0x14] sm:$0xff]  }
 0x441   : > { %16524 = vmatprep.mubr.msk.bf16.mxu1 %vm22360_vm12, %v22291_v1  ;;  %v7688_v53 = vrot.slane %v7686_v47, 2  ;;  %v7691_v0 = vrot.slane %v7689_v40, 3  ;;  %v14877_v27 = vpack.c.bf16 %v7144_v36, %v7143_v35  ;;  %v6315_v2 = vpop.f32.mrf.mxu0  ;;  %vm22628_vm9 = vmmov %vm22620_vm7  ;;  %v6523_v22 = vmul.f32 0.055555556, %v6482_v19 }
 0x442   : > { %v9574_v26 = vrot.slane %v9572_v14, 4  ;;  %v8827_v16 = vrot.slane %v8825_v49, 3  ;;  %v8830_v25 = vrot.slane %v8828_v34, 4  ;;  %v9586_v47 = vshrl.u32 %v17774_v7, 16  ;;  %v17813_v14 = vld [vmem:[%s22280_s3 + $0x178] sm:$0xff]   ;;  %v17792_v49 = vld [vmem:[%s22280_s3 + $0x120] sm:$0xff]  }
 0x443   : > { %v7692_v28 = vor.u32 %v7691_v0, %v7688_v53  ;;  %14998 = vst [vmem:[#allocation3 + $0xa8] sm:$0xff] %v14877_v27   ;;  %v16439_v43 = vpop.f32.mrf.mxu0  ;;  %v6564_v10 = vadd.f32 0.027777778, %v6523_v22  ;;  %v9589_v40 = vshll.u32 %v17774_v7, 16  ;;  %v8835_v45 = vrot.slane %v8833_v44, 3  ;;  %v17781_v7 = vld [vmem:[#allocation3 + $0x34] sm:$0xff]  }
 0x444   : > { %16625 = vmatmul.mubr.bf16.gmra.mxu0 %v8263_v57  ;;  %v17758_v21 = vld [vmem:[#allocation3 + $0x9c] sm:$0xff]   ;;  %v8838_v57 = vrot.slane %v8836_v11, 4  ;;  %v9575_v0 = vor.u32 %v9574_v26, %v9571_v3  ;;  %vm22629_vm1 = vsmask.f32 4352  ;;  %v8831_v27 = vor.u32 %v8830_v25, %v8827_v16 }
 0x445   : > { %16628 = vmatprep.mubr.msk.bf16.mxu0 %vm22360_vm12, %v22291_v1  ;;  %v7693_v48 = vsel %vm22624_vm10, %v7683_v5, %v7692_v28  ;;  %v17760_v50 = vld [vmem:[#allocation3 + $0x9c] sm:$0xff]   ;;  %v8264_v56 = vrot.slane %v17758_v21, 3  ;;  %v9582_v5 = vrot.slane %v9580_v54, 4  ;;  %v17421_v41 = vtrunc.f32 %v6564_v10  ;;  %v17776_v21 = vld [vmem:[#allocation3 + $0x24] sm:$0xff]   ;;  %vm22630_vm0 = vmmov %vm22629_vm1 }
 0x446   : > { %v7695_v42 = vshrl.u32 %v17760_v50, 16  ;;  %v7698_v33 = vshll.u32 %v17760_v50, 16  ;;  %v9591_v2 = vrot.slane %v9589_v40, 4  ;;  %v8842_v50 = vshrl.u32 %v17775_v31, 16  ;;  %vm22631_vm10 = vmmov %vm22630_vm0  ;;  %v17815_v10 = vld [vmem:[%s22280_s3 + $0x170] sm:$0xff]   ;;  %v17798_v3 = vld [vmem:[%s22280_s3 + $0x118] sm:$0xff]  }
 0x447   : > { %v8265_v63 = vsel %vm22625_vm2, %v8262_v55, %v8264_v56  ;;  %v7015_v55 = vld [vmem:[#allocation4 + $0x58] sm:$0xf]  ;;  %v9583_v4 = vor.u32 %v9582_v5, %v9579_v29  ;;  %v17422_v53 = vcvt.f32.s32 %v17421_v41  ;;  %v8845_v43 = vshll.u32 %v17775_v31, 16  ;;  %vm22632_vm2 = vmmov %vm22630_vm0  ;;  %v17817_v40 = vld [vmem:[%s22280_s3 + $0x168] sm:$0xff]  }
 0x448   : > { %16525 = vmatmul.mubr.bf16.gmra.mxu1 %v7693_v48  ;;  %v7697_v23 = vrot.slane %v7695_v42, 2  ;;  %v7700_v9 = vrot.slane %v7698_v33, 3  ;;  %v7063_v24 = vadd.f32 %v20760_v32, %v7015_v55  ;;  %v8839_v48 = vor.u32 %v8838_v57, %v8835_v45  ;;  %v17773_v42 = vld [vmem:[%s22280_s3 + $0x138] sm:$0xff]   ;;  %v17804_v31 = vld [vmem:[%s22280_s3 + $0x110] sm:$0xff]  }
 0x449   : > { %16528 = vmatprep.mubr.msk.bf16.mxu1 %vm22360_vm12, %v22291_v1  ;;  %v6646_v35 = vmul.u32 18, %v17422_v53  ;;  %vm6728_vm11 = vcmp.ge.s32.totalorder %v17422_v53, 1  ;;  %vm6769_vm13 = vcmp.le.s32.totalorder %v17422_v53, 16  ;;  %v9584_v36 = vsel %vm22629_vm1, %v9575_v0, %v9583_v4  ;;  %v17783_v0 = vld [vmem:[#allocation3 + $0x3c] sm:$0xff]   ;;  %vm22638_vm1 = vmmov %vm22630_vm0 }
 0x44a   : > { %v7701_v8 = vor.u32 %v7700_v9, %v7697_v23  ;;  %v17762_v51 = vld [vmem:[#allocation3 + $0xa4] sm:$0x1f]   ;;  %vm6810_vm4 = vmand %vm6728_vm11, %vm6769_vm13  ;;  %v7104_v32 = vmax.f32 %v7063_v24, 0.0  ;;  %v9598_v23 = vshll.u32 %v17776_v21, 16  ;;  %v8840_v9 = vsel %vm22630_vm0, %v8831_v27, %v8839_v48 }
 0x44b   : > { %v17765_v15 = vld [vmem:[#allocation3 + $0xa4] sm:$0x1f]   ;;  %v8266_v58 = vrot.slane %v17762_v51, 3  ;;  %v8847_v51 = vrot.slane %v8845_v43, 4  ;;  %v9613_v41 = vshrl.u32 %v17781_v7, 16  ;;  %v9616_v55 = vshll.u32 %v17781_v7, 16  ;;  %vm22636_vm11 = vmmov %vm22630_vm0 }
 0x44c   : > { %16629 = vmatmul.mubr.bf16.gmra.mxu0 %v8265_v63  ;;  %v7702_v37 = vsel %vm22626_vm15, %v7692_v28, %v7701_v8  ;;  %v7704_v59 = vshrl.u32 %v17765_v15, 16  ;;  %v7707_v60 = vshll.u32 %v17765_v15, 16  ;;  %v9588_v28 = vrot.slane %v9586_v47, 3  ;;  %v17778_v15 = vld [vmem:[#allocation3 + $0x2c] sm:$0xff]   ;;  %vm22633_vm15 = vmmov %vm22630_vm0 }
 0x44d   : > { %16632 = vmatprep.mubr.msk.bf16.mxu0 %vm22360_vm12, %v22291_v1  ;;  %v8267_v12 = vsel %vm22627_vm14, %v8264_v56, %v8266_v58  ;;  %v6687_v56 = vsub.s32 %v6441_v6, %v6646_v35  ;;  %v9595_v63 = vshrl.u32 %v17776_v21, 16  ;;  %v9604_v46 = vshrl.u32 %v17778_v15, 16  ;;  %vm22634_vm14 = vmmov %vm22630_vm0  ;;  %v17810_v21 = vld [vmem:[%s22280_s3 + $0x108] sm:$0xff]  }
 0x44e   : > { %v7706_v18 = vrot.slane %v7704_v59, 2  ;;  %v7709_v13 = vrot.slane %v7707_v60, 3  ;;  %v9592_v33 = vor.u32 %v9591_v2, %v9588_v28  ;;  %v17779_v59 = vld [vmem:[%s22280_s3 + $0x130] sm:$0xff]   ;;  %v9607_v54 = vshll.u32 %v17778_v15, 16  ;;  %v17819_v28 = vld [vmem:[%s22280_s3 + $0x160] sm:$0xff]   ;;  %vm22637_vm13 = vmmov %vm22630_vm0 }
 0x44f   : > { %vm6851_vm5 = vcmp.ge.s32.totalorder %v6687_v56, 1  ;;  %vm6933_vm7 = vcmp.le.s32.totalorder %v6687_v56, 16  ;;  %v9597_v30 = vrot.slane %v9595_v63, 3  ;;  %v9606_v29 = vrot.slane %v9604_v46, 3  ;;  %v17784_v63 = vld [vmem:[#allocation3 + $0x34] sm:$0xff]   ;;  %v17821_v15 = vld [vmem:[%s22280_s3 + $0x100] sm:$0xff]  }
 0x450   : > { %16529 = vmatmul.mubr.bf16.gmra.mxu1 %v7702_v37  ;;  %v7710_v39 = vor.u32 %v7709_v13, %v7706_v18  ;;  %vm6892_vm6 = vmand %vm6810_vm4, %vm6851_vm5  ;;  %v17777_v37 = vld [vmem:[#allocation3 + $0x1c] sm:$0xff]   ;;  %v9600_v18 = vrot.slane %v9598_v23, 4  ;;  %v9609_v5 = vrot.slane %v9607_v54, 4  ;;  %v9615_v57 = vrot.slane %v9613_v41, 3 }
 0x451   : > { %16532 = vmatprep.mubr.msk.bf16.mxu1 %vm22360_vm12, %v22291_v1  ;;  %vm6974_vm3 = vmand %vm6892_vm6, %vm6933_vm7  ;;  %v8851_v17 = vshrl.u32 %v17777_v37, 16  ;;  %v8854_v61 = vshll.u32 %v17777_v37, 16  ;;  %v9618_v53 = vrot.slane %v9616_v55, 4  ;;  %v9625_v43 = vshll.u32 %v17783_v0, 16  ;;  %v17822_v23 = vld [vmem:[%s22280_s3 + $0x158] sm:$0xff]   ;;  %v17786_v37 = vld [vmem:[#allocation3 + $0x44] sm:$0xff]  }
 0x452   : > { %v7711_v20 = vsel %vm22628_vm9, %v7701_v8, %v7710_v39  ;;  %v8844_v8 = vrot.slane %v8842_v50, 3  ;;  %v9601_v6 = vor.u32 %v9600_v18, %v9597_v30  ;;  %v9610_v26 = vor.u32 %v9609_v5, %v9606_v29  ;;  %vm22635_vm9 = vmmov %vm22630_vm0  ;;  %v17787_v29 = vld [vmem:[#allocation3 + $0x3c] sm:$0xff]   ;;  %v17825_v5 = vld [vmem:[%s22280_s3 + $0x148] sm:$0xff]  }
 0x453   : > { %v8853_v19 = vrot.slane %v8851_v17, 3  ;;  %v8856_v38 = vrot.slane %v8854_v61, 4  ;;  %v9622_v50 = vshrl.u32 %v17783_v0, 16  ;;  %v8881_v17 = vshll.u32 %v17784_v63, 16  ;;  %v17824_v61 = vld [vmem:[%s22280_s3 + $0x150] sm:$0xff]   ;;  %vm22639_vm4 = vmmov %vm22630_vm0 }
 0x454   : > { %16633 = vmatmul.mubr.bf16.gmra.mxu0 %v8267_v12  ;;  %v9593_v12 = vsel %vm22631_vm10, %v9583_v4, %v9592_v33  ;;  %v8848_v13 = vor.u32 %v8847_v51, %v8844_v8  ;;  %v9602_v22 = vsel %vm22633_vm15, %v9592_v33, %v9601_v6  ;;  %v17782_v4 = vld [vmem:[#allocation3 + $0x2c] sm:$0xff]   ;;  %v9611_v45 = vsel %vm22635_vm9, %v9601_v6, %v9610_v26  ;;  %vm22640_vm5 = vmmov %vm22630_vm0 }
 0x455   : > { %16636 = vmatprep.mubr.msk.bf16.mxu0 %vm22360_vm12, %v22291_v1  ;;  %v8857_v44 = vor.u32 %v8856_v38, %v8853_v19  ;;  %v8872_v27 = vshll.u32 %v17782_v4, 16  ;;  %v9634_v19 = vshll.u32 %v17786_v37, 16  ;;  %vm22641_vm7 = vmmov %vm22630_vm0 }
 0x456   : > { %v8849_v62 = vsel %vm22632_vm2, %v8839_v48, %v8848_v13  ;;  %v9619_v48 = vor.u32 %v9618_v53, %v9615_v57  ;;  %v17789_v57 = vld [vmem:[#allocation3 + $0x44] sm:$0xff]   ;;  %vm22642_vm6 = vmmov %vm22630_vm0 }
 0x457   : > { %v8858_v25 = vsel %vm22634_vm14, %v8848_v13, %v8857_v44  ;;  %v8874_v33 = vrot.slane %v8872_v27, 4  ;;  %v8878_v13 = vshrl.u32 %v17784_v63, 16  ;;  %vm22645_vm10 = vmmov %vm22630_vm0 }
 0x458   : > { %16533 = vmatmul.mubr.bf16.gmra.mxu1 %v7711_v20  ;;  %v17780_v20 = vld [vmem:[#allocation3 + $0x24] sm:$0xff]   ;;  %vm22646_vm2 = vmmov %vm22630_vm0 }
 0x459   : > { %16536 = vmatprep.mubr.msk.bf16.mxu1 %vm22360_vm12, %v22291_v1  ;;  %v8860_v34 = vshrl.u32 %v17780_v20, 16  ;;  %v8863_v11 = vshll.u32 %v17780_v20, 16  ;;  %vm22647_vm15 = vmmov %vm22630_vm0 }
 0x45a   : > { %vm22648_vm14 = vmmov %vm22630_vm0 }
 0x45b   : > { %v8862_v16 = vrot.slane %v8860_v34, 3  ;;  %v8865_v47 = vrot.slane %v8863_v11, 4  ;;  %vm22649_vm9 = vmmov %vm22630_vm0 }
 0x45c   : > { %16637 = vmatmul.mubr.bf16.gmra.mxu0 %v8266_v58  ;;  %v7145_v58 = vsel %vm6974_vm3, %v7104_v32, 0.0  ;;  %vm22643_vm3 = vmmov %vm22630_vm0 }
 0x45d   : > { %16756 = vmatprep.mubr.msk.bf16.mxu0 %vm22360_vm12, %v22291_v1  ;;  %v14737_v60 = vpack.c.bf16 %v7145_v58, %v7145_v58  ;;  %v8866_v35 = vor.u32 %v8865_v47, %v8862_v16  ;;  %v17788_v16 = vld [vmem:[#allocation3 + $0x4c] sm:$0xff]   ;;  %v17826_v47 = vld [vmem:[%s22280_s3 + $0x140] sm:$0xff]  }
 0x45f   : > { %7360 = vst [vmem:[#allocation3 + $0xb0] sm:$0x3] %v14737_v60  ;;  %v8867_v32 = vsel %vm22636_vm11, %v8857_v44, %v8866_v35  ;;  %v9624_v60 = vrot.slane %v9622_v50, 3  ;;  %vm22650_vm11 = vmmov %vm22630_vm0 }
 0x460   : > { %16537 = vmatmul.mubr.bf16.gmra.mxu1 %v7710_v39  ;;  %v17785_v39 = vld [vmem:[%s22280_s3 + $0x128] sm:$0xff]  }
 0x461   : > { %16656 = vmatprep.mubr.msk.bf16.mxu1 %vm22360_vm12, %v22291_v1 }
 0x464   : > { %16757 = vmatmul.mubr.bf16.vlgmr.msra.gmra.mxu0 %v9584_v36  ;;  %v8869_v36 = vshrl.u32 %v17782_v4, 16  ;;  %v8887_v4 = vshrl.u32 %v17787_v29, 16 }
 0x465   : > { %16760 = vmatprep.mubr.msk.bf16.mxu0 %vm22360_vm12, %v22291_v1  ;;  %16941 = vmatpush3.bf16.msra.mxu0 %v17813_v14  ;;  %v8371_v24 = vpop.f32.mrf.mxu0 }
 0x466   : > { %16942 = vmatprep.subr.bf16.mxu0 %v22291_v1 }
 0x467   : > { %v16558_v2 = vpop.f32.mrf.mxu0 }
 0x468   : > { %16657 = vmatmul.mubr.bf16.vlgmr.msra.gmra.mxu1 %v8840_v9 }
 0x469   : > { %16841 = vmatpush3.bf16.msra.mxu1 %v17773_v42  ;;  %16660 = vmatprep.mubr.msk.bf16.mxu1 %vm22360_vm12, %v22291_v1  ;;  %v8374_v56 = vpop.f32.mrf.mxu0  ;;  %v8871_v42 = vrot.slane %v8869_v36, 3 }
 0x46a   : > { %16842 = vmatprep.subr.bf16.mxu1 %v22291_v1  ;;  %16943 = vmatpush3.bf16.msra.mxu0 %v17815_v10 }
 0x46b   : > { %16944 = vmatprep.subr.bf16.mxu0 %v22291_v1  ;;  %v7815_v9 = vpop.f32.mrf.mxu1  ;;  %v16559_v51 = vpop.f32.mrf.mxu0  ;;  %v8875_v18 = vor.u32 %v8874_v33, %v8871_v42 }
 0x46c   : > { %16761 = vmatmul.mubr.bf16.gmra.mxu0 %v9593_v12  ;;  %v8537_v8 = vadd.f32 %v8371_v24, %v7815_v9  ;;  %v9627_v12 = vrot.slane %v9625_v43, 4  ;;  %v9640_v24 = vshrl.u32 %v17788_v16, 16  ;;  %v17790_v43 = vld [vmem:[#allocation3 + $0x54] sm:$0xff]   ;;  %v8896_v9 = vshrl.u32 %v17789_v57, 16 }
 0x46d   : > { %16764 = vmatprep.mubr.msk.bf16.mxu0 %vm22360_vm12, %v22291_v1  ;;  %16843 = vmatpush3.bf16.msra.mxu1 %v17779_v59  ;;  %v16458_v58 = vpop.f32.mrf.mxu1  ;;  %v9620_v59 = vsel %vm22637_vm13, %v9610_v26, %v9619_v48  ;;  %v8876_v14 = vsel %vm22638_vm1, %v8866_v35, %v8875_v18  ;;  %v9636_v26 = vrot.slane %v9634_v19, 4  ;;  %v9643_v35 = vshll.u32 %v17788_v16, 16  ;;  %vm22651_vm13 = vmmov %vm22630_vm0 }
 0x46e   : > { %16844 = vmatprep.subr.bf16.mxu1 %v22291_v1  ;;  %16945 = vmatpush3.bf16.msra.mxu0 %v17817_v40  ;;  %8578 = vst [vmem:[#allocation4 + $0xb0] sm:$0xff] %v8537_v8  ;;  %v9628_v20 = vor.u32 %v9627_v12, %v9624_v60  ;;  %v9642_v42 = vrot.slane %v9640_v24, 3  ;;  %v8899_v8 = vshll.u32 %v17789_v57, 16  ;;  %v17791_v58 = vld [vmem:[#allocation3 + $0x4c] sm:$0xff]   ;;  %v9649_v12 = vshrl.u32 %v17790_v43, 16  ;;  %v17795_v24 = vld [vmem:[#allocation3 + $0x64] sm:$0xff]   ;;  %vm22652_vm1 = vmmov %vm22630_vm0 }
 0x46f   : > { %16946 = vmatprep.subr.bf16.mxu0 %v22291_v1  ;;  %v9645_v33 = vrot.slane %v9643_v35, 4 }
 0x470   : > { %16661 = vmatmul.mubr.bf16.gmra.mxu1 %v8849_v62  ;;  %v8379_v30 = vpop.f32.mrf.mxu0  ;;  %v9631_v62 = vshrl.u32 %v17786_v37, 16  ;;  %v9629_v10 = vsel %vm22639_vm4, %v9619_v48, %v9628_v20  ;;  %v9651_v19 = vrot.slane %v9649_v12, 3  ;;  %v17797_v12 = vld [vmem:[#allocation3 + $0x6c] sm:$0xff]   ;;  %vm22653_vm4 = vmmov %vm22630_vm0 }
 0x471   : > { %16664 = vmatprep.mubr.msk.bf16.mxu1 %vm22360_vm12, %v22291_v1  ;;  %16845 = vmatpush3.bf16.msra.mxu1 %v17785_v39  ;;  %v7818_v39 = vpop.f32.mrf.mxu1  ;;  %v9646_v60 = vor.u32 %v9645_v33, %v9642_v42 }
 0x472   : > { %16846 = vmatprep.subr.bf16.mxu1 %v22291_v1  ;;  %16947 = vmatpush3.bf16.msra.mxu0 %v17819_v28  ;;  %v8538_v6 = vadd.f32 %v8374_v56, %v7818_v39  ;;  %v16562_v46 = vpop.f32.mrf.mxu0  ;;  %v8889_v28 = vrot.slane %v8887_v4, 3 }
 0x473   : > { %16948 = vmatprep.subr.bf16.mxu0 %v22291_v1  ;;  %v16459_v54 = vpop.f32.mrf.mxu1 }
 0x474   : > { %16765 = vmatmul.mubr.bf16.gmra.mxu0 %v9602_v22  ;;  %8579 = vst [vmem:[#allocation4 + $0xd0] sm:$0xff] %v8538_v6  ;;  %v8382_v38 = vpop.f32.mrf.mxu0  ;;  %v8883_v22 = vrot.slane %v8881_v17, 4  ;;  %v8898_v17 = vrot.slane %v8896_v9, 3  ;;  %v17793_v54 = vld [vmem:[#allocation3 + $0x5c] sm:$0xff]  }
 0x475   : > { %16768 = vmatprep.mubr.msk.bf16.mxu0 %vm22360_vm12, %v22291_v1  ;;  %16847 = vmatpush3.bf16.msra.mxu1 %v17792_v49  ;;  %v8880_v49 = vrot.slane %v8878_v13, 3  ;;  %v9661_v16 = vshll.u32 %v17793_v54, 16  ;;  %v17796_v9 = vld [vmem:[#allocation3 + $0x5c] sm:$0xff]  }
 0x476   : > { %16848 = vmatprep.subr.bf16.mxu1 %v22291_v1  ;;  %16949 = vmatpush3.bf16.msra.mxu0 %v17822_v23  ;;  %v7823_v34 = vpop.f32.mrf.mxu1  ;;  %v16563_v44 = vpop.f32.mrf.mxu0 }
 0x477   : > { %16950 = vmatprep.subr.bf16.mxu0 %v22291_v1  ;;  %v8539_v7 = vadd.f32 %v8379_v30, %v7823_v34  ;;  %v8884_v55 = vor.u32 %v8883_v22, %v8880_v49  ;;  %v9652_v30 = vshll.u32 %v17790_v43, 16  ;;  %v8905_v22 = vshrl.u32 %v17791_v58, 16 }
 0x478   : > { %16665 = vmatmul.mubr.bf16.gmra.mxu1 %v8858_v25  ;;  %v16462_v11 = vpop.f32.mrf.mxu1  ;;  %v8890_v25 = vshll.u32 %v17787_v29, 16  ;;  %v8908_v29 = vshll.u32 %v17791_v58, 16 }
 0x479   : > { %16668 = vmatprep.mubr.msk.bf16.mxu1 %vm22360_vm12, %v22291_v1  ;;  %16849 = vmatpush3.bf16.msra.mxu1 %v17798_v3  ;;  %v9633_v3 = vrot.slane %v9631_v62, 3  ;;  %8580 = vst [vmem:[#allocation4 + $0x10] sm:$0xff] %v8539_v7  ;;  %v8885_v27 = vsel %vm22640_vm5, %v8875_v18, %v8884_v55  ;;  %vm22654_vm5 = vmmov %vm22630_vm0 }
 0x47a   : > { %16850 = vmatprep.subr.bf16.mxu1 %v22291_v1  ;;  %16951 = vmatpush3.bf16.msra.mxu0 %v17824_v61  ;;  %v7826_v40 = vpop.f32.mrf.mxu1  ;;  %v8892_v2 = vrot.slane %v8890_v25, 4  ;;  %v8901_v61 = vrot.slane %v8899_v8, 4  ;;  %v8907_v25 = vrot.slane %v8905_v22, 3  ;;  %v17799_v22 = vld [vmem:[#allocation3 + $0x64] sm:$0xff]  }
 0x47b   : > { %16952 = vmatprep.subr.bf16.mxu0 %v22291_v1  ;;  %v8387_v41 = vpop.f32.mrf.mxu0  ;;  %v9637_v0 = vor.u32 %v9636_v26, %v9633_v3  ;;  %v9658_v26 = vshrl.u32 %v17793_v54, 16 }
 0x47c   : > { %16769 = vmatmul.mubr.bf16.gmra.mxu0 %v9611_v45  ;;  %v16463_v53 = vpop.f32.mrf.mxu1  ;;  %v8893_v23 = vor.u32 %v8892_v2, %v8889_v28  ;;  %v8902_v49 = vor.u32 %v8901_v61, %v8898_v17  ;;  %v8926_v17 = vshll.u32 %v17796_v9, 16 }
 0x47d   : > { %16772 = vmatprep.mubr.msk.bf16.mxu0 %vm22360_vm12, %v22291_v1  ;;  %16851 = vmatpush3.bf16.msra.mxu1 %v17804_v31  ;;  %v8540_v31 = vadd.f32 %v8382_v38, %v7826_v40  ;;  %v16566_v45 = vpop.f32.mrf.mxu0  ;;  %v9647_v62 = vsel %vm22630_vm0, %v9637_v0, %v9646_v60  ;;  %v9654_v38 = vrot.slane %v9652_v30, 4  ;;  %v9660_v53 = vrot.slane %v9658_v26, 3 }
 0x47e   : > { %16852 = vmatprep.subr.bf16.mxu1 %v22291_v1  ;;  %16953 = vmatpush3.bf16.msra.mxu0 %v17825_v5  ;;  %v8894_v13 = vsel %vm22642_vm6, %v8884_v55, %v8893_v23  ;;  %v7173_v5 = vld [vmem:[#allocation3 + $0xb8] sm:$0xf]  ;;  %v8903_v4 = vsel %vm22643_vm3, %v8893_v23, %v8902_v49  ;;  %vm22656_vm6 = vmmov %vm22630_vm0 }
 0x47f   : > { %16954 = vmatprep.subr.bf16.mxu0 %v22291_v1  ;;  %8581 = vst [vmem:[#allocation4 + $0x48] sm:$0xff] %v8540_v31  ;;  %v8390_v36 = vpop.f32.mrf.mxu0  ;;  %v7174_v7 = vsel %vm18730_vm8, 0, %v7173_v5  ;;  %v9655_v3 = vor.u32 %v9654_v38, %v9651_v19  ;;  %vm22644_vm8 = vmmov %vm22630_vm0 }
 0x480   : > { %16669 = vmatmul.mubr.bf16.gmra.mxu1 %v8867_v32  ;;  %v9638_v32 = vsel %vm22641_vm7, %v9628_v20, %v9637_v0  ;;  %7175 = vst [vmem:[#allocation3 + $0xb8] sm:$0xf] %v7174_v7  ;;  %v9663_v0 = vrot.slane %v9661_v16, 4  ;;  %v17800_v7 = vld [vmem:[#allocation3 + $0x74] sm:$0xff]   ;;  %vm22655_vm7 = vmmov %vm22630_vm0 }
 0x481   : > { %16672 = vmatprep.mubr.msk.bf16.mxu1 %vm22360_vm12, %v22291_v1  ;;  %16853 = vmatpush3.bf16.msra.mxu1 %v17810_v21  ;;  %v7831_v21 = vpop.f32.mrf.mxu1  ;;  %v16567_v50 = vpop.f32.mrf.mxu0  ;;  %v9656_v57 = vsel %vm22644_vm8, %v9646_v60, %v9655_v3  ;;  %vm22657_vm3 = vmmov %vm22630_vm0 }
 0x482   : > { %16854 = vmatprep.subr.bf16.mxu1 %v22291_v1  ;;  %16955 = vmatpush3.bf16.msra.mxu0 %v17826_v47  ;;  %v8541_v48 = vadd.f32 %v8387_v41, %v7831_v21  ;;  %v17794_v41 = vld [vmem:[#allocation3 + $0x54] sm:$0xff]   ;;  %v8910_v47 = vrot.slane %v8908_v29, 4  ;;  %v9664_v43 = vor.u32 %v9663_v0, %v9660_v53  ;;  %vm22658_vm8 = vmmov %vm22630_vm0 }
 0x483   : > { %17140 = vmatprep.subr.bf16.mxu0 %v22291_v1  ;;  %v16466_v56 = vpop.f32.mrf.mxu1  ;;  %v8917_v28 = vshll.u32 %v17794_v41, 16 }
 0x484   : > { %16773 = vmatmul.mubr.bf16.gmra.mxu0 %v9620_v59  ;;  %8582 = vst [vmem:[#allocation4 + $0x120] sm:$0xff] %v8541_v48  ;;  %v8395_v63 = vpop.f32.mrf.mxu0  ;;  %v9667_v56 = vshrl.u32 %v17795_v24, 16  ;;  %v9665_v58 = vsel %vm22646_vm2, %v9655_v3, %v9664_v43  ;;  %vm22660_vm2 = vmmov %vm22630_vm0 }
 0x485   : > { %16776 = vmatprep.mubr.msk.bf16.mxu0 %vm22360_vm12, %v22291_v1  ;;  %16855 = vmatpush3.bf16.msra.mxu1 %v17821_v15  ;;  %v7834_v51 = vpop.f32.mrf.mxu1  ;;  %v8919_v23 = vrot.slane %v8917_v28, 4 }
 0x486   : > { %17040 = vmatprep.subr.bf16.mxu1 %v22291_v1  ;;  %v8542_v37 = vadd.f32 %v8390_v36, %v7834_v51  ;;  %v16570_v15 = vpop.f32.mrf.mxu0  ;;  %v8911_v36 = vor.u32 %v8910_v47, %v8907_v25 }
 0x487   : > { %v16467_v59 = vpop.f32.mrf.mxu1 }
 0x488   : > { %16673 = vmatmul.mubr.bf16.gmra.mxu1 %v8876_v14  ;;  %8583 = vst [vmem:[#allocation4 + $0x38] sm:$0xff] %v8542_v37  ;;  %v8398_v18 = vpop.f32.mrf.mxu0  ;;  %v8912_v33 = vsel %vm22645_vm10, %v8902_v49, %v8911_v36  ;;  %v9669_v59 = vrot.slane %v9667_v56, 3  ;;  %v8928_v49 = vrot.slane %v8926_v17, 4  ;;  %vm22659_vm10 = vmmov %vm22630_vm0 }
 0x489   : > { %16676 = vmatprep.mubr.msk.bf16.mxu1 %vm22360_vm12, %v22291_v1 }
 0x48a   : > { %v7839_v39 = vpop.f32.mrf.mxu1  ;;  %v16571_v46 = vpop.f32.mrf.mxu0 }
 0x48b   : > { %v8543_v6 = vadd.f32 %v8395_v63, %v7839_v39 }
 0x48c   : > { %16777 = vmatmul.mubr.bf16.gmra.mxu0 %v9629_v10  ;;  %v16470_v20 = vpop.f32.mrf.mxu1 }
 0x48d   : > { %16780 = vmatprep.mubr.msk.bf16.mxu0 %vm22360_vm12, %v22291_v1  ;;  %8584 = vst [vmem:[#allocation4 + $0xf8] sm:$0xff] %v8543_v6  ;;  %v9676_v20 = vshrl.u32 %v17797_v12, 16 }
 0x48e   : > { %v8403_v14 = vpop.f32.mrf.mxu0  ;;  %v7842_v34 = vpop.f32.mrf.mxu1 }
 0x48f   : > { %v8544_v44 = vadd.f32 %v8398_v18, %v7842_v34 }
 0x490   : > { %16677 = vmatmul.mubr.bf16.gmra.mxu1 %v8885_v27  ;;  %v16574_v11 = vpop.f32.mrf.mxu0  ;;  %v16471_v10 = vpop.f32.mrf.mxu1  ;;  %v8914_v27 = vshrl.u32 %v17794_v41, 16  ;;  %v8932_v41 = vshrl.u32 %v17799_v22, 16 }
 0x491   : > { %16680 = vmatprep.mubr.msk.bf16.mxu1 %vm22360_vm12, %v22291_v1  ;;  %8585 = vst [vmem:[#allocation4 + $0x100] sm:$0xff] %v8544_v44  ;;  %v9678_v10 = vrot.slane %v9676_v20, 3 }
 0x492   : > { %v8406_v55 = vpop.f32.mrf.mxu0  ;;  %v8916_v63 = vrot.slane %v8914_v27, 3  ;;  %v8934_v0 = vrot.slane %v8932_v41, 3 }
 0x493   : > { %v7847_v40 = vpop.f32.mrf.mxu1 }
 0x494   : > { %16781 = vmatmul.mubr.bf16.gmra.mxu0 %v9638_v32  ;;  %v8545_v31 = vadd.f32 %v8403_v14, %v7847_v40  ;;  %v16575_v45 = vpop.f32.mrf.mxu0  ;;  %v9670_v32 = vshll.u32 %v17795_v24, 16  ;;  %v8920_v18 = vor.u32 %v8919_v23, %v8916_v63 }
 0x495   : > { %16784 = vmatprep.mubr.msk.bf16.mxu0 %vm22360_vm12, %v22291_v1  ;;  %v16474_v52 = vpop.f32.mrf.mxu1  ;;  %v9685_v45 = vshrl.u32 %v17800_v7, 16 }
 0x496   : > { %8586 = vst [vmem:[#allocation4 + $0x80] sm:$0xff] %v8545_v31  ;;  %v9672_v60 = vrot.slane %v9670_v32, 4  ;;  %v8921_v38 = vsel %vm22647_vm15, %v8911_v36, %v8920_v18  ;;  %v9688_v52 = vshll.u32 %v17800_v7, 16  ;;  %vm22661_vm15 = vmmov %vm22630_vm0 }
 0x497   : > { %v8411_v35 = vpop.f32.mrf.mxu0  ;;  %v7850_v2 = vpop.f32.mrf.mxu1 }
 0x498   : > { %16681 = vmatmul.mubr.bf16.gmra.mxu1 %v8894_v13  ;;  %v8546_v21 = vadd.f32 %v8406_v55, %v7850_v2  ;;  %v8923_v13 = vshrl.u32 %v17796_v9, 16  ;;  %v9673_v54 = vor.u32 %v9672_v60, %v9669_v59  ;;  %v8935_v55 = vshll.u32 %v17799_v22, 16 }
 0x499   : > { %16684 = vmatprep.mubr.msk.bf16.mxu1 %vm22360_vm12, %v22291_v1  ;;  %v16578_v48 = vpop.f32.mrf.mxu0  ;;  %v16475_v50 = vpop.f32.mrf.mxu1 }
 0x49a   : > { %8587 = vst [vmem:[#allocation4 + $0x108] sm:$0xff] %v8546_v21  ;;  %v8925_v14 = vrot.slane %v8923_v13, 3  ;;  %v9674_v11 = vsel %vm22648_vm14, %v9664_v43, %v9673_v54  ;;  %v8937_v24 = vrot.slane %v8935_v55, 4  ;;  %v9687_v48 = vrot.slane %v9685_v45, 3  ;;  %v17802_v43 = vld [vmem:[#allocation3 + $0x7c] sm:$0xff]   ;;  %vm22662_vm14 = vmmov %vm22630_vm0 }
 0x49b   : > { %v8414_v42 = vpop.f32.mrf.mxu0  ;;  %v9690_v50 = vrot.slane %v9688_v52, 4 }
 0x49c   : > { %16785 = vmatmul.mubr.bf16.gmra.mxu0 %v9647_v62  ;;  %v9679_v62 = vshll.u32 %v17797_v12, 16  ;;  %v8929_v16 = vor.u32 %v8928_v49, %v8925_v14  ;;  %v8938_v32 = vor.u32 %v8937_v24, %v8934_v0 }
 0x49d   : > { %16788 = vmatprep.mubr.msk.bf16.mxu0 %vm22360_vm12, %v22291_v1  ;;  %v7855_v8 = vpop.f32.mrf.mxu1  ;;  %v16579_v37 = vpop.f32.mrf.mxu0 }
 0x49e   : > { %v8547_v51 = vadd.f32 %v8411_v35, %v7855_v8  ;;  %v9681_v3 = vrot.slane %v9679_v62, 4  ;;  %v8930_v53 = vsel %vm22649_vm9, %v8920_v18, %v8929_v16  ;;  %v17801_v35 = vld [vmem:[#allocation3 + $0x6c] sm:$0xff]   ;;  %v9694_v37 = vshrl.u32 %v17802_v43, 16  ;;  %vm22663_vm9 = vmmov %vm22630_vm0 }
 0x49f   : > { %v16478_v15 = vpop.f32.mrf.mxu1  ;;  %v8939_v59 = vsel %vm22651_vm13, %v8929_v16, %v8938_v32  ;;  %vm22665_vm13 = vmmov %vm22630_vm0 }
 0x4a0   : > { %16685 = vmatmul.mubr.bf16.gmra.mxu1 %v8903_v4  ;;  %8588 = vst [vmem:[#allocation4 + $0x138] sm:$0xff] %v8547_v51  ;;  %v9682_v31 = vor.u32 %v9681_v3, %v9678_v10  ;;  %v9691_v51 = vor.u32 %v9690_v50, %v9687_v48  ;;  %v9697_v15 = vshll.u32 %v17802_v43, 16 }
 0x4a1   : > { %16688 = vmatprep.mubr.msk.bf16.mxu1 %vm22360_vm12, %v22291_v1  ;;  %v7858_v61 = vpop.f32.mrf.mxu1 }
 0x4a2   : > { %v8419_v30 = vpop.f32.mrf.mxu0  ;;  %v8548_v39 = vadd.f32 %v8414_v42, %v7858_v61  ;;  %v9683_v21 = vsel %vm22650_vm11, %v9673_v54, %v9682_v31  ;;  %v8941_v42 = vshrl.u32 %v17801_v35, 16  ;;  %v17805_v54 = vld [vmem:[#allocation3 + $0x84] sm:$0xff]   ;;  %vm22664_vm11 = vmmov %vm22630_vm0 }
 0x4a3   : > { %v16479_v46 = vpop.f32.mrf.mxu1  ;;  %v9706_v7 = vshll.u32 %v17805_v54, 16 }
 0x4a4   : > { %16789 = vmatmul.mubr.bf16.gmra.mxu0 %v9656_v57  ;;  %v16582_v6 = vpop.f32.mrf.mxu0  ;;  %8589 = vst [vmem:[#allocation4 + $0xf0] sm:$0xff] %v8548_v39  ;;  %v8943_v60 = vrot.slane %v8941_v42, 3  ;;  %v9692_v39 = vsel %vm22652_vm1, %v9682_v31, %v9691_v51  ;;  %v9699_v46 = vrot.slane %v9697_v15, 4  ;;  %v17807_v31 = vld [vmem:[#allocation3 + $0x8c] sm:$0xff]   ;;  %vm22666_vm1 = vmmov %vm22630_vm0 }
 0x4a5   : > { %16792 = vmatprep.mubr.msk.bf16.mxu0 %vm22360_vm12, %v22291_v1  ;;  %v9696_v6 = vrot.slane %v9694_v37, 3 }
 0x4a6   : > { %v8422_v19 = vpop.f32.mrf.mxu0 }
 0x4a8   : > { %16689 = vmatmul.mubr.bf16.gmra.mxu1 %v8912_v33  ;;  %v7863_v29 = vpop.f32.mrf.mxu1  ;;  %v16583_v34 = vpop.f32.mrf.mxu0  ;;  %v8944_v33 = vshll.u32 %v17801_v35, 16 }
 0x4a9   : > { %16692 = vmatprep.mubr.msk.bf16.mxu1 %vm22360_vm12, %v22291_v1  ;;  %v8549_v5 = vadd.f32 %v8419_v30, %v7863_v29  ;;  %v17803_v30 = vld [vmem:[#allocation3 + $0x74] sm:$0xff]   ;;  %v9703_v34 = vshrl.u32 %v17805_v54, 16 }
 0x4aa   : > { %v16482_v44 = vpop.f32.mrf.mxu1  ;;  %v8946_v12 = vrot.slane %v8944_v33, 4 }
 0x4ab   : > { %8590 = vst [vmem:[#allocation4 + $0x18] sm:$0xff] %v8549_v5  ;;  %v9700_v5 = vor.u32 %v9699_v46, %v9696_v6 }
 0x4ac   : > { %16793 = vmatmul.mubr.bf16.gmra.mxu0 %v9665_v58  ;;  %v8427_v26 = vpop.f32.mrf.mxu0  ;;  %v7866_v4 = vpop.f32.mrf.mxu1  ;;  %v8947_v62 = vor.u32 %v8946_v12, %v8943_v60 }
 0x4ad   : > { %16796 = vmatprep.mubr.msk.bf16.mxu0 %vm22360_vm12, %v22291_v1  ;;  %v8550_v25 = vadd.f32 %v8422_v19, %v7866_v4  ;;  %v8950_v19 = vshrl.u32 %v17803_v30, 16 }
 0x4ae   : > { %v16586_v47 = vpop.f32.mrf.mxu0  ;;  %v16483_v40 = vpop.f32.mrf.mxu1 }
 0x4af   : > { %8591 = vst [vmem:[#allocation4 + $0xc8] sm:$0xff] %v8550_v25  ;;  %v8952_v10 = vrot.slane %v8950_v19, 3  ;;  %v9701_v25 = vsel %vm22654_vm5, %v9691_v51, %v9700_v5  ;;  %v9705_v47 = vrot.slane %v9703_v34, 3  ;;  %v9708_v40 = vrot.slane %v9706_v7, 4  ;;  %v17809_v51 = vld [vmem:[#allocation3 + $0x94] sm:$0xff]  }
 0x4b0   : > { %16693 = vmatmul.mubr.bf16.gmra.mxu1 %v8921_v38  ;;  %v8430_v57 = vpop.f32.mrf.mxu0  ;;  %v8953_v38 = vshll.u32 %v17803_v30, 16 }
 0x4b1   : > { %16696 = vmatprep.mubr.msk.bf16.mxu1 %vm22360_vm12, %v22291_v1  ;;  %v7871_v36 = vpop.f32.mrf.mxu1 }
 0x4b2   : > { %v8551_v27 = vadd.f32 %v8427_v26, %v7871_v36  ;;  %v16587_v28 = vpop.f32.mrf.mxu0  ;;  %v8955_v3 = vrot.slane %v8953_v38, 4  ;;  %v17806_v26 = vld [vmem:[#allocation3 + $0x7c] sm:$0xff]  }
 0x4b3   : > { %v16486_v2 = vpop.f32.mrf.mxu1  ;;  %v9712_v28 = vshrl.u32 %v17807_v31, 16 }
 0x4b4   : > { %16797 = vmatmul.mubr.bf16.gmra.mxu0 %v9674_v11  ;;  %8592 = vst [vmem:[#allocation4 + $0x70] sm:$0xff] %v8551_v27  ;;  %v8948_v11 = vsel %vm22653_vm4, %v8938_v32, %v8947_v62  ;;  %v8956_v52 = vor.u32 %v8955_v3, %v8952_v10  ;;  %v9709_v27 = vor.u32 %v9708_v40, %v9705_v47  ;;  %v9715_v2 = vshll.u32 %v17807_v31, 16 }
 0x4b5   : > { %16800 = vmatprep.mubr.msk.bf16.mxu0 %vm22360_vm12, %v22291_v1  ;;  %v8435_v56 = vpop.f32.mrf.mxu0  ;;  %v7874_v63 = vpop.f32.mrf.mxu1  ;;  %vm22667_vm4 = vsmask.f32 7424 }
 0x4b6   : > { %v8552_v23 = vadd.f32 %v8430_v57, %v7874_v63  ;;  %v8959_v57 = vshrl.u32 %v17806_v26, 16  ;;  %v8957_v48 = vsel %vm22655_vm7, %v8947_v62, %v8956_v52  ;;  %vm22668_vm5 = vmmov %vm22667_vm4 }
 0x4b7   : > { %v16590_v9 = vpop.f32.mrf.mxu0  ;;  %v16487_v8 = vpop.f32.mrf.mxu1  ;;  %vm22669_vm7 = vmmov %vm22667_vm4 }
 0x4b8   : > { %16697 = vmatmul.mubr.bf16.gmra.mxu1 %v8930_v53  ;;  %8593 = vst [vmem:[#allocation4 + $0x20] sm:$0xff] %v8552_v23  ;;  %v8962_v53 = vshll.u32 %v17806_v26, 16  ;;  %v8961_v50 = vrot.slane %v8959_v57, 3  ;;  %v9710_v23 = vsel %vm22656_vm6, %v9700_v5, %v9709_v27  ;;  %v9714_v9 = vrot.slane %v9712_v28, 3  ;;  %v17812_v5 = vld [vmem:[#allocation3 + $0x9c] sm:$0xff]   ;;  %vm22670_vm6 = vmmov %vm22667_vm4 }
 0x4b9   : > { %16700 = vmatprep.mubr.msk.bf16.mxu1 %vm22360_vm12, %v22291_v1  ;;  %v8438_v58 = vpop.f32.mrf.mxu0  ;;  %v9717_v8 = vrot.slane %v9715_v2, 4 }
 0x4ba   : > { %v8964_v43 = vrot.slane %v8962_v53, 4 }
 0x4bb   : > { %v7879_v18 = vpop.f32.mrf.mxu1  ;;  %v16591_v17 = vpop.f32.mrf.mxu0 }
 0x4bc   : > { %16801 = vmatmul.mubr.bf16.gmra.mxu0 %v9683_v21  ;;  %v8553_v13 = vadd.f32 %v8435_v56, %v7879_v18  ;;  %v17808_v56 = vld [vmem:[#allocation3 + $0x84] sm:$0xff]   ;;  %v8965_v15 = vor.u32 %v8964_v43, %v8961_v50  ;;  %v9721_v17 = vshrl.u32 %v17809_v51, 16 }
 0x4bd   : > { %16804 = vmatprep.mubr.msk.bf16.mxu0 %vm22360_vm12, %v22291_v1  ;;  %v16490_v61 = vpop.f32.mrf.mxu1 }
 0x4be   : > { %8594 = vst [vmem:[#allocation4 + $0x128] sm:$0xff] %v8553_v13  ;;  %v9718_v13 = vor.u32 %v9717_v8, %v9714_v9  ;;  %v9724_v61 = vshll.u32 %v17809_v51, 16  ;;  %v8966_v6 = vsel %vm22630_vm0, %v8956_v52, %v8965_v15  ;;  %vm22671_vm0 = vmmov %vm22667_vm4 }
 0x4bf   : > { %v8443_v20 = vpop.f32.mrf.mxu0  ;;  %v7882_v14 = vpop.f32.mrf.mxu1 }
 0x4c0   : > { %16701 = vmatmul.mubr.bf16.gmra.mxu1 %v8939_v59  ;;  %v8554_v49 = vadd.f32 %v8438_v58, %v7882_v14  ;;  %v8968_v58 = vshrl.u32 %v17808_v56, 16  ;;  %v8971_v59 = vshll.u32 %v17808_v56, 16 }
 0x4c1   : > { %16704 = vmatprep.mubr.msk.bf16.mxu1 %vm22360_vm12, %v22291_v1  ;;  %v16594_v22 = vpop.f32.mrf.mxu0  ;;  %v16491_v29 = vpop.f32.mrf.mxu1 }
 0x4c2   : > { %8595 = vst [vmem:[#allocation4 + $0x110] sm:$0xff] %v8554_v49  ;;  %v8970_v46 = vrot.slane %v8968_v58, 3  ;;  %v8973_v54 = vrot.slane %v8971_v59, 4  ;;  %v9719_v49 = vsel %vm22657_vm3, %v9709_v27, %v9718_v13  ;;  %v9723_v22 = vrot.slane %v9721_v17, 3  ;;  %v17816_v27 = vld [vmem:[#allocation3 + $0xa4] sm:$0xff]   ;;  %vm22672_vm3 = vmmov %vm22671_vm0 }
 0x4c3   : > { %v8446_v44 = vpop.f32.mrf.mxu0  ;;  %v9726_v29 = vrot.slane %v9724_v61, 4 }
 0x4c4   : > { %16805 = vmatmul.mubr.bf16.gmra.mxu0 %v9692_v39  ;;  %v8974_v7 = vor.u32 %v8973_v54, %v8970_v46 }
 0x4c5   : > { %16808 = vmatprep.mubr.msk.bf16.mxu0 %vm22360_vm12, %v22291_v1  ;;  %v7887_v16 = vpop.f32.mrf.mxu1  ;;  %v16595_v55 = vpop.f32.mrf.mxu0 }
 0x4c6   : > { %v8555_v41 = vadd.f32 %v8443_v20, %v7887_v16  ;;  %v17811_v20 = vld [vmem:[#allocation3 + $0x8c] sm:$0xff]   ;;  %v9730_v55 = vshrl.u32 %v17812_v5, 16  ;;  %v8975_v47 = vsel %vm22658_vm8, %v8965_v15, %v8974_v7  ;;  %vm22673_vm8 = vmmov %vm22671_vm0 }
 0x4c7   : > { %v16494_v4 = vpop.f32.mrf.mxu1 }
 0x4c8   : > { %16705 = vmatmul.mubr.bf16.gmra.mxu1 %v8948_v11  ;;  %8596 = vst [vmem:[#allocation4 + $0x8] sm:$0xff] %v8555_v41  ;;  %v8451_v45 = vpop.f32.mrf.mxu0  ;;  %v8980_v11 = vshll.u32 %v17811_v20, 16  ;;  %v9727_v41 = vor.u32 %v9726_v29, %v9723_v22  ;;  %v9733_v4 = vshll.u32 %v17812_v5, 16 }
 0x4c9   : > { %16708 = vmatprep.mubr.msk.bf16.mxu1 %vm22360_vm12, %v22291_v1  ;;  %v7890_v0 = vpop.f32.mrf.mxu1 }
 0x4ca   : > { %v8556_v24 = vadd.f32 %v8446_v44, %v7890_v0  ;;  %v16598_v35 = vpop.f32.mrf.mxu0  ;;  %v8977_v44 = vshrl.u32 %v17811_v20, 16  ;;  %v8982_v31 = vrot.slane %v8980_v11, 4 }
 0x4cb   : > { %v16495_v36 = vpop.f32.mrf.mxu1  ;;  %v9732_v35 = vrot.slane %v9730_v55, 3 }
 0x4cc   : > { %16809 = vmatmul.mubr.bf16.gmra.mxu0 %v9701_v25  ;;  %8597 = vst [vmem:[#allocation4 + $0x98] sm:$0xff] %v8556_v24  ;;  %v8454_v21 = vpop.f32.mrf.mxu0  ;;  %v8979_v40 = vrot.slane %v8977_v44, 3  ;;  %v9728_v24 = vsel %vm22659_vm10, %v9718_v13, %v9727_v41  ;;  %v9735_v36 = vrot.slane %v9733_v4, 4  ;;  %v17820_v13 = vld [vmem:[#allocation3 + $0xac] sm:$0x3f]   ;;  %vm22674_vm10 = vmmov %vm22671_vm0 }
 0x4cd   : > { %16812 = vmatprep.mubr.msk.bf16.mxu0 %vm22360_vm12, %v22291_v1 }
 0x4ce   : > { %v7895_v32 = vpop.f32.mrf.mxu1  ;;  %v16599_v33 = vpop.f32.mrf.mxu0  ;;  %v8983_v2 = vor.u32 %v8982_v31, %v8979_v40 }
 0x4cf   : > { %v8557_v42 = vadd.f32 %v8451_v45, %v7895_v32  ;;  %v17814_v45 = vld [vmem:[#allocation3 + $0x94] sm:$0xff]   ;;  %v9739_v33 = vshrl.u32 %v17816_v27, 16 }
 0x4d0   : > { %16709 = vmatmul.mubr.bf16.gmra.mxu1 %v8957_v48  ;;  %v16498_v63 = vpop.f32.mrf.mxu1  ;;  %v8989_v48 = vshll.u32 %v17814_v45, 16  ;;  %v8984_v9 = vsel %vm22660_vm2, %v8974_v7, %v8983_v2  ;;  %vm22675_vm2 = vmmov %vm22671_vm0 }
 0x4d1   : > { %16712 = vmatprep.mubr.msk.bf16.mxu1 %vm22360_vm12, %v22291_v1  ;;  %8598 = vst [vmem:[#allocation4 + $0xa8] sm:$0xff] %v8557_v42  ;;  %v8459_v37 = vpop.f32.mrf.mxu0  ;;  %v9736_v42 = vor.u32 %v9735_v36, %v9732_v35  ;;  %v9742_v63 = vshll.u32 %v17816_v27, 16 }
 0x4d2   : > { %v7898_v60 = vpop.f32.mrf.mxu1  ;;  %v8991_v51 = vrot.slane %v8989_v48, 4 }
 0x4d3   : > { %v8558_v12 = vadd.f32 %v8454_v21, %v7898_v60  ;;  %v16602_v30 = vpop.f32.mrf.mxu0  ;;  %v8986_v21 = vshrl.u32 %v17814_v45, 16 }
 0x4d4   : > { %16813 = vmatmul.mubr.bf16.gmra.mxu0 %v9710_v23  ;;  %v16499_v18 = vpop.f32.mrf.mxu1  ;;  %v9741_v30 = vrot.slane %v9739_v33, 3  ;;  %v17828_v33 = vld [vmem:[#allocation3 + $0x18] sm:$0xff]  }
 0x4d5   : > { %16816 = vmatprep.mubr.msk.bf16.mxu0 %vm22360_vm12, %v22291_v1  ;;  %8599 = vst [vmem:[#allocation4 + $0x90] sm:$0xff] %v8558_v12  ;;  %v8462_v39 = vpop.f32.mrf.mxu0  ;;  %v8988_v8 = vrot.slane %v8986_v21, 3  ;;  %v9737_v12 = vsel %vm22661_vm15, %v9727_v41, %v9736_v42  ;;  %v9744_v18 = vrot.slane %v9742_v63, 4  ;;  %vm22676_vm15 = vmmov %vm22671_vm0 }
 0x4d7   : > { %v7903_v62 = vpop.f32.mrf.mxu1  ;;  %v16603_v38 = vpop.f32.mrf.mxu0  ;;  %v8992_v61 = vor.u32 %v8991_v51, %v8988_v8 }
 0x4d8   : > { %16713 = vmatmul.mubr.bf16.gmra.mxu1 %v8966_v6  ;;  %v8559_v19 = vadd.f32 %v8459_v37, %v7903_v62  ;;  %v17818_v37 = vld [vmem:[#allocation3 + $0x9c] sm:$0xff]   ;;  %v9748_v38 = vshrl.u32 %v17820_v13, 16 }
 0x4d9   : > { %16716 = vmatprep.mubr.msk.bf16.mxu1 %vm22360_vm12, %v22291_v1  ;;  %v16502_v14 = vpop.f32.mrf.mxu1  ;;  %v8998_v6 = vshll.u32 %v17818_v37, 16  ;;  %v8993_v22 = vsel %vm22662_vm14, %v8983_v2, %v8992_v61  ;;  %vm22677_vm14 = vmmov %vm22671_vm0 }
 0x4da   : > { %8600 = vst [vmem:[#allocation4 + $0xe0] sm:$0xff] %v8559_v19  ;;  %v9745_v19 = vor.u32 %v9744_v18, %v9741_v30  ;;  %v9751_v14 = vshll.u32 %v17820_v13, 16 }
 0x4db   : > { %v8467_v34 = vpop.f32.mrf.mxu0  ;;  %v7906_v10 = vpop.f32.mrf.mxu1  ;;  %v9000_v5 = vrot.slane %v8998_v6, 4 }
 0x4dc   : > { %16817 = vmatmul.mubr.bf16.gmra.mxu0 %v9719_v49  ;;  %v8560_v3 = vadd.f32 %v8462_v39, %v7906_v10  ;;  %v8995_v39 = vshrl.u32 %v17818_v37, 16 }
 0x4dd   : > { %16820 = vmatprep.mubr.msk.bf16.mxu0 %vm22360_vm12, %v22291_v1  ;;  %v16606_v26 = vpop.f32.mrf.mxu0  ;;  %v16503_v16 = vpop.f32.mrf.mxu1 }
 0x4de   : > { %8601 = vst [vmem:[#allocation4 + $0x88] sm:$0xff] %v8560_v3  ;;  %v8997_v29 = vrot.slane %v8995_v39, 3  ;;  %v9746_v3 = vsel %vm22663_vm9, %v9736_v42, %v9745_v19  ;;  %v9750_v26 = vrot.slane %v9748_v38, 3  ;;  %v9753_v16 = vrot.slane %v9751_v14, 4  ;;  %v17831_v39 = vld [vmem:[#allocation3 + $0x20] sm:$0xff]   ;;  %vm22678_vm9 = vmmov %vm22671_vm0 }
 0x4df   : > { %v8470_v25 = vpop.f32.mrf.mxu0  ;;  %v10878_v14 = vshll.u32 %v17831_v39, 16 }
 0x4e0   : > { %v7911_v52 = vpop.f32.mrf.mxu1  ;;  %16717 = vmatmul.mubr.bf16.gmra.mxu1 %v8975_v47  ;;  %v9001_v55 = vor.u32 %v9000_v5, %v8997_v29 }
 0x4e1   : > { %v8561_v57 = vadd.f32 %v8467_v34, %v7911_v52  ;;  %v16607_v53 = vpop.f32.mrf.mxu0  ;;  %16720 = vmatprep.mubr.msk.bf16.mxu1 %vm22360_vm12, %v22291_v1  ;;  %v17823_v34 = vld [vmem:[#allocation3 + $0xa4] sm:$0x3f]   ;;  %v9754_v52 = vor.u32 %v9753_v16, %v9750_v26 }
 0x4e2   : > { %v16506_v0 = vpop.f32.mrf.mxu1  ;;  %v9004_v4 = vshrl.u32 %v17823_v34, 16  ;;  %v9002_v53 = vsel %vm22664_vm11, %v8992_v61, %v9001_v55  ;;  %vm22679_vm11 = vmmov %vm22671_vm0 }
 0x4e3   : > { %8602 = vst [vmem:[#allocation4 + $0xc0] sm:$0xff] %v8561_v57  ;;  %v9755_v2 = vsel %vm22665_vm13, %v9745_v19, %v9754_v52  ;;  %vm22680_vm13 = vmmov %vm22671_vm0 }
 0x4e4   : > { %v8475_v28 = vpop.f32.mrf.mxu0  ;;  %16821 = vmatmul.mubr.bf16.gmra.mxu0 %v9728_v24  ;;  %v7914_v50 = vpop.f32.mrf.mxu1  ;;  %v9006_v0 = vrot.slane %v9004_v4, 3 }
 0x4e5   : > { %16824 = vmatprep.mubr.msk.bf16.mxu0 %vm22360_vm12, %v22291_v1  ;;  %v8562_v43 = vadd.f32 %v8470_v25, %v7914_v50  ;;  %v9007_v25 = vshll.u32 %v17823_v34, 16  ;;  %v17830_v34 = vld [vmem:[%s22280_s3 + $0x1b8] sm:$0xff]  }
 0x4e6   : > { %v16610_v56 = vpop.f32.mrf.mxu0  ;;  %v16507_v32 = vpop.f32.mrf.mxu1 }
 0x4e7   : > { %8603 = vst [vmem:[#allocation4 + $0x118] sm:$0xff] %v8562_v43  ;;  %v9009_v24 = vrot.slane %v9007_v25, 4  ;;  %v17827_v43 = vld [vmem:[#allocation3 + $0x10] sm:$0xff]  }
 0x4e8   : > { %v8478_v23 = vpop.f32.mrf.mxu0  ;;  %v7919_v15 = vpop.f32.mrf.mxu1  ;;  %16721 = vmatmul.mubr.bf16.gmra.mxu1 %v8984_v9  ;;  %v10865_v8 = vshll.u32 %v17827_v43, 16  ;;  %v17836_v25 = vld [vmem:[%s22280_s3 + $0x1b0] sm:$0xff]  }
 0x4e9   : > { %v8563_v58 = vadd.f32 %v8475_v28, %v7919_v15  ;;  %16724 = vmatprep.mubr.msk.bf16.mxu1 %vm22360_vm12, %v22291_v1  ;;  %v9010_v48 = vor.u32 %v9009_v24, %v9006_v0  ;;  %v17842_v0 = vld [vmem:[%s22280_s3 + $0x1a8] sm:$0xff]  }
 0x4ea   : > { %v16611_v59 = vpop.f32.mrf.mxu0  ;;  %v16510_v60 = vpop.f32.mrf.mxu1 }
 0x4eb   : > { %8604 = vst [vmem:[#allocation4 + $0xd8] sm:$0xff] %v8563_v58  ;;  %v10870_v58 = vshll.u32 %v17828_v33, 16 }
 0x4ec   : > { %v8483_v17 = vpop.f32.mrf.mxu0  ;;  %16825 = vmatmul.mubr.bf16.gmra.mxu0 %v9737_v12  ;;  %v7922_v46 = vpop.f32.mrf.mxu1  ;;  %v10867_v12 = vrot.slane %v10865_v8, 1 }
 0x4ed   : > { %16828 = vmatprep.mubr.msk.bf16.mxu0 %vm22360_vm12, %v22291_v1  ;;  %v8564_v54 = vadd.f32 %v8478_v23, %v7922_v46  ;;  %v9011_v23 = vsel %vm22666_vm1, %v9001_v55, %v9010_v48  ;;  %v10872_v61 = vrot.slane %v10870_v58, 1  ;;  %vm22681_vm1 = vmmov %vm22671_vm0 }
 0x4ee   : > { %v16614_v20 = vpop.f32.mrf.mxu0  ;;  %v16511_v62 = vpop.f32.mrf.mxu1 }
 0x4ef   : > { %8605 = vst [vmem:[#allocation4 + $0xa0] sm:$0xff] %v8564_v54 }
 0x4f0   : > { %v8486_v49 = vpop.f32.mrf.mxu0  ;;  %v7927_v7 = vpop.f32.mrf.mxu1  ;;  %16725 = vmatmul.mubr.bf16.gmra.mxu1 %v8993_v22 }
 0x4f1   : > { %v8565_v44 = vadd.f32 %v8483_v17, %v7927_v7  ;;  %16728 = vmatprep.mubr.msk.bf16.mxu1 %vm22360_vm12, %v22291_v1  ;;  %v10863_v17 = vshrl.u32 %v17827_v43, 16 }
 0x4f2   : > { %v16615_v11 = vpop.f32.mrf.mxu0  ;;  %v16514_v10 = vpop.f32.mrf.mxu1 }
 0x4f3   : > { %8606 = vst [vmem:[#allocation4 + $0x68] sm:$0xff] %v8565_v44  ;;  %v10868_v54 = vor.u32 %v10867_v12, %v10863_v17  ;;  %v17829_v44 = vld [vmem:[#allocation3 + $0x10] sm:$0xff]   ;;  %v10874_v11 = vshrl.u32 %v17828_v33, 16  ;;  %v10880_v10 = vrot.slane %v10878_v14, 1 }
 0x4f4   : > { %v8491_v41 = vpop.f32.mrf.mxu0  ;;  %16829 = vmatmul.mubr.bf16.gmra.mxu0 %v9746_v3  ;;  %v7930_v47 = vpop.f32.mrf.mxu1  ;;  %v21257_v3 = vld [vmem:[#allocation3 + $0x28] sm:$0xff]  }
 0x4f5   : > { %16832 = vmatprep.mubr.msk.bf16.mxu0 %vm22360_vm12, %v22291_v1  ;;  %v8566_v40 = vadd.f32 %v8486_v49, %v7930_v47  ;;  %v10873_v38 = vsel %vm22667_vm4, %v10868_v54, %v10872_v61  ;;  %vm22682_vm4 = vmmov %vm22671_vm0 }
 0x4f6   : > { %v16618_v31 = vpop.f32.mrf.mxu0  ;;  %v16515_v45 = vpop.f32.mrf.mxu1 }
 0x4f7   : > { %8607 = vst [vmem:[#allocation4 + $0x130] sm:$0xff] %v8566_v40  ;;  %v10886_v31 = vshll.u32 %v21257_v3, 16 }
 0x4f8   : > { %v8494_v57 = vpop.f32.mrf.mxu0  ;;  %v7935_v35 = vpop.f32.mrf.mxu1  ;;  %16729 = vmatmul.mubr.bf16.gmra.mxu1 %v9002_v53 }
 0x4f9   : > { %v8567_v36 = vadd.f32 %v8491_v41, %v7935_v35  ;;  %16732 = vmatprep.mubr.msk.bf16.mxu1 %vm22360_vm12, %v22291_v1  ;;  %v10876_v41 = vor.u32 %v10874_v11, %v10872_v61  ;;  %v17832_v35 = vld [vmem:[#allocation3 + $0x18] sm:$0xff]  }
 0x4fa   : > { %v16619_v27 = vpop.f32.mrf.mxu0  ;;  %v16518_v28 = vpop.f32.mrf.mxu1  ;;  %v17879_v11 = vld [vmem:[%s22280_s3 + $0x1d8] sm:$0xff]  }
 0x4fb   : > { %8608 = vst [vmem:[#allocation4 + $0x50] sm:$0xff] %v8567_v36  ;;  %v10881_v40 = vsel %vm22668_vm5, %v10876_v41, %v10880_v10  ;;  %v10882_v36 = vshrl.u32 %v17831_v39, 16  ;;  %v10888_v27 = vrot.slane %v10886_v31, 1  ;;  %v21272_v28 = vld [vmem:[#allocation3 + $0x30] sm:$0xff]   ;;  %vm22683_vm5 = vmmov %vm22671_vm0 }
 0x4fc   : > { %v8499_v21 = vpop.f32.mrf.mxu0  ;;  %16833 = vmatmul.mubr.bf16.gmra.mxu0 %v9755_v2  ;;  %v7938_v50 = vpop.f32.mrf.mxu1 }
 0x4fd   : > { %16836 = vmatprep.mubr.msk.bf16.mxu0 %vm22360_vm12, %v22291_v1  ;;  %v8568_v56 = vadd.f32 %v8494_v57, %v7938_v50  ;;  %v10884_v50 = vor.u32 %v10882_v36, %v10880_v10  ;;  %v17839_v36 = vld [vmem:[#allocation3 + $0x30] sm:$0xff]  }
 0x4fe   : > { %v16622_v32 = vpop.f32.mrf.mxu0  ;;  %v16519_v42 = vpop.f32.mrf.mxu1 }
 0x4ff   : > { %8609 = vst [vmem:[#allocation4 + $0xe8] sm:$0xff] %v8568_v56  ;;  %v17849_v32 = vld [vmem:[%s22280_s3 + $0x1a0] sm:$0xff]   ;;  %v10889_v33 = vsel %vm22669_vm7, %v10884_v50, %v10888_v27  ;;  %v8621_v50 = vld [vmem:[#allocation4 + $0x10] sm:$0xff]  ;;  %vm22684_vm7 = vmmov %vm22671_vm0 }
 0x500   : > { %v8502_v63 = vpop.f32.mrf.mxu0  ;;  %v7943_v9 = vpop.f32.mrf.mxu1  ;;  %16733 = vmatmul.mubr.bf16.gmra.mxu1 %v9011_v23 }
 0x501   : > { %v8569_v51 = vadd.f32 %v8499_v21, %v7943_v9  ;;  %16736 = vmatprep.mubr.msk.bf16.mxu1 %vm22360_vm12, %v22291_v1  ;;  %v17870_v21 = vld [vmem:[%s22280_s3 + $0x1f8] sm:$0xff]   ;;  %v17872_v9 = vld [vmem:[%s22280_s3 + $0x1f0] sm:$0xff]  }
 0x502   : > { %v16623_v37 = vpop.f32.mrf.mxu0  ;;  %v16522_v15 = vpop.f32.mrf.mxu1 }
 0x503   : > { %8610 = vst [vmem:[#allocation4] sm:$0xff] %v8569_v51  ;;  %v17855_v15 = vld [vmem:[%s22280_s3 + $0x198] sm:$0xff]  }
 0x504   : > { %v8507_v59 = vpop.f32.mrf.mxu0  ;;  %16837 = vmatmul.mubr.bf16.gmra.mxu0 %v9754_v52  ;;  %v7946_v60 = vpop.f32.mrf.mxu1 }
 0x505   : > { %16956 = vmatprep.mubr.msk.bf16.mxu0 %vm22360_vm12, %v22291_v1  ;;  %v8570_v30 = vadd.f32 %v8502_v63, %v7946_v60  ;;  %v10894_v63 = vshll.u32 %v21272_v28, 16  ;;  %v10890_v60 = vshrl.u32 %v21257_v3, 16  ;;  %v8619_v3 = vld [vmem:[#allocation4 + $0xb0] sm:$0xff] }
 0x506   : > { %v16626_v18 = vpop.f32.mrf.mxu0  ;;  %v16523_v13 = vpop.f32.mrf.mxu1 }
 0x507   : > { %8611 = vst [vmem:[#allocation4 + $0x40] sm:$0xff] %v8570_v30  ;;  %v10896_v12 = vrot.slane %v10894_v63, 1  ;;  %v21296_v30 = vld [vmem:[#allocation3 + $0x38] sm:$0xff]   ;;  %v17874_v13 = vld [vmem:[%s22280_s3 + $0x1e8] sm:$0xff]   ;;  %v10892_v61 = vor.u32 %v10890_v60, %v10888_v27 }
 0x508   : > { %v8510_v6 = vpop.f32.mrf.mxu0  ;;  %v7951_v46 = vpop.f32.mrf.mxu1  ;;  %16737 = vmatmul.mubr.bf16.gmra.mxu1 %v9010_v48  ;;  %v10906_v27 = vshrl.u32 %v21296_v30, 16  ;;  %v17841_v60 = vld [vmem:[#allocation3 + $0x38] sm:$0xff]  }
 0x509   : > { %v8571_v20 = vadd.f32 %v8507_v59, %v7951_v46  ;;  %16856 = vmatprep.mubr.msk.bf16.mxu1 %vm22360_vm12, %v22291_v1  ;;  %v17834_v59 = vld [vmem:[#allocation3 + $0x20] sm:$0xff]   ;;  %v10897_v54 = vsel %vm22670_vm6, %v10892_v61, %v10896_v12  ;;  %vm22685_vm6 = vmmov %vm22671_vm0 }
 0x50a   : > { %v16627_v62 = vpop.f32.mrf.mxu0  ;;  %v16526_v19 = vpop.f32.mrf.mxu1 }
 0x50b   : > { %8612 = vst [vmem:[#allocation4 + $0x78] sm:$0xff] %v8571_v20  ;;  %v10902_v20 = vshll.u32 %v21296_v30, 16  ;;  %v17876_v19 = vld [vmem:[%s22280_s3 + $0x1e0] sm:$0xff]  }
 0x50c   : > { %v8515_v49 = vpop.f32.mrf.mxu0  ;;  %16957 = vmatmul.mubr.bf16.vlgmr.msra.gmra.mxu0 %v10873_v38  ;;  %v7954_v22 = vpop.f32.mrf.mxu1 }
 0x50d   : > { %16960 = vmatprep.mubr.msk.bf16.mxu0 %vm22360_vm12, %v22291_v1  ;;  %v8572_v29 = vadd.f32 %v8510_v6, %v7954_v22  ;;  %17141 = vmatpush3.bf16.msra.mxu0 %v17870_v21  ;;  %v17861_v6 = vld [vmem:[%s22280_s3 + $0x190] sm:$0xff]  }
 0x50e   : > { %v16630_v5 = vpop.f32.mrf.mxu0  ;;  %v16527_v7 = vpop.f32.mrf.mxu1  ;;  %17142 = vmatprep.subr.bf16.mxu0 %v22291_v1 }
 0x50f   : > { %8613 = vst [vmem:[#allocation4 + $0x30] sm:$0xff] %v8572_v29  ;;  %v17837_v29 = vld [vmem:[#allocation3 + $0x28] sm:$0xff]   ;;  %v10898_v5 = vshrl.u32 %v21272_v28, 16  ;;  %v21323_v7 = vld [vmem:[#allocation3 + $0x40] sm:$0xff]  }
 0x510   : > { %v8518_v26 = vpop.f32.mrf.mxu0  ;;  %v7959_v16 = vpop.f32.mrf.mxu1  ;;  %16857 = vmatmul.mubr.bf16.vlgmr.msra.gmra.mxu1 %v17829_v44  ;;  %v10910_v31 = vshll.u32 %v21323_v7, 16 }
 0x511   : > { %v8573_v55 = vadd.f32 %v8515_v49, %v7959_v16  ;;  %17041 = vmatpush3.bf16.msra.mxu1 %v17830_v34  ;;  %16860 = vmatprep.mubr.msk.bf16.mxu1 %vm22360_vm12, %v22291_v1  ;;  %v17867_v49 = vld [vmem:[%s22280_s3 + $0x188] sm:$0xff]   ;;  %v10904_v34 = vrot.slane %v10902_v20, 1  ;;  %v10900_v16 = vor.u32 %v10898_v5, %v10896_v12  ;;  %v10914_v12 = vshrl.u32 %v21323_v7, 16 }
 0x512   : > { %v16631_v4 = vpop.f32.mrf.mxu0  ;;  %v16530_v47 = vpop.f32.mrf.mxu1  ;;  %17042 = vmatprep.subr.bf16.mxu1 %v22291_v1  ;;  %17143 = vmatpush3.bf16.msra.mxu0 %v17872_v9  ;;  %v10912_v28 = vrot.slane %v10910_v31, 1 }
 0x513   : > { %8614 = vst [vmem:[#allocation4 + $0xb8] sm:$0xff] %v8573_v55  ;;  %17144 = vmatprep.subr.bf16.mxu0 %v22291_v1 }
 0x514   : > { %v8523_v45 = vpop.f32.mrf.mxu0  ;;  %16961 = vmatmul.mubr.bf16.gmra.mxu0 %v10881_v40  ;;  %v7962_v52 = vpop.f32.mrf.mxu1  ;;  %v10905_v40 = vsel %vm22671_vm0, %v10900_v16, %v10904_v34 }
 0x515   : > { %16964 = vmatprep.mubr.msk.bf16.mxu0 %vm22360_vm12, %v22291_v1  ;;  %v8574_v57 = vadd.f32 %v8518_v26, %v7962_v52  ;;  %17043 = vmatpush3.bf16.msra.mxu1 %v17836_v25  ;;  %v17878_v25 = vld [vmem:[%s22280_s3 + $0x180] sm:$0xff]   ;;  %v17881_v52 = vld [vmem:[%s22280_s3 + $0x1d0] sm:$0xff]  }
 0x516   : > { %v16634_v53 = vpop.f32.mrf.mxu0  ;;  %v16531_v24 = vpop.f32.mrf.mxu1  ;;  %17044 = vmatprep.subr.bf16.mxu1 %v22291_v1  ;;  %17145 = vmatpush3.bf16.msra.mxu0 %v17874_v13 }
 0x517   : > { %8615 = vst [vmem:[#allocation4 + $0x60] sm:$0xff] %v8574_v57  ;;  %17146 = vmatprep.subr.bf16.mxu0 %v22291_v1  ;;  %v8620_v57 = vld [vmem:[#allocation4 + $0xd0] sm:$0xff] }
 0x518   : > { %v8526_v2 = vpop.f32.mrf.mxu0  ;;  %v7967_v48 = vpop.f32.mrf.mxu1  ;;  %16861 = vmatmul.mubr.bf16.gmra.mxu1 %v17832_v35 }
 0x519   : > { %v8575_v43 = vadd.f32 %v8523_v45, %v7967_v48  ;;  %16864 = vmatprep.mubr.msk.bf16.mxu1 %vm22360_vm12, %v22291_v1  ;;  %17045 = vmatpush3.bf16.msra.mxu1 %v17842_v0  ;;  %v17882_v48 = vld [vmem:[%s22280_s3 + $0x1c8] sm:$0xff]  }
 0x51a   : > { %v16635_v56 = vpop.f32.mrf.mxu0  ;;  %v16534_v42 = vpop.f32.mrf.mxu1  ;;  %17046 = vmatprep.subr.bf16.mxu1 %v22291_v1  ;;  %17147 = vmatpush3.bf16.msra.mxu0 %v17876_v19 }
 0x51b   : > { %8616 = vst [vmem:[#allocation4 + $0x28] sm:$0xff] %v8575_v43  ;;  %17148 = vmatprep.subr.bf16.mxu0 %v22291_v1  ;;  %v10908_v56 = vor.u32 %v10906_v27, %v10904_v34  ;;  %v17844_v34 = vld [vmem:[#allocation3 + $0x40] sm:$0xff]  }
 0x51c   : > { %v8531_v23 = vpop.f32.mrf.mxu0  ;;  %16965 = vmatmul.mubr.bf16.gmra.mxu0 %v10889_v33  ;;  %v7970_v8 = vpop.f32.mrf.mxu1 }
 0x51d   : > { %16968 = vmatprep.mubr.msk.bf16.mxu0 %vm22360_vm12, %v22291_v1  ;;  %v8576_v51 = vadd.f32 %v8526_v2, %v7970_v8  ;;  %17047 = vmatpush3.bf16.msra.mxu1 %v17849_v32  ;;  %v21349_v2 = vld [vmem:[#allocation3 + $0x48] sm:$0xff]   ;;  %v10913_v63 = vsel %vm22672_vm3, %v10908_v56, %v10912_v28  ;;  %vm22686_vm3 = vcmask 1046528  }
 0x51e   : > { %v16638_v37 = vpop.f32.mrf.mxu0  ;;  %v16535_v58 = vpop.f32.mrf.mxu1  ;;  %17048 = vmatprep.subr.bf16.mxu1 %v22291_v1  ;;  %17149 = vmatpush3.bf16.msra.mxu0 %v17879_v11  ;;  %v17884_v8 = vld [vmem:[%s22280_s3 + $0x1c0] sm:$0xff]   ;;  %v10922_v7 = vshrl.u32 %v21349_v2, 16 }
 0x51f   : > { %8617 = vst [vmem:[#allocation4 + $0x140] sm:$0xff] %v8576_v51  ;;  %17150 = vmatprep.subr.bf16.mxu0 %v22291_v1  ;;  %v8622_v51 = vld [vmem:[#allocation4 + $0x48] sm:$0xff] }
 0x520   : > { %v8534_v18 = vpop.f32.mrf.mxu0  ;;  %v7975_v17 = vpop.f32.mrf.mxu1  ;;  %16865 = vmatmul.mubr.bf16.gmra.mxu1 %v17834_v59 }
 0x521   : > { %8021 = vst [vmem:[#allocation4 + $0x58] sm:$0xf] %v7975_v17  ;;  %16868 = vmatprep.mubr.msk.bf16.mxu1 %vm22360_vm12, %v22291_v1  ;;  %17049 = vmatpush3.bf16.msra.mxu1 %v17855_v15  ;;  %v17845_v18 = vld [vmem:[#allocation3 + $0x50] sm:$0xff]   ;;  %v8623_v17 = vld [vmem:[#allocation4 + $0x120] sm:$0xff] }
 0x522   : > { %v16639_v39 = vpop.f32.mrf.mxu0  ;;  %v16538_v46 = vpop.f32.mrf.mxu1  ;;  %17050 = vmatprep.subr.bf16.mxu1 %v22291_v1  ;;  %17151 = vmatpush3.bf16.msra.mxu0 %v17881_v52  ;;  %v10926_v19 = vshll.u32 %v17845_v18, 16  ;;  %v8626_v52 = vld [vmem:[#allocation4 + $0x100] sm:$0xff] }
 0x523   : > { %17152 = vmatprep.subr.bf16.mxu0 %v22291_v1  ;;  %v10916_v39 = vor.u32 %v10914_v12, %v10912_v28  ;;  %v17850_v28 = vld [vmem:[#allocation3 + $0x60] sm:$0xff]  }
 0x524   : > { %v21311_v62 = vpop.f32.mrf.mxu0  ;;  %16969 = vmatmul.mubr.bf16.gmra.mxu0 %v10897_v54  ;;  %v7978_v38 = vpop.f32.mrf.mxu1  ;;  %v10928_v11 = vrot.slane %v10926_v19, 1 }
 0x525   : > { %16972 = vmatprep.mubr.msk.bf16.mxu0 %vm22360_vm12, %v22291_v1  ;;  %17051 = vmatpush3.bf16.msra.mxu1 %v17861_v6 }
 0x526   : > { %v16758_v14 = vpop.f32.mrf.mxu0  ;;  %v16539_v22 = vpop.f32.mrf.mxu1  ;;  %17052 = vmatprep.subr.bf16.mxu1 %v22291_v1  ;;  %17153 = vmatpush3.bf16.msra.mxu0 %v17882_v48  ;;  %v8627_v48 = vld [vmem:[#allocation4 + $0x80] sm:$0xff] }
 0x527   : > { %17154 = vmatprep.subr.bf16.mxu0 %v22291_v1  ;;  %v8624_v14 = vld [vmem:[#allocation4 + $0x38] sm:$0xff] }
 0x528   : > { %v21326_v44 = vpop.f32.mrf.mxu0  ;;  %v8062_v10 = vld [vmem:[#allocation4 + $0x58] sm:$0xf]  ;;  %v9115_v26 = vpop.f32.mrf.mxu1  ;;  %16869 = vmatmul.mubr.bf16.gmra.mxu1 %v17837_v29 }
 0x529   : > { %v8577_v41 = vadd.f32 %v8531_v23, %v8062_v10  ;;  %v9281_v55 = vadd.f32 %v9115_v26, %v8619_v3  ;;  %16872 = vmatprep.mubr.msk.bf16.mxu1 %vm22360_vm12, %v22291_v1  ;;  %17053 = vmatpush3.bf16.msra.mxu1 %v17867_v49  ;;  %v10918_v23 = vshll.u32 %v21349_v2, 16  ;;  %v17847_v10 = vld [vmem:[#allocation3 + $0x58] sm:$0xff]  }
 0x52a   : > { %v16759_v4 = vpop.f32.mrf.mxu0  ;;  %v16658_v47 = vpop.f32.mrf.mxu1  ;;  %17054 = vmatprep.subr.bf16.mxu1 %v22291_v1  ;;  %17155 = vmatpush3.bf16.msra.mxu0 %v17884_v8  ;;  %v8625_v26 = vld [vmem:[#allocation4 + $0xf8] sm:$0xff]  ;;  %v8628_v8 = vld [vmem:[#allocation4 + $0x108] sm:$0xff] }
 0x52b   : > { %8618 = vst [vmem:[#allocation4 + $0x58] sm:$0xf] %v8577_v41  ;;  %9322 = vst [vmem:[#allocation4 + $0xb0] sm:$0xff] %v9281_v55  ;;  %v10920_v30 = vrot.slane %v10918_v23, 1 }
 0x52c   : > { %v21340_v45 = vpop.f32.mrf.mxu0  ;;  %16973 = vmatmul.mubr.bf16.gmra.mxu0 %v10905_v40  ;;  %v9118_v53 = vpop.f32.mrf.mxu1  ;;  %v10934_v40 = vshll.u32 %v17847_v10, 16 }
 0x52d   : > { %16976 = vmatprep.mubr.msk.bf16.mxu0 %vm22360_vm12, %v22291_v1  ;;  %v9282_v0 = vadd.f32 %v9118_v53, %v8620_v57  ;;  %17055 = vmatpush3.bf16.msra.mxu1 %v17878_v25  ;;  %v10921_v20 = vsel %vm22673_vm8, %v10916_v39, %v10920_v30  ;;  %v10924_v41 = vor.u32 %v10922_v7, %v10920_v30  ;;  %v17852_v30 = vld [vmem:[#allocation3 + $0x68] sm:$0xff]   ;;  %v17851_v7 = vld [vmem:[#allocation3 + $0x58] sm:$0xff]   ;;  %vm22687_vm8 = vmmov %vm22671_vm0 }
 0x52e   : > { %v16762_v24 = vpop.f32.mrf.mxu0  ;;  %v16659_v35 = vpop.f32.mrf.mxu1  ;;  %17240 = vmatprep.subr.bf16.mxu1 %v22291_v1  ;;  %v10936_v27 = vrot.slane %v10934_v40, 1  ;;  %v10950_v19 = vshll.u32 %v17852_v30, 16 }
 0x52f   : > { %9323 = vst [vmem:[#allocation4 + $0xd0] sm:$0xff] %v9282_v0  ;;  %v10929_v47 = vsel %vm22674_vm10, %v10924_v41, %v10928_v11  ;;  %v17846_v35 = vld [vmem:[#allocation3 + $0x48] sm:$0xff]   ;;  %v8631_v41 = vld [vmem:[#allocation4 + $0x18] sm:$0xff]  ;;  %vm22688_vm10 = vmmov %vm22686_vm3 }
 0x530   : > { %v21352_v21 = vpop.f32.mrf.mxu0  ;;  %v9123_v43 = vpop.f32.mrf.mxu1  ;;  %16873 = vmatmul.mubr.bf16.gmra.mxu1 %v17839_v36  ;;  %v10930_v36 = vshrl.u32 %v17845_v18, 16 }
 0x531   : > { %v9283_v32 = vadd.f32 %v9123_v43, %v8621_v50  ;;  %16876 = vmatprep.mubr.msk.bf16.mxu1 %vm22360_vm12, %v22291_v1 }
 0x532   : > { %v16763_v42 = vpop.f32.mrf.mxu0  ;;  %v16662_v33 = vpop.f32.mrf.mxu1  ;;  %v10932_v43 = vor.u32 %v10930_v36, %v10928_v11  ;;  %v10946_v11 = vshrl.u32 %v17850_v28, 16 }
 0x533   : > { %9324 = vst [vmem:[#allocation4 + $0x10] sm:$0xff] %v9283_v32 }
 0x534   : > { %v21362_v9 = vpop.f32.mrf.mxu0  ;;  %16977 = vmatmul.mubr.bf16.gmra.mxu0 %v10913_v63  ;;  %v9126_v37 = vpop.f32.mrf.mxu1  ;;  %v10937_v33 = vsel %vm22675_vm2, %v10932_v43, %v10936_v27  ;;  %v10942_v63 = vshll.u32 %v17850_v28, 16  ;;  %v17853_v28 = vld [vmem:[#allocation3 + $0x60] sm:$0xff]   ;;  %v17857_v43 = vld [vmem:[#allocation3 + $0x78] sm:$0xff]   ;;  %vm22689_vm2 = vmmov %vm22671_vm0 }
 0x535   : > { %16980 = vmatprep.mubr.msk.bf16.mxu0 %vm22360_vm12, %v22291_v1  ;;  %v9284_v15 = vadd.f32 %v9126_v37, %v8622_v51 }
 0x536   : > { %v16766_v58 = vpop.f32.mrf.mxu0  ;;  %v16663_v59 = vpop.f32.mrf.mxu1  ;;  %v10944_v12 = vrot.slane %v10942_v63, 1 }
 0x537   : > { %9325 = vst [vmem:[#allocation4 + $0x48] sm:$0xff] %v9284_v15  ;;  %v17848_v59 = vld [vmem:[#allocation3 + $0x50] sm:$0xff]  }
 0x538   : > { %v21371_v13 = vpop.f32.mrf.mxu0  ;;  %v9131_v61 = vpop.f32.mrf.mxu1  ;;  %16877 = vmatmul.mubr.bf16.gmra.mxu1 %v17841_v60  ;;  %v10938_v60 = vshrl.u32 %v17847_v10, 16  ;;  %v10952_v10 = vrot.slane %v10950_v19, 1 }
 0x539   : > { %v9285_v6 = vadd.f32 %v9131_v61, %v8623_v17  ;;  %16880 = vmatprep.mubr.msk.bf16.mxu1 %vm22360_vm12, %v22291_v1  ;;  %v8629_v17 = vld [vmem:[#allocation4 + $0x138] sm:$0xff] }
 0x53a   : > { %v16767_v46 = vpop.f32.mrf.mxu0  ;;  %v16666_v54 = vpop.f32.mrf.mxu1  ;;  %v10940_v39 = vor.u32 %v10938_v60, %v10936_v27 }
 0x53b   : > { %9326 = vst [vmem:[#allocation4 + $0x120] sm:$0xff] %v9285_v6 }
 0x53c   : > { %v21376_v38 = vpop.f32.mrf.mxu0  ;;  %16981 = vmatmul.mubr.bf16.gmra.mxu0 %v10921_v20  ;;  %v9134_v49 = vpop.f32.mrf.mxu1  ;;  %v10945_v20 = vsel %vm22676_vm15, %v10940_v39, %v10944_v12  ;;  %vm22690_vm15 = vmmov %vm22686_vm3 }
 0x53d   : > { %16984 = vmatprep.mubr.msk.bf16.mxu0 %vm22360_vm12, %v22291_v1  ;;  %v9286_v22 = vadd.f32 %v9134_v49, %v8624_v14  ;;  %v8630_v49 = vld [vmem:[#allocation4 + $0xf0] sm:$0xff] }
 0x53e   : > { %v16770_v29 = vpop.f32.mrf.mxu0  ;;  %v16667_v5 = vpop.f32.mrf.mxu1 }
 0x53f   : > { %9327 = vst [vmem:[#allocation4 + $0x38] sm:$0xff] %v9286_v22 }
 0x540   : > { %v21381_v3 = vpop.f32.mrf.mxu0  ;;  %v9139_v16 = vpop.f32.mrf.mxu1  ;;  %16881 = vmatmul.mubr.bf16.gmra.mxu1 %v17844_v34 }
 0x541   : > { %v9287_v55 = vadd.f32 %v9139_v16, %v8625_v26  ;;  %16884 = vmatprep.mubr.msk.bf16.mxu1 %vm22360_vm12, %v22291_v1  ;;  %v17854_v26 = vld [vmem:[#allocation3 + $0x70] sm:$0xff]  }
 0x542   : > { %v16771_v4 = vpop.f32.mrf.mxu0  ;;  %v16670_v25 = vpop.f32.mrf.mxu1  ;;  %v10962_v39 = vshrl.u32 %v17854_v26, 16 }
 0x543   : > { %9328 = vst [vmem:[#allocation4 + $0xf8] sm:$0xff] %v9287_v55  ;;  %v10948_v4 = vor.u32 %v10946_v11, %v10944_v12 }
 0x544   : > { %v21386_v31 = vpop.f32.mrf.mxu0  ;;  %16985 = vmatmul.mubr.bf16.gmra.mxu0 %v10929_v47  ;;  %v9142_v57 = vpop.f32.mrf.mxu1 }
 0x545   : > { %16988 = vmatprep.mubr.msk.bf16.mxu0 %vm22360_vm12, %v22291_v1  ;;  %v9288_v53 = vadd.f32 %v9142_v57, %v8626_v52  ;;  %v10953_v52 = vsel %vm22677_vm14, %v10948_v4, %v10952_v10  ;;  %v10958_v57 = vshll.u32 %v17854_v26, 16  ;;  %vm22691_vm14 = vmmov %vm22671_vm0 }
 0x546   : > { %v16774_v0 = vpop.f32.mrf.mxu0  ;;  %v16671_v24 = vpop.f32.mrf.mxu1 }
 0x547   : > { %9329 = vst [vmem:[#allocation4 + $0x100] sm:$0xff] %v9288_v53  ;;  %v8632_v0 = vld [vmem:[#allocation4 + $0xc8] sm:$0xff] }
 0x548   : > { %v21390_v2 = vpop.f32.mrf.mxu0  ;;  %v9147_v50 = vpop.f32.mrf.mxu1  ;;  %16885 = vmatmul.mubr.bf16.gmra.mxu1 %v17846_v35 }
 0x549   : > { %v9289_v56 = vadd.f32 %v9147_v50, %v8627_v48  ;;  %16888 = vmatprep.mubr.msk.bf16.mxu1 %vm22360_vm12, %v22291_v1  ;;  %v10954_v48 = vshrl.u32 %v17852_v30, 16  ;;  %v10960_v50 = vrot.slane %v10958_v57, 1 }
 0x54a   : > { %v16775_v32 = vpop.f32.mrf.mxu0  ;;  %v16674_v42 = vpop.f32.mrf.mxu1 }
 0x54b   : > { %9330 = vst [vmem:[#allocation4 + $0x80] sm:$0xff] %v9289_v56  ;;  %v8633_v32 = vld [vmem:[#allocation4 + $0x70] sm:$0xff] }
 0x54c   : > { %v21395_v23 = vpop.f32.mrf.mxu0  ;;  %16989 = vmatmul.mubr.bf16.gmra.mxu0 %v10937_v33  ;;  %v9150_v51 = vpop.f32.mrf.mxu1  ;;  %v10956_v33 = vor.u32 %v10954_v48, %v10952_v10  ;;  %v8636_v10 = vld [vmem:[#allocation4 + $0x110] sm:$0xff] }
 0x54d   : > { %16992 = vmatprep.mubr.msk.bf16.mxu0 %vm22360_vm12, %v22291_v1  ;;  %v9290_v37 = vadd.f32 %v9150_v51, %v8628_v8 }
 0x54e   : > { %v16778_v15 = vpop.f32.mrf.mxu0  ;;  %v16675_v58 = vpop.f32.mrf.mxu1 }
 0x54f   : > { %9331 = vst [vmem:[#allocation4 + $0x108] sm:$0xff] %v9290_v37  ;;  %v10961_v37 = vsel %vm22678_vm9, %v10956_v33, %v10960_v50  ;;  %v10966_v15 = vshll.u32 %v17857_v43, 16  ;;  %vm22692_vm9 = vmmov %vm22686_vm3 }
 0x550   : > { %v21399_v18 = vpop.f32.mrf.mxu0  ;;  %v9155_v61 = vpop.f32.mrf.mxu1  ;;  %16889 = vmatmul.mubr.bf16.gmra.mxu1 %v17848_v59  ;;  %v8634_v59 = vld [vmem:[#allocation4 + $0x20] sm:$0xff] }
 0x551   : > { %v9291_v6 = vadd.f32 %v9155_v61, %v8629_v17  ;;  %16892 = vmatprep.mubr.msk.bf16.mxu1 %vm22360_vm12, %v22291_v1  ;;  %v17856_v61 = vld [vmem:[#allocation3 + $0x68] sm:$0xff]  }
 0x552   : > { %v16779_v46 = vpop.f32.mrf.mxu0  ;;  %v16678_v54 = vpop.f32.mrf.mxu1 }
 0x553   : > { %9332 = vst [vmem:[#allocation4 + $0x138] sm:$0xff] %v9291_v6  ;;  %v10968_v6 = vrot.slane %v10966_v15, 1  ;;  %v17859_v46 = vld [vmem:[#allocation3 + $0x80] sm:$0xff]  }
 0x554   : > { %v21404_v14 = vpop.f32.mrf.mxu0  ;;  %16993 = vmatmul.mubr.bf16.gmra.mxu0 %v10945_v20  ;;  %v9158_v22 = vpop.f32.mrf.mxu1  ;;  %v8635_v20 = vld [vmem:[#allocation4 + $0x128] sm:$0xff] }
 0x555   : > { %16996 = vmatprep.mubr.msk.bf16.mxu0 %vm22360_vm12, %v22291_v1  ;;  %v9292_v29 = vadd.f32 %v9158_v22, %v8630_v49  ;;  %v10964_v49 = vor.u32 %v10962_v39, %v10960_v50 }
 0x556   : > { %v16782_v5 = vpop.f32.mrf.mxu0  ;;  %v16679_v34 = vpop.f32.mrf.mxu1 }
 0x557   : > { %9333 = vst [vmem:[#allocation4 + $0xf0] sm:$0xff] %v9292_v29  ;;  %v10969_v34 = vsel %vm22679_vm11, %v10964_v49, %v10968_v6  ;;  %v8640_v49 = vld [vmem:[#allocation4 + $0x90] sm:$0xff]  ;;  %vm22694_vm11 = vmmov %vm22671_vm0 }
 0x558   : > { %v21408_v16 = vpop.f32.mrf.mxu0  ;;  %v9163_v55 = vpop.f32.mrf.mxu1  ;;  %16893 = vmatmul.mubr.bf16.gmra.mxu1 %v17851_v7  ;;  %v10974_v7 = vshll.u32 %v17859_v46, 16 }
 0x559   : > { %v9293_v25 = vadd.f32 %v9163_v55, %v8631_v41  ;;  %16896 = vmatprep.mubr.msk.bf16.mxu1 %vm22360_vm12, %v22291_v1 }
 0x55a   : > { %v16783_v47 = vpop.f32.mrf.mxu0  ;;  %v16682_v40 = vpop.f32.mrf.mxu1 }
 0x55b   : > { %9334 = vst [vmem:[#allocation4 + $0x18] sm:$0xff] %v9293_v25  ;;  %v17858_v25 = vld [vmem:[#allocation3 + $0x70] sm:$0xff]   ;;  %v10970_v47 = vshrl.u32 %v17857_v43, 16  ;;  %v10976_v40 = vrot.slane %v10974_v7, 1  ;;  %v17863_v7 = vld [vmem:[#allocation3 + $0x80] sm:$0xff]  }
 0x55c   : > { %v21413_v53 = vpop.f32.mrf.mxu0  ;;  %16997 = vmatmul.mubr.bf16.gmra.mxu0 %v10953_v52  ;;  %v9166_v24 = vpop.f32.mrf.mxu1  ;;  %v17862_v52 = vld [vmem:[#allocation3 + $0x88] sm:$0xff]  }
 0x55d   : > { %17000 = vmatprep.mubr.msk.bf16.mxu0 %vm22360_vm12, %v22291_v1  ;;  %v9294_v35 = vadd.f32 %v9166_v24, %v8632_v0  ;;  %v8637_v0 = vld [vmem:[#allocation4 + $0x8] sm:$0xff]  ;;  %v10982_v50 = vshll.u32 %v17862_v52, 16 }
 0x55e   : > { %v16786_v36 = vpop.f32.mrf.mxu0  ;;  %v16683_v27 = vpop.f32.mrf.mxu1 }
 0x55f   : > { %9335 = vst [vmem:[#allocation4 + $0xc8] sm:$0xff] %v9294_v35  ;;  %v10972_v35 = vor.u32 %v10970_v47, %v10968_v6  ;;  %v10984_v15 = vrot.slane %v10982_v50, 1 }
 0x560   : > { %v21417_v56 = vpop.f32.mrf.mxu0  ;;  %v9171_v42 = vpop.f32.mrf.mxu1  ;;  %16897 = vmatmul.mubr.bf16.gmra.mxu1 %v17853_v28 }
 0x561   : > { %v9295_v63 = vadd.f32 %v9171_v42, %v8633_v32  ;;  %16900 = vmatprep.mubr.msk.bf16.mxu1 %vm22360_vm12, %v22291_v1  ;;  %v10977_v48 = vsel %vm22680_vm13, %v10972_v35, %v10976_v40  ;;  %v8638_v32 = vld [vmem:[#allocation4 + $0x98] sm:$0xff]  ;;  %vm22695_vm13 = vmmov %vm22686_vm3 }
 0x562   : > { %v16787_v8 = vpop.f32.mrf.mxu0  ;;  %v16686_v51 = vpop.f32.mrf.mxu1 }
 0x563   : > { %9336 = vst [vmem:[#allocation4 + $0x70] sm:$0xff] %v9295_v63  ;;  %v17860_v51 = vld [vmem:[#allocation3 + $0x78] sm:$0xff]  }
 0x564   : > { %v21422_v58 = vpop.f32.mrf.mxu0  ;;  %17001 = vmatmul.mubr.bf16.gmra.mxu0 %v10961_v37  ;;  %v9174_v60 = vpop.f32.mrf.mxu1  ;;  %v10978_v37 = vshrl.u32 %v17859_v46, 16 }
 0x565   : > { %17004 = vmatprep.mubr.msk.bf16.mxu0 %vm22360_vm12, %v22291_v1  ;;  %v9296_v12 = vadd.f32 %v9174_v60, %v8634_v59  ;;  %v17864_v59 = vld [vmem:[#allocation3 + $0x90] sm:$0xff]  }
 0x566   : > { %v16790_v30 = vpop.f32.mrf.mxu0  ;;  %v16687_v17 = vpop.f32.mrf.mxu1 }
 0x567   : > { %9337 = vst [vmem:[#allocation4 + $0x20] sm:$0xff] %v9296_v12  ;;  %v8639_v12 = vld [vmem:[#allocation4 + $0xa8] sm:$0xff]  ;;  %v10980_v17 = vor.u32 %v10978_v37, %v10976_v40  ;;  %v8643_v37 = vld [vmem:[#allocation4 + $0xc0] sm:$0xff] }
 0x568   : > { %v21426_v54 = vpop.f32.mrf.mxu0  ;;  %v9179_v19 = vpop.f32.mrf.mxu1  ;;  %16901 = vmatmul.mubr.bf16.gmra.mxu1 %v17856_v61 }
 0x569   : > { %v9297_v22 = vadd.f32 %v9179_v19, %v8635_v20  ;;  %16904 = vmatprep.mubr.msk.bf16.mxu1 %vm22360_vm12, %v22291_v1  ;;  %v10985_v20 = vsel %vm22681_vm1, %v10980_v17, %v10984_v15  ;;  %v10990_v19 = vshll.u32 %v17864_v59, 16  ;;  %vm22697_vm1 = vmmov %vm22671_vm0 }
 0x56a   : > { %v16791_v29 = vpop.f32.mrf.mxu0  ;;  %v16690_v5 = vpop.f32.mrf.mxu1 }
 0x56b   : > { %9338 = vst [vmem:[#allocation4 + $0x128] sm:$0xff] %v9297_v22 }
 0x56c   : > { %v21431_v11 = vpop.f32.mrf.mxu0  ;;  %17005 = vmatmul.mubr.bf16.gmra.mxu0 %v10969_v34  ;;  %v9182_v26 = vpop.f32.mrf.mxu1 }
 0x56d   : > { %17008 = vmatprep.mubr.msk.bf16.mxu0 %vm22360_vm12, %v22291_v1  ;;  %v9298_v41 = vadd.f32 %v9182_v26, %v8636_v10  ;;  %v10986_v10 = vshrl.u32 %v17862_v52, 16  ;;  %v10992_v26 = vrot.slane %v10990_v19, 1 }
 0x56e   : > { %v16794_v55 = vpop.f32.mrf.mxu0  ;;  %v16691_v4 = vpop.f32.mrf.mxu1 }
 0x56f   : > { %9339 = vst [vmem:[#allocation4 + $0x110] sm:$0xff] %v9298_v41  ;;  %v17866_v41 = vld [vmem:[#allocation3 + $0x98] sm:$0xff]   ;;  %v10988_v47 = vor.u32 %v10986_v10, %v10984_v15  ;;  %v17873_v10 = vld [vmem:[#allocation3 + $0xa8] sm:$0xff]  }
 0x570   : > { %v21435_v57 = vpop.f32.mrf.mxu0  ;;  %v9187_v24 = vpop.f32.mrf.mxu1  ;;  %16905 = vmatmul.mubr.bf16.gmra.mxu1 %v17858_v25  ;;  %v8641_v4 = vld [vmem:[#allocation4 + $0xe0] sm:$0xff] }
 0x571   : > { %v9299_v36 = vadd.f32 %v9187_v24, %v8637_v0  ;;  %16908 = vmatprep.mubr.msk.bf16.mxu1 %vm22360_vm12, %v22291_v1  ;;  %v10993_v35 = vsel %vm22682_vm4, %v10988_v47, %v10992_v26  ;;  %vm22699_vm4 = vmmov %vm22686_vm3 }
 0x572   : > { %v16795_v27 = vpop.f32.mrf.mxu0  ;;  %v16694_v28 = vpop.f32.mrf.mxu1 }
 0x573   : > { %9340 = vst [vmem:[#allocation4 + $0x8] sm:$0xff] %v9299_v36  ;;  %v10998_v36 = vshll.u32 %v17866_v41, 16  ;;  %v8642_v27 = vld [vmem:[#allocation4 + $0x88] sm:$0xff] }
 0x574   : > { %v21440_v43 = vpop.f32.mrf.mxu0  ;;  %17009 = vmatmul.mubr.bf16.gmra.mxu0 %v10977_v48  ;;  %v9190_v42 = vpop.f32.mrf.mxu1 }
 0x575   : > { %17012 = vmatprep.mubr.msk.bf16.mxu0 %vm22360_vm12, %v22291_v1  ;;  %v9300_v33 = vadd.f32 %v9190_v42, %v8638_v32  ;;  %v17865_v42 = vld [vmem:[#allocation3 + $0x88] sm:$0xff]  }
 0x576   : > { %v16798_v63 = vpop.f32.mrf.mxu0  ;;  %v16695_v8 = vpop.f32.mrf.mxu1 }
 0x577   : > { %9341 = vst [vmem:[#allocation4 + $0x98] sm:$0xff] %v9300_v33  ;;  %v10994_v33 = vshrl.u32 %v17864_v59, 16  ;;  %v11000_v63 = vrot.slane %v10998_v36, 1  ;;  %v17869_v8 = vld [vmem:[#allocation3 + $0xa0] sm:$0xff]   ;;  %v11014_v36 = vshll.u32 %v17873_v10, 16 }
 0x578   : > { %v21444_v60 = vpop.f32.mrf.mxu0  ;;  %v9195_v30 = vpop.f32.mrf.mxu1  ;;  %16909 = vmatmul.mubr.bf16.gmra.mxu1 %v17860_v51 }
 0x579   : > { %v9301_v61 = vadd.f32 %v9195_v30, %v8639_v12  ;;  %16912 = vmatprep.mubr.msk.bf16.mxu1 %vm22360_vm12, %v22291_v1  ;;  %v10996_v12 = vor.u32 %v10994_v33, %v10992_v26  ;;  %v11010_v33 = vshrl.u32 %v17869_v8, 16 }
 0x57a   : > { %v16799_v39 = vpop.f32.mrf.mxu0  ;;  %v16698_v6 = vpop.f32.mrf.mxu1 }
 0x57b   : > { %9342 = vst [vmem:[#allocation4 + $0xa8] sm:$0xff] %v9301_v61  ;;  %v11001_v39 = vsel %vm22683_vm5, %v10996_v12, %v11000_v63  ;;  %v11006_v6 = vshll.u32 %v17869_v8, 16  ;;  %v8647_v12 = vld [vmem:[#allocation4 + $0x68] sm:$0xff]  ;;  %vm22700_vm5 = vmmov %vm22671_vm0 }
 0x57c   : > { %v21449_v46 = vpop.f32.mrf.mxu0  ;;  %17013 = vmatmul.mubr.bf16.gmra.mxu0 %v10985_v20  ;;  %v9198_v22 = vpop.f32.mrf.mxu1  ;;  %v8644_v20 = vld [vmem:[#allocation4 + $0x118] sm:$0xff] }
 0x57d   : > { %17016 = vmatprep.mubr.msk.bf16.mxu0 %vm22360_vm12, %v22291_v1  ;;  %v9302_v29 = vadd.f32 %v9198_v22, %v8640_v49 }
 0x57e   : > { %v16802_v5 = vpop.f32.mrf.mxu0  ;;  %v16699_v34 = vpop.f32.mrf.mxu1 }
 0x57f   : > { %9343 = vst [vmem:[#allocation4 + $0x90] sm:$0xff] %v9302_v29  ;;  %v17868_v5 = vld [vmem:[#allocation3 + $0x90] sm:$0xff]   ;;  %v11002_v34 = vshrl.u32 %v17866_v41, 16 }
 0x580   : > { %v21453_v55 = vpop.f32.mrf.mxu0  ;;  %v9203_v25 = vpop.f32.mrf.mxu1  ;;  %16913 = vmatmul.mubr.bf16.gmra.mxu1 %v17863_v7  ;;  %v11008_v7 = vrot.slane %v11006_v6, 1 }
 0x581   : > { %v9303_v40 = vadd.f32 %v9203_v25, %v8641_v4  ;;  %16916 = vmatprep.mubr.msk.bf16.mxu1 %vm22360_vm12, %v22291_v1  ;;  %v8645_v4 = vld [vmem:[#allocation4 + $0xd8] sm:$0xff]  ;;  %v11004_v47 = vor.u32 %v11002_v34, %v11000_v63  ;;  %v11016_v63 = vrot.slane %v11014_v36, 1 }
 0x582   : > { %v16803_v0 = vpop.f32.mrf.mxu0  ;;  %v16702_v24 = vpop.f32.mrf.mxu1 }
 0x583   : > { %9344 = vst [vmem:[#allocation4 + $0xe0] sm:$0xff] %v9303_v40 }
 0x584   : > { %v21458_v52 = vpop.f32.mrf.mxu0  ;;  %17017 = vmatmul.mubr.bf16.gmra.mxu0 %v10993_v35  ;;  %v9206_v28 = vpop.f32.mrf.mxu1  ;;  %v11009_v35 = vsel %vm22684_vm7, %v11004_v47, %v11008_v7  ;;  %vm22701_vm7 = vmmov %vm22686_vm3 }
 0x585   : > { %17020 = vmatprep.mubr.msk.bf16.mxu0 %vm22360_vm12, %v22291_v1  ;;  %v9304_v48 = vadd.f32 %v9206_v28, %v8642_v27  ;;  %v8646_v27 = vld [vmem:[#allocation4 + $0xa0] sm:$0xff] }
 0x586   : > { %v16806_v50 = vpop.f32.mrf.mxu0  ;;  %v16703_v32 = vpop.f32.mrf.mxu1 }
 0x587   : > { %9345 = vst [vmem:[#allocation4 + $0x88] sm:$0xff] %v9304_v48 }
 0x588   : > { %v21462_v51 = vpop.f32.mrf.mxu0  ;;  %v9211_v15 = vpop.f32.mrf.mxu1  ;;  %16917 = vmatmul.mubr.bf16.gmra.mxu1 %v17865_v42  ;;  %v17871_v42 = vld [vmem:[#allocation3 + $0x98] sm:$0xff]  }
 0x589   : > { %v9305_v30 = vadd.f32 %v9211_v15, %v8643_v37  ;;  %16920 = vmatprep.mubr.msk.bf16.mxu1 %vm22360_vm12, %v22291_v1  ;;  %v17877_v37 = vld [vmem:[#allocation3 + $0xb0] ss:$0 sps:$4 sm:$0x77]  }
 0x58a   : > { %v16807_v17 = vpop.f32.mrf.mxu0  ;;  %v16706_v61 = vpop.f32.mrf.mxu1 }
 0x58b   : > { %9346 = vst [vmem:[#allocation4 + $0xc0] sm:$0xff] %v9305_v30  ;;  %v11012_v17 = vor.u32 %v11010_v33, %v11008_v7  ;;  %v17875_v7 = vld [vmem:[#allocation3 + $0xa0] sm:$0xff]  }
 0x58c   : > { %v21467_v59 = vpop.f32.mrf.mxu0  ;;  %17021 = vmatmul.mubr.bf16.gmra.mxu0 %v11001_v39  ;;  %v9214_v19 = vpop.f32.mrf.mxu1 }
 0x58d   : > { %17024 = vmatprep.mubr.msk.bf16.mxu0 %vm22360_vm12, %v22291_v1  ;;  %v9306_v49 = vadd.f32 %v9214_v19, %v8644_v20  ;;  %v11017_v20 = vsel %vm22685_vm6, %v11012_v17, %v11016_v63  ;;  %v11022_v19 = vshll.u32 %v17877_v37, 16  ;;  %v8651_v17 = vld [vmem:[#allocation4] sm:$0xff]  ;;  %vm22702_vm6 = vmmov %vm22671_vm0 }
 0x58e   : > { %v16810_v22 = vpop.f32.mrf.mxu0  ;;  %v16707_v29 = vpop.f32.mrf.mxu1 }
 0x58f   : > { %9347 = vst [vmem:[#allocation4 + $0x118] sm:$0xff] %v9306_v49  ;;  %v8648_v49 = vld [vmem:[#allocation4 + $0x130] sm:$0xff] }
 0x590   : > { %v21471_v26 = vpop.f32.mrf.mxu0  ;;  %v9219_v25 = vpop.f32.mrf.mxu1  ;;  %16921 = vmatmul.mubr.bf16.gmra.mxu1 %v17868_v5 }
 0x591   : > { %v9307_v40 = vadd.f32 %v9219_v25, %v8645_v4  ;;  %16924 = vmatprep.mubr.msk.bf16.mxu1 %vm22360_vm12, %v22291_v1  ;;  %v11018_v4 = vshrl.u32 %v17873_v10, 16  ;;  %v11024_v25 = vrot.slane %v11022_v19, 1  ;;  %v8650_v10 = vld [vmem:[#allocation4 + $0xe8] sm:$0xff]  ;;  %v17887_v19 = vld [vmem:[#allocation3 + $0x18] sm:$0xff]  }
 0x592   : > { %v16811_v0 = vpop.f32.mrf.mxu0  ;;  %v16710_v24 = vpop.f32.mrf.mxu1 }
 0x593   : > { %9348 = vst [vmem:[#allocation4 + $0xd8] sm:$0xff] %v9307_v40  ;;  %v8649_v40 = vld [vmem:[#allocation4 + $0x50] sm:$0xff]  ;;  %v11020_v24 = vor.u32 %v11018_v4, %v11016_v63 }
 0x594   : > { %v21476_v41 = vpop.f32.mrf.mxu0  ;;  %17025 = vmatmul.mubr.bf16.gmra.mxu0 %v11009_v35  ;;  %v9222_v28 = vpop.f32.mrf.mxu1  ;;  %v17880_v63 = vld [vmem:[#allocation3 + $0xa8] sm:$0xff]  }
 0x595   : > { %17028 = vmatprep.mubr.msk.bf16.mxu0 %vm22360_vm12, %v22291_v1  ;;  %v9308_v48 = vadd.f32 %v9222_v28, %v8646_v27  ;;  %v11025_v28 = vsel %vm22671_vm0, %v11020_v24, %v11024_v25  ;;  %v17883_v24 = vld [vmem:[#allocation3 + $0xb0] ss:$0 sps:$4 sm:$0x33]   ;;  %vm22703_vm0 = vmmov %vm22686_vm3 }
 0x596   : > { %v16814_v50 = vpop.f32.mrf.mxu0  ;;  %v16711_v32 = vpop.f32.mrf.mxu1 }
 0x597   : > { %9349 = vst [vmem:[#allocation4 + $0xa0] sm:$0xff] %v9308_v48 }
 0x598   : > { %v21480_v15 = vpop.f32.mrf.mxu0  ;;  %v9227_v30 = vpop.f32.mrf.mxu1  ;;  %16925 = vmatmul.mubr.bf16.gmra.mxu1 %v17871_v42 }
 0x599   : > { %v9309_v61 = vadd.f32 %v9227_v30, %v8647_v12  ;;  %16928 = vmatprep.mubr.msk.bf16.mxu1 %vm22360_vm12, %v22291_v1  ;;  %v11026_v30 = vshrl.u32 %v17877_v37, 16 }
 0x59a   : > { %v16815_v39 = vpop.f32.mrf.mxu0  ;;  %v16714_v6 = vpop.f32.mrf.mxu1 }
 0x59b   : > { %9350 = vst [vmem:[#allocation4 + $0x68] sm:$0xff] %v9309_v61 }
 0x59c   : > { %v21485_v8 = vpop.f32.mrf.mxu0  ;;  %17029 = vmatmul.mubr.bf16.gmra.mxu0 %v11017_v20  ;;  %v9230_v22 = vpop.f32.mrf.mxu1  ;;  %v11028_v20 = vor.u32 %v11026_v30, %v11024_v25 }
 0x59d   : > { %17032 = vmatprep.mubr.msk.bf16.mxu0 %vm22360_vm12, %v22291_v1  ;;  %v9310_v29 = vadd.f32 %v9230_v22, %v8648_v49  ;;  %v17886_v22 = vld [vmem:[#allocation3 + $0x20] sm:$0xff]  }
 0x59e   : > { %v16818_v5 = vpop.f32.mrf.mxu0  ;;  %v16715_v34 = vpop.f32.mrf.mxu1 }
 0x59f   : > { %9351 = vst [vmem:[#allocation4 + $0x130] sm:$0xff] %v9310_v29  ;;  %v21504_v5 = vld [vmem:[#allocation3 + $0x20] sm:$0xff]  }
 0x5a0   : > { %v21489_v47 = vpop.f32.mrf.mxu0  ;;  %v9235_v0 = vpop.f32.mrf.mxu1  ;;  %16929 = vmatmul.mubr.bf16.gmra.mxu1 %v17875_v7  ;;  %v8652_v34 = vld [vmem:[#allocation4 + $0x40] sm:$0xff] }
 0x5a1   : > { %v9311_v35 = vadd.f32 %v9235_v0, %v8649_v40  ;;  %16932 = vmatprep.mubr.msk.bf16.mxu1 %vm22360_vm12, %v22291_v1  ;;  %v17885_v7 = vld [vmem:[#allocation3 + $0x18] sm:$0xfe]   ;;  %v11585_v40 = vshll.u32 %v17887_v19, 16 }
 0x5a2   : > { %v16819_v36 = vpop.f32.mrf.mxu0  ;;  %v16718_v27 = vpop.f32.mrf.mxu1 }
 0x5a3   : > { %9352 = vst [vmem:[#allocation4 + $0x50] sm:$0xff] %v9311_v35  ;;  %v12303_v35 = vrot.slane %v17886_v22, 1  ;;  %v11590_v27 = vshll.u32 %v21504_v5, 16 }
 0x5a4   : > { %v21494_v48 = vpop.f32.mrf.mxu0  ;;  %17033 = vmatmul.mubr.bf16.gmra.mxu0 %v11025_v28  ;;  %v9238_v50 = vpop.f32.mrf.mxu1  ;;  %v8653_v28 = vld [vmem:[#allocation4 + $0x78] sm:$0xff] }
 0x5a5   : > { %17036 = vmatprep.mubr.msk.bf16.mxu0 %vm22360_vm12, %v22291_v1  ;;  %v9312_v32 = vadd.f32 %v9238_v50, %v8650_v10  ;;  %v12302_v50 = vrot.slane %v17885_v7, 1 }
 0x5a6   : > { %v16822_v42 = vpop.f32.mrf.mxu0  ;;  %v16719_v33 = vpop.f32.mrf.mxu1 }
 0x5a7   : > { %9353 = vst [vmem:[#allocation4 + $0xe8] sm:$0xff] %v9312_v32  ;;  %v11587_v33 = vrot.slane %v11585_v40, 1  ;;  %v12304_v30 = vsel %vm22686_vm3, %v12302_v50, %v12303_v35  ;;  %vm22704_vm3 = vmmov %vm22697_vm1 }
 0x5a8   : > { %v21498_v12 = vpop.f32.mrf.mxu0  ;;  %v9243_v61 = vpop.f32.mrf.mxu1  ;;  %16933 = vmatmul.mubr.bf16.gmra.mxu1 %v17880_v63 }
 0x5a9   : > { %v9313_v39 = vadd.f32 %v9243_v61, %v8651_v17  ;;  %16936 = vmatprep.mubr.msk.bf16.mxu1 %vm22360_vm12, %v22291_v1  ;;  %v21514_v17 = vld [vmem:[#allocation3 + $0x28] sm:$0xff]  }
 0x5aa   : > { %v16823_v6 = vpop.f32.mrf.mxu0  ;;  %v16722_v49 = vpop.f32.mrf.mxu1  ;;  %v12305_v40 = vrot.slane %v21514_v17, 1  ;;  %v11594_v17 = vshrl.u32 %v21504_v5, 16 }
 0x5ab   : > { %9354 = vst [vmem:[#allocation4] sm:$0xff] %v9313_v39  ;;  %v11583_v39 = vshrl.u32 %v17887_v19, 16  ;;  %v11592_v6 = vrot.slane %v11590_v27, 1  ;;  %v8654_v49 = vld [vmem:[#allocation4 + $0x30] sm:$0xff]  ;;  %v8655_v27 = vld [vmem:[#allocation4 + $0xb8] sm:$0xff] }
 0x5ac   : > { %v21502_v29 = vpop.f32.mrf.mxu0  ;;  %17037 = vmatmul.mubr.bf16.gmra.mxu0 %v11028_v20  ;;  %v9246_v37 = vpop.f32.mrf.mxu1  ;;  %v21518_v20 = vld [vmem:[#allocation3 + $0x28] sm:$0xff]  }
 0x5ad   : > { %17156 = vmatprep.mubr.msk.bf16.mxu0 %vm22360_vm12, %v22291_v1  ;;  %v9314_v4 = vadd.f32 %v9246_v37, %v8652_v34  ;;  %v11588_v7 = vor.u32 %v11587_v33, %v11583_v39  ;;  %v12306_v33 = vsel %vm22688_vm10, %v12303_v35, %v12305_v40  ;;  %vm22706_vm10 = vmmov %vm22697_vm1 }
 0x5ae   : > { %v16826_v25 = vpop.f32.mrf.mxu0  ;;  %v16723_v0 = vpop.f32.mrf.mxu1 }
 0x5af   : > { %9355 = vst [vmem:[#allocation4 + $0x40] sm:$0xff] %v9314_v4  ;;  %v17889_v4 = vld [vmem:[%s22280_s3 + $0x238] sm:$0xff]   ;;  %v11593_v0 = vsel %vm22687_vm8, %v11588_v7, %v11592_v6  ;;  %v11596_v7 = vor.u32 %v11594_v17, %v11592_v6  ;;  %vm22705_vm8 = vmmov %vm22703_vm0 }
 0x5b0   : > { %v21508_v36 = vpop.f32.mrf.mxu0  ;;  %v9251_v10 = vpop.f32.mrf.mxu1  ;;  %16937 = vmatmul.mubr.bf16.gmra.mxu1 %v17883_v24  ;;  %v11598_v24 = vshll.u32 %v21518_v20, 16 }
 0x5b1   : > { %v9315_v32 = vadd.f32 %v9251_v10, %v8653_v28  ;;  %17056 = vmatprep.mubr.msk.bf16.mxu1 %vm22360_vm12, %v22291_v1 }
 0x5b2   : > { %v16827_v42 = vpop.f32.mrf.mxu0  ;;  %v16726_v63 = vpop.f32.mrf.mxu1  ;;  %v11600_v39 = vrot.slane %v11598_v24, 1 }
 0x5b3   : > { %9356 = vst [vmem:[#allocation4 + $0x78] sm:$0xff] %v9315_v32  ;;  %v17895_v32 = vld [vmem:[%s22280_s3 + $0x230] sm:$0xff]  }
 0x5b4   : > { %v21516_v61 = vpop.f32.mrf.mxu0  ;;  %17157 = vmatmul.mubr.bf16.vlgmr.msra.gmra.mxu0 %v12304_v30  ;;  %v9254_v22 = vpop.f32.mrf.mxu1  ;;  %v21536_v63 = vld [vmem:[#allocation3 + $0x30] sm:$0xff]   ;;  %v11601_v24 = vsel %vm22689_vm2, %v11596_v7, %v11600_v39  ;;  %vm22707_vm2 = vmmov %vm22703_vm0 }
 0x5b5   : > { %17160 = vmatprep.mubr.msk.bf16.mxu0 %vm22360_vm12, %v22291_v1  ;;  %v9316_v34 = vadd.f32 %v9254_v22, %v8654_v49  ;;  %v21542_v49 = vld [vmem:[#allocation3 + $0x30] sm:$0xff]   ;;  %v8656_v22 = vld [vmem:[#allocation4 + $0x60] sm:$0xff] }
 0x5b6   : > { %v16830_v37 = vpop.f32.mrf.mxu0  ;;  %v16727_v25 = vpop.f32.mrf.mxu1 }
 0x5b7   : > { %9357 = vst [vmem:[#allocation4 + $0x30] sm:$0xff] %v9316_v34 }
 0x5b8   : > { %v21526_v19 = vpop.f32.mrf.mxu0  ;;  %v9259_v28 = vpop.f32.mrf.mxu1  ;;  %17057 = vmatmul.mubr.bf16.vlgmr.msra.gmra.mxu1 %v11593_v0  ;;  %v12307_v0 = vrot.slane %v21536_v63, 1  ;;  %v21561_v63 = vld [vmem:[#allocation3 + $0x38] sm:$0xff]  }
 0x5b9   : > { %v9317_v10 = vadd.f32 %v9259_v28, %v8655_v27  ;;  %17241 = vmatpush3.bf16.msra.mxu1 %v17889_v4  ;;  %17060 = vmatprep.mubr.msk.bf16.mxu1 %vm22360_vm12, %v22291_v1  ;;  %v17901_v4 = vld [vmem:[%s22280_s3 + $0x228] sm:$0xff]   ;;  %v11606_v27 = vshll.u32 %v21542_v49, 16  ;;  %v8657_v28 = vld [vmem:[#allocation4 + $0x28] sm:$0xff] }
 0x5ba   : > { %v16831_v50 = vpop.f32.mrf.mxu0  ;;  %v16730_v42 = vpop.f32.mrf.mxu1  ;;  %17242 = vmatprep.subr.bf16.mxu1 %v22291_v1 }
 0x5bb   : > { %9358 = vst [vmem:[#allocation4 + $0xb8] sm:$0xff] %v9317_v10 }
 0x5bc   : > { %v21539_v30 = vpop.f32.mrf.mxu0  ;;  %17161 = vmatmul.mubr.bf16.gmra.mxu0 %v12306_v33  ;;  %v9262_v34 = vpop.f32.mrf.mxu1  ;;  %v12308_v33 = vsel %vm22690_vm15, %v12305_v40, %v12307_v0  ;;  %vm22708_vm15 = vmmov %vm22697_vm1 }
 0x5bd   : > { %17164 = vmatprep.mubr.msk.bf16.mxu0 %vm22360_vm12, %v22291_v1  ;;  %v9318_v37 = vadd.f32 %v9262_v34, %v8656_v22  ;;  %17243 = vmatpush3.bf16.msra.mxu1 %v17895_v32  ;;  %v17908_v32 = vld [vmem:[%s22280_s3 + $0x220] sm:$0xff]   ;;  %v11602_v22 = vshrl.u32 %v21518_v20, 16  ;;  %v11608_v34 = vrot.slane %v11606_v27, 1 }
 0x5be   : > { %v16834_v35 = vpop.f32.mrf.mxu0  ;;  %v16731_v25 = vpop.f32.mrf.mxu1  ;;  %17244 = vmatprep.subr.bf16.mxu1 %v22291_v1 }
 0x5bf   : > { %9359 = vst [vmem:[#allocation4 + $0x60] sm:$0xff] %v9318_v37  ;;  %v21567_v37 = vld [vmem:[#allocation3 + $0x38] sm:$0xff]   ;;  %v11604_v25 = vor.u32 %v11602_v22, %v11600_v39 }
 0x5c0   : > { %v21551_v5 = vpop.f32.mrf.mxu0  ;;  %v9267_v10 = vpop.f32.mrf.mxu1  ;;  %17061 = vmatmul.mubr.bf16.gmra.mxu1 %v11601_v24  ;;  %v8658_v35 = vld [vmem:[#allocation4 + $0x140] sm:$0xff] }
 0x5c1   : > { %v9319_v6 = vadd.f32 %v9267_v10, %v8657_v28  ;;  %17064 = vmatprep.mubr.msk.bf16.mxu1 %vm22360_vm12, %v22291_v1  ;;  %17245 = vmatpush3.bf16.msra.mxu1 %v17901_v4  ;;  %v17914_v24 = vld [vmem:[%s22280_s3 + $0x218] sm:$0xff]   ;;  %v12309_v10 = vrot.slane %v21561_v63, 1  ;;  %v11609_v27 = vsel %vm22691_vm14, %v11604_v25, %v11608_v34  ;;  %vm22709_vm14 = vmmov %vm22703_vm0 }
 0x5c2   : > { %v16835_v50 = vpop.f32.mrf.mxu0  ;;  %v16734_v42 = vpop.f32.mrf.mxu1  ;;  %17246 = vmatprep.subr.bf16.mxu1 %v22291_v1  ;;  %v21590_v25 = vld [vmem:[#allocation3 + $0x40] sm:$0xff]  }
 0x5c3   : > { %9360 = vst [vmem:[#allocation4 + $0x28] sm:$0xff] %v9319_v6  ;;  %v11614_v6 = vshll.u32 %v21567_v37, 16  ;;  %v8659_v50 = vld [vmem:[#allocation4 + $0x58] sm:$0xf]  ;;  %v12310_v22 = vsel %vm22692_vm9, %v12307_v0, %v12309_v10  ;;  %vm22710_vm9 = vmmov %vm22697_vm1 }
 0x5c4   : > { %v21564_v17 = vpop.f32.mrf.mxu0  ;;  %17165 = vmatmul.mubr.bf16.gmra.mxu0 %v12308_v33  ;;  %v9270_v7 = vpop.f32.mrf.mxu1  ;;  %v17920_v33 = vld [vmem:[%s22280_s3 + $0x210] sm:$0xff]  }
 0x5c5   : > { %17168 = vmatprep.mubr.msk.bf16.mxu0 %vm22360_vm12, %v22291_v1  ;;  %v9320_v4 = vadd.f32 %v9270_v7, %v8658_v35  ;;  %17247 = vmatpush3.bf16.msra.mxu1 %v17908_v32  ;;  %v21584_v35 = vld [vmem:[#allocation3 + $0x40] sm:$0xff]  }
 0x5c6   : > { %v16838_v40 = vpop.f32.mrf.mxu0  ;;  %v16735_v28 = vpop.f32.mrf.mxu1  ;;  %17248 = vmatprep.subr.bf16.mxu1 %v22291_v1 }
 0x5c7   : > { %9361 = vst [vmem:[#allocation4 + $0x140] sm:$0xff] %v9320_v4  ;;  %v11610_v4 = vshrl.u32 %v21542_v49, 16  ;;  %v11616_v40 = vrot.slane %v11614_v6, 1  ;;  %v9363_v28 = vld [vmem:[#allocation4 + $0xb0] sm:$0xff] }
 0x5c8   : > { %v10022_v20 = vpop.f32.mrf.mxu0  ;;  %v9275_v42 = vpop.f32.mrf.mxu1  ;;  %17065 = vmatmul.mubr.bf16.gmra.mxu1 %v11609_v27  ;;  %v17926_v27 = vld [vmem:[%s22280_s3 + $0x208] sm:$0xff]   ;;  %v10025_v49 = vadd.f32 %v21311_v62, %v9363_v28 }
 0x5c9   : > { %v9321_v39 = vadd.f32 %v9275_v42, %v8659_v50  ;;  %17068 = vmatprep.mubr.msk.bf16.mxu1 %vm22360_vm12, %v22291_v1  ;;  %17249 = vmatpush3.bf16.msra.mxu1 %v17914_v24  ;;  %v11612_v0 = vor.u32 %v11610_v4, %v11608_v34  ;;  %v12311_v42 = vrot.slane %v21584_v35, 1  ;;  %v9364_v34 = vld [vmem:[#allocation4 + $0xd0] sm:$0xff]  ;;  %v17933_v35 = vld [vmem:[%s22280_s3 + $0x200] sm:$0xff]  }
 0x5ca   : > { %v16839_v32 = vpop.f32.mrf.mxu0  ;;  %v16738_v63 = vpop.f32.mrf.mxu1  ;;  %17250 = vmatprep.subr.bf16.mxu1 %v22291_v1  ;;  %v10026_v28 = vadd.f32 %v21326_v44, %v9364_v34 }
 0x5cb   : > { %9362 = vst [vmem:[#allocation4 + $0x58] sm:$0xf] %v9321_v39  ;;  %v11617_v39 = vsel %vm22694_vm11, %v11612_v0, %v11616_v40  ;;  %v11622_v32 = vshll.u32 %v21590_v25, 16  ;;  %v12312_v4 = vsel %vm22695_vm13, %v12309_v10, %v12311_v42  ;;  %v11618_v0 = vshrl.u32 %v21567_v37, 16  ;;  %vm22711_vm11 = vmmov %vm22703_vm0 }
 0x5cc   : > { %v21587_v7 = vpop.f32.mrf.mxu0  ;;  %17169 = vmatmul.mubr.bf16.gmra.mxu0 %v12310_v22  ;;  %v9278_v24 = vpop.f32.mrf.mxu1  ;;  %vm22712_vm13 = vmmov %vm22697_vm1 }
 0x5cd   : > { %17172 = vmatprep.mubr.msk.bf16.mxu0 %vm22360_vm12, %v22291_v1  ;;  %17251 = vmatpush3.bf16.msra.mxu1 %v17920_v33  ;;  %v17899_v24 = vld [vmem:[#allocation3 + $0x48] sm:$0xff]  }
 0x5ce   : > { %v16958_v20 = vpop.f32.mrf.mxu0  ;;  %v16739_v50 = vpop.f32.mrf.mxu1  ;;  %17252 = vmatprep.subr.bf16.mxu1 %v22291_v1 }
 0x5cf   : > { %v11624_v50 = vrot.slane %v11622_v32, 1 }
 0x5d0   : > { %v21600_v6 = vpop.f32.mrf.mxu0  ;;  %v10412_v63 = vpop.f32.mrf.mxu1  ;;  %17069 = vmatmul.mubr.bf16.gmra.mxu1 %v11617_v39  ;;  %v9365_v39 = vld [vmem:[#allocation4 + $0x10] sm:$0xff] }
 0x5d1   : > { %22693 = vst [vmem:[#allocation5_spill] sm:$0xff] %v21600_v6  ;;  %v10578_v33 = vadd.f32 %v10412_v63, %v10025_v49  ;;  %17072 = vmatprep.mubr.msk.bf16.mxu1 %vm22360_vm12, %v22291_v1  ;;  %17253 = vmatpush3.bf16.msra.mxu1 %v17926_v27  ;;  %v21615_v27 = vld [vmem:[#allocation3 + $0x48] sm:$0xff]   ;;  %v10027_v44 = vadd.f32 %v21340_v45, %v9365_v39 }
 0x5d2   : > { %v16959_v22 = vpop.f32.mrf.mxu0  ;;  %v16858_v62 = vpop.f32.mrf.mxu1  ;;  %17254 = vmatprep.subr.bf16.mxu1 %v22291_v1  ;;  %v11630_v32 = vshll.u32 %v21615_v27, 16 }
 0x5d3   : > { %10619 = vst [vmem:[#allocation4 + $0xb0] sm:$0xff] %v10578_v33  ;;  %v11620_v22 = vor.u32 %v11618_v0, %v11616_v40  ;;  %v12313_v62 = vrot.slane %v17899_v24, 1  ;;  %v17902_v24 = vld [vmem:[#allocation3 + $0x50] sm:$0xff]  }
 0x5d4   : > { %v21612_v20 = vpop.f32.mrf.mxu0  ;;  %17173 = vmatmul.mubr.bf16.gmra.mxu0 %v12312_v4  ;;  %v10415_v49 = vpop.f32.mrf.mxu1  ;;  %v11632_v39 = vrot.slane %v11630_v32, 1 }
 0x5d5   : > { %22696 = vst [vmem:[#allocation6_spill] sm:$0xff] %v21612_v20  ;;  %17176 = vmatprep.mubr.msk.bf16.mxu0 %vm22360_vm12, %v22291_v1  ;;  %v10579_v10 = vadd.f32 %v10415_v49, %v10026_v28  ;;  %17255 = vmatpush3.bf16.msra.mxu1 %v17933_v35  ;;  %v11625_v37 = vsel %vm22697_vm1, %v11620_v22, %v11624_v50  ;;  %v9366_v20 = vld [vmem:[#allocation4 + $0x48] sm:$0xff]  ;;  %v22698_v28 = vmov 0.0   ;;  %v11626_v49 = vshrl.u32 %v21590_v25, 16  ;;  %vm22713_vm1 = vmmov %vm22703_vm0 }
 0x5d6   : > { %v16962_v63 = vpop.f32.mrf.mxu0  ;;  %v16859_v33 = vpop.f32.mrf.mxu1  ;;  %v12314_v35 = vsel %vm22699_vm4, %v12311_v42, %v12313_v62  ;;  %v10028_v45 = vadd.f32 %v21352_v21, %v9366_v20  ;;  %vm22714_vm4 = vmmov %vm22704_vm3 }
 0x5d7   : > { %10620 = vst [vmem:[#allocation4 + $0xd0] sm:$0xff] %v10579_v10  ;;  %v21631_v10 = vld [vmem:[#allocation3 + $0x50] sm:$0xff]   ;;  %v11628_v42 = vor.u32 %v11626_v49, %v11624_v50 }
 0x5d8   : > { %v21620_v34 = vpop.f32.mrf.mxu0  ;;  %v10420_v4 = vpop.f32.mrf.mxu1  ;;  %17073 = vmatmul.mubr.bf16.gmra.mxu1 %v11625_v37  ;;  %v11638_v37 = vshll.u32 %v21631_v10, 16 }
 0x5d9   : > { %v10580_v6 = vadd.f32 %v10420_v4, %v10027_v44  ;;  %17076 = vmatprep.mubr.msk.bf16.mxu1 %vm22360_vm12, %v22698_v28  ;;  %v11633_v25 = vsel %vm22700_vm5, %v11628_v42, %v11632_v39  ;;  %v9368_v4 = vld [vmem:[#allocation4 + $0x38] sm:$0xff]  ;;  %vm22715_vm5 = vmmov %vm22703_vm0 }
 0x5da   : > { %v16963_v1 = vpop.f32.mrf.mxu0  ;;  %v16862_v40 = vpop.f32.mrf.mxu1  ;;  %v9369_v42 = vld [vmem:[#allocation4 + $0xf8] sm:$0xff] }
 0x5db   : > { %10621 = vst [vmem:[#allocation4 + $0x10] sm:$0xff] %v10580_v6  ;;  %v9367_v1 = vld [vmem:[#allocation4 + $0x120] sm:$0xff]  ;;  %v12315_v6 = vrot.slane %v17902_v24, 1 }
 0x5dc   : > { %v21628_v0 = vpop.f32.mrf.mxu0  ;;  %17177 = vmatmul.mubr.bf16.gmra.mxu0 %v12314_v35  ;;  %v10423_v63 = vpop.f32.mrf.mxu1  ;;  %v10029_v21 = vadd.f32 %v21362_v9, %v9367_v1  ;;  %v10030_v9 = vadd.f32 %v21371_v13, %v9368_v4  ;;  %v11640_v1 = vrot.slane %v11638_v37, 1  ;;  %v10031_v13 = vadd.f32 %v21376_v38, %v9369_v42 }
 0x5dd   : > { %17180 = vmatprep.mubr.msk.bf16.mxu0 %vm22360_vm12, %v22698_v28  ;;  %v10581_v22 = vadd.f32 %v10423_v63, %v10028_v45  ;;  %v12316_v24 = vsel %vm22701_vm7, %v12313_v62, %v12315_v6  ;;  %v17904_v45 = vld [vmem:[#allocation3 + $0x58] sm:$0xff]   ;;  %v11634_v63 = vshrl.u32 %v21615_v27, 16  ;;  %vm22716_vm7 = vmmov %vm22704_vm3 }
 0x5de   : > { %v16966_v33 = vpop.f32.mrf.mxu0  ;;  %v16863_v44 = vpop.f32.mrf.mxu1 }
 0x5df   : > { %10622 = vst [vmem:[#allocation4 + $0x48] sm:$0xff] %v10581_v22  ;;  %v21647_v22 = vld [vmem:[#allocation3 + $0x58] sm:$0xff]   ;;  %v11636_v62 = vor.u32 %v11634_v63, %v11632_v39 }
 0x5e0   : > { %v21636_v20 = vpop.f32.mrf.mxu0  ;;  %v10428_v32 = vpop.f32.mrf.mxu1  ;;  %17077 = vmatmul.mubr.bf16.gmra.mxu1 %v11633_v25  ;;  %v11646_v37 = vshll.u32 %v21647_v22, 16 }
 0x5e1   : > { %v10582_v40 = vadd.f32 %v10428_v32, %v10029_v21  ;;  %17080 = vmatprep.mubr.msk.bf16.mxu1 %vm22360_vm12, %v22698_v28  ;;  %v12317_v32 = vrot.slane %v17904_v45, 1  ;;  %v11641_v27 = vsel %vm22702_vm6, %v11636_v62, %v11640_v1  ;;  %v9371_v62 = vld [vmem:[#allocation4 + $0x80] sm:$0xff]  ;;  %vm22717_vm6 = vmmov %vm22703_vm0 }
 0x5e2   : > { %v16967_v35 = vpop.f32.mrf.mxu0  ;;  %v16866_v50 = vpop.f32.mrf.mxu1  ;;  %v11648_v42 = vrot.slane %v11646_v37, 1 }
 0x5e3   : > { %10623 = vst [vmem:[#allocation4 + $0x120] sm:$0xff] %v10582_v40  ;;  %v9370_v35 = vld [vmem:[#allocation4 + $0x100] sm:$0xff]  ;;  %v12318_v45 = vsel %vm22703_vm0, %v12315_v6, %v12317_v32  ;;  %vm22718_vm0 = vmmov %vm22704_vm3 }
 0x5e4   : > { %v21644_v49 = vpop.f32.mrf.mxu0  ;;  %17181 = vmatmul.mubr.bf16.gmra.mxu0 %v12316_v24  ;;  %v10431_v33 = vpop.f32.mrf.mxu1  ;;  %v10032_v38 = vadd.f32 %v21381_v3, %v9370_v35  ;;  %v10033_v3 = vadd.f32 %v21386_v31, %v9371_v62 }
 0x5e5   : > { %17184 = vmatprep.mubr.msk.bf16.mxu0 %vm22360_vm12, %v22698_v28  ;;  %v10583_v44 = vadd.f32 %v10431_v33, %v10030_v9  ;;  %v17906_v9 = vld [vmem:[#allocation3 + $0x60] sm:$0xff]   ;;  %v11642_v33 = vshrl.u32 %v21631_v10, 16 }
 0x5e6   : > { %v16970_v21 = vpop.f32.mrf.mxu0  ;;  %v16867_v25 = vpop.f32.mrf.mxu1 }
 0x5e7   : > { %10624 = vst [vmem:[#allocation4 + $0x38] sm:$0xff] %v10583_v44  ;;  %v21663_v44 = vld [vmem:[#allocation3 + $0x60] sm:$0xff]   ;;  %v11644_v6 = vor.u32 %v11642_v33, %v11640_v1 }
 0x5e8   : > { %v21652_v4 = vpop.f32.mrf.mxu0  ;;  %v10436_v40 = vpop.f32.mrf.mxu1  ;;  %17081 = vmatmul.mubr.bf16.gmra.mxu1 %v11641_v27  ;;  %v11654_v37 = vshll.u32 %v21663_v44, 16 }
 0x5e9   : > { %v10584_v50 = vadd.f32 %v10436_v40, %v10031_v13  ;;  %17084 = vmatprep.mubr.msk.bf16.mxu1 %vm22360_vm12, %v22698_v28  ;;  %v12319_v40 = vrot.slane %v17906_v9, 1  ;;  %v11649_v10 = vsel %vm22704_vm3, %v11644_v6, %v11648_v42  ;;  %v17909_v9 = vld [vmem:[#allocation3 + $0x68] sm:$0xff]   ;;  %vm22719_vm3 = vmmov %vm22713_vm1 }
 0x5ea   : > { %v16971_v24 = vpop.f32.mrf.mxu0  ;;  %v16870_v39 = vpop.f32.mrf.mxu1 }
 0x5eb   : > { %10625 = vst [vmem:[#allocation4 + $0xf8] sm:$0xff] %v10584_v50  ;;  %v9403_v50 = vld [vmem:[#allocation4 + $0x58] sm:$0xf]  ;;  %v9372_v39 = vld [vmem:[#allocation4 + $0x108] sm:$0xff]  ;;  %v12320_v31 = vsel %vm22705_vm8, %v12317_v32, %v12319_v40  ;;  %vm22720_vm8 = vmmov %vm22718_vm0 }
 0x5ec   : > { %v21660_v63 = vpop.f32.mrf.mxu0  ;;  %17185 = vmatmul.mubr.bf16.gmra.mxu0 %v12318_v45  ;;  %v10439_v21 = vpop.f32.mrf.mxu1  ;;  %v10065_v45 = vadd.f32 %v21564_v17, %v9403_v50  ;;  %v10034_v33 = vadd.f32 %v21390_v2, %v9372_v39  ;;  %v21680_v17 = vld [vmem:[#allocation3 + $0x68] sm:$0xff]  }
 0x5ed   : > { %17188 = vmatprep.mubr.msk.bf16.mxu0 %vm22360_vm12, %v22698_v28  ;;  %v10585_v25 = vadd.f32 %v10439_v21, %v10032_v38 }
 0x5ee   : > { %v16974_v13 = vpop.f32.mrf.mxu0  ;;  %v16871_v27 = vpop.f32.mrf.mxu1  ;;  %10106 = vst [vmem:[#allocation4 + $0x58] sm:$0xf] %v10065_v45 }
 0x5ef   : > { %10626 = vst [vmem:[#allocation4 + $0x100] sm:$0xff] %v10585_v25  ;;  %v11650_v25 = vshrl.u32 %v21647_v22, 16  ;;  %v11656_v13 = vrot.slane %v11654_v37, 1  ;;  %v9373_v27 = vld [vmem:[#allocation4 + $0x138] sm:$0xff]  ;;  %v11662_v37 = vshll.u32 %v21680_v17, 16 }
 0x5f0   : > { %v21668_v35 = vpop.f32.mrf.mxu0  ;;  %v10444_v24 = vpop.f32.mrf.mxu1  ;;  %17085 = vmatmul.mubr.bf16.gmra.mxu1 %v11649_v10  ;;  %v10035_v2 = vadd.f32 %v21395_v23, %v9373_v27  ;;  %v21696_v27 = vld [vmem:[#allocation3 + $0x70] sm:$0xff]  }
 0x5f1   : > { %v10586_v38 = vadd.f32 %v10444_v24, %v10033_v3  ;;  %17088 = vmatprep.mubr.msk.bf16.mxu1 %vm22360_vm12, %v22698_v28  ;;  %v11652_v10 = vor.u32 %v11650_v25, %v11648_v42  ;;  %v12321_v24 = vrot.slane %v17909_v9, 1  ;;  %v17911_v9 = vld [vmem:[#allocation3 + $0x70] sm:$0xff]   ;;  %v11658_v25 = vshrl.u32 %v21663_v44, 16 }
 0x5f2   : > { %v16975_v21 = vpop.f32.mrf.mxu0  ;;  %v16874_v1 = vpop.f32.mrf.mxu1 }
 0x5f3   : > { %10627 = vst [vmem:[#allocation4 + $0x80] sm:$0xff] %v10586_v38  ;;  %v11657_v22 = vsel %vm22706_vm10, %v11652_v10, %v11656_v13  ;;  %v9374_v38 = vld [vmem:[#allocation4 + $0xf0] sm:$0xff]  ;;  %vm22721_vm10 = vmmov %vm22713_vm1 }
 0x5f4   : > { %v21677_v62 = vpop.f32.mrf.mxu0  ;;  %17189 = vmatmul.mubr.bf16.gmra.mxu0 %v12320_v31  ;;  %v10447_v6 = vpop.f32.mrf.mxu1  ;;  %v12322_v31 = vsel %vm22707_vm2, %v12319_v40, %v12321_v24  ;;  %v10036_v23 = vadd.f32 %v21399_v18, %v9374_v38  ;;  %v11660_v40 = vor.u32 %v11658_v25, %v11656_v13  ;;  %v11666_v25 = vshrl.u32 %v21680_v17, 16  ;;  %vm22722_vm2 = vmmov %vm22718_vm0 }
 0x5f5   : > { %17192 = vmatprep.mubr.msk.bf16.mxu0 %vm22360_vm12, %v22698_v28  ;;  %v10587_v3 = vadd.f32 %v10447_v6, %v10034_v33  ;;  %v11664_v6 = vrot.slane %v11662_v37, 1  ;;  %v11670_v37 = vshll.u32 %v21696_v27, 16 }
 0x5f6   : > { %v16978_v32 = vpop.f32.mrf.mxu0  ;;  %v16875_v50 = vpop.f32.mrf.mxu1 }
 0x5f7   : > { %10628 = vst [vmem:[#allocation4 + $0x108] sm:$0xff] %v10587_v3  ;;  %v9375_v32 = vld [vmem:[#allocation4 + $0x18] sm:$0xff]  ;;  %v11665_v44 = vsel %vm22708_vm15, %v11660_v40, %v11664_v6  ;;  %vm22723_vm15 = vmmov %vm22713_vm1 }
 0x5f8   : > { %v21685_v39 = vpop.f32.mrf.mxu0  ;;  %v10452_v45 = vpop.f32.mrf.mxu1  ;;  %17089 = vmatmul.mubr.bf16.gmra.mxu1 %v11657_v22  ;;  %v12323_v22 = vrot.slane %v17911_v9, 1  ;;  %v10037_v18 = vadd.f32 %v21404_v14, %v9375_v32  ;;  %v17913_v9 = vld [vmem:[#allocation3 + $0x78] sm:$0xff]  }
 0x5f9   : > { %v10588_v21 = vadd.f32 %v10452_v45, %v10035_v2  ;;  %17092 = vmatprep.mubr.msk.bf16.mxu1 %vm22360_vm12, %v22698_v28  ;;  %v21712_v32 = vld [vmem:[#allocation3 + $0x78] sm:$0xff]  }
 0x5fa   : > { %v16979_v1 = vpop.f32.mrf.mxu0  ;;  %v16878_v42 = vpop.f32.mrf.mxu1 }
 0x5fb   : > { %10629 = vst [vmem:[#allocation4 + $0x138] sm:$0xff] %v10588_v21  ;;  %v9376_v21 = vld [vmem:[#allocation4 + $0xc8] sm:$0xff] }
 0x5fc   : > { %v21693_v33 = vpop.f32.mrf.mxu0  ;;  %17193 = vmatmul.mubr.bf16.gmra.mxu0 %v12322_v31  ;;  %v10455_v3 = vpop.f32.mrf.mxu1  ;;  %v12324_v31 = vsel %vm22709_vm14, %v12321_v24, %v12323_v22  ;;  %v10038_v14 = vadd.f32 %v21408_v16, %v9376_v21  ;;  %v11668_v24 = vor.u32 %v11666_v25, %v11664_v6  ;;  %v11674_v25 = vshrl.u32 %v21696_v27, 16  ;;  %vm22724_vm14 = vmmov %vm22718_vm0 }
 0x5fd   : > { %17196 = vmatprep.mubr.msk.bf16.mxu0 %vm22360_vm12, %v22698_v28  ;;  %v10589_v10 = vadd.f32 %v10455_v3, %v10036_v23  ;;  %v11672_v3 = vrot.slane %v11670_v37, 1  ;;  %v11678_v37 = vshll.u32 %v21712_v32, 16 }
 0x5fe   : > { %v16982_v50 = vpop.f32.mrf.mxu0  ;;  %v16879_v2 = vpop.f32.mrf.mxu1 }
 0x5ff   : > { %10630 = vst [vmem:[#allocation4 + $0xf0] sm:$0xff] %v10589_v10  ;;  %v9377_v50 = vld [vmem:[#allocation4 + $0x70] sm:$0xff]  ;;  %v11673_v17 = vsel %vm22710_vm9, %v11668_v24, %v11672_v3  ;;  %vm22725_vm9 = vmmov %vm22713_vm1 }
 0x600   : > { %v21701_v45 = vpop.f32.mrf.mxu0  ;;  %v10460_v38 = vpop.f32.mrf.mxu1  ;;  %17093 = vmatmul.mubr.bf16.gmra.mxu1 %v11665_v44  ;;  %v12325_v44 = vrot.slane %v17913_v9, 1  ;;  %v10039_v16 = vadd.f32 %v21413_v53, %v9377_v50  ;;  %v17916_v9 = vld [vmem:[#allocation3 + $0x80] sm:$0xff]  }
 0x601   : > { %v10590_v1 = vadd.f32 %v10460_v38, %v10037_v18  ;;  %17096 = vmatprep.mubr.msk.bf16.mxu1 %vm22360_vm12, %v22698_v28  ;;  %v21728_v50 = vld [vmem:[#allocation3 + $0x80] sm:$0xff]  }
 0x602   : > { %v16983_v42 = vpop.f32.mrf.mxu0  ;;  %v16882_v13 = vpop.f32.mrf.mxu1 }
 0x603   : > { %10631 = vst [vmem:[#allocation4 + $0x18] sm:$0xff] %v10590_v1  ;;  %v9378_v1 = vld [vmem:[#allocation4 + $0x20] sm:$0xff] }
 0x604   : > { %v21709_v23 = vpop.f32.mrf.mxu0  ;;  %17197 = vmatmul.mubr.bf16.gmra.mxu0 %v12324_v31  ;;  %v10463_v10 = vpop.f32.mrf.mxu1  ;;  %v12326_v31 = vsel %vm22711_vm11, %v12323_v22, %v12325_v44  ;;  %v10040_v53 = vadd.f32 %v21417_v56, %v9378_v1  ;;  %v11676_v22 = vor.u32 %v11674_v25, %v11672_v3  ;;  %v11682_v25 = vshrl.u32 %v21712_v32, 16  ;;  %vm22726_vm11 = vmmov %vm22718_vm0 }
 0x605   : > { %17200 = vmatprep.mubr.msk.bf16.mxu0 %vm22360_vm12, %v22698_v28  ;;  %v10591_v40 = vadd.f32 %v10463_v10, %v10038_v14  ;;  %v11680_v10 = vrot.slane %v11678_v37, 1  ;;  %v11686_v37 = vshll.u32 %v21728_v50, 16 }
 0x606   : > { %v16986_v2 = vpop.f32.mrf.mxu0  ;;  %v16883_v18 = vpop.f32.mrf.mxu1 }
 0x607   : > { %10632 = vst [vmem:[#allocation4 + $0xc8] sm:$0xff] %v10591_v40  ;;  %v9379_v2 = vld [vmem:[#allocation4 + $0x128] sm:$0xff]  ;;  %v11681_v27 = vsel %vm22712_vm13, %v11676_v22, %v11680_v10  ;;  %vm22727_vm13 = vmmov %vm22713_vm1 }
 0x608   : > { %v21717_v38 = vpop.f32.mrf.mxu0  ;;  %v10468_v21 = vpop.f32.mrf.mxu1  ;;  %17097 = vmatmul.mubr.bf16.gmra.mxu1 %v11673_v17  ;;  %v12327_v17 = vrot.slane %v17916_v9, 1  ;;  %v10041_v56 = vadd.f32 %v21422_v58, %v9379_v2  ;;  %v17918_v9 = vld [vmem:[#allocation3 + $0x88] sm:$0xff]  }
 0x609   : > { %v10592_v42 = vadd.f32 %v10468_v21, %v10039_v16  ;;  %17100 = vmatprep.mubr.msk.bf16.mxu1 %vm22360_vm12, %v22698_v28  ;;  %v21744_v2 = vld [vmem:[#allocation3 + $0x88] sm:$0xff]  }
 0x60a   : > { %v16987_v13 = vpop.f32.mrf.mxu0  ;;  %v16886_v6 = vpop.f32.mrf.mxu1 }
 0x60b   : > { %10633 = vst [vmem:[#allocation4 + $0x70] sm:$0xff] %v10592_v42  ;;  %v9380_v42 = vld [vmem:[#allocation4 + $0x110] sm:$0xff] }
 0x60c   : > { %v21725_v14 = vpop.f32.mrf.mxu0  ;;  %17201 = vmatmul.mubr.bf16.gmra.mxu0 %v12326_v31  ;;  %v10471_v40 = vpop.f32.mrf.mxu1  ;;  %v12328_v31 = vsel %vm22713_vm1, %v12325_v44, %v12327_v17  ;;  %v10042_v58 = vadd.f32 %v21426_v54, %v9380_v42  ;;  %v11684_v44 = vor.u32 %v11682_v25, %v11680_v10  ;;  %v11690_v25 = vshrl.u32 %v21728_v50, 16  ;;  %vm22728_vm1 = vmmov %vm22718_vm0 }
 0x60d   : > { %17204 = vmatprep.mubr.msk.bf16.mxu0 %vm22360_vm12, %v22698_v28  ;;  %v10593_v24 = vadd.f32 %v10471_v40, %v10040_v53  ;;  %v11688_v40 = vrot.slane %v11686_v37, 1  ;;  %v11694_v37 = vshll.u32 %v21744_v2, 16 }
 0x60e   : > { %v16990_v18 = vpop.f32.mrf.mxu0  ;;  %v16887_v16 = vpop.f32.mrf.mxu1 }
 0x60f   : > { %10634 = vst [vmem:[#allocation4 + $0x20] sm:$0xff] %v10593_v24  ;;  %v9381_v18 = vld [vmem:[#allocation4 + $0x8] sm:$0xff]  ;;  %v11689_v32 = vsel %vm22714_vm4, %v11684_v44, %v11688_v40  ;;  %vm22729_vm4 = vsmask.f32 6400 }
 0x610   : > { %v21733_v21 = vpop.f32.mrf.mxu0  ;;  %v10476_v1 = vpop.f32.mrf.mxu1  ;;  %17101 = vmatmul.mubr.bf16.gmra.mxu1 %v11681_v27  ;;  %v12329_v27 = vrot.slane %v17918_v9, 1  ;;  %v10043_v54 = vadd.f32 %v21431_v11, %v9381_v18  ;;  %v17921_v9 = vld [vmem:[#allocation3 + $0x90] sm:$0xff]  }
 0x611   : > { %v10594_v13 = vadd.f32 %v10476_v1, %v10041_v56  ;;  %17104 = vmatprep.mubr.msk.bf16.mxu1 %vm22360_vm12, %v22698_v28  ;;  %v21760_v18 = vld [vmem:[#allocation3 + $0x90] sm:$0xff]  }
 0x612   : > { %v16991_v6 = vpop.f32.mrf.mxu0  ;;  %v16890_v3 = vpop.f32.mrf.mxu1 }
 0x613   : > { %10635 = vst [vmem:[#allocation4 + $0x128] sm:$0xff] %v10594_v13  ;;  %v9382_v13 = vld [vmem:[#allocation4 + $0x98] sm:$0xff] }
 0x614   : > { %v21741_v53 = vpop.f32.mrf.mxu0  ;;  %17205 = vmatmul.mubr.bf16.gmra.mxu0 %v12328_v31  ;;  %v10479_v24 = vpop.f32.mrf.mxu1  ;;  %v12330_v31 = vsel %vm22715_vm5, %v12327_v17, %v12329_v27  ;;  %v10044_v11 = vadd.f32 %v21435_v57, %v9382_v13  ;;  %v11692_v17 = vor.u32 %v11690_v25, %v11688_v40  ;;  %v11698_v25 = vshrl.u32 %v21744_v2, 16  ;;  %vm22730_vm5 = vmmov %vm22729_vm4 }
 0x615   : > { %17208 = vmatprep.mubr.msk.bf16.mxu0 %vm22360_vm12, %v22698_v28  ;;  %v10595_v22 = vadd.f32 %v10479_v24, %v10042_v58  ;;  %v11696_v24 = vrot.slane %v11694_v37, 1  ;;  %v11702_v37 = vshll.u32 %v21760_v18, 16 }
 0x616   : > { %v16994_v16 = vpop.f32.mrf.mxu0  ;;  %v16891_v56 = vpop.f32.mrf.mxu1 }
 0x617   : > { %10636 = vst [vmem:[#allocation4 + $0x110] sm:$0xff] %v10595_v22  ;;  %v9383_v16 = vld [vmem:[#allocation4 + $0xa8] sm:$0xff]  ;;  %v11697_v50 = vsel %vm22716_vm7, %v11692_v17, %v11696_v24  ;;  %vm22731_vm7 = vmmov %vm22729_vm4 }
 0x618   : > { %v21749_v1 = vpop.f32.mrf.mxu0  ;;  %v10484_v42 = vpop.f32.mrf.mxu1  ;;  %17105 = vmatmul.mubr.bf16.gmra.mxu1 %v11689_v32  ;;  %v12331_v32 = vrot.slane %v17921_v9, 1  ;;  %v10045_v57 = vadd.f32 %v21440_v43, %v9383_v16  ;;  %v17923_v9 = vld [vmem:[#allocation3 + $0x98] sm:$0xff]  }
 0x619   : > { %v10596_v6 = vadd.f32 %v10484_v42, %v10043_v54  ;;  %17108 = vmatprep.mubr.msk.bf16.mxu1 %vm22360_vm12, %v22698_v28  ;;  %v21776_v16 = vld [vmem:[#allocation3 + $0x98] sm:$0xff]  }
 0x61a   : > { %v16995_v3 = vpop.f32.mrf.mxu0  ;;  %v16894_v10 = vpop.f32.mrf.mxu1 }
 0x61b   : > { %10637 = vst [vmem:[#allocation4 + $0x8] sm:$0xff] %v10596_v6  ;;  %v9384_v6 = vld [vmem:[#allocation4 + $0x90] sm:$0xff] }
 0x61c   : > { %v21757_v58 = vpop.f32.mrf.mxu0  ;;  %17209 = vmatmul.mubr.bf16.gmra.mxu0 %v12330_v31  ;;  %v10487_v22 = vpop.f32.mrf.mxu1  ;;  %v12332_v31 = vsel %vm22717_vm6, %v12329_v27, %v12331_v32  ;;  %v10046_v43 = vadd.f32 %v21444_v60, %v9384_v6  ;;  %v11700_v27 = vor.u32 %v11698_v25, %v11696_v24  ;;  %v11706_v25 = vshrl.u32 %v21760_v18, 16  ;;  %vm22732_vm6 = vmmov %vm22729_vm4 }
 0x61d   : > { %17212 = vmatprep.mubr.msk.bf16.mxu0 %vm22360_vm12, %v22698_v28  ;;  %v10597_v44 = vadd.f32 %v10487_v22, %v10044_v11  ;;  %v11704_v22 = vrot.slane %v11702_v37, 1  ;;  %v11710_v37 = vshll.u32 %v21776_v16, 16 }
 0x61e   : > { %v16998_v56 = vpop.f32.mrf.mxu0  ;;  %v16895_v54 = vpop.f32.mrf.mxu1 }
 0x61f   : > { %10638 = vst [vmem:[#allocation4 + $0x98] sm:$0xff] %v10597_v44  ;;  %v9385_v56 = vld [vmem:[#allocation4 + $0xe0] sm:$0xff]  ;;  %v11705_v2 = vsel %vm22718_vm0, %v11700_v27, %v11704_v22  ;;  %vm22735_vm0 = vmmov %vm22729_vm4 }
 0x620   : > { %v21765_v42 = vpop.f32.mrf.mxu0  ;;  %v10492_v13 = vpop.f32.mrf.mxu1  ;;  %17109 = vmatmul.mubr.bf16.gmra.mxu1 %v11697_v50  ;;  %v12333_v50 = vrot.slane %v17923_v9, 1  ;;  %v10047_v60 = vadd.f32 %v21449_v46, %v9385_v56  ;;  %v17925_v9 = vld [vmem:[#allocation3 + $0xa0] sm:$0xff]  }
 0x621   : > { %v10598_v3 = vadd.f32 %v10492_v13, %v10045_v57  ;;  %17112 = vmatprep.mubr.msk.bf16.mxu1 %vm22360_vm12, %v22698_v28  ;;  %v21792_v56 = vld [vmem:[#allocation3 + $0xa0] sm:$0xff]  }
 0x622   : > { %v16999_v10 = vpop.f32.mrf.mxu0  ;;  %v16898_v40 = vpop.f32.mrf.mxu1 }
 0x623   : > { %10639 = vst [vmem:[#allocation4 + $0xa8] sm:$0xff] %v10598_v3  ;;  %v9386_v3 = vld [vmem:[#allocation4 + $0x88] sm:$0xff] }
 0x624   : > { %v21773_v11 = vpop.f32.mrf.mxu0  ;;  %17213 = vmatmul.mubr.bf16.gmra.mxu0 %v12332_v31  ;;  %v10495_v44 = vpop.f32.mrf.mxu1  ;;  %v12334_v31 = vsel %vm22719_vm3, %v12331_v32, %v12333_v50  ;;  %v10048_v46 = vadd.f32 %v21453_v55, %v9386_v3  ;;  %v11708_v32 = vor.u32 %v11706_v25, %v11704_v22  ;;  %v11714_v25 = vshrl.u32 %v21776_v16, 16  ;;  %vm22736_vm3 = vmmov %vm22735_vm0 }
 0x625   : > { %17216 = vmatprep.mubr.msk.bf16.mxu0 %vm22360_vm12, %v22698_v28  ;;  %v10599_v17 = vadd.f32 %v10495_v44, %v10046_v43  ;;  %v11712_v44 = vrot.slane %v11710_v37, 1  ;;  %v11718_v37 = vshll.u32 %v21792_v56, 16 }
 0x626   : > { %v17002_v54 = vpop.f32.mrf.mxu0  ;;  %v16899_v57 = vpop.f32.mrf.mxu1 }
 0x627   : > { %10640 = vst [vmem:[#allocation4 + $0x90] sm:$0xff] %v10599_v17  ;;  %v9387_v54 = vld [vmem:[#allocation4 + $0xc0] sm:$0xff]  ;;  %v11713_v18 = vsel %vm22720_vm8, %v11708_v32, %v11712_v44  ;;  %vm22737_vm8 = vmmov %vm22735_vm0 }
 0x628   : > { %v21781_v13 = vpop.f32.mrf.mxu0  ;;  %v10500_v6 = vpop.f32.mrf.mxu1  ;;  %17113 = vmatmul.mubr.bf16.gmra.mxu1 %v11705_v2  ;;  %v12335_v2 = vrot.slane %v17925_v9, 1  ;;  %v10049_v55 = vadd.f32 %v21458_v52, %v9387_v54  ;;  %v17928_v9 = vld [vmem:[#allocation3 + $0xa8] sm:$0xff]  }
 0x629   : > { %v10600_v10 = vadd.f32 %v10500_v6, %v10047_v60  ;;  %17116 = vmatprep.mubr.msk.bf16.mxu1 %vm22360_vm12, %v22698_v28  ;;  %v21808_v54 = vld [vmem:[#allocation3 + $0xa8] sm:$0xff]  }
 0x62a   : > { %v17003_v40 = vpop.f32.mrf.mxu0  ;;  %v16902_v24 = vpop.f32.mrf.mxu1 }
 0x62b   : > { %10641 = vst [vmem:[#allocation4 + $0xe0] sm:$0xff] %v10600_v10  ;;  %v9388_v10 = vld [vmem:[#allocation4 + $0x118] sm:$0xff] }
 0x62c   : > { %v21789_v43 = vpop.f32.mrf.mxu0  ;;  %17217 = vmatmul.mubr.bf16.gmra.mxu0 %v12334_v31  ;;  %v10503_v17 = vpop.f32.mrf.mxu1  ;;  %v12336_v31 = vsel %vm22721_vm10, %v12333_v50, %v12335_v2  ;;  %v10050_v52 = vadd.f32 %v21462_v51, %v9388_v10  ;;  %v11716_v50 = vor.u32 %v11714_v25, %v11712_v44  ;;  %v11722_v25 = vshrl.u32 %v21792_v56, 16  ;;  %vm22738_vm10 = vmmov %vm22735_vm0 }
 0x62d   : > { %17220 = vmatprep.mubr.msk.bf16.mxu0 %vm22360_vm12, %v22698_v28  ;;  %v10601_v27 = vadd.f32 %v10503_v17, %v10048_v46  ;;  %v11720_v17 = vrot.slane %v11718_v37, 1  ;;  %v11726_v37 = vshll.u32 %v21808_v54, 16 }
 0x62e   : > { %v17006_v57 = vpop.f32.mrf.mxu0  ;;  %v16903_v60 = vpop.f32.mrf.mxu1 }
 0x62f   : > { %10642 = vst [vmem:[#allocation4 + $0x88] sm:$0xff] %v10601_v27  ;;  %v9389_v57 = vld [vmem:[#allocation4 + $0xd8] sm:$0xff]  ;;  %v11721_v16 = vsel %vm22722_vm2, %v11716_v50, %v11720_v17  ;;  %vm22739_vm2 = vmmov %vm22735_vm0 }
 0x630   : > { %v21797_v6 = vpop.f32.mrf.mxu0  ;;  %v10508_v3 = vpop.f32.mrf.mxu1  ;;  %17117 = vmatmul.mubr.bf16.gmra.mxu1 %v11713_v18  ;;  %v12337_v18 = vrot.slane %v17928_v9, 1  ;;  %v10051_v51 = vadd.f32 %v21467_v59, %v9389_v57  ;;  %v17930_v9 = vld [vmem:[#allocation3 + $0xb0] sm:$0xff]  }
 0x631   : > { %v10602_v40 = vadd.f32 %v10508_v3, %v10049_v55  ;;  %17120 = vmatprep.mubr.msk.bf16.mxu1 %vm22360_vm12, %v22698_v28  ;;  %v17931_v57 = vld [vmem:[#allocation3 + $0xb0] sm:$0xff]  }
 0x632   : > { %v17007_v24 = vpop.f32.mrf.mxu0  ;;  %v16906_v22 = vpop.f32.mrf.mxu1  ;;  %v11734_v56 = vshll.u32 %v17931_v57, 16 }
 0x633   : > { %10643 = vst [vmem:[#allocation4 + $0xc0] sm:$0xff] %v10602_v40  ;;  %v9390_v40 = vld [vmem:[#allocation4 + $0xa0] sm:$0xff] }
 0x634   : > { %v21805_v46 = vpop.f32.mrf.mxu0  ;;  %17221 = vmatmul.mubr.bf16.gmra.mxu0 %v12336_v31  ;;  %v10511_v27 = vpop.f32.mrf.mxu1  ;;  %v12338_v31 = vsel %vm22723_vm15, %v12335_v2, %v12337_v18  ;;  %v10052_v59 = vadd.f32 %v21471_v26, %v9390_v40  ;;  %vm22740_vm15 = vmmov %vm22735_vm0 }
 0x635   : > { %17224 = vmatprep.mubr.msk.bf16.mxu0 %vm22360_vm12, %v22698_v28  ;;  %v10603_v32 = vadd.f32 %v10511_v27, %v10050_v52  ;;  %v11728_v27 = vrot.slane %v11726_v37, 1 }
 0x636   : > { %v17010_v60 = vpop.f32.mrf.mxu0  ;;  %v16907_v55 = vpop.f32.mrf.mxu1 }
 0x637   : > { %10644 = vst [vmem:[#allocation4 + $0x118] sm:$0xff] %v10603_v32  ;;  %v9391_v60 = vld [vmem:[#allocation4 + $0x68] sm:$0xff] }
 0x638   : > { %v21813_v3 = vpop.f32.mrf.mxu0  ;;  %v10516_v10 = vpop.f32.mrf.mxu1  ;;  %17121 = vmatmul.mubr.bf16.gmra.mxu1 %v11721_v16  ;;  %v12339_v16 = vrot.slane %v17930_v9, 1  ;;  %v10053_v26 = vadd.f32 %v21476_v41, %v9391_v60  ;;  %v17932_v9 = vld [vmem:[#allocation3 + $0xb8] ss:$0 sps:$4 sm:$0x77]  }
 0x639   : > { %v10604_v24 = vadd.f32 %v10516_v10, %v10051_v51  ;;  %17124 = vmatprep.mubr.msk.bf16.mxu1 %vm22360_vm12, %v22698_v28  ;;  %v11724_v51 = vor.u32 %v11722_v25, %v11720_v17  ;;  %v11730_v25 = vshrl.u32 %v21808_v54, 16  ;;  %v17934_v60 = vld [vmem:[#allocation3 + $0xb8] ss:$0 sps:$4 sm:$0x77]  }
 0x63a   : > { %v17011_v22 = vpop.f32.mrf.mxu0  ;;  %v16910_v44 = vpop.f32.mrf.mxu1  ;;  %v12340_v17 = vsel %vm22725_vm9, %v12337_v18, %v12339_v16  ;;  %v11742_v54 = vshll.u32 %v17934_v60, 16  ;;  %vm22742_vm9 = vmmov %vm22735_vm0 }
 0x63b   : > { %10645 = vst [vmem:[#allocation4 + $0xd8] sm:$0xff] %v10604_v24  ;;  %v11729_v40 = vsel %vm22724_vm14, %v11724_v51, %v11728_v27  ;;  %v9392_v24 = vld [vmem:[#allocation4 + $0x130] sm:$0xff]  ;;  %vm22741_vm14 = vmmov %vm22735_vm0 }
 0x63c   : > { %v21821_v52 = vpop.f32.mrf.mxu0  ;;  %17225 = vmatmul.mubr.bf16.gmra.mxu0 %v12338_v31  ;;  %v10519_v32 = vpop.f32.mrf.mxu1  ;;  %v10054_v41 = vadd.f32 %v21480_v15, %v9392_v24 }
 0x63d   : > { %17228 = vmatprep.mubr.msk.bf16.mxu0 %vm22360_vm12, %v22698_v28  ;;  %v10605_v50 = vadd.f32 %v10519_v32, %v10052_v59  ;;  %v11736_v32 = vrot.slane %v11734_v56, 1 }
 0x63e   : > { %v17014_v55 = vpop.f32.mrf.mxu0  ;;  %v16911_v2 = vpop.f32.mrf.mxu1 }
 0x63f   : > { %10646 = vst [vmem:[#allocation4 + $0xa0] sm:$0xff] %v10605_v50  ;;  %v9393_v55 = vld [vmem:[#allocation4 + $0x50] sm:$0xff] }
 0x640   : > { %v21827_v10 = vpop.f32.mrf.mxu0  ;;  %v10524_v37 = vpop.f32.mrf.mxu1  ;;  %17125 = vmatmul.mubr.bf16.gmra.mxu1 %v11729_v40  ;;  %v12341_v40 = vrot.slane %v17932_v9, 1  ;;  %v10055_v15 = vadd.f32 %v21485_v8, %v9393_v55 }
 0x641   : > { %v10606_v22 = vadd.f32 %v10524_v37, %v10053_v26  ;;  %17128 = vmatprep.mubr.msk.bf16.mxu1 %vm22360_vm12, %v22698_v28  ;;  %v11732_v26 = vor.u32 %v11730_v25, %v11728_v27 }
 0x642   : > { %v17015_v44 = vpop.f32.mrf.mxu0  ;;  %v16914_v31 = vpop.f32.mrf.mxu1  ;;  %v12342_v9 = vsel %vm22727_vm13, %v12339_v16, %v12341_v40  ;;  %vm22747_vm13 = vmmov %vm22735_vm0 }
 0x643   : > { %10647 = vst [vmem:[#allocation4 + $0x68] sm:$0xff] %v10606_v22  ;;  %v11737_v24 = vsel %vm22726_vm11, %v11732_v26, %v11736_v32  ;;  %v9394_v22 = vld [vmem:[#allocation4 + $0xe8] sm:$0xff]  ;;  %vm22744_vm11 = vmmov %vm22735_vm0 }
 0x644   : > { %v21834_v59 = vpop.f32.mrf.mxu0  ;;  %17229 = vmatmul.mubr.bf16.gmra.mxu0 %v12340_v17  ;;  %v10527_v50 = vpop.f32.mrf.mxu1  ;;  %v11738_v17 = vshrl.u32 %v17931_v57, 16  ;;  %v10056_v8 = vadd.f32 %v21489_v47, %v9394_v22 }
 0x645   : > { %17232 = vmatprep.mubr.msk.bf16.mxu0 %vm22360_vm12, %v22698_v28  ;;  %v10607_v51 = vadd.f32 %v10527_v50, %v10054_v41  ;;  %v11744_v50 = vrot.slane %v11742_v54, 1  ;;  %v11746_v54 = vshrl.u32 %v17934_v60, 16 }
 0x646   : > { %v17018_v2 = vpop.f32.mrf.mxu0  ;;  %v16915_v18 = vpop.f32.mrf.mxu1  ;;  %v11740_v25 = vor.u32 %v11738_v17, %v11736_v32  ;;  %v9396_v32 = vld [vmem:[#allocation4 + $0x40] sm:$0xff] }
 0x647   : > { %10648 = vst [vmem:[#allocation4 + $0x130] sm:$0xff] %v10607_v51  ;;  %v9395_v51 = vld [vmem:[#allocation4] sm:$0xff]  ;;  %v10058_v17 = vadd.f32 %v21498_v12, %v9396_v32  ;;  %v17937_v32 = vld [vmem:[#allocation3 + $0x28] sm:$0xff]  }
 0x648   : > { %v21840_v37 = vpop.f32.mrf.mxu0  ;;  %v10532_v56 = vpop.f32.mrf.mxu1  ;;  %17129 = vmatmul.mubr.bf16.gmra.mxu1 %v11737_v24  ;;  %v10057_v57 = vadd.f32 %v21494_v48, %v9395_v51  ;;  %v11745_v47 = vsel %vm22728_vm1, %v11740_v25, %v11744_v50  ;;  %v9397_v25 = vld [vmem:[#allocation4 + $0x78] sm:$0xff]  ;;  %vm22749_vm1 = vmmov %vm22735_vm0 }
 0x649   : > { %v10608_v44 = vadd.f32 %v10532_v56, %v10055_v15  ;;  %17132 = vmatprep.mubr.msk.bf16.mxu1 %vm22360_vm12, %v22698_v28  ;;  %v17936_v15 = vld [vmem:[#allocation3 + $0x20] sm:$0xff]  }
 0x64a   : > { %v17019_v31 = vpop.f32.mrf.mxu0  ;;  %v16918_v27 = vpop.f32.mrf.mxu1 }
 0x64b   : > { %10649 = vst [vmem:[#allocation4 + $0x50] sm:$0xff] %v10608_v44  ;;  %v17935_v44 = vld [vmem:[#allocation3 + $0x18] sm:$0xfe]   ;;  %v12905_v27 = vshrl.u32 %v17936_v15, 16 }
 0x64c   : > { %v21847_v41 = vpop.f32.mrf.mxu0  ;;  %17233 = vmatmul.mubr.bf16.gmra.mxu0 %v12342_v9  ;;  %v10535_v55 = vpop.f32.mrf.mxu1  ;;  %v12908_v9 = vshll.u32 %v17936_v15, 16  ;;  %v9398_v15 = vld [vmem:[#allocation4 + $0x30] sm:$0xff] }
 0x64d   : > { %17236 = vmatprep.mubr.msk.bf16.mxu0 %vm22360_vm12, %v22698_v28  ;;  %v10609_v2 = vadd.f32 %v10535_v55, %v10056_v8  ;;  %v11748_v55 = vor.u32 %v11746_v54, %v11744_v50 }
 0x64e   : > { %v17022_v26 = vpop.f32.mrf.mxu0  ;;  %v16919_v18 = vpop.f32.mrf.mxu1  ;;  %v12910_v12 = vrot.slane %v12908_v9, 2  ;;  %v12917_v9 = vshll.u32 %v17937_v32, 16 }
 0x64f   : > { %10650 = vst [vmem:[#allocation4 + $0xe8] sm:$0xff] %v10609_v2  ;;  %v12897_v2 = vshrl.u32 %v17935_v44, 16  ;;  %v12900_v26 = vshll.u32 %v17935_v44, 16 }
 0x650   : > { %v21852_v16 = vpop.f32.mrf.mxu0  ;;  %v10540_v24 = vpop.f32.mrf.mxu1  ;;  %17133 = vmatmul.mubr.bf16.gmra.mxu1 %v11745_v47 }
 0x651   : > { %v10610_v56 = vadd.f32 %v10540_v24, %v10057_v57  ;;  %17136 = vmatprep.mubr.msk.bf16.mxu1 %vm22360_vm12, %v22698_v28  ;;  %v10059_v57 = vadd.f32 %v21502_v29, %v9397_v25  ;;  %v12907_v24 = vrot.slane %v12905_v27, 1  ;;  %v12899_v50 = vrot.slane %v12897_v2, 1  ;;  %v9399_v25 = vld [vmem:[#allocation4 + $0xb8] sm:$0xff] }
 0x652   : > { %v17023_v22 = vpop.f32.mrf.mxu0  ;;  %v16922_v31 = vpop.f32.mrf.mxu1  ;;  %v12902_v54 = vrot.slane %v12900_v26, 2  ;;  %v12914_v27 = vshrl.u32 %v17937_v32, 16 }
 0x653   : > { %10651 = vst [vmem:[#allocation4] sm:$0xff] %v10610_v56  ;;  %v10060_v31 = vadd.f32 %v21508_v36, %v9398_v15  ;;  %v12919_v36 = vrot.slane %v12917_v9, 2  ;;  %v17938_v15 = vld [vmem:[#allocation3 + $0x30] sm:$0xff]   ;;  %v9401_v9 = vld [vmem:[#allocation4 + $0x28] sm:$0xff] }
 0x654   : > { %v21858_v48 = vpop.f32.mrf.mxu0  ;;  %17237 = vmatmul.mubr.bf16.gmra.mxu0 %v12341_v40  ;;  %v10543_v8 = vpop.f32.mrf.mxu1 }
 0x655   : > { %v10611_v51 = vadd.f32 %v10543_v8, %v10058_v17  ;;  %v12911_v17 = vor.u32 %v12910_v12, %v12907_v24  ;;  %v9400_v24 = vld [vmem:[#allocation4 + $0x60] sm:$0xff] }
 0x656   : > { %v17026_v60 = vpop.f32.mrf.mxu0  ;;  %v16923_v18 = vpop.f32.mrf.mxu1 }
 0x657   : > { %10652 = vst [vmem:[#allocation4 + $0x40] sm:$0xff] %v10611_v51  ;;  %v12903_v60 = vor.u32 %v12902_v54, %v12899_v50  ;;  %v10062_v50 = vadd.f32 %v21526_v19, %v9400_v24  ;;  %v17939_v19 = vld [vmem:[#allocation3 + $0x38] sm:$0xff]  }
 0x658   : > { %v21861_v47 = vpop.f32.mrf.mxu0  ;;  %v10548_v56 = vpop.f32.mrf.mxu1  ;;  %17137 = vmatmul.mubr.bf16.gmra.mxu1 %v11748_v55 }
 0x659   : > { %v10612_v40 = vadd.f32 %v10548_v56, %v10059_v57  ;;  %17256 = vmatprep.mubr.msk.bf16.mxu1 %vm22360_vm12, %v22698_v28  ;;  %v10061_v57 = vadd.f32 %v21516_v61, %v9399_v25  ;;  %v12912_v26 = vsel %vm22729_vm4, %v12903_v60, %v12911_v17  ;;  %v12916_v56 = vrot.slane %v12914_v27, 1  ;;  %vm22750_vm4 = vmmov %vm22735_vm0 }
 0x65a   : > { %v17027_v22 = vpop.f32.mrf.mxu0  ;;  %v16926_v44 = vpop.f32.mrf.mxu1 }
 0x65b   : > { %10653 = vst [vmem:[#allocation4 + $0x78] sm:$0xff] %v10612_v40  ;;  %v12920_v54 = vor.u32 %v12919_v36, %v12916_v56  ;;  %v12923_v44 = vshrl.u32 %v17938_v15, 16  ;;  %v9402_v56 = vld [vmem:[#allocation4 + $0x140] sm:$0xff] }
 0x65c   : > { %v21866_v29 = vpop.f32.mrf.mxu0  ;;  %v10551_v8 = vpop.f32.mrf.mxu1 }
 0x65d   : > { %v10613_v55 = vadd.f32 %v10551_v8, %v10060_v31  ;;  %v12926_v31 = vshll.u32 %v17938_v15, 16 }
 0x65e   : > { %v17030_v51 = vpop.f32.mrf.mxu0  ;;  %v16927_v18 = vpop.f32.mrf.mxu1 }
 0x65f   : > { %10654 = vst [vmem:[#allocation4 + $0x30] sm:$0xff] %v10613_v55  ;;  %v10063_v51 = vadd.f32 %v21539_v30, %v9401_v9  ;;  %v12921_v18 = vsel %vm22730_vm5, %v12911_v17, %v12920_v54  ;;  %vm22751_vm5 = vmmov %vm22735_vm0 }
 0x660   : > { %v21869_v2 = vpop.f32.mrf.mxu0  ;;  %v10556_v40 = vpop.f32.mrf.mxu1  ;;  %17257 = vmatmul.mubr.bf16.vlgmr.msra.gmra.mxu1 %v12912_v26  ;;  %v12928_v26 = vrot.slane %v12926_v31, 2 }
 0x661   : > { %v10614_v12 = vadd.f32 %v10556_v40, %v10061_v57  ;;  %17260 = vmatprep.mubr.msk.bf16.mxu1 %vm22360_vm12, %v22698_v28  ;;  %v12925_v57 = vrot.slane %v12923_v44, 1 }
 0x662   : > { %v17031_v32 = vpop.f32.mrf.mxu0  ;;  %v16930_v22 = vpop.f32.mrf.mxu1 }
 0x663   : > { %10655 = vst [vmem:[#allocation4 + $0xb8] sm:$0xff] %v10614_v12  ;;  %v10064_v12 = vadd.f32 %v21551_v5, %v9402_v56  ;;  %v12929_v32 = vor.u32 %v12928_v26, %v12925_v57  ;;  %v12932_v22 = vshrl.u32 %v17939_v19, 16 }
 0x664   : > { %v21875_v61 = vpop.f32.mrf.mxu0  ;;  %v10559_v27 = vpop.f32.mrf.mxu1 }
 0x665   : > { %v10615_v8 = vadd.f32 %v10559_v27, %v10062_v50  ;;  %v12935_v50 = vshll.u32 %v17939_v19, 16 }
 0x666   : > { %v17034_v25 = vpop.f32.mrf.mxu0  ;;  %v16931_v55 = vpop.f32.mrf.mxu1 }
 0x667   : > { %10656 = vst [vmem:[#allocation4 + $0x60] sm:$0xff] %v10615_v8  ;;  %v12930_v8 = vsel %vm22731_vm7, %v12920_v54, %v12929_v32  ;;  %v12934_v25 = vrot.slane %v12932_v22, 1  ;;  %v12937_v55 = vrot.slane %v12935_v50, 2  ;;  %v10660_v54 = vld [vmem:[#allocation4 + $0xb0] sm:$0xff]  ;;  %vm22752_vm7 = vmmov %vm22735_vm0 }
 0x668   : > { %v21878_v60 = vpop.f32.mrf.mxu0  ;;  %v10564_v40 = vpop.f32.mrf.mxu1  ;;  %17261 = vmatmul.mubr.bf16.gmra.mxu1 %v12921_v18  ;;  %v10147_v18 = vld [vmem:[#allocation4 + $0x58] sm:$0xf]  ;;  %v17941_v50 = vld [vmem:[#allocation3 + $0x48] sm:$0xff]  }
 0x669   : > { %v10616_v36 = vadd.f32 %v10564_v40, %v10063_v51  ;;  %17264 = vmatprep.mubr.msk.bf16.mxu1 %vm22360_vm12, %v22698_v28  ;;  %v17940_v51 = vld [vmem:[#allocation3 + $0x40] sm:$0xff]   ;;  %v12938_v19 = vor.u32 %v12937_v55, %v12934_v25 }
 0x66a   : > { %v17035_v15 = vpop.f32.mrf.mxu0  ;;  %v16934_v24 = vpop.f32.mrf.mxu1  ;;  %v12941_v56 = vshrl.u32 %v17940_v51, 16 }
 0x66b   : > { %10657 = vst [vmem:[#allocation4 + $0x28] sm:$0xff] %v10616_v36  ;;  %v12944_v15 = vshll.u32 %v17940_v51, 16 }
 0x66c   : > { %v11292_v30 = vpop.f32.mrf.mxu0  ;;  %v10567_v17 = vpop.f32.mrf.mxu1 }
 0x66d   : > { %v10617_v44 = vadd.f32 %v10567_v17, %v10064_v12  ;;  %v11298_v17 = vadd.f32 %v21587_v7, %v10660_v54  ;;  %v22733_v7 = vld [vmem:[#allocation5_spill] sm:$0xff]  ;;  %v10662_v54 = vld [vmem:[#allocation4 + $0x10] sm:$0xff] }
 0x66e   : > { %v17038_v31 = vpop.f32.mrf.mxu0  ;;  %v16935_v27 = vpop.f32.mrf.mxu1 }
 0x66f   : > { %10658 = vst [vmem:[#allocation4 + $0x140] sm:$0xff] %v10617_v44  ;;  %v12939_v31 = vsel %vm22732_vm6, %v12929_v32, %v12938_v19  ;;  %v12943_v27 = vrot.slane %v12941_v56, 1  ;;  %v12953_v56 = vshll.u32 %v17941_v50, 16  ;;  %vm22753_vm6 = vmmov %vm22735_vm0 }
 0x670   : > { %v11295_v9 = vpop.f32.mrf.mxu0  ;;  %v10572_v40 = vpop.f32.mrf.mxu1  ;;  %17265 = vmatmul.mubr.bf16.gmra.mxu1 %v12930_v8 }
 0x671   : > { %v10618_v36 = vadd.f32 %v10572_v40, %v10147_v18  ;;  %17268 = vmatprep.mubr.msk.bf16.mxu1 %vm22360_vm12, %v22698_v28  ;;  %v12946_v9 = vrot.slane %v12944_v15, 2  ;;  %v10661_v18 = vld [vmem:[#allocation4 + $0xd0] sm:$0xff] }
 0x672   : > { %v17039_v5 = vpop.f32.mrf.mxu0  ;;  %v16938_v57 = vpop.f32.mrf.mxu1 }
 0x673   : > { %10659 = vst [vmem:[#allocation4 + $0x58] sm:$0xf] %v10618_v36  ;;  %v12950_v36 = vshrl.u32 %v17941_v50, 16  ;;  %v11299_v57 = vadd.f32 %v22733_v7, %v10661_v18  ;;  %v12947_v32 = vor.u32 %v12946_v9, %v12943_v27  ;;  %v17942_v18 = vld [vmem:[#allocation3 + $0x50] sm:$0xff]   ;;  %v10663_v27 = vld [vmem:[#allocation4 + $0x48] sm:$0xff] }
 0x674   : > { %v21887_v26 = vpop.f32.mrf.mxu0  ;;  %v10575_v24 = vpop.f32.mrf.mxu1  ;;  %v11301_v7 = vadd.f32 %v21620_v34, %v10663_v27  ;;  %v17943_v34 = vld [vmem:[#allocation3 + $0x58] sm:$0xff]  }
 0x676   : > { %v17158_v12 = vpop.f32.mrf.mxu0  ;;  %v16939_v22 = vpop.f32.mrf.mxu1 }
 0x678   : > { %v21890_v44 = vpop.f32.mrf.mxu0  ;;  %v11852_v8 = vpop.f32.mrf.mxu1  ;;  %17269 = vmatmul.mubr.bf16.gmra.mxu1 %v12939_v31  ;;  %v22734_v31 = vld [vmem:[#allocation6_spill] sm:$0xff] }
 0x679   : > { %v12018_v40 = vadd.f32 %v11852_v8, %v11298_v17  ;;  %17272 = vmatprep.mubr.msk.bf16.mxu1 %vm22360_vm12, %v22698_v28  ;;  %v11300_v8 = vadd.f32 %v22734_v31, %v10662_v54  ;;  %v12959_v54 = vshrl.u32 %v17942_v18, 16 }
 0x67a   : > { %v17159_v25 = vpop.f32.mrf.mxu0  ;;  %v10700_v55 = vld [vmem:[#allocation4 + $0x58] sm:$0xf]  ;;  %v17058_v51 = vpop.f32.mrf.mxu1 }
 0x67b   : > { %v11338_v5 = vadd.f32 %v11292_v30, %v10700_v55  ;;  %12059 = vst [vmem:[#allocation4 + $0xb0] sm:$0xff] %v12018_v40  ;;  %v12948_v30 = vsel %vm22735_vm0, %v12938_v19, %v12947_v32  ;;  %v12952_v40 = vrot.slane %v12950_v36, 1  ;;  %v12955_v55 = vrot.slane %v12953_v56, 2  ;;  %v10664_v56 = vld [vmem:[#allocation4 + $0x120] sm:$0xff] }
 0x67c   : > { %v21896_v24 = vpop.f32.mrf.mxu0  ;;  %v11855_v15 = vpop.f32.mrf.mxu1  ;;  %v12962_v19 = vshll.u32 %v17942_v18, 16  ;;  %v11302_v31 = vadd.f32 %v21628_v0, %v10664_v56 }
 0x67d   : > { %11379 = vst [vmem:[#allocation4 + $0x58] sm:$0xf] %v11338_v5  ;;  %v12019_v12 = vadd.f32 %v11855_v15, %v11299_v57  ;;  %v12956_v15 = vor.u32 %v12955_v55, %v12952_v40  ;;  %v10665_v40 = vld [vmem:[#allocation4 + $0x38] sm:$0xff] }
 0x67e   : > { %v17162_v22 = vpop.f32.mrf.mxu0  ;;  %v17059_v17 = vpop.f32.mrf.mxu1 }
 0x67f   : > { %12060 = vst [vmem:[#allocation4 + $0xd0] sm:$0xff] %v12019_v12 }
 0x680   : > { %v21899_v25 = vpop.f32.mrf.mxu0  ;;  %v11860_v51 = vpop.f32.mrf.mxu1  ;;  %17273 = vmatmul.mubr.bf16.gmra.mxu1 %v12948_v30  ;;  %v12957_v30 = vsel %vm22736_vm3, %v12947_v32, %v12956_v15  ;;  %v12971_v32 = vshll.u32 %v17943_v34, 16 }
 0x681   : > { %v12020_v50 = vadd.f32 %v11860_v51, %v11300_v8  ;;  %17276 = vmatprep.mubr.msk.bf16.mxu1 %vm22360_vm12, %v22698_v28  ;;  %v12961_v51 = vrot.slane %v12959_v54, 1 }
 0x682   : > { %v17163_v9 = vpop.f32.mrf.mxu0  ;;  %v17062_v5 = vpop.f32.mrf.mxu1 }
 0x683   : > { %12061 = vst [vmem:[#allocation4 + $0x10] sm:$0xff] %v12020_v50  ;;  %v12964_v50 = vrot.slane %v12962_v19, 2  ;;  %v11303_v5 = vadd.f32 %v21636_v20, %v10665_v40  ;;  %v10666_v19 = vld [vmem:[#allocation4 + $0xf8] sm:$0xff]  ;;  %v17944_v20 = vld [vmem:[#allocation3 + $0x60] sm:$0xff]  }
 0x684   : > { %v21905_v57 = vpop.f32.mrf.mxu0  ;;  %v11863_v36 = vpop.f32.mrf.mxu1 }
 0x685   : > { %v12021_v12 = vadd.f32 %v11863_v36, %v11301_v7  ;;  %v12965_v7 = vor.u32 %v12964_v50, %v12961_v51  ;;  %v12968_v36 = vshrl.u32 %v17943_v34, 16  ;;  %v10667_v51 = vld [vmem:[#allocation4 + $0x100] sm:$0xff] }
 0x686   : > { %v17166_v22 = vpop.f32.mrf.mxu0  ;;  %v17063_v17 = vpop.f32.mrf.mxu1 }
 0x687   : > { %12062 = vst [vmem:[#allocation4 + $0x48] sm:$0xff] %v12021_v12  ;;  %v11304_v17 = vadd.f32 %v21644_v49, %v10666_v19 }
 0x688   : > { %v21908_v8 = vpop.f32.mrf.mxu0  ;;  %v11868_v27 = vpop.f32.mrf.mxu1  ;;  %17277 = vmatmul.mubr.bf16.gmra.mxu1 %v12957_v30  ;;  %v12966_v30 = vsel %vm22737_vm8, %v12956_v15, %v12965_v7  ;;  %v12980_v15 = vshll.u32 %v17944_v20, 16 }
 0x689   : > { %v12022_v55 = vadd.f32 %v11868_v27, %v11302_v31  ;;  %17280 = vmatprep.mubr.msk.bf16.mxu1 %vm22360_vm12, %v22698_v28  ;;  %v12970_v27 = vrot.slane %v12968_v36, 1 }
 0x68a   : > { %v17167_v18 = vpop.f32.mrf.mxu0  ;;  %v17066_v9 = vpop.f32.mrf.mxu1 }
 0x68b   : > { %12063 = vst [vmem:[#allocation4 + $0x120] sm:$0xff] %v12022_v55  ;;  %v12973_v55 = vrot.slane %v12971_v32, 2  ;;  %v11305_v9 = vadd.f32 %v21652_v4, %v10667_v51  ;;  %v10668_v32 = vld [vmem:[#allocation4 + $0x80] sm:$0xff]  ;;  %v17945_v4 = vld [vmem:[#allocation3 + $0x68] sm:$0xff]  }
 0x68c   : > { %v21914_v0 = vpop.f32.mrf.mxu0  ;;  %v11871_v54 = vpop.f32.mrf.mxu1 }
 0x68d   : > { %v12023_v56 = vadd.f32 %v11871_v54, %v11303_v5  ;;  %v12974_v5 = vor.u32 %v12973_v55, %v12970_v27  ;;  %v12977_v54 = vshrl.u32 %v17944_v20, 16  ;;  %v10669_v27 = vld [vmem:[#allocation4 + $0x108] sm:$0xff] }
 0x68e   : > { %v17170_v12 = vpop.f32.mrf.mxu0  ;;  %v17067_v22 = vpop.f32.mrf.mxu1 }
 0x68f   : > { %12064 = vst [vmem:[#allocation4 + $0x38] sm:$0xff] %v12023_v56  ;;  %v11306_v22 = vadd.f32 %v21660_v63, %v10668_v32 }
 0x690   : > { %v21917_v31 = vpop.f32.mrf.mxu0  ;;  %v11876_v40 = vpop.f32.mrf.mxu1  ;;  %17281 = vmatmul.mubr.bf16.gmra.mxu1 %v12966_v30  ;;  %v12975_v30 = vsel %vm22738_vm10, %v12965_v7, %v12974_v5  ;;  %v12989_v7 = vshll.u32 %v17945_v4, 16 }
 0x691   : > { %v12024_v50 = vadd.f32 %v11876_v40, %v11304_v17  ;;  %17284 = vmatprep.mubr.msk.bf16.mxu1 %vm22360_vm12, %v22698_v28  ;;  %v12979_v40 = vrot.slane %v12977_v54, 1 }
 0x692   : > { %v17171_v34 = vpop.f32.mrf.mxu0  ;;  %v17070_v18 = vpop.f32.mrf.mxu1 }
 0x693   : > { %12065 = vst [vmem:[#allocation4 + $0xf8] sm:$0xff] %v12024_v50  ;;  %v12982_v50 = vrot.slane %v12980_v15, 2  ;;  %v11307_v18 = vadd.f32 %v21668_v35, %v10669_v27  ;;  %v10670_v15 = vld [vmem:[#allocation4 + $0x138] sm:$0xff] }
 0x694   : > { %v21923_v49 = vpop.f32.mrf.mxu0  ;;  %v11879_v36 = vpop.f32.mrf.mxu1  ;;  %v17946_v35 = vld [vmem:[#allocation3 + $0x70] sm:$0xff]  }
 0x695   : > { %v12025_v19 = vadd.f32 %v11879_v36, %v11305_v9  ;;  %v12983_v9 = vor.u32 %v12982_v50, %v12979_v40  ;;  %v12986_v36 = vshrl.u32 %v17945_v4, 16  ;;  %v10671_v40 = vld [vmem:[#allocation4 + $0xf0] sm:$0xff] }
 0x696   : > { %v17174_v56 = vpop.f32.mrf.mxu0  ;;  %v17071_v12 = vpop.f32.mrf.mxu1 }
 0x697   : > { %12066 = vst [vmem:[#allocation4 + $0x100] sm:$0xff] %v12025_v19  ;;  %v11308_v12 = vadd.f32 %v21677_v62, %v10670_v15 }
 0x698   : > { %v21926_v17 = vpop.f32.mrf.mxu0  ;;  %v11884_v51 = vpop.f32.mrf.mxu1  ;;  %17285 = vmatmul.mubr.bf16.gmra.mxu1 %v12975_v30  ;;  %v12984_v30 = vsel %vm22739_vm2, %v12974_v5, %v12983_v9  ;;  %v12998_v5 = vshll.u32 %v17946_v35, 16 }
 0x699   : > { %v12026_v55 = vadd.f32 %v11884_v51, %v11306_v22  ;;  %17288 = vmatprep.mubr.msk.bf16.mxu1 %vm22360_vm12, %v22698_v28  ;;  %v12988_v51 = vrot.slane %v12986_v36, 1 }
 0x69a   : > { %v17175_v20 = vpop.f32.mrf.mxu0  ;;  %v17074_v34 = vpop.f32.mrf.mxu1 }
 0x69b   : > { %12067 = vst [vmem:[#allocation4 + $0x80] sm:$0xff] %v12026_v55  ;;  %v12991_v55 = vrot.slane %v12989_v7, 2  ;;  %v11309_v34 = vadd.f32 %v21685_v39, %v10671_v40  ;;  %v10672_v7 = vld [vmem:[#allocation4 + $0x18] sm:$0xff] }
 0x69c   : > { %v21932_v63 = vpop.f32.mrf.mxu0  ;;  %v11887_v54 = vpop.f32.mrf.mxu1  ;;  %v17947_v39 = vld [vmem:[#allocation3 + $0x78] sm:$0xff]  }
 0x69d   : > { %v12027_v32 = vadd.f32 %v11887_v54, %v11307_v18  ;;  %v12992_v18 = vor.u32 %v12991_v55, %v12988_v51  ;;  %v12995_v54 = vshrl.u32 %v17946_v35, 16  ;;  %v10673_v51 = vld [vmem:[#allocation4 + $0xc8] sm:$0xff] }
 0x69e   : > { %v17178_v19 = vpop.f32.mrf.mxu0  ;;  %v17075_v56 = vpop.f32.mrf.mxu1 }
 0x69f   : > { %12068 = vst [vmem:[#allocation4 + $0x108] sm:$0xff] %v12027_v32  ;;  %v11310_v56 = vadd.f32 %v21693_v33, %v10672_v7 }
 0x6a0   : > { %v21935_v22 = vpop.f32.mrf.mxu0  ;;  %v11892_v27 = vpop.f32.mrf.mxu1  ;;  %17289 = vmatmul.mubr.bf16.gmra.mxu1 %v12984_v30  ;;  %v12993_v30 = vsel %vm22740_vm15, %v12983_v9, %v12992_v18  ;;  %v13007_v9 = vshll.u32 %v17947_v39, 16 }
 0x6a1   : > { %v12028_v50 = vadd.f32 %v11892_v27, %v11308_v12  ;;  %17292 = vmatprep.mubr.msk.bf16.mxu1 %vm22360_vm12, %v22698_v28  ;;  %v12997_v27 = vrot.slane %v12995_v54, 1 }
 0x6a2   : > { %v17179_v4 = vpop.f32.mrf.mxu0  ;;  %v17078_v20 = vpop.f32.mrf.mxu1 }
 0x6a3   : > { %12069 = vst [vmem:[#allocation4 + $0x138] sm:$0xff] %v12028_v50  ;;  %v13000_v50 = vrot.slane %v12998_v5, 2  ;;  %v11311_v20 = vadd.f32 %v21701_v45, %v10673_v51  ;;  %v10674_v5 = vld [vmem:[#allocation4 + $0x70] sm:$0xff]  ;;  %v17948_v45 = vld [vmem:[#allocation3 + $0x80] sm:$0xff]  }
 0x6a4   : > { %v21941_v62 = vpop.f32.mrf.mxu0  ;;  %v11895_v36 = vpop.f32.mrf.mxu1 }
 0x6a5   : > { %v12029_v15 = vadd.f32 %v11895_v36, %v11309_v34  ;;  %v13001_v34 = vor.u32 %v13000_v50, %v12997_v27  ;;  %v13004_v36 = vshrl.u32 %v17947_v39, 16  ;;  %v10675_v27 = vld [vmem:[#allocation4 + $0x20] sm:$0xff] }
 0x6a6   : > { %v17182_v32 = vpop.f32.mrf.mxu0  ;;  %v17079_v19 = vpop.f32.mrf.mxu1 }
 0x6a7   : > { %12070 = vst [vmem:[#allocation4 + $0xf0] sm:$0xff] %v12029_v15  ;;  %v11312_v19 = vadd.f32 %v21709_v23, %v10674_v5 }
 0x6a8   : > { %v21944_v12 = vpop.f32.mrf.mxu0  ;;  %v11900_v40 = vpop.f32.mrf.mxu1  ;;  %17293 = vmatmul.mubr.bf16.gmra.mxu1 %v12993_v30  ;;  %v13002_v30 = vsel %vm22741_vm14, %v12992_v18, %v13001_v34  ;;  %v13016_v18 = vshll.u32 %v17948_v45, 16 }
 0x6a9   : > { %v12030_v55 = vadd.f32 %v11900_v40, %v11310_v56  ;;  %17296 = vmatprep.mubr.msk.bf16.mxu1 %vm22360_vm12, %v22698_v28  ;;  %v13006_v40 = vrot.slane %v13004_v36, 1 }
 0x6aa   : > { %v17183_v35 = vpop.f32.mrf.mxu0  ;;  %v17082_v4 = vpop.f32.mrf.mxu1 }
 0x6ab   : > { %12071 = vst [vmem:[#allocation4 + $0x18] sm:$0xff] %v12030_v55  ;;  %v13009_v55 = vrot.slane %v13007_v9, 2  ;;  %v11313_v4 = vadd.f32 %v21717_v38, %v10675_v27  ;;  %v10676_v9 = vld [vmem:[#allocation4 + $0x128] sm:$0xff] }
 0x6ac   : > { %v21950_v33 = vpop.f32.mrf.mxu0  ;;  %v11903_v54 = vpop.f32.mrf.mxu1  ;;  %v17949_v38 = vld [vmem:[#allocation3 + $0x88] sm:$0xff]  }
 0x6ad   : > { %v12031_v7 = vadd.f32 %v11903_v54, %v11311_v20  ;;  %v13010_v20 = vor.u32 %v13009_v55, %v13006_v40  ;;  %v13013_v54 = vshrl.u32 %v17948_v45, 16  ;;  %v10677_v40 = vld [vmem:[#allocation4 + $0x110] sm:$0xff] }
 0x6ae   : > { %v17186_v15 = vpop.f32.mrf.mxu0  ;;  %v17083_v32 = vpop.f32.mrf.mxu1 }
 0x6af   : > { %12072 = vst [vmem:[#allocation4 + $0xc8] sm:$0xff] %v12031_v7  ;;  %v11314_v32 = vadd.f32 %v21725_v14, %v10676_v9 }
 0x6b0   : > { %v21953_v56 = vpop.f32.mrf.mxu0  ;;  %v11908_v51 = vpop.f32.mrf.mxu1  ;;  %17297 = vmatmul.mubr.bf16.gmra.mxu1 %v13002_v30  ;;  %v13011_v30 = vsel %vm22742_vm9, %v13001_v34, %v13010_v20  ;;  %v13025_v34 = vshll.u32 %v17949_v38, 16 }
 0x6b1   : > { %v12032_v50 = vadd.f32 %v11908_v51, %v11312_v19  ;;  %17300 = vmatprep.mubr.msk.bf16.mxu1 %vm22360_vm12, %v22698_v28  ;;  %v13015_v51 = vrot.slane %v13013_v54, 1 }
 0x6b2   : > { %v17187_v39 = vpop.f32.mrf.mxu0  ;;  %v17086_v35 = vpop.f32.mrf.mxu1 }
 0x6b3   : > { %12073 = vst [vmem:[#allocation4 + $0x70] sm:$0xff] %v12032_v50  ;;  %v13018_v50 = vrot.slane %v13016_v18, 2  ;;  %v11315_v35 = vadd.f32 %v21733_v21, %v10677_v40  ;;  %v10678_v18 = vld [vmem:[#allocation4 + $0x8] sm:$0xff]  ;;  %v17950_v21 = vld [vmem:[#allocation3 + $0x90] sm:$0xff]  }
 0x6b4   : > { %v21959_v23 = vpop.f32.mrf.mxu0  ;;  %v11911_v36 = vpop.f32.mrf.mxu1 }
 0x6b5   : > { %v12033_v5 = vadd.f32 %v11911_v36, %v11313_v4  ;;  %v13019_v4 = vor.u32 %v13018_v50, %v13015_v51  ;;  %v13022_v36 = vshrl.u32 %v17949_v38, 16  ;;  %v10679_v51 = vld [vmem:[#allocation4 + $0x98] sm:$0xff] }
 0x6b6   : > { %v17190_v7 = vpop.f32.mrf.mxu0  ;;  %v17087_v15 = vpop.f32.mrf.mxu1 }
 0x6b7   : > { %12074 = vst [vmem:[#allocation4 + $0x20] sm:$0xff] %v12033_v5  ;;  %v11316_v15 = vadd.f32 %v21741_v53, %v10678_v18 }
 0x6b8   : > { %v21962_v19 = vpop.f32.mrf.mxu0  ;;  %v11916_v27 = vpop.f32.mrf.mxu1  ;;  %17301 = vmatmul.mubr.bf16.gmra.mxu1 %v13011_v30  ;;  %v13020_v30 = vsel %vm22744_vm11, %v13010_v20, %v13019_v4  ;;  %v13034_v20 = vshll.u32 %v17950_v21, 16 }
 0x6b9   : > { %v12034_v55 = vadd.f32 %v11916_v27, %v11314_v32  ;;  %17304 = vmatprep.mubr.msk.bf16.mxu1 %vm22360_vm12, %v22698_v28  ;;  %v13024_v27 = vrot.slane %v13022_v36, 1 }
 0x6ba   : > { %v17191_v45 = vpop.f32.mrf.mxu0  ;;  %v17090_v39 = vpop.f32.mrf.mxu1 }
 0x6bb   : > { %12075 = vst [vmem:[#allocation4 + $0x128] sm:$0xff] %v12034_v55  ;;  %v13027_v55 = vrot.slane %v13025_v34, 2  ;;  %v11317_v39 = vadd.f32 %v21749_v1, %v10679_v51  ;;  %v10680_v34 = vld [vmem:[#allocation4 + $0xa8] sm:$0xff]  ;;  %v17951_v1 = vld [vmem:[#allocation3 + $0x98] sm:$0xff]  }
 0x6bc   : > { %v21968_v14 = vpop.f32.mrf.mxu0  ;;  %v11919_v54 = vpop.f32.mrf.mxu1 }
 0x6bd   : > { %v12035_v9 = vadd.f32 %v11919_v54, %v11315_v35  ;;  %v13028_v35 = vor.u32 %v13027_v55, %v13024_v27  ;;  %v13031_v54 = vshrl.u32 %v17950_v21, 16  ;;  %v10681_v27 = vld [vmem:[#allocation4 + $0x90] sm:$0xff] }
 0x6be   : > { %v17194_v5 = vpop.f32.mrf.mxu0  ;;  %v17091_v7 = vpop.f32.mrf.mxu1 }
 0x6bf   : > { %12076 = vst [vmem:[#allocation4 + $0x110] sm:$0xff] %v12035_v9  ;;  %v11318_v7 = vadd.f32 %v21757_v58, %v10680_v34 }
 0x6c0   : > { %v21971_v32 = vpop.f32.mrf.mxu0  ;;  %v11924_v40 = vpop.f32.mrf.mxu1  ;;  %17305 = vmatmul.mubr.bf16.gmra.mxu1 %v13020_v30  ;;  %v13029_v30 = vsel %vm22747_vm13, %v13019_v4, %v13028_v35  ;;  %v13043_v4 = vshll.u32 %v17951_v1, 16 }
 0x6c1   : > { %22743 = vst [vmem:[#allocation5_spill] sm:$0xff] %v21971_v32  ;;  %v12036_v50 = vadd.f32 %v11924_v40, %v11316_v15  ;;  %17308 = vmatprep.mubr.msk.bf16.mxu1 %vm22360_vm12, %v22698_v28  ;;  %v13033_v40 = vrot.slane %v13031_v54, 1 }
 0x6c2   : > { %v17195_v38 = vpop.f32.mrf.mxu0  ;;  %v17094_v45 = vpop.f32.mrf.mxu1 }
 0x6c3   : > { %12077 = vst [vmem:[#allocation4 + $0x8] sm:$0xff] %v12036_v50  ;;  %v13036_v50 = vrot.slane %v13034_v20, 2  ;;  %v11319_v45 = vadd.f32 %v21765_v42, %v10681_v27  ;;  %v10682_v20 = vld [vmem:[#allocation4 + $0xe0] sm:$0xff] }
 0x6c4   : > { %v21977_v53 = vpop.f32.mrf.mxu0  ;;  %v11927_v36 = vpop.f32.mrf.mxu1  ;;  %v17952_v42 = vld [vmem:[#allocation3 + $0xa0] sm:$0xff]  }
 0x6c5   : > { %22745 = vst [vmem:[#allocation6_spill] sm:$0xff] %v21977_v53  ;;  %v12037_v18 = vadd.f32 %v11927_v36, %v11317_v39  ;;  %v13037_v39 = vor.u32 %v13036_v50, %v13033_v40  ;;  %v13040_v36 = vshrl.u32 %v17951_v1, 16  ;;  %v10683_v40 = vld [vmem:[#allocation4 + $0x88] sm:$0xff] }
 0x6c6   : > { %v17198_v9 = vpop.f32.mrf.mxu0  ;;  %v17095_v5 = vpop.f32.mrf.mxu1 }
 0x6c7   : > { %12078 = vst [vmem:[#allocation4 + $0x98] sm:$0xff] %v12037_v18  ;;  %v11320_v5 = vadd.f32 %v21773_v11, %v10682_v20 }
 0x6c8   : > { %v21980_v15 = vpop.f32.mrf.mxu0  ;;  %v11932_v51 = vpop.f32.mrf.mxu1  ;;  %17309 = vmatmul.mubr.bf16.gmra.mxu1 %v13029_v30  ;;  %v13038_v30 = vsel %vm22749_vm1, %v13028_v35, %v13037_v39  ;;  %v13052_v35 = vshll.u32 %v17952_v42, 16 }
 0x6c9   : > { %22746 = vst [vmem:[#allocation7_spill] sm:$0xff] %v21980_v15  ;;  %v12038_v55 = vadd.f32 %v11932_v51, %v11318_v7  ;;  %17312 = vmatprep.mubr.msk.bf16.mxu1 %vm22360_vm12, %v22698_v28  ;;  %v13042_v51 = vrot.slane %v13040_v36, 1 }
 0x6ca   : > { %v17199_v21 = vpop.f32.mrf.mxu0  ;;  %v17098_v38 = vpop.f32.mrf.mxu1 }
 0x6cb   : > { %12079 = vst [vmem:[#allocation4 + $0xa8] sm:$0xff] %v12038_v55  ;;  %v13045_v55 = vrot.slane %v13043_v4, 2  ;;  %v11321_v38 = vadd.f32 %v21781_v13, %v10683_v40  ;;  %v10684_v4 = vld [vmem:[#allocation4 + $0xc0] sm:$0xff]  ;;  %v17953_v13 = vld [vmem:[#allocation3 + $0xa8] sm:$0xff]  }
 0x6cc   : > { %v21986_v58 = vpop.f32.mrf.mxu0  ;;  %v11935_v54 = vpop.f32.mrf.mxu1 }
 0x6cd   : > { %22748 = vst [vmem:[#allocation8_spill] sm:$0xff] %v21986_v58  ;;  %v12039_v34 = vadd.f32 %v11935_v54, %v11319_v45  ;;  %v13046_v45 = vor.u32 %v13045_v55, %v13042_v51  ;;  %v13049_v54 = vshrl.u32 %v17952_v42, 16  ;;  %v10685_v51 = vld [vmem:[#allocation4 + $0x118] sm:$0xff] }
 0x6ce   : > { %v17202_v18 = vpop.f32.mrf.mxu0  ;;  %v17099_v9 = vpop.f32.mrf.mxu1 }
 0x6cf   : > { %12080 = vst [vmem:[#allocation4 + $0x90] sm:$0xff] %v12039_v34  ;;  %v11322_v9 = vadd.f32 %v21789_v43, %v10684_v4 }
 0x6d0   : > { %v21989_v7 = vpop.f32.mrf.mxu0  ;;  %v11940_v27 = vpop.f32.mrf.mxu1  ;;  %17313 = vmatmul.mubr.bf16.gmra.mxu1 %v13038_v30  ;;  %v13047_v30 = vsel %vm22750_vm4, %v13037_v39, %v13046_v45  ;;  %v13061_v39 = vshll.u32 %v17953_v13, 16 }
 0x6d1   : > { %v12040_v50 = vadd.f32 %v11940_v27, %v11320_v5  ;;  %17316 = vmatprep.mubr.msk.bf16.mxu1 %vm22360_vm12, %v22698_v28  ;;  %v13051_v27 = vrot.slane %v13049_v54, 1 }
 0x6d2   : > { %v17203_v1 = vpop.f32.mrf.mxu0  ;;  %v17102_v21 = vpop.f32.mrf.mxu1 }
 0x6d3   : > { %12081 = vst [vmem:[#allocation4 + $0xe0] sm:$0xff] %v12040_v50  ;;  %v13054_v50 = vrot.slane %v13052_v35, 2  ;;  %v11323_v21 = vadd.f32 %v21797_v6, %v10685_v51  ;;  %v10686_v35 = vld [vmem:[#allocation4 + $0xd8] sm:$0xff] }
 0x6d4   : > { %v21995_v11 = vpop.f32.mrf.mxu0  ;;  %v11943_v36 = vpop.f32.mrf.mxu1  ;;  %v17954_v6 = vld [vmem:[#allocation3 + $0xb0] sm:$0xff]  }
 0x6d5   : > { %v21997_v20 = vadd.f32 %v11943_v36, %v11321_v38  ;;  %v13055_v38 = vor.u32 %v13054_v50, %v13051_v27  ;;  %v13058_v36 = vshrl.u32 %v17953_v13, 16  ;;  %v10687_v27 = vld [vmem:[#allocation4 + $0xa0] sm:$0xff] }
 0x6d6   : > { %v17206_v34 = vpop.f32.mrf.mxu0  ;;  %v17103_v18 = vpop.f32.mrf.mxu1 }
 0x6d8   : > { %v22000_v5 = vpop.f32.mrf.mxu0  ;;  %v11948_v40 = vpop.f32.mrf.mxu1  ;;  %17317 = vmatmul.mubr.bf16.gmra.mxu1 %v13047_v30 }
 0x6d9   : > { %v22003_v55 = vadd.f32 %v11948_v40, %v11322_v9  ;;  %17320 = vmatprep.mubr.msk.bf16.mxu1 %vm22360_vm12, %v22698_v28  ;;  %v11324_v9 = vadd.f32 %v21805_v46, %v10686_v35  ;;  %v13056_v40 = vsel %vm22751_vm5, %v13046_v45, %v13055_v38  ;;  %v13070_v45 = vshll.u32 %v17954_v6, 16 }
 0x6da   : > { %v17207_v42 = vpop.f32.mrf.mxu0  ;;  %v17106_v1 = vpop.f32.mrf.mxu1 }
 0x6db   : > { %v13060_v42 = vrot.slane %v13058_v36, 1  ;;  %v13063_v1 = vrot.slane %v13061_v39, 2  ;;  %v10688_v39 = vld [vmem:[#allocation4 + $0x68] sm:$0xff]  ;;  %v13072_v15 = vrot.slane %v13070_v45, 2  ;;  %v10690_v45 = vld [vmem:[#allocation4 + $0x50] sm:$0xff] }
 0x6dc   : > { %v22008_v43 = vpop.f32.mrf.mxu0  ;;  %v11951_v54 = vpop.f32.mrf.mxu1 }
 0x6dd   : > { %v22010_v4 = vadd.f32 %v11951_v54, %v11323_v21  ;;  %v11325_v54 = vadd.f32 %v21813_v3, %v10687_v27  ;;  %v13064_v35 = vor.u32 %v13063_v1, %v13060_v42  ;;  %v17955_v3 = vld [vmem:[#allocation3 + $0xb8] ss:$0 sps:$4 sm:$0xff]   ;;  %v10689_v42 = vld [vmem:[#allocation4 + $0x130] sm:$0xff] }
 0x6de   : > { %v17210_v34 = vpop.f32.mrf.mxu0  ;;  %v17107_v18 = vpop.f32.mrf.mxu1 }
 0x6df   : > { %v13067_v34 = vshrl.u32 %v17954_v6, 16 }
 0x6e0   : > { %v22013_v30 = vpop.f32.mrf.mxu0  ;;  %v11956_v51 = vpop.f32.mrf.mxu1  ;;  %17321 = vmatmul.mubr.bf16.gmra.mxu1 %v13056_v40 }
 0x6e1   : > { %v22016_v50 = vadd.f32 %v11956_v51, %v11324_v9  ;;  %17324 = vmatprep.mubr.msk.bf16.mxu1 %vm22360_vm12, %v22698_v28  ;;  %v11326_v9 = vadd.f32 %v21821_v52, %v10688_v39  ;;  %v13076_v39 = vshrl.u32 %v17955_v3, 16 }
 0x6e2   : > { %v17211_v13 = vpop.f32.mrf.mxu0  ;;  %v17110_v21 = vpop.f32.mrf.mxu1 }
 0x6e3   : > { %v13065_v13 = vsel %vm22752_vm7, %v13055_v38, %v13064_v35  ;;  %v13069_v21 = vrot.slane %v13067_v34, 1  ;;  %v13079_v38 = vshll.u32 %v17955_v3, 16 }
 0x6e4   : > { %v22021_v46 = vpop.f32.mrf.mxu0  ;;  %v11959_v36 = vpop.f32.mrf.mxu1 }
 0x6e5   : > { %v22023_v18 = vadd.f32 %v11959_v36, %v11325_v54  ;;  %v13073_v36 = vor.u32 %v13072_v15, %v13069_v21  ;;  %v13081_v32 = vrot.slane %v13079_v38, 2 }
 0x6e6   : > { %v17214_v40 = vpop.f32.mrf.mxu0  ;;  %v17111_v58 = vpop.f32.mrf.mxu1 }
 0x6e7   : > { %v11327_v58 = vadd.f32 %v21827_v10, %v10689_v42  ;;  %v10691_v42 = vld [vmem:[#allocation4 + $0xe8] sm:$0xff] }
 0x6e8   : > { %v22026_v51 = vpop.f32.mrf.mxu0  ;;  %v11964_v27 = vpop.f32.mrf.mxu1  ;;  %17325 = vmatmul.mubr.bf16.gmra.mxu1 %v13065_v13 }
 0x6e9   : > { %v22029_v1 = vadd.f32 %v11964_v27, %v11326_v9  ;;  %17328 = vmatprep.mubr.msk.bf16.mxu1 %vm22360_vm12, %v22698_v28  ;;  %v11328_v9 = vadd.f32 %v21834_v59, %v10690_v45  ;;  %v10692_v45 = vld [vmem:[#allocation4] sm:$0xff] }
 0x6ea   : > { %v17215_v6 = vpop.f32.mrf.mxu0  ;;  %v17114_v54 = vpop.f32.mrf.mxu1 }
 0x6eb   : > { %v13074_v6 = vsel %vm22753_vm6, %v13064_v35, %v13073_v36  ;;  %v13078_v54 = vrot.slane %v13076_v39, 1 }
 0x6ec   : > { %v22034_v52 = vpop.f32.mrf.mxu0  ;;  %v11967_v34 = vpop.f32.mrf.mxu1 }
 0x6ed   : > { %v22036_v40 = vadd.f32 %v11967_v34, %v11327_v58  ;;  %v13082_v59 = vor.u32 %v13081_v32, %v13078_v54 }
 0x6ee   : > { %v17218_v13 = vpop.f32.mrf.mxu0  ;;  %v17115_v53 = vpop.f32.mrf.mxu1 }
 0x6ef   : > { %v11329_v53 = vadd.f32 %v21840_v37, %v10691_v42  ;;  %v11330_v13 = vadd.f32 %v21847_v41, %v10692_v45  ;;  %v10694_v41 = vld [vmem:[#allocation4 + $0x78] sm:$0xff] }
 0x6f0   : > { %v22039_v27 = vpop.f32.mrf.mxu0  ;;  %v11972_v10 = vpop.f32.mrf.mxu1  ;;  %17329 = vmatmul.mubr.bf16.gmra.mxu1 %v13074_v6  ;;  %v13083_v6 = vsel %vm22735_vm0, %v13073_v36, %v13082_v59  ;;  %v22066_v36 = vadd.f32 %v21989_v7, %v21997_v20 }
 0x6f1   : > { %v22042_v15 = vadd.f32 %v11972_v10, %v11328_v9  ;;  %17332 = vmatprep.mubr.msk.bf16.mxu1 %vm22360_vm12, %v22698_v28 }
 0x6f2   : > { %v17219_v21 = vpop.f32.mrf.mxu0  ;;  %v17118_v3 = vpop.f32.mrf.mxu1 }
 0x6f3   : > { %v10693_v21 = vld [vmem:[#allocation4 + $0x40] sm:$0xff] }
 0x6f4   : > { %v22047_v58 = vpop.f32.mrf.mxu0  ;;  %v11975_v34 = vpop.f32.mrf.mxu1  ;;  %v11331_v54 = vadd.f32 %v21852_v16, %v10693_v21 }
 0x6f5   : > { %v22049_v35 = vadd.f32 %v11975_v34, %v11329_v53 }
 0x6f6   : > { %v17222_v39 = vpop.f32.mrf.mxu0  ;;  %v17119_v38 = vpop.f32.mrf.mxu1 }
 0x6f7   : > { %v11332_v38 = vadd.f32 %v21858_v48, %v10694_v41  ;;  %v22080_v48 = vadd.f32 %v21995_v11, %v22003_v55  ;;  %v10698_v55 = vld [vmem:[#allocation4 + $0x28] sm:$0xff] }
 0x6f8   : > { %v22052_v9 = vpop.f32.mrf.mxu0  ;;  %v11980_v10 = vpop.f32.mrf.mxu1  ;;  %17333 = vmatmul.mubr.bf16.gmra.mxu1 %v13083_v6  ;;  %v10695_v6 = vld [vmem:[#allocation4 + $0x30] sm:$0xff] }
 0x6f9   : > { %v22055_v3 = vadd.f32 %v11980_v10, %v11330_v13  ;;  %17336 = vmatprep.mubr.msk.bf16.mxu1 %vm22360_vm12, %v22698_v28 }
 0x6fa   : > { %v17223_v37 = vpop.f32.mrf.mxu0  ;;  %v17122_v32 = vpop.f32.mrf.mxu1 }
 0x6fb   : > { %v11333_v37 = vadd.f32 %v21861_v47, %v10695_v6 }
 0x6fc   : > { %v22060_v42 = vpop.f32.mrf.mxu0  ;;  %v11983_v53 = vpop.f32.mrf.mxu1 }
 0x6fd   : > { %v22062_v34 = vadd.f32 %v11983_v53, %v11331_v54  ;;  %v10696_v53 = vld [vmem:[#allocation4 + $0xb8] sm:$0xff] }
 0x6fe   : > { %v17226_v45 = vpop.f32.mrf.mxu0  ;;  %v17123_v39 = vpop.f32.mrf.mxu1 }
 0x6ff   : > { %v11334_v45 = vadd.f32 %v21866_v29, %v10696_v53  ;;  %v22098_v29 = vadd.f32 %v22008_v43, %v22016_v50 }
 0x700   : > { %v22069_v13 = vpop.f32.mrf.mxu0  ;;  %v11988_v28 = vpop.f32.mrf.mxu1  ;;  %17337 = vmatmul.mubr.bf16.gmra.mxu1 %v13082_v59  ;;  %v22084_v59 = vadd.f32 %v22000_v5, %v22010_v4  ;;  %v22102_v4 = vadd.f32 %v22013_v30, %v22023_v18  ;;  %v22114_v30 = vadd.f32 %v22021_v46, %v22029_v1  ;;  %v22126_v46 = vadd.f32 %v22039_v27, %v22049_v35  ;;  %v12102_v27 = vld [vmem:[#allocation4 + $0x10] sm:$0xff] }
 0x701   : > { %v22071_v16 = vadd.f32 %v11988_v28, %v11332_v38  ;;  %v10697_v38 = vld [vmem:[#allocation4 + $0x60] sm:$0xff] }
 0x702   : > { %v17227_v10 = vpop.f32.mrf.mxu0  ;;  %v17126_v21 = vpop.f32.mrf.mxu1 }
 0x703   : > { %v11335_v21 = vadd.f32 %v21869_v2, %v10697_v38 }
 0x704   : > { %v22074_v32 = vpop.f32.mrf.mxu0  ;;  %v11991_v54 = vpop.f32.mrf.mxu1 }
 0x705   : > { %v22076_v7 = vadd.f32 %v11991_v54, %v11333_v37 }
 0x706   : > { %v17230_v20 = vpop.f32.mrf.mxu0  ;;  %v17127_v41 = vpop.f32.mrf.mxu1 }
 0x707   : > { %v11336_v20 = vadd.f32 %v21875_v61, %v10698_v55  ;;  %v22118_v61 = vadd.f32 %v22026_v51, %v22036_v40 }
 0x708   : > { %v22087_v39 = vpop.f32.mrf.mxu0  ;;  %v11996_v47 = vpop.f32.mrf.mxu1 }
 0x709   : > { %v22089_v28 = vadd.f32 %v11996_v47, %v11334_v45  ;;  %v10699_v45 = vld [vmem:[#allocation4 + $0x140] sm:$0xff] }
 0x70a   : > { %v17231_v6 = vpop.f32.mrf.mxu0  ;;  %v17130_v10 = vpop.f32.mrf.mxu1 }
 0x70b   : > { %v11337_v10 = vadd.f32 %v21878_v60, %v10699_v45 }
 0x70c   : > { %v22092_v37 = vpop.f32.mrf.mxu0  ;;  %v11999_v11 = vpop.f32.mrf.mxu1 }
 0x70d   : > { %v22094_v54 = vadd.f32 %v11999_v11, %v11335_v21 }
 0x70e   : > { %v17234_v5 = vpop.f32.mrf.mxu0  ;;  %v17131_v53 = vpop.f32.mrf.mxu1 }
 0x70f   : > { %v11420_v5 = vld [vmem:[#allocation4 + $0x58] sm:$0xf] }
 0x710   : > { %v22105_v41 = vpop.f32.mrf.mxu0  ;;  %v12004_v2 = vpop.f32.mrf.mxu1 }
 0x711   : > { %v22107_v47 = vadd.f32 %v12004_v2, %v11336_v20 }
 0x712   : > { %v17235_v38 = vpop.f32.mrf.mxu0  ;;  %v17134_v6 = vpop.f32.mrf.mxu1 }
 0x713   : > { %v12100_v38 = vld [vmem:[#allocation4 + $0xb0] sm:$0xff]  ;;  %v22122_v6 = vadd.f32 %v22034_v52, %v22042_v15 }
 0x714   : > { %v12606_v21 = vpop.f32.mrf.mxu0  ;;  %v12007_v43 = vpop.f32.mrf.mxu1  ;;  %v12612_v1 = vadd.f32 %v21887_v26, %v12100_v38 }
 0x715   : > { %v22110_v50 = vadd.f32 %v12007_v43, %v11337_v10  ;;  %v12101_v10 = vld [vmem:[#allocation4 + $0xd0] sm:$0xff] }
 0x716   : > { %v17238_v18 = vpop.f32.mrf.mxu0  ;;  %v17135_v11 = vpop.f32.mrf.mxu1  ;;  %v12613_v15 = vadd.f32 %v21890_v44, %v12101_v10  ;;  %v12614_v44 = vadd.f32 %v21896_v24, %v12102_v27 }
 0x717   : > { %v22132_v18 = vld [vmem:[%s22281_s4] ss:$0 sm:$0xff] }
 0x718   : > { %v12609_v55 = vpop.f32.mrf.mxu0  ;;  %v12012_v53 = vpop.f32.mrf.mxu1 }
 0x719   : > { %v12058_v20 = vadd.f32 %v12012_v53, %v11420_v5  ;;  %v22138_v53 = vadd.f32 %v22047_v58, %v22055_v3 }
 0x71a   : > { %v17239_v2 = vpop.f32.mrf.mxu0  ;;  %v17138_v60 = vpop.f32.mrf.mxu1 }
 0x71b   : > { %12099 = vst [vmem:[#allocation4 + $0x58] sm:$0xf] %v12058_v20  ;;  %v22142_v20 = vadd.f32 %v22052_v9, %v22062_v34 }
 0x71c   : > { %v12015_v45 = vpop.f32.mrf.mxu1 }
 0x71d   : > { %v12103_v45 = vld [vmem:[#allocation4 + $0x48] sm:$0xff] }
 0x71e   : > { %v17139_v51 = vpop.f32.mrf.mxu1  ;;  %v12615_v3 = vadd.f32 %v21899_v25, %v12103_v45 }
 0x720   : > { %v13187_v40 = vpop.f32.mrf.mxu1 }
 0x721   : > { %v13353_v43 = vadd.f32 %v13187_v40, %v12612_v1  ;;  %v12104_v40 = vld [vmem:[#allocation4 + $0x120] sm:$0xff] }
 0x722   : > { %v12140_v11 = vld [vmem:[#allocation4 + $0x58] sm:$0xf]  ;;  %v17258_v55 = vpop.f32.mrf.mxu1  ;;  %v12616_v25 = vadd.f32 %v21905_v57, %v12104_v40  ;;  %v22175_v57 = vadd.f32 %v22087_v39, %v22094_v54  ;;  %v12108_v39 = vld [vmem:[#allocation4 + $0x80] sm:$0xff] }
 0x723   : > { %13394 = vst [vmem:[#allocation4 + $0xb0] sm:$0xff] %v13353_v43  ;;  %v12652_v52 = vadd.f32 %v12606_v21, %v12140_v11  ;;  %v13483_v35 = vadd.f32 %v22132_v18, %v13353_v43  ;;  %v22158_v43 = vadd.f32 %v22060_v42, %v22071_v16  ;;  %v22162_v11 = vadd.f32 %v22069_v13, %v22076_v7  ;;  %v12106_v13 = vld [vmem:[#allocation4 + $0xf8] sm:$0xff] }
 0x724   : > { %v13190_v5 = vpop.f32.mrf.mxu1 }
 0x725   : > { %12693 = vst [vmem:[#allocation4 + $0x58] sm:$0xf] %v12652_v52  ;;  %v13354_v26 = vadd.f32 %v13190_v5, %v12613_v15  ;;  %v13524_v38 = vmax.f32 %v13483_v35, 0.0  ;;  %v12105_v5 = vld [vmem:[#allocation4 + $0x38] sm:$0xff] }
 0x726   : > { %v17259_v2 = vpop.f32.mrf.mxu1  ;;  %v12617_v42 = vadd.f32 %v21908_v8, %v12105_v5  ;;  %v12618_v8 = vadd.f32 %v21914_v0, %v12106_v13  ;;  %v22188_v0 = vadd.f32 %v22105_v41, %v22110_v50  ;;  %v12110_v41 = vld [vmem:[#allocation4 + $0x138] sm:$0xff] }
 0x727   : > { %13395 = vst [vmem:[#allocation4 + $0xd0] sm:$0xff] %v13354_v26  ;;  %v13484_v21 = vadd.f32 %v22132_v18, %v13354_v26 }
 0x728   : > { %v13195_v60 = vpop.f32.mrf.mxu1 }
 0x729   : > { %v13525_v51 = vmax.f32 %v13484_v21, 0.0  ;;  %v13355_v1 = vadd.f32 %v13195_v60, %v12614_v44  ;;  %v22171_v60 = vadd.f32 %v22074_v32, %v22089_v28 }
 0x72a   : > { %v17262_v58 = vpop.f32.mrf.mxu1 }
 0x72b   : > { %v14882_v9 = vpack.c.bf16 %v13525_v51, %v13524_v38  ;;  %13396 = vst [vmem:[#allocation4 + $0x10] sm:$0xff] %v13355_v1  ;;  %v13485_v24 = vadd.f32 %v22132_v18, %v13355_v1  ;;  %v12107_v1 = vld [vmem:[#allocation4 + $0x100] sm:$0xff] }
 0x72c   : > { %v13198_v34 = vpop.f32.mrf.mxu1  ;;  %v12619_v32 = vadd.f32 %v21917_v31, %v12107_v1  ;;  %v12620_v31 = vadd.f32 %v21923_v49, %v12108_v39 }
 0x72d   : > { %14883 = vst [vmem:[%s22151_s12] sm:$0xff] %v14882_v9   ;;  %v13356_v10 = vadd.f32 %v13198_v34, %v12615_v3  ;;  %v13526_v27 = vmax.f32 %v13485_v24, 0.0 }
 0x72e   : > { %v17263_v55 = vpop.f32.mrf.mxu1 }
 0x72f   : > { %13397 = vst [vmem:[#allocation4 + $0x48] sm:$0xff] %v13356_v10  ;;  %v13486_v52 = vadd.f32 %v22132_v18, %v13356_v10  ;;  %v22184_v10 = vadd.f32 %v22092_v37, %v22107_v47 }
 0x730   : > { %v13203_v15 = vpop.f32.mrf.mxu1 }
 0x731   : > { %v13527_v35 = vmax.f32 %v13486_v52, 0.0  ;;  %v13357_v26 = vadd.f32 %v13203_v15, %v12616_v25  ;;  %v12109_v15 = vld [vmem:[#allocation4 + $0x108] sm:$0xff] }
 0x732   : > { %v17266_v2 = vpop.f32.mrf.mxu1  ;;  %v12621_v37 = vadd.f32 %v21926_v17, %v12109_v15 }
 0x733   : > { %v14887_v21 = vpack.c.bf16 %v13527_v35, %v13526_v27  ;;  %13398 = vst [vmem:[#allocation4 + $0x120] sm:$0xff] %v13357_v26  ;;  %v13487_v7 = vadd.f32 %v22132_v18, %v13357_v26 }
 0x734   : > { %v13206_v16 = vpop.f32.mrf.mxu1 }
 0x735   : > { %14999 = vst [vmem:[%s22151_s12 + $0x8] sm:$0xff] %v14887_v21   ;;  %v13358_v44 = vadd.f32 %v13206_v16, %v12617_v42  ;;  %v13528_v58 = vmax.f32 %v13487_v7, 0.0  ;;  %v12622_v16 = vadd.f32 %v21932_v63, %v12110_v41  ;;  %v12111_v7 = vld [vmem:[#allocation4 + $0xf0] sm:$0xff] }
 0x736   : > { %v17267_v45 = vpop.f32.mrf.mxu1 }
 0x737   : > { %13399 = vst [vmem:[#allocation4 + $0x38] sm:$0xff] %v13358_v44  ;;  %v13488_v38 = vadd.f32 %v22132_v18, %v13358_v44 }
 0x738   : > { %v13211_v51 = vpop.f32.mrf.mxu1 }
 0x739   : > { %v13529_v9 = vmax.f32 %v13488_v38, 0.0  ;;  %v13359_v3 = vadd.f32 %v13211_v51, %v12618_v8  ;;  %v12623_v51 = vadd.f32 %v21935_v22, %v12111_v7 }
 0x73a   : > { %v17270_v34 = vpop.f32.mrf.mxu1 }
 0x73b   : > { %v14892_v40 = vpack.c.bf16 %v13529_v9, %v13528_v58  ;;  %13400 = vst [vmem:[#allocation4 + $0xf8] sm:$0xff] %v13359_v3  ;;  %v13489_v54 = vadd.f32 %v22132_v18, %v13359_v3  ;;  %v12112_v58 = vld [vmem:[#allocation4 + $0x18] sm:$0xff] }
 0x73c   : > { %v13214_v28 = vpop.f32.mrf.mxu1 }
 0x73d   : > { %15000 = vst [vmem:[%s22151_s12 + $0x10] sm:$0xff] %v14892_v40   ;;  %v13360_v24 = vadd.f32 %v13214_v28, %v12619_v32  ;;  %v13530_v5 = vmax.f32 %v13489_v54, 0.0  ;;  %v12624_v40 = vadd.f32 %v21941_v62, %v12112_v58  ;;  %v12113_v28 = vld [vmem:[#allocation4 + $0xc8] sm:$0xff] }
 0x73e   : > { %v17271_v55 = vpop.f32.mrf.mxu1 }
 0x73f   : > { %13401 = vst [vmem:[#allocation4 + $0x100] sm:$0xff] %v13360_v24  ;;  %v13490_v52 = vadd.f32 %v22132_v18, %v13360_v24 }
 0x740   : > { %v13219_v25 = vpop.f32.mrf.mxu1 }
 0x741   : > { %v13531_v27 = vmax.f32 %v13490_v52, 0.0  ;;  %v13361_v35 = vadd.f32 %v13219_v25, %v12620_v31  ;;  %v12625_v52 = vadd.f32 %v21944_v12, %v12113_v28  ;;  %v12114_v25 = vld [vmem:[#allocation4 + $0x70] sm:$0xff] }
 0x742   : > { %v17274_v26 = vpop.f32.mrf.mxu1 }
 0x743   : > { %v14897_v2 = vpack.c.bf16 %v13531_v27, %v13530_v5  ;;  %13402 = vst [vmem:[#allocation4 + $0x80] sm:$0xff] %v13361_v35  ;;  %v13491_v50 = vadd.f32 %v22132_v18, %v13361_v35  ;;  %v12626_v35 = vadd.f32 %v21950_v33, %v12114_v25 }
 0x744   : > { %v13222_v47 = vpop.f32.mrf.mxu1 }
 0x745   : > { %15001 = vst [vmem:[%s22151_s12 + $0x18] sm:$0xff] %v14897_v2   ;;  %v13362_v21 = vadd.f32 %v13222_v47, %v12621_v37  ;;  %v13532_v44 = vmax.f32 %v13491_v50, 0.0  ;;  %v12115_v2 = vld [vmem:[#allocation4 + $0x20] sm:$0xff] }
 0x746   : > { %v17275_v42 = vpop.f32.mrf.mxu1 }
 0x747   : > { %13403 = vst [vmem:[#allocation4 + $0x108] sm:$0xff] %v13362_v21  ;;  %v13492_v49 = vadd.f32 %v22132_v18, %v13362_v21  ;;  %v12627_v21 = vadd.f32 %v21953_v56, %v12115_v2 }
 0x748   : > { %v13227_v13 = vpop.f32.mrf.mxu1 }
 0x749   : > { %v13533_v45 = vmax.f32 %v13492_v49, 0.0  ;;  %v13363_v38 = vadd.f32 %v13227_v13, %v12622_v16  ;;  %v12116_v49 = vld [vmem:[#allocation4 + $0x128] sm:$0xff] }
 0x74a   : > { %v17278_v8 = vpop.f32.mrf.mxu1 }
 0x74b   : > { %v14902_v17 = vpack.c.bf16 %v13533_v45, %v13532_v44  ;;  %13404 = vst [vmem:[#allocation4 + $0x138] sm:$0xff] %v13363_v38  ;;  %v13493_v9 = vadd.f32 %v22132_v18, %v13363_v38  ;;  %v12628_v44 = vadd.f32 %v21959_v23, %v12116_v49  ;;  %v12117_v38 = vld [vmem:[#allocation4 + $0x110] sm:$0xff] }
 0x74c   : > { %v13230_v1 = vpop.f32.mrf.mxu1  ;;  %v12629_v58 = vadd.f32 %v21962_v19, %v12117_v38  ;;  %v22757_v38 = vld [vmem:[#allocation8_spill] sm:$0xff] }
 0x74d   : > { %15002 = vst [vmem:[%s22151_s12 + $0x20] sm:$0xff] %v14902_v17   ;;  %v13364_v3 = vadd.f32 %v13230_v1, %v12623_v51  ;;  %v13534_v39 = vmax.f32 %v13493_v9, 0.0 }
 0x74e   : > { %v17279_v34 = vpop.f32.mrf.mxu1 }
 0x74f   : > { %13405 = vst [vmem:[#allocation4 + $0xf0] sm:$0xff] %v13364_v3  ;;  %v13494_v63 = vadd.f32 %v22132_v18, %v13364_v3  ;;  %v12118_v3 = vld [vmem:[#allocation4 + $0x8] sm:$0xff] }
 0x750   : > { %v13235_v32 = vpop.f32.mrf.mxu1 }
 0x751   : > { %v13535_v54 = vmax.f32 %v13494_v63, 0.0  ;;  %v13365_v24 = vadd.f32 %v13235_v32, %v12624_v40  ;;  %v12630_v32 = vadd.f32 %v21968_v14, %v12118_v3 }
 0x752   : > { %v17282_v55 = vpop.f32.mrf.mxu1 }
 0x753   : > { %v14907_v22 = vpack.c.bf16 %v13535_v54, %v13534_v39  ;;  %13406 = vst [vmem:[#allocation4 + $0x18] sm:$0xff] %v13365_v24  ;;  %v13495_v15 = vadd.f32 %v22132_v18, %v13365_v24  ;;  %v12119_v39 = vld [vmem:[#allocation4 + $0x98] sm:$0xff] }
 0x754   : > { %v13238_v31 = vpop.f32.mrf.mxu1 }
 0x755   : > { %15003 = vst [vmem:[%s22151_s12 + $0x28] sm:$0xff] %v14907_v22   ;;  %v13366_v5 = vadd.f32 %v13238_v31, %v12625_v52  ;;  %v13536_v37 = vmax.f32 %v13495_v15, 0.0  ;;  %v22754_v52 = vld [vmem:[#allocation5_spill] sm:$0xff] }
 0x756   : > { %v17283_v27 = vpop.f32.mrf.mxu1  ;;  %v12631_v31 = vadd.f32 %v22754_v52, %v12119_v39  ;;  %v12120_v15 = vld [vmem:[#allocation4 + $0xa8] sm:$0xff] }
 0x757   : > { %13407 = vst [vmem:[#allocation4 + $0xc8] sm:$0xff] %v13366_v5  ;;  %v13496_v62 = vadd.f32 %v22132_v18, %v13366_v5 }
 0x758   : > { %v13243_v26 = vpop.f32.mrf.mxu1 }
 0x759   : > { %v13537_v47 = vmax.f32 %v13496_v62, 0.0  ;;  %v13367_v41 = vadd.f32 %v13243_v26, %v12626_v35  ;;  %v22755_v35 = vld [vmem:[#allocation6_spill] sm:$0xff] }
 0x75a   : > { %v17286_v50 = vpop.f32.mrf.mxu1  ;;  %v12632_v26 = vadd.f32 %v22755_v35, %v12120_v15 }
 0x75b   : > { %v14912_v12 = vpack.c.bf16 %v13537_v47, %v13536_v37  ;;  %13408 = vst [vmem:[#allocation4 + $0x70] sm:$0xff] %v13367_v41  ;;  %v13497_v16 = vadd.f32 %v22132_v18, %v13367_v41  ;;  %v12121_v37 = vld [vmem:[#allocation4 + $0x90] sm:$0xff] }
 0x75c   : > { %v13246_v42 = vpop.f32.mrf.mxu1 }
 0x75d   : > { %15004 = vst [vmem:[%s22151_s12 + $0x30] sm:$0xff] %v14912_v12   ;;  %v13368_v13 = vadd.f32 %v13246_v42, %v12627_v21  ;;  %v13538_v8 = vmax.f32 %v13497_v16, 0.0  ;;  %v22756_v42 = vld [vmem:[#allocation7_spill] sm:$0xff] }
 0x75e   : > { %v17287_v7 = vpop.f32.mrf.mxu1  ;;  %v12633_v49 = vadd.f32 %v22756_v42, %v12121_v37 }
 0x75f   : > { %13409 = vst [vmem:[#allocation4 + $0x20] sm:$0xff] %v13368_v13  ;;  %v13498_v33 = vadd.f32 %v22132_v18, %v13368_v13  ;;  %v12122_v13 = vld [vmem:[#allocation4 + $0xe0] sm:$0xff] }
 0x760   : > { %v13251_v45 = vpop.f32.mrf.mxu1 }
 0x761   : > { %v13539_v17 = vmax.f32 %v13498_v33, 0.0  ;;  %v13369_v51 = vadd.f32 %v13251_v45, %v12628_v44 }
 0x762   : > { %v17290_v1 = vpop.f32.mrf.mxu1 }
 0x763   : > { %v14917_v56 = vpack.c.bf16 %v13539_v17, %v13538_v8  ;;  %13410 = vst [vmem:[#allocation4 + $0x128] sm:$0xff] %v13369_v51  ;;  %v13499_v34 = vadd.f32 %v22132_v18, %v13369_v51  ;;  %v12634_v8 = vadd.f32 %v22757_v38, %v12122_v13 }
 0x764   : > { %v13254_v9 = vpop.f32.mrf.mxu1 }
 0x765   : > { %15005 = vst [vmem:[%s22151_s12 + $0x38] sm:$0xff] %v14917_v56   ;;  %v13370_v63 = vadd.f32 %v13254_v9, %v12629_v58  ;;  %v13540_v54 = vmax.f32 %v13499_v34, 0.0 }
 0x766   : > { %v17291_v40 = vpop.f32.mrf.mxu1 }
 0x767   : > { %13411 = vst [vmem:[#allocation4 + $0x110] sm:$0xff] %v13370_v63  ;;  %v13500_v23 = vadd.f32 %v22132_v18, %v13370_v63 }
 0x768   : > { %v13259_v28 = vpop.f32.mrf.mxu1 }
 0x769   : > { %v13541_v24 = vmax.f32 %v13500_v23, 0.0  ;;  %v13371_v55 = vadd.f32 %v13259_v28, %v12630_v32 }
 0x76a   : > { %v17294_v22 = vpop.f32.mrf.mxu1 }
 0x76b   : > { %v14922_v19 = vpack.c.bf16 %v13541_v24, %v13540_v54  ;;  %13412 = vst [vmem:[#allocation4 + $0x8] sm:$0xff] %v13371_v55  ;;  %v13501_v5 = vadd.f32 %v22132_v18, %v13371_v55 }
 0x76c   : > { %v13262_v25 = vpop.f32.mrf.mxu1 }
 0x76d   : > { %15006 = vst [vmem:[%s22151_s12 + $0x40] sm:$0xff] %v14922_v19   ;;  %v13372_v27 = vadd.f32 %v13262_v25, %v12631_v31  ;;  %v13542_v47 = vmax.f32 %v13501_v5, 0.0 }
 0x76e   : > { %v17295_v62 = vpop.f32.mrf.mxu1 }
 0x76f   : > { %13413 = vst [vmem:[#allocation4 + $0x98] sm:$0xff] %v13372_v27  ;;  %v13502_v14 = vadd.f32 %v22132_v18, %v13372_v27 }
 0x770   : > { %v13267_v2 = vpop.f32.mrf.mxu1 }
 0x771   : > { %v13543_v41 = vmax.f32 %v13502_v14, 0.0  ;;  %v13373_v50 = vadd.f32 %v13267_v2, %v12632_v26 }
 0x772   : > { %v17298_v12 = vpop.f32.mrf.mxu1 }
 0x773   : > { %v14927_v21 = vpack.c.bf16 %v13543_v41, %v13542_v47  ;;  %13414 = vst [vmem:[#allocation4 + $0xa8] sm:$0xff] %v13373_v50  ;;  %v13503_v7 = vadd.f32 %v22132_v18, %v13373_v50 }
 0x774   : > { %v13270_v16 = vpop.f32.mrf.mxu1 }
 0x775   : > { %15007 = vst [vmem:[%s22151_s12 + $0x48] sm:$0xff] %v14927_v21   ;;  %v13374_v33 = vadd.f32 %v13270_v16, %v12633_v49  ;;  %v13544_v51 = vmax.f32 %v13503_v7, 0.0 }
 0x776   : > { %v17299_v44 = vpop.f32.mrf.mxu1 }
 0x777   : > { %13415 = vst [vmem:[#allocation4 + $0x90] sm:$0xff] %v13374_v33  ;;  %v13504_v45 = vadd.f32 %v22132_v18, %v13374_v33 }
 0x778   : > { %v13275_v17 = vpop.f32.mrf.mxu1 }
 0x779   : > { %v13545_v1 = vmax.f32 %v13504_v45, 0.0  ;;  %v13375_v56 = vadd.f32 %v13275_v17, %v12634_v8 }
 0x77a   : > { %v17302_v58 = vpop.f32.mrf.mxu1 }
 0x77b   : > { %v14932_v9 = vpack.c.bf16 %v13545_v1, %v13544_v51  ;;  %13416 = vst [vmem:[#allocation4 + $0xe0] sm:$0xff] %v13375_v56  ;;  %v13505_v34 = vadd.f32 %v22132_v18, %v13375_v56 }
 0x77c   : > { %v13278_v3 = vpop.f32.mrf.mxu1 }
 0x77d   : > { %15008 = vst [vmem:[%s22151_s12 + $0x50] sm:$0xff] %v14932_v9   ;;  %v13376_v63 = vadd.f32 %v13278_v3, %v22066_v36  ;;  %v13546_v28 = vmax.f32 %v13505_v34, 0.0 }
 0x77e   : > { %v17303_v40 = vpop.f32.mrf.mxu1 }
 0x77f   : > { %13417 = vst [vmem:[#allocation4 + $0x88] sm:$0xff] %v13376_v63  ;;  %v13506_v23 = vadd.f32 %v22132_v18, %v13376_v63 }
 0x780   : > { %v13283_v32 = vpop.f32.mrf.mxu1 }
 0x781   : > { %v13547_v39 = vmax.f32 %v13506_v23, 0.0  ;;  %v13377_v54 = vadd.f32 %v13283_v32, %v22080_v48 }
 0x782   : > { %v17306_v24 = vpop.f32.mrf.mxu1 }
 0x783   : > { %v14937_v55 = vpack.c.bf16 %v13547_v39, %v13546_v28  ;;  %13418 = vst [vmem:[#allocation4 + $0xc0] sm:$0xff] %v13377_v54  ;;  %v13507_v19 = vadd.f32 %v22132_v18, %v13377_v54 }
 0x784   : > { %v13286_v22 = vpop.f32.mrf.mxu1 }
 0x785   : > { %15009 = vst [vmem:[%s22151_s12 + $0x58] sm:$0xff] %v14937_v55   ;;  %v13378_v52 = vadd.f32 %v13286_v22, %v22084_v59  ;;  %v13548_v15 = vmax.f32 %v13507_v19, 0.0 }
 0x786   : > { %v17307_v36 = vpop.f32.mrf.mxu1 }
 0x787   : > { %13419 = vst [vmem:[#allocation4 + $0x118] sm:$0xff] %v13378_v52  ;;  %v13508_v31 = vadd.f32 %v22132_v18, %v13378_v52 }
 0x788   : > { %v13291_v25 = vpop.f32.mrf.mxu1 }
 0x789   : > { %v13549_v5 = vmax.f32 %v13508_v31, 0.0  ;;  %v13379_v27 = vadd.f32 %v13291_v25, %v22098_v29 }
 0x78a   : > { %v17310_v48 = vpop.f32.mrf.mxu1 }
 0x78b   : > { %v14942_v62 = vpack.c.bf16 %v13549_v5, %v13548_v15  ;;  %13420 = vst [vmem:[#allocation4 + $0xd8] sm:$0xff] %v13379_v27  ;;  %v13509_v35 = vadd.f32 %v22132_v18, %v13379_v27 }
 0x78c   : > { %v13294_v14 = vpop.f32.mrf.mxu1 }
 0x78d   : > { %15010 = vst [vmem:[%s22151_s12 + $0x60] sm:$0xff] %v14942_v62   ;;  %v13380_v26 = vadd.f32 %v13294_v14, %v22102_v4  ;;  %v13550_v47 = vmax.f32 %v13509_v35, 0.0 }
 0x78e   : > { %v17311_v59 = vpop.f32.mrf.mxu1 }
 0x78f   : > { %13421 = vst [vmem:[#allocation4 + $0xa0] sm:$0xff] %v13380_v26  ;;  %v13510_v2 = vadd.f32 %v22132_v18, %v13380_v26 }
 0x790   : > { %v13299_v37 = vpop.f32.mrf.mxu1 }
 0x791   : > { %v13551_v41 = vmax.f32 %v13510_v2, 0.0  ;;  %v13381_v50 = vadd.f32 %v13299_v37, %v22114_v30 }
 0x792   : > { %v17314_v29 = vpop.f32.mrf.mxu1 }
 0x793   : > { %v14947_v12 = vpack.c.bf16 %v13551_v41, %v13550_v47  ;;  %13422 = vst [vmem:[#allocation4 + $0x68] sm:$0xff] %v13381_v50  ;;  %v13511_v42 = vadd.f32 %v22132_v18, %v13381_v50 }
 0x794   : > { %v13302_v21 = vpop.f32.mrf.mxu1 }
 0x795   : > { %15011 = vst [vmem:[%s22151_s12 + $0x68] sm:$0xff] %v14947_v12   ;;  %v13382_v49 = vadd.f32 %v13302_v21, %v22118_v61  ;;  %v13552_v7 = vmax.f32 %v13511_v42, 0.0  ;;  %v12734_v12 = vld [vmem:[#allocation4 + $0x58] sm:$0xf] }
 0x796   : > { %v17315_v4 = vpop.f32.mrf.mxu1 }
 0x797   : > { %13423 = vst [vmem:[#allocation4 + $0x130] sm:$0xff] %v13382_v49  ;;  %v13512_v16 = vadd.f32 %v22132_v18, %v13382_v49 }
 0x798   : > { %v13307_v13 = vpop.f32.mrf.mxu1 }
 0x799   : > { %v13553_v33 = vmax.f32 %v13512_v16, 0.0  ;;  %v13383_v44 = vadd.f32 %v13307_v13, %v22122_v6 }
 0x79a   : > { %v17318_v30 = vpop.f32.mrf.mxu1 }
 0x79b   : > { %v14952_v45 = vpack.c.bf16 %v13553_v33, %v13552_v7  ;;  %13424 = vst [vmem:[#allocation4 + $0x50] sm:$0xff] %v13383_v44  ;;  %v13513_v8 = vadd.f32 %v22132_v18, %v13383_v44 }
 0x79c   : > { %v13310_v38 = vpop.f32.mrf.mxu1 }
 0x79d   : > { %15012 = vst [vmem:[%s22151_s12 + $0x70] sm:$0xff] %v14952_v45   ;;  %v13384_v17 = vadd.f32 %v13310_v38, %v22126_v46  ;;  %v13554_v56 = vmax.f32 %v13513_v8, 0.0 }
 0x79e   : > { %v17319_v61 = vpop.f32.mrf.mxu1 }
 0x79f   : > { %13425 = vst [vmem:[#allocation4 + $0xe8] sm:$0xff] %v13384_v17  ;;  %v13514_v51 = vadd.f32 %v22132_v18, %v13384_v17 }
 0x7a0   : > { %v13315_v1 = vpop.f32.mrf.mxu1 }
 0x7a1   : > { %v13555_v58 = vmax.f32 %v13514_v51, 0.0  ;;  %v13385_v9 = vadd.f32 %v13315_v1, %v22138_v53 }
 0x7a2   : > { %v17322_v6 = vpop.f32.mrf.mxu1 }
 0x7a3   : > { %v14957_v3 = vpack.c.bf16 %v13555_v58, %v13554_v56  ;;  %13426 = vst [vmem:[#allocation4] sm:$0xff] %v13385_v9  ;;  %v13515_v63 = vadd.f32 %v22132_v18, %v13385_v9 }
 0x7a4   : > { %v13318_v34 = vpop.f32.mrf.mxu1 }
 0x7a5   : > { %15013 = vst [vmem:[%s22151_s12 + $0x78] sm:$0xff] %v14957_v3   ;;  %v13386_v40 = vadd.f32 %v13318_v34, %v22142_v20  ;;  %v13556_v28 = vmax.f32 %v13515_v63, 0.0 }
 0x7a6   : > { %v17323_v46 = vpop.f32.mrf.mxu1 }
 0x7a7   : > { %13427 = vst [vmem:[#allocation4 + $0x40] sm:$0xff] %v13386_v40  ;;  %v13516_v23 = vadd.f32 %v22132_v18, %v13386_v40 }
 0x7a8   : > { %v13323_v32 = vpop.f32.mrf.mxu1 }
 0x7a9   : > { %v13557_v39 = vmax.f32 %v13516_v23, 0.0  ;;  %v13387_v54 = vadd.f32 %v13323_v32, %v22158_v43 }
 0x7aa   : > { %v17326_v53 = vpop.f32.mrf.mxu1 }
 0x7ab   : > { %v14962_v24 = vpack.c.bf16 %v13557_v39, %v13556_v28  ;;  %13428 = vst [vmem:[#allocation4 + $0x78] sm:$0xff] %v13387_v54  ;;  %v13517_v22 = vadd.f32 %v22132_v18, %v13387_v54 }
 0x7ac   : > { %v13326_v55 = vpop.f32.mrf.mxu1 }
 0x7ad   : > { %15014 = vst [vmem:[%s22151_s12 + $0x80] sm:$0xff] %v14962_v24   ;;  %v13388_v19 = vadd.f32 %v13326_v55, %v22162_v11  ;;  %v13558_v31 = vmax.f32 %v13517_v22, 0.0 }
 0x7ae   : > { %v17327_v20 = vpop.f32.mrf.mxu1 }
 0x7af   : > { %13429 = vst [vmem:[#allocation4 + $0x30] sm:$0xff] %v13388_v19  ;;  %v13518_v52 = vadd.f32 %v22132_v18, %v13388_v19 }
 0x7b0   : > { %v13331_v36 = vpop.f32.mrf.mxu1 }
 0x7b1   : > { %v13559_v25 = vmax.f32 %v13518_v52, 0.0  ;;  %v13389_v15 = vadd.f32 %v13331_v36, %v22171_v60 }
 0x7b2   : > { %v17330_v43 = vpop.f32.mrf.mxu1 }
 0x7b3   : > { %v14967_v5 = vpack.c.bf16 %v13559_v25, %v13558_v31  ;;  %13430 = vst [vmem:[#allocation4 + $0xb8] sm:$0xff] %v13389_v15  ;;  %v13519_v48 = vadd.f32 %v22132_v18, %v13389_v15 }
 0x7b4   : > { %v13334_v27 = vpop.f32.mrf.mxu1 }
 0x7b5   : > { %15015 = vst [vmem:[%s22151_s12 + $0x88] sm:$0xff] %v14967_v5   ;;  %v13390_v62 = vadd.f32 %v13334_v27, %v22175_v57  ;;  %v13560_v26 = vmax.f32 %v13519_v48, 0.0 }
 0x7b6   : > { %v17331_v11 = vpop.f32.mrf.mxu1 }
 0x7b7   : > { %13431 = vst [vmem:[#allocation4 + $0x60] sm:$0xff] %v13390_v62  ;;  %v13520_v14 = vadd.f32 %v22132_v18, %v13390_v62 }
 0x7b8   : > { %v13339_v35 = vpop.f32.mrf.mxu1 }
 0x7b9   : > { %v13561_v59 = vmax.f32 %v13520_v14, 0.0  ;;  %v13391_v2 = vadd.f32 %v13339_v35, %v22184_v10 }
 0x7ba   : > { %v17334_v60 = vpop.f32.mrf.mxu1 }
 0x7bb   : > { %v14972_v37 = vpack.c.bf16 %v13561_v59, %v13560_v26  ;;  %13432 = vst [vmem:[#allocation4 + $0x28] sm:$0xff] %v13391_v2  ;;  %v13521_v41 = vadd.f32 %v22132_v18, %v13391_v2 }
 0x7bc   : > { %v13342_v47 = vpop.f32.mrf.mxu1 }
 0x7bd   : > { %15016 = vst [vmem:[%s22151_s12 + $0x90] sm:$0xff] %v14972_v37   ;;  %v13392_v50 = vadd.f32 %v13342_v47, %v22188_v0  ;;  %v13562_v42 = vmax.f32 %v13521_v41, 0.0 }
 0x7be   : > { %v17335_v57 = vpop.f32.mrf.mxu1 }
 0x7bf   : > { %13433 = vst [vmem:[#allocation4 + $0x140] sm:$0xff] %v13392_v50  ;;  %v13522_v29 = vadd.f32 %v22132_v18, %v13392_v50 }
 0x7c0   : > { %v13347_v21 = vpop.f32.mrf.mxu1 }
 0x7c1   : > { %v13563_v49 = vmax.f32 %v13522_v29, 0.0  ;;  %v13393_v10 = vadd.f32 %v13347_v21, %v12734_v12 }
 0x7c2   : > { %v17338_v4 = vpop.f32.mrf.mxu1 }
 0x7c3   : > { %v14977_v16 = vpack.c.bf16 %v13563_v49, %v13562_v42  ;;  %13434 = vst [vmem:[#allocation4 + $0x58] sm:$0xf] %v13393_v10 }
 0x7c4   : > { %v13350_v13 = vpop.f32.mrf.mxu1 }
 0x7c5   : > { %15017 = vst [vmem:[%s22151_s12 + $0x98] sm:$0xff] %v14977_v16  }
 0x7c6   : > { %v17339_v7 = vpop.f32.mrf.mxu1 }
 0x7ca   : > { %v13475_v33 = vld [vmem:[#allocation4 + $0x58] sm:$0xf] }
 0x7cb   : > { %v13523_v44 = vadd.f32 %v22132_v18, %v13475_v33 }
 0x7cd   : > { %v13564_v0 = vmax.f32 %v13523_v44, 0.0 }
 0x7cf   : > { %v14778_v30 = vpack.c.bf16 %v13564_v0, %v13564_v0 }
 0x7d1   : > { %13770 = vst [vmem:[%s22151_s12 + $0xa0] sm:$0x3] %v14778_v30 }
 0x7d2 PF: > { %s15_s18 = sadd.s32 1, %s17964_s18  }
 0x7d3   : > { %p12_p4 = scmp.ge.s32.totalorder %s15_s18, 4  }
 0x7d5   :  { %14 = sbr.rel (!%p12_p4) target bundleno = 1 (0x1), region = 86 }

</bundles_post_ra>
